<compile_context>
chip_gen: v6e
topology: v6e:2x2x1
jax: 0.10.0
libtpu: 0.0.40
codegen_flags: <defaults>
</compile_context>

<pallas_src>
import jax
import jax.numpy as jnp
from jax.experimental import pallas as pl
from jax.experimental.pallas import tpu as pltpu

EPS = 1e-5
LANE = 128
SUB = 8


def _round_up(x, m):
    return (x + m - 1) // m * m


# --------------------------------------------------------------------------
# Kernel 1/2: [optional BN-FMA + ReLU prologue] -> 3x3 conv (9 tap matmuls)
#             -> raw conv output + per-tile BN partial sums (sum, sum(y^2)).
# One grid step == one image (no halo exchange needed across steps).
# --------------------------------------------------------------------------
def _make_conv3x3_kernel(H, W, Wp, Cp, prologue_relu):
    rows = H * W

    def kernel(scale_ref, shift_ref, x_ref, w_ref, y_ref, sum_ref, ssq_ref,
               pad_ref):
        # BN prologue as a single FMA (identity scale/shift for conv1), f32.
        xin = x_ref[...] * scale_ref[...] + shift_ref[...]
        if prologue_relu:
            xin = jnp.maximum(xin, 0.0)

        # Zero ONLY the 1-px halo border (plus the sublane-alignment columns);
        # the interior is fully overwritten right below, every grid step.
        zrow = jnp.zeros((1, 1, Wp, Cp), jnp.bfloat16)
        zcol = jnp.zeros((1, H + 2, 1, Cp), jnp.bfloat16)
        pad_ref[:, 0:1, :, :] = zrow                       # top halo row
        pad_ref[:, H + 1:H + 2, :, :] = zrow               # bottom halo row
        pad_ref[:, :, 0:1, :] = zcol                       # left halo col
        pad_ref[:, :, W + 1:Wp, :] = jnp.zeros(            # right halo + align
            (1, H + 2, Wp - W - 1, Cp), jnp.bfloat16)
        pad_ref[:, 1:H + 1, 1:W + 1, :] = xin.astype(jnp.bfloat16)

        # 3x3 conv as 9 accumulating tap matmuls: bf16 operands, f32 accumulate.
        # TODO(synk): group taps (K>=256) to better fill the v6e/v7x MXU.
        acc = None
        for dy in range(3):
            for dx in range(3):
                tap = pad_ref[:, dy:dy + H, dx:dx + W, :].reshape(rows, Cp)
                part = jnp.dot(tap, w_ref[3 * dy + dx],
                               preferred_element_type=jnp.float32)
                acc = part if acc is None else acc + part

        y_ref[...] = acc.reshape(1, H, W, Cp)
        # One-pass BN statistics for this tile: sum(y) and sum(y*y).
        sum_ref[...] = jnp.sum(acc, axis=0).reshape(1, 1, Cp)
        ssq_ref[...] = jnp.sum(acc * acc, axis=0).reshape(1, 1, Cp)

    return kernel


def _conv3x3_stats_call(x, scale, shift, w_packed, *, prologue_relu):
    N, H, W, Cp = x.shape
    Wp = _round_up(W + 2, SUB)
    kernel = _make_conv3x3_kernel(H, W, Wp, Cp, prologue_relu)
    return pl.pallas_call(
        kernel,
        grid=(N,),
        in_specs=[
            pl.BlockSpec((1, Cp), lambda n: (0, 0)),            # scale
            pl.BlockSpec((1, Cp), lambda n: (0, 0)),            # shift
            pl.BlockSpec((1, H, W, Cp), lambda n: (n, 0, 0, 0)),  # activation
            pl.BlockSpec((9, Cp, Cp), lambda n: (0, 0, 0)),     # packed weights
        ],
        out_specs=(
            pl.BlockSpec((1, H, W, Cp), lambda n: (n, 0, 0, 0)),  # raw conv out
            pl.BlockSpec((1, 1, Cp), lambda n: (n, 0, 0)),        # sum(y)
            pl.BlockSpec((1, 1, Cp), lambda n: (n, 0, 0)),        # sum(y*y)
        ),
        out_shape=(
            jax.ShapeDtypeStruct((N, H, W, Cp), jnp.float32),
            jax.ShapeDtypeStruct((N, 1, Cp), jnp.float32),
            jax.ShapeDtypeStruct((N, 1, Cp), jnp.float32),
        ),
        scratch_shapes=[pltpu.VMEM((1, H + 2, Wp, Cp), jnp.bfloat16)],
        compiler_params=pltpu.CompilerParams(
            dimension_semantics=("parallel",)),
    )(scale, shift, x, w_packed)


# --------------------------------------------------------------------------
# Kernel 3: apply BN2 (FMA) + residual add + ReLU, tiled over the batch.
# --------------------------------------------------------------------------
def _bn_residual_call(y_raw, x, scale, shift, *, skip_after_nonlin):
    N, H, W, Cp = x.shape

    def kernel(scale_ref, shift_ref, y_ref, x_ref, out_ref):
        y = y_ref[...] * scale_ref[...] + shift_ref[...]
        ident = x_ref[...]
        if skip_after_nonlin:
            out = jnp.maximum(y, 0.0) + ident
        else:
            out = jnp.maximum(y + ident, 0.0)
        out_ref[...] = out.astype(out_ref.dtype)

    return pl.pallas_call(
        kernel,
        grid=(N,),
        in_specs=[
            pl.BlockSpec((1, Cp), lambda n: (0, 0)),
            pl.BlockSpec((1, Cp), lambda n: (0, 0)),
            pl.BlockSpec((1, H, W, Cp), lambda n: (n, 0, 0, 0)),
            pl.BlockSpec((1, H, W, Cp), lambda n: (n, 0, 0, 0)),
        ],
        out_specs=pl.BlockSpec((1, H, W, Cp), lambda n: (n, 0, 0, 0)),
        out_shape=jax.ShapeDtypeStruct((N, H, W, Cp), jnp.float32),
        compiler_params=pltpu.CompilerParams(
            dimension_semantics=("parallel",)),
    )(scale, shift, y_raw, x)


def _bn_scale_shift(sum_nc, ssq_nc, gamma, beta, count):
    """Reduce per-tile partial sums -> BN scale/shift (batch stats, biased var)."""
    mean = jnp.sum(sum_nc, axis=0) / count            # (1, Cp)
    ex2 = jnp.sum(ssq_nc, axis=0) / count
    var = jnp.maximum(ex2 - mean * mean, 0.0)         # guard E[y^2]-mean^2 cancel
    scale = gamma * jax.lax.rsqrt(var + EPS)
    shift = beta - mean * scale
    return scale, shift


def basic_block_forward(x_nchw, params, *, skip_after_nonlin=False):
    """BasicBlock.forward.  NCHW in/out (PyTorch convention), NHWC inside."""
    N, C, H, W = x_nchw.shape
    Cp = params['w1'].shape[-1]                       # padded channel count

    # NCHW -> NHWC, channels zero-padded to the 128-lane boundary (padded
    # channels stay exactly zero end-to-end: zero weights, gamma=0).
    x = jnp.transpose(x_nchw, (0, 2, 3, 1)).astype(jnp.float32)
    x = jnp.pad(x, ((0, 0), (0, 0), (0, 0), (0, Cp - C)))

    ones = jnp.ones((1, Cp), jnp.float32)
    zeros = jnp.zeros((1, Cp), jnp.float32)
    count = float(N * H * W)

    # Pass 1: conv1 raw output + BN1 partial sums (per image).
    y1, s1, q1 = _conv3x3_stats_call(x, ones, zeros, params['w1'],
                                     prologue_relu=False)
    scale1, shift1 = _bn_scale_shift(s1, q1, params['g1'], params['b1'], count)

    # Pass 2: apply BN1+ReLU (prologue FMA), conv2 raw output + BN2 partial sums.
    y2, s2, q2 = _conv3x3_stats_call(y1, scale1, shift1, params['w2'],
                                     prologue_relu=True)
    scale2, shift2 = _bn_scale_shift(s2, q2, params['g2'], params['b2'], count)

    # Pass 3: apply BN2, residual add with identity (downsample=None), ReLU.
    out = _bn_residual_call(y2, x, scale2, shift2,
                            skip_after_nonlin=skip_after_nonlin)

    out = out[..., :C]                                # drop channel padding
    return jnp.transpose(out, (0, 3, 1, 2)).astype(x_nchw.dtype)


def init_basic_block_params(key, inplanes, planes):
    """Deterministic params mirroring BasicBlock.__init__ (bias-free convs,
    BN gamma=1/beta=0).  Conv weights are packed at init into the per-tap
    matmul layout (9, Cp, Cp) in bf16, channel-padded to 128 lanes."""
    assert inplanes == planes, \
        "default BasicBlock (downsample=None) needs inplanes == planes"
    Cp = _round_up(max(inplanes, planes), LANE)
    k1, k2 = jax.random.split(key)

    def pack_conv3x3(k, cin, cout):
        w = 0.1 * jax.random.normal(k, (3, 3, cin, cout), jnp.float32)
        wp = jnp.zeros((3, 3, Cp, Cp), jnp.float32).at[:, :, :cin, :cout].set(w)
        return wp.reshape(9, Cp, Cp).astype(jnp.bfloat16)   # tap-major, bf16

    def bn(c):
        g = jnp.zeros((1, Cp), jnp.float32).at[0, :c].set(1.0)
        b = jnp.zeros((1, Cp), jnp.float32)
        return g, b

    g1, b1 = bn(planes)
    g2, b2 = bn(planes)
    return {
        'w1': pack_conv3x3(k1, inplanes, planes), 'g1': g1, 'b1': b1,
        'w2': pack_conv3x3(k2, planes, planes), 'g2': g2, 'b2': b2,
    }


def _reference_forward(x_nchw, params, C, *, skip_after_nonlin=False):
    """Pure-JAX (XLA) reference of the same forward (bf16 conv operands,
    f32 accumulation / BN, matching the kernel's numerics)."""
    x = jnp.transpose(x_nchw, (0, 2, 3, 1)).astype(jnp.float32)

    def conv(y, w_packed):
        Cp = w_packed.shape[-1]
        w = w_packed.reshape(3, 3, Cp, Cp)[:, :, :C, :C]   # HWIO, bf16
        return jax.lax.conv_general_dilated(
            y.astype(jnp.bfloat16), w, (1, 1), ((1, 1), (1, 1)),
            dimension_numbers=('NHWC', 'HWIO', 'NHWC'),
            preferred_element_type=jnp.float32)

    def bn_act(y, relu):
        m = jnp.mean(y, axis=(0, 1, 2), keepdims=True)
        v = jnp.mean((y - m) ** 2, axis=(0, 1, 2), keepdims=True)
        out = (y - m) * jax.lax.rsqrt(v + EPS)             # gamma=1, beta=0
        return jnp.maximum(out, 0.0) if relu else out

    y = bn_act(conv(x, params['w1']), True)
    y = bn_act(conv(y, params['w2']), False)
    if skip_after_nonlin:
        y = jnp.maximum(y, 0.0) + x
    else:
        y = jnp.maximum(y + x, 0.0)
    return jnp.transpose(y, (0, 3, 1, 2))


if __name__ == "__main__":
    key = jax.random.PRNGKey(0)
    kx, kp = jax.random.split(key)

    # BasicBlock(inplanes=4, planes=4) — defaults: stride=1, downsample=None.
    N, C, H, W = 2, 4, 16, 16
    x = jax.random.normal(kx, (N, C, H, W), jnp.float32)   # NCHW like PyTorch
    params = init_basic_block_params(kp, inplanes=C, planes=C)

    fwd = jax.jit(lambda v: basic_block_forward(v, params))
    out = fwd(x)
    jax.block_until_ready(out)

    assert out.shape == (N, C, H, W), out.shape
    assert bool(jnp.all(jnp.isfinite(out)))
    assert bool(jnp.all(out >= 0.0))                        # ReLU after the add

    ref = _reference_forward(x, params, C)
    assert bool(jnp.allclose(out, ref, rtol=2e-3, atol=2e-3)), \
        float(jnp.max(jnp.abs(out - ref)))

    print("KERNEL_OK")
</pallas_src>

<mosaic_0001>
module attributes {stable_mosaic.version = 11 : i64} {
  func.func @kernel(%arg0: i32, %arg1: memref<1x128xf32, #tpu.memory_space<vmem>>, %arg2: memref<1x128xf32, #tpu.memory_space<vmem>>, %arg3: memref<1x16x16x128xf32, #tpu.memory_space<vmem>>, %arg4: memref<9x128x128xbf16, #tpu.memory_space<vmem>>, %arg5: memref<1x16x16x128xf32, #tpu.memory_space<vmem>>, %arg6: memref<1x1x128xf32, #tpu.memory_space<vmem>>, %arg7: memref<1x1x128xf32, #tpu.memory_space<vmem>>, %arg8: memref<1x18x24x128xbf16, #tpu.memory_space<vmem>>) attributes {dimension_semantics = [#tpu.dimension_semantics<parallel>], iteration_bounds = array<i64: 2>, scalar_prefetch = 0 : i64, scratch_operands = 1 : i64, tpu.core_type = #tpu.core_type<tc>, window_params = [{pipeline_mode = #tpu.pipeline_mode<synchronous>, transform_indices = @transform_0, window_bounds = array<i64: 1, 128>}, {pipeline_mode = #tpu.pipeline_mode<synchronous>, transform_indices = @transform_1, window_bounds = array<i64: 1, 128>}, {transform_indices = @transform_2, window_bounds = array<i64: 1, 16, 16, 128>}, {pipeline_mode = #tpu.pipeline_mode<synchronous>, transform_indices = @transform_3, window_bounds = array<i64: 9, 128, 128>}, {transform_indices = @transform_4, window_bounds = array<i64: 1, 16, 16, 128>}, {transform_indices = @transform_5, window_bounds = array<i64: 1, 1, 128>}, {transform_indices = @transform_6, window_bounds = array<i64: 1, 1, 128>}]} {
    %c0 = arith.constant 0 : index
    %c0_0 = arith.constant 0 : index
    %c0_1 = arith.constant 0 : index
    %c0_2 = arith.constant 0 : index
    %0 = vector.load %arg3[%c0, %c0_0, %c0_1, %c0_2] : memref<1x16x16x128xf32, #tpu.memory_space<vmem>>, vector<1x16x16x128xf32>
    %c0_3 = arith.constant 0 : index
    %c0_4 = arith.constant 0 : index
    %1 = vector.load %arg1[%c0_3, %c0_4] : memref<1x128xf32, #tpu.memory_space<vmem>>, vector<1x128xf32>
    %2 = vector.shape_cast %1 : vector<1x128xf32> to vector<1x1x1x128xf32>
    %3 = vector.broadcast %2 : vector<1x1x1x128xf32> to vector<1x16x16x128xf32>
    %4 = arith.mulf %0, %3 : vector<1x16x16x128xf32>
    %c0_5 = arith.constant 0 : index
    %c0_6 = arith.constant 0 : index
    %5 = vector.load %arg2[%c0_5, %c0_6] : memref<1x128xf32, #tpu.memory_space<vmem>>, vector<1x128xf32>
    %6 = vector.shape_cast %5 : vector<1x128xf32> to vector<1x1x1x128xf32>
    %7 = vector.broadcast %6 : vector<1x1x1x128xf32> to vector<1x16x16x128xf32>
    %8 = arith.addf %4, %7 : vector<1x16x16x128xf32>
    %cst = arith.constant 0.000000e+00 : bf16
    %9 = vector.broadcast %cst : bf16 to vector<1x1x24x128xbf16>
    %cst_7 = arith.constant 0.000000e+00 : bf16
    %10 = vector.broadcast %cst_7 : bf16 to vector<1x18x1x128xbf16>
    %c0_8 = arith.constant 0 : index
    %c0_9 = arith.constant 0 : index
    %c0_10 = arith.constant 0 : index
    %c0_11 = arith.constant 0 : index
    %11 = vector.load %arg8[%c0_8, %c0_9, %c0_10, %c0_11] : memref<1x18x24x128xbf16, #tpu.memory_space<vmem>>, vector<1x1x24x128xbf16>
    tpu.vector_store %arg8[%c0_8, %c0_9, %c0_10, %c0_11], %9 {strides = array<i32>} : memref<1x18x24x128xbf16, #tpu.memory_space<vmem>>, vector<1x1x24x128xbf16>,
    %c0_12 = arith.constant 0 : index
    %c17 = arith.constant 17 : index
    %c0_13 = arith.constant 0 : index
    %c0_14 = arith.constant 0 : index
    %12 = vector.load %arg8[%c0_12, %c17, %c0_13, %c0_14] : memref<1x18x24x128xbf16, #tpu.memory_space<vmem>>, vector<1x1x24x128xbf16>
    tpu.vector_store %arg8[%c0_12, %c17, %c0_13, %c0_14], %9 {strides = array<i32>} : memref<1x18x24x128xbf16, #tpu.memory_space<vmem>>, vector<1x1x24x128xbf16>,
    %c0_15 = arith.constant 0 : index
    %c0_16 = arith.constant 0 : index
    %c0_17 = arith.constant 0 : index
    %c0_18 = arith.constant 0 : index
    %13 = vector.load %arg8[%c0_15, %c0_16, %c0_17, %c0_18] : memref<1x18x24x128xbf16, #tpu.memory_space<vmem>>, vector<1x18x1x128xbf16>
    tpu.vector_store %arg8[%c0_15, %c0_16, %c0_17, %c0_18], %10 {strides = array<i32>} : memref<1x18x24x128xbf16, #tpu.memory_space<vmem>>, vector<1x18x1x128xbf16>,
    %cst_19 = arith.constant 0.000000e+00 : bf16
    %14 = vector.broadcast %cst_19 : bf16 to vector<1x18x7x128xbf16>
    %c0_20 = arith.constant 0 : index
    %c0_21 = arith.constant 0 : index
    %c17_22 = arith.constant 17 : index
    %c0_23 = arith.constant 0 : index
    %15 = vector.load %arg8[%c0_20, %c0_21, %c17_22, %c0_23] : memref<1x18x24x128xbf16, #tpu.memory_space<vmem>>, vector<1x18x7x128xbf16>
    tpu.vector_store %arg8[%c0_20, %c0_21, %c17_22, %c0_23], %14 {strides = array<i32>} : memref<1x18x24x128xbf16, #tpu.memory_space<vmem>>, vector<1x18x7x128xbf16>,
    %16 = arith.truncf %8 : vector<1x16x16x128xf32> to vector<1x16x16x128xbf16>
    %c0_24 = arith.constant 0 : index
    %c1 = arith.constant 1 : index
    %c1_25 = arith.constant 1 : index
    %c0_26 = arith.constant 0 : index
    %17 = vector.load %arg8[%c0_24, %c1, %c1_25, %c0_26] : memref<1x18x24x128xbf16, #tpu.memory_space<vmem>>, vector<1x16x16x128xbf16>
    tpu.vector_store %arg8[%c0_24, %c1, %c1_25, %c0_26], %16 {strides = array<i32>} : memref<1x18x24x128xbf16, #tpu.memory_space<vmem>>, vector<1x16x16x128xbf16>,
    %c0_27 = arith.constant 0 : index
    %c0_28 = arith.constant 0 : index
    %c0_29 = arith.constant 0 : index
    %c0_30 = arith.constant 0 : index
    %18 = vector.load %arg8[%c0_27, %c0_28, %c0_29, %c0_30] : memref<1x18x24x128xbf16, #tpu.memory_space<vmem>>, vector<1x16x16x128xbf16>
    %19 = vector.shape_cast %18 : vector<1x16x16x128xbf16> to vector<256x128xbf16>
    %c0_31 = arith.constant 0 : index
    %c0_32 = arith.constant 0 : index
    %c0_33 = arith.constant 0 : index
    %20 = vector.load %arg4[%c0_31, %c0_32, %c0_33] : memref<9x128x128xbf16, #tpu.memory_space<vmem>>, vector<1x128x128xbf16>
    %21 = vector.shape_cast %20 : vector<1x128x128xbf16> to vector<128x128xbf16>
    %cst_34 = arith.constant dense<0.000000e+00> : vector<256x128xf32>
    %22 = tpu.matmul %19, %21, %cst_34 {dimension_numbers = #tpu.dot_dimension_numbers<[1], [0], [0], [1], [0, 0, 1, 1], [], []>} : vector<256x128xbf16>, vector<128x128xbf16>, vector<256x128xf32> -> vector<256x128xf32>
    %c0_35 = arith.constant 0 : index
    %c0_36 = arith.constant 0 : index
    %c1_37 = arith.constant 1 : index
    %c0_38 = arith.constant 0 : index
    %23 = vector.load %arg8[%c0_35, %c0_36, %c1_37, %c0_38] : memref<1x18x24x128xbf16, #tpu.memory_space<vmem>>, vector<1x16x16x128xbf16>
    %24 = vector.shape_cast %23 : vector<1x16x16x128xbf16> to vector<256x128xbf16>
    %c1_39 = arith.constant 1 : index
    %c0_40 = arith.constant 0 : index
    %c0_41 = arith.constant 0 : index
    %25 = vector.load %arg4[%c1_39, %c0_40, %c0_41] : memref<9x128x128xbf16, #tpu.memory_space<vmem>>, vector<1x128x128xbf16>
    %26 = vector.shape_cast %25 : vector<1x128x128xbf16> to vector<128x128xbf16>
    %cst_42 = arith.constant dense<0.000000e+00> : vector<256x128xf32>
    %27 = tpu.matmul %24, %26, %cst_42 {dimension_numbers = #tpu.dot_dimension_numbers<[1], [0], [0], [1], [0, 0, 1, 1], [], []>} : vector<256x128xbf16>, vector<128x128xbf16>, vector<256x128xf32> -> vector<256x128xf32>
    %28 = arith.addf %22, %27 : vector<256x128xf32>
    %c0_43 = arith.constant 0 : index
    %c0_44 = arith.constant 0 : index
    %c2 = arith.constant 2 : index
    %c0_45 = arith.constant 0 : index
    %29 = vector.load %arg8[%c0_43, %c0_44, %c2, %c0_45] : memref<1x18x24x128xbf16, #tpu.memory_space<vmem>>, vector<1x16x16x128xbf16>
    %30 = vector.shape_cast %29 : vector<1x16x16x128xbf16> to vector<256x128xbf16>
    %c2_46 = arith.constant 2 : index
    %c0_47 = arith.constant 0 : index
    %c0_48 = arith.constant 0 : index
    %31 = vector.load %arg4[%c2_46, %c0_47, %c0_48] : memref<9x128x128xbf16, #tpu.memory_space<vmem>>, vector<1x128x128xbf16>
    %32 = vector.shape_cast %31 : vector<1x128x128xbf16> to vector<128x128xbf16>
    %cst_49 = arith.constant dense<0.000000e+00> : vector<256x128xf32>
    %33 = tpu.matmul %30, %32, %cst_49 {dimension_numbers = #tpu.dot_dimension_numbers<[1], [0], [0], [1], [0, 0, 1, 1], [], []>} : vector<256x128xbf16>, vector<128x128xbf16>, vector<256x128xf32> -> vector<256x128xf32>
    %34 = arith.addf %28, %33 : vector<256x128xf32>
    %c0_50 = arith.constant 0 : index
    %c1_51 = arith.constant 1 : index
    %c0_52 = arith.constant 0 : index
    %c0_53 = arith.constant 0 : index
    %35 = vector.load %arg8[%c0_50, %c1_51, %c0_52, %c0_53] : memref<1x18x24x128xbf16, #tpu.memory_space<vmem>>, vector<1x16x16x128xbf16>
    %36 = vector.shape_cast %35 : vector<1x16x16x128xbf16> to vector<256x128xbf16>
    %c3 = arith.constant 3 : index
    %c0_54 = arith.constant 0 : index
    %c0_55 = arith.constant 0 : index
    %37 = vector.load %arg4[%c3, %c0_54, %c0_55] : memref<9x128x128xbf16, #tpu.memory_space<vmem>>, vector<1x128x128xbf16>
    %38 = vector.shape_cast %37 : vector<1x128x128xbf16> to vector<128x128xbf16>
    %cst_56 = arith.constant dense<0.000000e+00> : vector<256x128xf32>
    %39 = tpu.matmul %36, %38, %cst_56 {dimension_numbers = #tpu.dot_dimension_numbers<[1], [0], [0], [1], [0, 0, 1, 1], [], []>} : vector<256x128xbf16>, vector<128x128xbf16>, vector<256x128xf32> -> vector<256x128xf32>
    %40 = arith.addf %34, %39 : vector<256x128xf32>
    %c0_57 = arith.constant 0 : index
    %c1_58 = arith.constant 1 : index
    %c1_59 = arith.constant 1 : index
    %c0_60 = arith.constant 0 : index
    %41 = vector.load %arg8[%c0_57, %c1_58, %c1_59, %c0_60] : memref<1x18x24x128xbf16, #tpu.memory_space<vmem>>, vector<1x16x16x128xbf16>
    %42 = vector.shape_cast %41 : vector<1x16x16x128xbf16> to vector<256x128xbf16>
    %c4 = arith.constant 4 : index
    %c0_61 = arith.constant 0 : index
    %c0_62 = arith.constant 0 : index
    %43 = vector.load %arg4[%c4, %c0_61, %c0_62] : memref<9x128x128xbf16, #tpu.memory_space<vmem>>, vector<1x128x128xbf16>
    %44 = vector.shape_cast %43 : vector<1x128x128xbf16> to vector<128x128xbf16>
    %cst_63 = arith.constant dense<0.000000e+00> : vector<256x128xf32>
    %45 = tpu.matmul %42, %44, %cst_63 {dimension_numbers = #tpu.dot_dimension_numbers<[1], [0], [0], [1], [0, 0, 1, 1], [], []>} : vector<256x128xbf16>, vector<128x128xbf16>, vector<256x128xf32> -> vector<256x128xf32>
    %46 = arith.addf %40, %45 : vector<256x128xf32>
    %c0_64 = arith.constant 0 : index
    %c1_65 = arith.constant 1 : index
    %c2_66 = arith.constant 2 : index
    %c0_67 = arith.constant 0 : index
    %47 = vector.load %arg8[%c0_64, %c1_65, %c2_66, %c0_67] : memref<1x18x24x128xbf16, #tpu.memory_space<vmem>>, vector<1x16x16x128xbf16>
    %48 = vector.shape_cast %47 : vector<1x16x16x128xbf16> to vector<256x128xbf16>
    %c5 = arith.constant 5 : index
    %c0_68 = arith.constant 0 : index
    %c0_69 = arith.constant 0 : index
    %49 = vector.load %arg4[%c5, %c0_68, %c0_69] : memref<9x128x128xbf16, #tpu.memory_space<vmem>>, vector<1x128x128xbf16>
    %50 = vector.shape_cast %49 : vector<1x128x128xbf16> to vector<128x128xbf16>
    %cst_70 = arith.constant dense<0.000000e+00> : vector<256x128xf32>
    %51 = tpu.matmul %48, %50, %cst_70 {dimension_numbers = #tpu.dot_dimension_numbers<[1], [0], [0], [1], [0, 0, 1, 1], [], []>} : vector<256x128xbf16>, vector<128x128xbf16>, vector<256x128xf32> -> vector<256x128xf32>
    %52 = arith.addf %46, %51 : vector<256x128xf32>
    %c0_71 = arith.constant 0 : index
    %c2_72 = arith.constant 2 : index
    %c0_73 = arith.constant 0 : index
    %c0_74 = arith.constant 0 : index
    %53 = vector.load %arg8[%c0_71, %c2_72, %c0_73, %c0_74] : memref<1x18x24x128xbf16, #tpu.memory_space<vmem>>, vector<1x16x16x128xbf16>
    %54 = vector.shape_cast %53 : vector<1x16x16x128xbf16> to vector<256x128xbf16>
    %c6 = arith.constant 6 : index
    %c0_75 = arith.constant 0 : index
    %c0_76 = arith.constant 0 : index
    %55 = vector.load %arg4[%c6, %c0_75, %c0_76] : memref<9x128x128xbf16, #tpu.memory_space<vmem>>, vector<1x128x128xbf16>
    %56 = vector.shape_cast %55 : vector<1x128x128xbf16> to vector<128x128xbf16>
    %cst_77 = arith.constant dense<0.000000e+00> : vector<256x128xf32>
    %57 = tpu.matmul %54, %56, %cst_77 {dimension_numbers = #tpu.dot_dimension_numbers<[1], [0], [0], [1], [0, 0, 1, 1], [], []>} : vector<256x128xbf16>, vector<128x128xbf16>, vector<256x128xf32> -> vector<256x128xf32>
    %58 = arith.addf %52, %57 : vector<256x128xf32>
    %c0_78 = arith.constant 0 : index
    %c2_79 = arith.constant 2 : index
    %c1_80 = arith.constant 1 : index
    %c0_81 = arith.constant 0 : index
    %59 = vector.load %arg8[%c0_78, %c2_79, %c1_80, %c0_81] : memref<1x18x24x128xbf16, #tpu.memory_space<vmem>>, vector<1x16x16x128xbf16>
    %60 = vector.shape_cast %59 : vector<1x16x16x128xbf16> to vector<256x128xbf16>
    %c7 = arith.constant 7 : index
    %c0_82 = arith.constant 0 : index
    %c0_83 = arith.constant 0 : index
    %61 = vector.load %arg4[%c7, %c0_82, %c0_83] : memref<9x128x128xbf16, #tpu.memory_space<vmem>>, vector<1x128x128xbf16>
    %62 = vector.shape_cast %61 : vector<1x128x128xbf16> to vector<128x128xbf16>
    %cst_84 = arith.constant dense<0.000000e+00> : vector<256x128xf32>
    %63 = tpu.matmul %60, %62, %cst_84 {dimension_numbers = #tpu.dot_dimension_numbers<[1], [0], [0], [1], [0, 0, 1, 1], [], []>} : vector<256x128xbf16>, vector<128x128xbf16>, vector<256x128xf32> -> vector<256x128xf32>
    %64 = arith.addf %58, %63 : vector<256x128xf32>
    %c0_85 = arith.constant 0 : index
    %c2_86 = arith.constant 2 : index
    %c2_87 = arith.constant 2 : index
    %c0_88 = arith.constant 0 : index
    %65 = vector.load %arg8[%c0_85, %c2_86, %c2_87, %c0_88] : memref<1x18x24x128xbf16, #tpu.memory_space<vmem>>, vector<1x16x16x128xbf16>
    %66 = vector.shape_cast %65 : vector<1x16x16x128xbf16> to vector<256x128xbf16>
    %c8 = arith.constant 8 : index
    %c0_89 = arith.constant 0 : index
    %c0_90 = arith.constant 0 : index
    %67 = vector.load %arg4[%c8, %c0_89, %c0_90] : memref<9x128x128xbf16, #tpu.memory_space<vmem>>, vector<1x128x128xbf16>
    %68 = vector.shape_cast %67 : vector<1x128x128xbf16> to vector<128x128xbf16>
    %cst_91 = arith.constant dense<0.000000e+00> : vector<256x128xf32>
    %69 = tpu.matmul %66, %68, %cst_91 {dimension_numbers = #tpu.dot_dimension_numbers<[1], [0], [0], [1], [0, 0, 1, 1], [], []>} : vector<256x128xbf16>, vector<128x128xbf16>, vector<256x128xf32> -> vector<256x128xf32>
    %70 = arith.addf %64, %69 : vector<256x128xf32>
    %71 = vector.shape_cast %70 : vector<256x128xf32> to vector<1x16x16x128xf32>
    %c0_92 = arith.constant 0 : index
    %c0_93 = arith.constant 0 : index
    %c0_94 = arith.constant 0 : index
    %c0_95 = arith.constant 0 : index
    %72 = vector.load %arg5[%c0_92, %c0_93, %c0_94, %c0_95] : memref<1x16x16x128xf32, #tpu.memory_space<vmem>>, vector<1x16x16x128xf32>
    tpu.vector_store %arg5[%c0_92, %c0_93, %c0_94, %c0_95], %71 {strides = array<i32>} : memref<1x16x16x128xf32, #tpu.memory_space<vmem>>, vector<1x16x16x128xf32>,
    %cst_96 = arith.constant dense<0.000000e+00> : vector<128xf32>
    %73 = vector.multi_reduction <add>, %70, %cst_96 [0] : vector<256x128xf32> to vector<128xf32>
    %74 = vector.shape_cast %73 : vector<128xf32> to vector<1x1x128xf32>
    %c0_97 = arith.constant 0 : index
    %c0_98 = arith.constant 0 : index
    %c0_99 = arith.constant 0 : index
    %75 = vector.load %arg6[%c0_97, %c0_98, %c0_99] : memref<1x1x128xf32, #tpu.memory_space<vmem>>, vector<1x1x128xf32>
    tpu.vector_store %arg6[%c0_97, %c0_98, %c0_99], %74 {strides = array<i32>} : memref<1x1x128xf32, #tpu.memory_space<vmem>>, vector<1x1x128xf32>,
    %76 = arith.mulf %70, %70 : vector<256x128xf32>
    %cst_100 = arith.constant dense<0.000000e+00> : vector<128xf32>
    %77 = vector.multi_reduction <add>, %76, %cst_100 [0] : vector<256x128xf32> to vector<128xf32>
    %78 = vector.shape_cast %77 : vector<128xf32> to vector<1x1x128xf32>
    %c0_101 = arith.constant 0 : index
    %c0_102 = arith.constant 0 : index
    %c0_103 = arith.constant 0 : index
    %79 = vector.load %arg7[%c0_101, %c0_102, %c0_103] : memref<1x1x128xf32, #tpu.memory_space<vmem>>, vector<1x1x128xf32>
    tpu.vector_store %arg7[%c0_101, %c0_102, %c0_103], %78 {strides = array<i32>} : memref<1x1x128xf32, #tpu.memory_space<vmem>>, vector<1x1x128xf32>,
    return
  }
  func.func @transform_0(%arg0: i32) -> (i32, i32) {
    %c0_i32 = arith.constant 0 : i32
    %c0_i32_0 = arith.constant 0 : i32
    %c0_i32_1 = arith.constant 0 : i32
    return %c0_i32, %c0_i32_0 : i32, i32
  }
  func.func @transform_1(%arg0: i32) -> (i32, i32) {
    %c0_i32 = arith.constant 0 : i32
    %c0_i32_0 = arith.constant 0 : i32
    %c0_i32_1 = arith.constant 0 : i32
    return %c0_i32, %c0_i32_0 : i32, i32
  }
  func.func @transform_2(%arg0: i32) -> (i32, i32, i32, i32) {
    %c0_i32 = arith.constant 0 : i32
    %c0_i32_0 = arith.constant 0 : i32
    %c0_i32_1 = arith.constant 0 : i32
    %c0_i32_2 = arith.constant 0 : i32
    return %arg0, %c0_i32, %c0_i32_0, %c0_i32_1 : i32, i32, i32, i32
  }
  func.func @transform_3(%arg0: i32) -> (i32, i32, i32) {
    %c0_i32 = arith.constant 0 : i32
    %c0_i32_0 = arith.constant 0 : i32
    %c0_i32_1 = arith.constant 0 : i32
    %c0_i32_2 = arith.constant 0 : i32
    return %c0_i32, %c0_i32_0, %c0_i32_1 : i32, i32, i32
  }
  func.func @transform_4(%arg0: i32) -> (i32, i32, i32, i32) {
    %c0_i32 = arith.constant 0 : i32
    %c0_i32_0 = arith.constant 0 : i32
    %c0_i32_1 = arith.constant 0 : i32
    %c0_i32_2 = arith.constant 0 : i32
    return %arg0, %c0_i32, %c0_i32_0, %c0_i32_1 : i32, i32, i32, i32
  }
  func.func @transform_5(%arg0: i32) -> (i32, i32, i32) {
    %c0_i32 = arith.constant 0 : i32
    %c0_i32_0 = arith.constant 0 : i32
    %c0_i32_1 = arith.constant 0 : i32
    return %arg0, %c0_i32, %c0_i32_0 : i32, i32, i32
  }
  func.func @transform_6(%arg0: i32) -> (i32, i32, i32) {
    %c0_i32 = arith.constant 0 : i32
    %c0_i32_0 = arith.constant 0 : i32
    %c0_i32_1 = arith.constant 0 : i32
    return %arg0, %c0_i32, %c0_i32_0 : i32, i32, i32
  }
}

module attributes {stable_mosaic.version = 11 : i64} {
  func.func @kernel(%arg0: i32, %arg1: memref<1x128xf32, #tpu.memory_space<vmem>>, %arg2: memref<1x128xf32, #tpu.memory_space<vmem>>, %arg3: memref<1x16x16x128xf32, #tpu.memory_space<vmem>>, %arg4: memref<9x128x128xbf16, #tpu.memory_space<vmem>>, %arg5: memref<1x16x16x128xf32, #tpu.memory_space<vmem>>, %arg6: memref<1x1x128xf32, #tpu.memory_space<vmem>>, %arg7: memref<1x1x128xf32, #tpu.memory_space<vmem>>, %arg8: memref<1x18x24x128xbf16, #tpu.memory_space<vmem>>) attributes {dimension_semantics = [#tpu.dimension_semantics<parallel>], iteration_bounds = array<i64: 2>, scalar_prefetch = 0 : i64, scratch_operands = 1 : i64, tpu.core_type = #tpu.core_type<tc>, window_params = [{pipeline_mode = #tpu.pipeline_mode<synchronous>, transform_indices = @transform_0, window_bounds = array<i64: 1, 128>}, {pipeline_mode = #tpu.pipeline_mode<synchronous>, transform_indices = @transform_1, window_bounds = array<i64: 1, 128>}, {transform_indices = @transform_2, window_bounds = array<i64: 1, 16, 16, 128>}, {pipeline_mode = #tpu.pipeline_mode<synchronous>, transform_indices = @transform_3, window_bounds = array<i64: 9, 128, 128>}, {transform_indices = @transform_4, window_bounds = array<i64: 1, 16, 16, 128>}, {transform_indices = @transform_5, window_bounds = array<i64: 1, 1, 128>}, {transform_indices = @transform_6, window_bounds = array<i64: 1, 1, 128>}]} {
    %c0 = arith.constant 0 : index
    %c0_0 = arith.constant 0 : index
    %c0_1 = arith.constant 0 : index
    %c0_2 = arith.constant 0 : index
    %0 = vector.load %arg3[%c0, %c0_0, %c0_1, %c0_2] : memref<1x16x16x128xf32, #tpu.memory_space<vmem>>, vector<1x16x16x128xf32>
    %c0_3 = arith.constant 0 : index
    %c0_4 = arith.constant 0 : index
    %1 = vector.load %arg1[%c0_3, %c0_4] : memref<1x128xf32, #tpu.memory_space<vmem>>, vector<1x128xf32>
    %2 = vector.shape_cast %1 : vector<1x128xf32> to vector<1x1x1x128xf32>
    %3 = vector.broadcast %2 : vector<1x1x1x128xf32> to vector<1x16x16x128xf32>
    %4 = arith.mulf %0, %3 : vector<1x16x16x128xf32>
    %c0_5 = arith.constant 0 : index
    %c0_6 = arith.constant 0 : index
    %5 = vector.load %arg2[%c0_5, %c0_6] : memref<1x128xf32, #tpu.memory_space<vmem>>, vector<1x128xf32>
    %6 = vector.shape_cast %5 : vector<1x128xf32> to vector<1x1x1x128xf32>
    %7 = vector.broadcast %6 : vector<1x1x1x128xf32> to vector<1x16x16x128xf32>
    %8 = arith.addf %4, %7 : vector<1x16x16x128xf32>
    %cst = arith.constant 0.000000e+00 : f32
    %9 = vector.broadcast %cst : f32 to vector<1x16x16x128xf32>
    %10 = arith.maximumf %8, %9 : vector<1x16x16x128xf32>
    %cst_7 = arith.constant 0.000000e+00 : bf16
    %11 = vector.broadcast %cst_7 : bf16 to vector<1x1x24x128xbf16>
    %cst_8 = arith.constant 0.000000e+00 : bf16
    %12 = vector.broadcast %cst_8 : bf16 to vector<1x18x1x128xbf16>
    %c0_9 = arith.constant 0 : index
    %c0_10 = arith.constant 0 : index
    %c0_11 = arith.constant 0 : index
    %c0_12 = arith.constant 0 : index
    %13 = vector.load %arg8[%c0_9, %c0_10, %c0_11, %c0_12] : memref<1x18x24x128xbf16, #tpu.memory_space<vmem>>, vector<1x1x24x128xbf16>
    tpu.vector_store %arg8[%c0_9, %c0_10, %c0_11, %c0_12], %11 {strides = array<i32>} : memref<1x18x24x128xbf16, #tpu.memory_space<vmem>>, vector<1x1x24x128xbf16>,
    %c0_13 = arith.constant 0 : index
    %c17 = arith.constant 17 : index
    %c0_14 = arith.constant 0 : index
    %c0_15 = arith.constant 0 : index
    %14 = vector.load %arg8[%c0_13, %c17, %c0_14, %c0_15] : memref<1x18x24x128xbf16, #tpu.memory_space<vmem>>, vector<1x1x24x128xbf16>
    tpu.vector_store %arg8[%c0_13, %c17, %c0_14, %c0_15], %11 {strides = array<i32>} : memref<1x18x24x128xbf16, #tpu.memory_space<vmem>>, vector<1x1x24x128xbf16>,
    %c0_16 = arith.constant 0 : index
    %c0_17 = arith.constant 0 : index
    %c0_18 = arith.constant 0 : index
    %c0_19 = arith.constant 0 : index
    %15 = vector.load %arg8[%c0_16, %c0_17, %c0_18, %c0_19] : memref<1x18x24x128xbf16, #tpu.memory_space<vmem>>, vector<1x18x1x128xbf16>
    tpu.vector_store %arg8[%c0_16, %c0_17, %c0_18, %c0_19], %12 {strides = array<i32>} : memref<1x18x24x128xbf16, #tpu.memory_space<vmem>>, vector<1x18x1x128xbf16>,
    %cst_20 = arith.constant 0.000000e+00 : bf16
    %16 = vector.broadcast %cst_20 : bf16 to vector<1x18x7x128xbf16>
    %c0_21 = arith.constant 0 : index
    %c0_22 = arith.constant 0 : index
    %c17_23 = arith.constant 17 : index
    %c0_24 = arith.constant 0 : index
    %17 = vector.load %arg8[%c0_21, %c0_22, %c17_23, %c0_24] : memref<1x18x24x128xbf16, #tpu.memory_space<vmem>>, vector<1x18x7x128xbf16>
    tpu.vector_store %arg8[%c0_21, %c0_22, %c17_23, %c0_24], %16 {strides = array<i32>} : memref<1x18x24x128xbf16, #tpu.memory_space<vmem>>, vector<1x18x7x128xbf16>,
    %18 = arith.truncf %10 : vector<1x16x16x128xf32> to vector<1x16x16x128xbf16>
    %c0_25 = arith.constant 0 : index
    %c1 = arith.constant 1 : index
    %c1_26 = arith.constant 1 : index
    %c0_27 = arith.constant 0 : index
    %19 = vector.load %arg8[%c0_25, %c1, %c1_26, %c0_27] : memref<1x18x24x128xbf16, #tpu.memory_space<vmem>>, vector<1x16x16x128xbf16>
    tpu.vector_store %arg8[%c0_25, %c1, %c1_26, %c0_27], %18 {strides = array<i32>} : memref<1x18x24x128xbf16, #tpu.memory_space<vmem>>, vector<1x16x16x128xbf16>,
    %c0_28 = arith.constant 0 : index
    %c0_29 = arith.constant 0 : index
    %c0_30 = arith.constant 0 : index
    %c0_31 = arith.constant 0 : index
    %20 = vector.load %arg8[%c0_28, %c0_29, %c0_30, %c0_31] : memref<1x18x24x128xbf16, #tpu.memory_space<vmem>>, vector<1x16x16x128xbf16>
    %21 = vector.shape_cast %20 : vector<1x16x16x128xbf16> to vector<256x128xbf16>
    %c0_32 = arith.constant 0 : index
    %c0_33 = arith.constant 0 : index
    %c0_34 = arith.constant 0 : index
    %22 = vector.load %arg4[%c0_32, %c0_33, %c0_34] : memref<9x128x128xbf16, #tpu.memory_space<vmem>>, vector<1x128x128xbf16>
    %23 = vector.shape_cast %22 : vector<1x128x128xbf16> to vector<128x128xbf16>
    %cst_35 = arith.constant dense<0.000000e+00> : vector<256x128xf32>
    %24 = tpu.matmul %21, %23, %cst_35 {dimension_numbers = #tpu.dot_dimension_numbers<[1], [0], [0], [1], [0, 0, 1, 1], [], []>} : vector<256x128xbf16>, vector<128x128xbf16>, vector<256x128xf32> -> vector<256x128xf32>
    %c0_36 = arith.constant 0 : index
    %c0_37 = arith.constant 0 : index
    %c1_38 = arith.constant 1 : index
    %c0_39 = arith.constant 0 : index
    %25 = vector.load %arg8[%c0_36, %c0_37, %c1_38, %c0_39] : memref<1x18x24x128xbf16, #tpu.memory_space<vmem>>, vector<1x16x16x128xbf16>
    %26 = vector.shape_cast %25 : vector<1x16x16x128xbf16> to vector<256x128xbf16>
    %c1_40 = arith.constant 1 : index
    %c0_41 = arith.constant 0 : index
    %c0_42 = arith.constant 0 : index
    %27 = vector.load %arg4[%c1_40, %c0_41, %c0_42] : memref<9x128x128xbf16, #tpu.memory_space<vmem>>, vector<1x128x128xbf16>
    %28 = vector.shape_cast %27 : vector<1x128x128xbf16> to vector<128x128xbf16>
    %cst_43 = arith.constant dense<0.000000e+00> : vector<256x128xf32>
    %29 = tpu.matmul %26, %28, %cst_43 {dimension_numbers = #tpu.dot_dimension_numbers<[1], [0], [0], [1], [0, 0, 1, 1], [], []>} : vector<256x128xbf16>, vector<128x128xbf16>, vector<256x128xf32> -> vector<256x128xf32>
    %30 = arith.addf %24, %29 : vector<256x128xf32>
    %c0_44 = arith.constant 0 : index
    %c0_45 = arith.constant 0 : index
    %c2 = arith.constant 2 : index
    %c0_46 = arith.constant 0 : index
    %31 = vector.load %arg8[%c0_44, %c0_45, %c2, %c0_46] : memref<1x18x24x128xbf16, #tpu.memory_space<vmem>>, vector<1x16x16x128xbf16>
    %32 = vector.shape_cast %31 : vector<1x16x16x128xbf16> to vector<256x128xbf16>
    %c2_47 = arith.constant 2 : index
    %c0_48 = arith.constant 0 : index
    %c0_49 = arith.constant 0 : index
    %33 = vector.load %arg4[%c2_47, %c0_48, %c0_49] : memref<9x128x128xbf16, #tpu.memory_space<vmem>>, vector<1x128x128xbf16>
    %34 = vector.shape_cast %33 : vector<1x128x128xbf16> to vector<128x128xbf16>
    %cst_50 = arith.constant dense<0.000000e+00> : vector<256x128xf32>
    %35 = tpu.matmul %32, %34, %cst_50 {dimension_numbers = #tpu.dot_dimension_numbers<[1], [0], [0], [1], [0, 0, 1, 1], [], []>} : vector<256x128xbf16>, vector<128x128xbf16>, vector<256x128xf32> -> vector<256x128xf32>
    %36 = arith.addf %30, %35 : vector<256x128xf32>
    %c0_51 = arith.constant 0 : index
    %c1_52 = arith.constant 1 : index
    %c0_53 = arith.constant 0 : index
    %c0_54 = arith.constant 0 : index
    %37 = vector.load %arg8[%c0_51, %c1_52, %c0_53, %c0_54] : memref<1x18x24x128xbf16, #tpu.memory_space<vmem>>, vector<1x16x16x128xbf16>
    %38 = vector.shape_cast %37 : vector<1x16x16x128xbf16> to vector<256x128xbf16>
    %c3 = arith.constant 3 : index
    %c0_55 = arith.constant 0 : index
    %c0_56 = arith.constant 0 : index
    %39 = vector.load %arg4[%c3, %c0_55, %c0_56] : memref<9x128x128xbf16, #tpu.memory_space<vmem>>, vector<1x128x128xbf16>
    %40 = vector.shape_cast %39 : vector<1x128x128xbf16> to vector<128x128xbf16>
    %cst_57 = arith.constant dense<0.000000e+00> : vector<256x128xf32>
    %41 = tpu.matmul %38, %40, %cst_57 {dimension_numbers = #tpu.dot_dimension_numbers<[1], [0], [0], [1], [0, 0, 1, 1], [], []>} : vector<256x128xbf16>, vector<128x128xbf16>, vector<256x128xf32> -> vector<256x128xf32>
    %42 = arith.addf %36, %41 : vector<256x128xf32>
    %c0_58 = arith.constant 0 : index
    %c1_59 = arith.constant 1 : index
    %c1_60 = arith.constant 1 : index
    %c0_61 = arith.constant 0 : index
    %43 = vector.load %arg8[%c0_58, %c1_59, %c1_60, %c0_61] : memref<1x18x24x128xbf16, #tpu.memory_space<vmem>>, vector<1x16x16x128xbf16>
    %44 = vector.shape_cast %43 : vector<1x16x16x128xbf16> to vector<256x128xbf16>
    %c4 = arith.constant 4 : index
    %c0_62 = arith.constant 0 : index
    %c0_63 = arith.constant 0 : index
    %45 = vector.load %arg4[%c4, %c0_62, %c0_63] : memref<9x128x128xbf16, #tpu.memory_space<vmem>>, vector<1x128x128xbf16>
    %46 = vector.shape_cast %45 : vector<1x128x128xbf16> to vector<128x128xbf16>
    %cst_64 = arith.constant dense<0.000000e+00> : vector<256x128xf32>
    %47 = tpu.matmul %44, %46, %cst_64 {dimension_numbers = #tpu.dot_dimension_numbers<[1], [0], [0], [1], [0, 0, 1, 1], [], []>} : vector<256x128xbf16>, vector<128x128xbf16>, vector<256x128xf32> -> vector<256x128xf32>
    %48 = arith.addf %42, %47 : vector<256x128xf32>
    %c0_65 = arith.constant 0 : index
    %c1_66 = arith.constant 1 : index
    %c2_67 = arith.constant 2 : index
    %c0_68 = arith.constant 0 : index
    %49 = vector.load %arg8[%c0_65, %c1_66, %c2_67, %c0_68] : memref<1x18x24x128xbf16, #tpu.memory_space<vmem>>, vector<1x16x16x128xbf16>
    %50 = vector.shape_cast %49 : vector<1x16x16x128xbf16> to vector<256x128xbf16>
    %c5 = arith.constant 5 : index
    %c0_69 = arith.constant 0 : index
    %c0_70 = arith.constant 0 : index
    %51 = vector.load %arg4[%c5, %c0_69, %c0_70] : memref<9x128x128xbf16, #tpu.memory_space<vmem>>, vector<1x128x128xbf16>
    %52 = vector.shape_cast %51 : vector<1x128x128xbf16> to vector<128x128xbf16>
    %cst_71 = arith.constant dense<0.000000e+00> : vector<256x128xf32>
    %53 = tpu.matmul %50, %52, %cst_71 {dimension_numbers = #tpu.dot_dimension_numbers<[1], [0], [0], [1], [0, 0, 1, 1], [], []>} : vector<256x128xbf16>, vector<128x128xbf16>, vector<256x128xf32> -> vector<256x128xf32>
    %54 = arith.addf %48, %53 : vector<256x128xf32>
    %c0_72 = arith.constant 0 : index
    %c2_73 = arith.constant 2 : index
    %c0_74 = arith.constant 0 : index
    %c0_75 = arith.constant 0 : index
    %55 = vector.load %arg8[%c0_72, %c2_73, %c0_74, %c0_75] : memref<1x18x24x128xbf16, #tpu.memory_space<vmem>>, vector<1x16x16x128xbf16>
    %56 = vector.shape_cast %55 : vector<1x16x16x128xbf16> to vector<256x128xbf16>
    %c6 = arith.constant 6 : index
    %c0_76 = arith.constant 0 : index
    %c0_77 = arith.constant 0 : index
    %57 = vector.load %arg4[%c6, %c0_76, %c0_77] : memref<9x128x128xbf16, #tpu.memory_space<vmem>>, vector<1x128x128xbf16>
    %58 = vector.shape_cast %57 : vector<1x128x128xbf16> to vector<128x128xbf16>
    %cst_78 = arith.constant dense<0.000000e+00> : vector<256x128xf32>
    %59 = tpu.matmul %56, %58, %cst_78 {dimension_numbers = #tpu.dot_dimension_numbers<[1], [0], [0], [1], [0, 0, 1, 1], [], []>} : vector<256x128xbf16>, vector<128x128xbf16>, vector<256x128xf32> -> vector<256x128xf32>
    %60 = arith.addf %54, %59 : vector<256x128xf32>
    %c0_79 = arith.constant 0 : index
    %c2_80 = arith.constant 2 : index
    %c1_81 = arith.constant 1 : index
    %c0_82 = arith.constant 0 : index
    %61 = vector.load %arg8[%c0_79, %c2_80, %c1_81, %c0_82] : memref<1x18x24x128xbf16, #tpu.memory_space<vmem>>, vector<1x16x16x128xbf16>
    %62 = vector.shape_cast %61 : vector<1x16x16x128xbf16> to vector<256x128xbf16>
    %c7 = arith.constant 7 : index
    %c0_83 = arith.constant 0 : index
    %c0_84 = arith.constant 0 : index
    %63 = vector.load %arg4[%c7, %c0_83, %c0_84] : memref<9x128x128xbf16, #tpu.memory_space<vmem>>, vector<1x128x128xbf16>
    %64 = vector.shape_cast %63 : vector<1x128x128xbf16> to vector<128x128xbf16>
    %cst_85 = arith.constant dense<0.000000e+00> : vector<256x128xf32>
    %65 = tpu.matmul %62, %64, %cst_85 {dimension_numbers = #tpu.dot_dimension_numbers<[1], [0], [0], [1], [0, 0, 1, 1], [], []>} : vector<256x128xbf16>, vector<128x128xbf16>, vector<256x128xf32> -> vector<256x128xf32>
    %66 = arith.addf %60, %65 : vector<256x128xf32>
    %c0_86 = arith.constant 0 : index
    %c2_87 = arith.constant 2 : index
    %c2_88 = arith.constant 2 : index
    %c0_89 = arith.constant 0 : index
    %67 = vector.load %arg8[%c0_86, %c2_87, %c2_88, %c0_89] : memref<1x18x24x128xbf16, #tpu.memory_space<vmem>>, vector<1x16x16x128xbf16>
    %68 = vector.shape_cast %67 : vector<1x16x16x128xbf16> to vector<256x128xbf16>
    %c8 = arith.constant 8 : index
    %c0_90 = arith.constant 0 : index
    %c0_91 = arith.constant 0 : index
    %69 = vector.load %arg4[%c8, %c0_90, %c0_91] : memref<9x128x128xbf16, #tpu.memory_space<vmem>>, vector<1x128x128xbf16>
    %70 = vector.shape_cast %69 : vector<1x128x128xbf16> to vector<128x128xbf16>
    %cst_92 = arith.constant dense<0.000000e+00> : vector<256x128xf32>
    %71 = tpu.matmul %68, %70, %cst_92 {dimension_numbers = #tpu.dot_dimension_numbers<[1], [0], [0], [1], [0, 0, 1, 1], [], []>} : vector<256x128xbf16>, vector<128x128xbf16>, vector<256x128xf32> -> vector<256x128xf32>
    %72 = arith.addf %66, %71 : vector<256x128xf32>
    %73 = vector.shape_cast %72 : vector<256x128xf32> to vector<1x16x16x128xf32>
    %c0_93 = arith.constant 0 : index
    %c0_94 = arith.constant 0 : index
    %c0_95 = arith.constant 0 : index
    %c0_96 = arith.constant 0 : index
    %74 = vector.load %arg5[%c0_93, %c0_94, %c0_95, %c0_96] : memref<1x16x16x128xf32, #tpu.memory_space<vmem>>, vector<1x16x16x128xf32>
    tpu.vector_store %arg5[%c0_93, %c0_94, %c0_95, %c0_96], %73 {strides = array<i32>} : memref<1x16x16x128xf32, #tpu.memory_space<vmem>>, vector<1x16x16x128xf32>,
    %cst_97 = arith.constant dense<0.000000e+00> : vector<128xf32>
    %75 = vector.multi_reduction <add>, %72, %cst_97 [0] : vector<256x128xf32> to vector<128xf32>
    %76 = vector.shape_cast %75 : vector<128xf32> to vector<1x1x128xf32>
    %c0_98 = arith.constant 0 : index
    %c0_99 = arith.constant 0 : index
    %c0_100 = arith.constant 0 : index
    %77 = vector.load %arg6[%c0_98, %c0_99, %c0_100] : memref<1x1x128xf32, #tpu.memory_space<vmem>>, vector<1x1x128xf32>
    tpu.vector_store %arg6[%c0_98, %c0_99, %c0_100], %76 {strides = array<i32>} : memref<1x1x128xf32, #tpu.memory_space<vmem>>, vector<1x1x128xf32>,
    %78 = arith.mulf %72, %72 : vector<256x128xf32>
    %cst_101 = arith.constant dense<0.000000e+00> : vector<128xf32>
    %79 = vector.multi_reduction <add>, %78, %cst_101 [0] : vector<256x128xf32> to vector<128xf32>
    %80 = vector.shape_cast %79 : vector<128xf32> to vector<1x1x128xf32>
    %c0_102 = arith.constant 0 : index
    %c0_103 = arith.constant 0 : index
    %c0_104 = arith.constant 0 : index
    %81 = vector.load %arg7[%c0_102, %c0_103, %c0_104] : memref<1x1x128xf32, #tpu.memory_space<vmem>>, vector<1x1x128xf32>
    tpu.vector_store %arg7[%c0_102, %c0_103, %c0_104], %80 {strides = array<i32>} : memref<1x1x128xf32, #tpu.memory_space<vmem>>, vector<1x1x128xf32>,
    return
  }
  func.func @transform_0(%arg0: i32) -> (i32, i32) {
    %c0_i32 = arith.constant 0 : i32
    %c0_i32_0 = arith.constant 0 : i32
    %c0_i32_1 = arith.constant 0 : i32
    return %c0_i32, %c0_i32_0 : i32, i32
  }
  func.func @transform_1(%arg0: i32) -> (i32, i32) {
    %c0_i32 = arith.constant 0 : i32
    %c0_i32_0 = arith.constant 0 : i32
    %c0_i32_1 = arith.constant 0 : i32
    return %c0_i32, %c0_i32_0 : i32, i32
  }
  func.func @transform_2(%arg0: i32) -> (i32, i32, i32, i32) {
    %c0_i32 = arith.constant 0 : i32
    %c0_i32_0 = arith.constant 0 : i32
    %c0_i32_1 = arith.constant 0 : i32
    %c0_i32_2 = arith.constant 0 : i32
    return %arg0, %c0_i32, %c0_i32_0, %c0_i32_1 : i32, i32, i32, i32
  }
  func.func @transform_3(%arg0: i32) -> (i32, i32, i32) {
    %c0_i32 = arith.constant 0 : i32
    %c0_i32_0 = arith.constant 0 : i32
    %c0_i32_1 = arith.constant 0 : i32
    %c0_i32_2 = arith.constant 0 : i32
    return %c0_i32, %c0_i32_0, %c0_i32_1 : i32, i32, i32
  }
  func.func @transform_4(%arg0: i32) -> (i32, i32, i32, i32) {
    %c0_i32 = arith.constant 0 : i32
    %c0_i32_0 = arith.constant 0 : i32
    %c0_i32_1 = arith.constant 0 : i32
    %c0_i32_2 = arith.constant 0 : i32
    return %arg0, %c0_i32, %c0_i32_0, %c0_i32_1 : i32, i32, i32, i32
  }
  func.func @transform_5(%arg0: i32) -> (i32, i32, i32) {
    %c0_i32 = arith.constant 0 : i32
    %c0_i32_0 = arith.constant 0 : i32
    %c0_i32_1 = arith.constant 0 : i32
    return %arg0, %c0_i32, %c0_i32_0 : i32, i32, i32
  }
  func.func @transform_6(%arg0: i32) -> (i32, i32, i32) {
    %c0_i32 = arith.constant 0 : i32
    %c0_i32_0 = arith.constant 0 : i32
    %c0_i32_1 = arith.constant 0 : i32
    return %arg0, %c0_i32, %c0_i32_0 : i32, i32, i32
  }
}

module attributes {stable_mosaic.version = 11 : i64} {
  func.func @kernel(%arg0: i32, %arg1: memref<1x128xf32, #tpu.memory_space<vmem>>, %arg2: memref<1x128xf32, #tpu.memory_space<vmem>>, %arg3: memref<1x16x16x128xf32, #tpu.memory_space<vmem>>, %arg4: memref<1x16x16x128xf32, #tpu.memory_space<vmem>>, %arg5: memref<1x16x16x128xf32, #tpu.memory_space<vmem>>) attributes {dimension_semantics = [#tpu.dimension_semantics<parallel>], iteration_bounds = array<i64: 2>, scalar_prefetch = 0 : i64, scratch_operands = 0 : i64, tpu.core_type = #tpu.core_type<tc>, window_params = [{pipeline_mode = #tpu.pipeline_mode<synchronous>, transform_indices = @transform_0, window_bounds = array<i64: 1, 128>}, {pipeline_mode = #tpu.pipeline_mode<synchronous>, transform_indices = @transform_1, window_bounds = array<i64: 1, 128>}, {transform_indices = @transform_2, window_bounds = array<i64: 1, 16, 16, 128>}, {transform_indices = @transform_3, window_bounds = array<i64: 1, 16, 16, 128>}, {transform_indices = @transform_4, window_bounds = array<i64: 1, 16, 16, 128>}]} {
    %c0 = arith.constant 0 : index
    %c0_0 = arith.constant 0 : index
    %c0_1 = arith.constant 0 : index
    %c0_2 = arith.constant 0 : index
    %0 = vector.load %arg3[%c0, %c0_0, %c0_1, %c0_2] : memref<1x16x16x128xf32, #tpu.memory_space<vmem>>, vector<1x16x16x128xf32>
    %c0_3 = arith.constant 0 : index
    %c0_4 = arith.constant 0 : index
    %1 = vector.load %arg1[%c0_3, %c0_4] : memref<1x128xf32, #tpu.memory_space<vmem>>, vector<1x128xf32>
    %2 = vector.shape_cast %1 : vector<1x128xf32> to vector<1x1x1x128xf32>
    %3 = vector.broadcast %2 : vector<1x1x1x128xf32> to vector<1x16x16x128xf32>
    %4 = arith.mulf %0, %3 : vector<1x16x16x128xf32>
    %c0_5 = arith.constant 0 : index
    %c0_6 = arith.constant 0 : index
    %5 = vector.load %arg2[%c0_5, %c0_6] : memref<1x128xf32, #tpu.memory_space<vmem>>, vector<1x128xf32>
    %6 = vector.shape_cast %5 : vector<1x128xf32> to vector<1x1x1x128xf32>
    %7 = vector.broadcast %6 : vector<1x1x1x128xf32> to vector<1x16x16x128xf32>
    %8 = arith.addf %4, %7 : vector<1x16x16x128xf32>
    %c0_7 = arith.constant 0 : index
    %c0_8 = arith.constant 0 : index
    %c0_9 = arith.constant 0 : index
    %c0_10 = arith.constant 0 : index
    %9 = vector.load %arg4[%c0_7, %c0_8, %c0_9, %c0_10] : memref<1x16x16x128xf32, #tpu.memory_space<vmem>>, vector<1x16x16x128xf32>
    %10 = arith.addf %8, %9 : vector<1x16x16x128xf32>
    %cst = arith.constant 0.000000e+00 : f32
    %11 = vector.broadcast %cst : f32 to vector<1x16x16x128xf32>
    %12 = arith.maximumf %10, %11 : vector<1x16x16x128xf32>
    %c0_11 = arith.constant 0 : index
    %c0_12 = arith.constant 0 : index
    %c0_13 = arith.constant 0 : index
    %c0_14 = arith.constant 0 : index
    %13 = vector.load %arg5[%c0_11, %c0_12, %c0_13, %c0_14] : memref<1x16x16x128xf32, #tpu.memory_space<vmem>>, vector<1x16x16x128xf32>
    tpu.vector_store %arg5[%c0_11, %c0_12, %c0_13, %c0_14], %12 {strides = array<i32>} : memref<1x16x16x128xf32, #tpu.memory_space<vmem>>, vector<1x16x16x128xf32>,
    return
  }
  func.func @transform_0(%arg0: i32) -> (i32, i32) {
    %c0_i32 = arith.constant 0 : i32
    %c0_i32_0 = arith.constant 0 : i32
    %c0_i32_1 = arith.constant 0 : i32
    return %c0_i32, %c0_i32_0 : i32, i32
  }
  func.func @transform_1(%arg0: i32) -> (i32, i32) {
    %c0_i32 = arith.constant 0 : i32
    %c0_i32_0 = arith.constant 0 : i32
    %c0_i32_1 = arith.constant 0 : i32
    return %c0_i32, %c0_i32_0 : i32, i32
  }
  func.func @transform_2(%arg0: i32) -> (i32, i32, i32, i32) {
    %c0_i32 = arith.constant 0 : i32
    %c0_i32_0 = arith.constant 0 : i32
    %c0_i32_1 = arith.constant 0 : i32
    %c0_i32_2 = arith.constant 0 : i32
    return %arg0, %c0_i32, %c0_i32_0, %c0_i32_1 : i32, i32, i32, i32
  }
  func.func @transform_3(%arg0: i32) -> (i32, i32, i32, i32) {
    %c0_i32 = arith.constant 0 : i32
    %c0_i32_0 = arith.constant 0 : i32
    %c0_i32_1 = arith.constant 0 : i32
    %c0_i32_2 = arith.constant 0 : i32
    return %arg0, %c0_i32, %c0_i32_0, %c0_i32_1 : i32, i32, i32, i32
  }
  func.func @transform_4(%arg0: i32) -> (i32, i32, i32, i32) {
    %c0_i32 = arith.constant 0 : i32
    %c0_i32_0 = arith.constant 0 : i32
    %c0_i32_1 = arith.constant 0 : i32
    %c0_i32_2 = arith.constant 0 : i32
    return %arg0, %c0_i32, %c0_i32_0, %c0_i32_1 : i32, i32, i32, i32
  }
}

</mosaic_0001>

<bundles_post_ra>
// kernel: _lambda_.5
= control target key start
LH: loop header
LB: loop body
LE: loop exit
PB: predicated region body
PF: predicated region fallthrough
CT: control target
= control target key end

     0   :  { %s582_s15 = smov 0   ;;  %s783_s0 = inlined_call_operand.vmem [shape: f32[1,128], index: 0, kind: input, shape index: {}]   ;;  %s784_s1 = inlined_call_operand.vmem [shape: f32[1,128], index: 1, kind: input, shape index: {}]   ;;  %s785_s2 = inlined_call_operand.vmem [shape: f32[2,16,16,128], index: 2, kind: input, shape index: {}]   ;;  %s786_s3 = inlined_call_operand.vmem [shape: f32[2,16,16,128], index: 3, kind: input, shape index: {}]   ;;  %s787_s4 = inlined_call_operand.vmem [shape: f32[2,16,16,128], index: 4, kind: output, shape index: {}]  }
   0x1 LB: > { %s523_s16 = sadd.s32 4294967295, %s555_s15   ;;  %p527_p0 = scmp.ge.s32.totalorder %s555_s15, 1  ;;  %s555_s15 = sphi %s582_s15, %s14_s15  }
   0x2   : > { %p172_p1 = scmp.lt.s32.totalorder %s555_s15, 3 }
   0x4   : > { %p173_p2 = pnand %p527_p0, %p172_p1 }
   0x5   : > { %p203_p3 = scmp.lt.s32.totalorder (!%p173_p2), %s523_s16, 1 }
   0x6   : > { %176 = sbr.rel (%p173_p2) target bundleno = 53 (0x35), region = 36 }
   0xb   : > { %s789_s16 = smov (!%p203_p3, %s523_s16), 1  ;;  %v595_v0 = vld [vmem:[%s783_s0] ss:$0 sm:$0xff] }
   0xc   : > { %s590_s17 = sshll.u32 %s789_s16, 8  ;;  %v613_v2 = vld [vmem:[%s784_s1] ss:$0 sm:$0xff] }
   0xd   : > { %s601_s22 = scalar_lea.vmem %s785_s2, %s590_s17  ;;  %s607_s25 = scalar_lea.vmem %s786_s3, %s590_s17 }
   0xe   : > { %v218_v1 = vld [vmem:[%s601_s22] sm:$0xff]  ;;  %v219_v3 = vld [vmem:[%s601_s22 + $0x8] sm:$0xff]  ;;  %v220_v7 = vld [vmem:[%s601_s22 + $0x10] sm:$0xff]  ;;  %s643_s30 = scalar_lea.vmem %s787_s4, %s590_s17 }
   0xf   : > { %v257_v4 = vmul.f32 %v595_v0, %v218_v1  ;;  %v328_v5 = vld [vmem:[%s607_s25] sm:$0xff]  ;;  %v258_v6 = vmul.f32 %v595_v0, %v219_v3  ;;  %v329_v8 = vld [vmem:[%s607_s25 + $0x8] sm:$0xff]  ;;  %v259_v9 = vmul.f32 %v595_v0, %v220_v7  ;;  %v221_v10 = vld [vmem:[%s601_s22 + $0x18] sm:$0xff] }
  0x10   : > { %v222_v11 = vld [vmem:[%s601_s22 + $0x20] sm:$0xff]  ;;  %v330_v14 = vld [vmem:[%s607_s25 + $0x10] sm:$0xff]  ;;  %v260_v15 = vmul.f32 %v595_v0, %v221_v10  ;;  %v331_v16 = vld [vmem:[%s607_s25 + $0x18] sm:$0xff] }
  0x11   : > { %v296_v12 = vadd.f32 %v613_v2, %v257_v4  ;;  %v297_v13 = vadd.f32 %v613_v2, %v258_v6  ;;  %v261_v17 = vmul.f32 %v595_v0, %v222_v11  ;;  %v223_v18 = vld [vmem:[%s601_s22 + $0x28] sm:$0xff]  ;;  %v298_v19 = vadd.f32 %v613_v2, %v259_v9  ;;  %v332_v20 = vld [vmem:[%s607_s25 + $0x20] sm:$0xff]  ;;  %v224_v22 = vld [vmem:[%s601_s22 + $0x30] sm:$0xff] }
  0x12   : > { %v262_v21 = vmul.f32 %v595_v0, %v223_v18  ;;  %v225_v23 = vld [vmem:[%s601_s22 + $0x38] sm:$0xff]  ;;  %v299_v26 = vadd.f32 %v613_v2, %v260_v15  ;;  %v333_v28 = vld [vmem:[%s607_s25 + $0x28] sm:$0xff]  ;;  %v263_v31 = vmul.f32 %v595_v0, %v224_v22  ;;  %v226_v33 = vld [vmem:[%s601_s22 + $0x40] sm:$0xff] }
  0x13   : > { %v360_v24 = vadd.f32 %v328_v5, %v296_v12  ;;  %v361_v25 = vadd.f32 %v329_v8, %v297_v13  ;;  %v300_v27 = vadd.f32 %v613_v2, %v261_v17  ;;  %v362_v29 = vadd.f32 %v330_v14, %v298_v19  ;;  %v227_v34 = vld [vmem:[%s601_s22 + $0x48] sm:$0xff]  ;;  %v334_v39 = vld [vmem:[%s607_s25 + $0x30] sm:$0xff]  ;;  %v335_v40 = vld [vmem:[%s607_s25 + $0x38] sm:$0xff] }
  0x14   : > { %v301_v30 = vadd.f32 %v613_v2, %v262_v21  ;;  %v264_v32 = vmul.f32 %v595_v0, %v225_v23  ;;  %v363_v37 = vadd.f32 %v331_v16, %v299_v26  ;;  %v228_v41 = vld [vmem:[%s601_s22 + $0x50] sm:$0xff]  ;;  %v302_v44 = vadd.f32 %v613_v2, %v263_v31  ;;  %v229_v46 = vld [vmem:[%s601_s22 + $0x58] sm:$0xff]  ;;  %v230_v47 = vld [vmem:[%s601_s22 + $0x60] sm:$0xff] }
  0x15   : > { %v392_v35 = vmax.f32 %v360_v24, 0.0  ;;  %v393_v36 = vmax.f32 %v361_v25, 0.0  ;;  %v364_v38 = vadd.f32 %v332_v20, %v300_v27  ;;  %v394_v42 = vmax.f32 %v362_v29, 0.0  ;;  %v231_v52 = vld [vmem:[%s601_s22 + $0x68] sm:$0xff]  ;;  %v336_v56 = vld [vmem:[%s607_s25 + $0x40] sm:$0xff]  ;;  %v338_v61 = vld [vmem:[%s607_s25 + $0x50] sm:$0xff] }
  0x16   : > { %v365_v43 = vadd.f32 %v333_v28, %v301_v30  ;;  %v303_v45 = vadd.f32 %v613_v2, %v264_v32  ;;  %v395_v48 = vmax.f32 %v363_v37, 0.0  ;;  %v265_v50 = vmul.f32 %v595_v0, %v226_v33  ;;  %v337_v57 = vld [vmem:[%s607_s25 + $0x48] sm:$0xff]  ;;  %v232_v1 = vld [vmem:[%s601_s22 + $0x70] sm:$0xff]  ;;  %v233_v3 = vld [vmem:[%s601_s22 + $0x78] sm:$0xff] }
  0x17   : > { %424 = vst [vmem:[%s643_s30] sm:$0xff] %v392_v35  ;;  %425 = vst [vmem:[%s643_s30 + $0x8] sm:$0xff] %v393_v36  ;;  %v396_v49 = vmax.f32 %v364_v38, 0.0  ;;  %v266_v51 = vmul.f32 %v595_v0, %v227_v34  ;;  %v366_v54 = vadd.f32 %v334_v39, %v302_v44  ;;  %v267_v58 = vmul.f32 %v595_v0, %v228_v41  ;;  %v339_v7 = vld [vmem:[%s607_s25 + $0x58] sm:$0xff]  ;;  %v340_v8 = vld [vmem:[%s607_s25 + $0x60] sm:$0xff] }
  0x18   : > { %426 = vst [vmem:[%s643_s30 + $0x10] sm:$0xff] %v394_v42  ;;  %v397_v53 = vmax.f32 %v365_v43, 0.0  ;;  %v367_v55 = vadd.f32 %v335_v40, %v303_v45  ;;  %427 = vst [vmem:[%s643_s30 + $0x18] sm:$0xff] %v395_v48  ;;  %v304_v59 = vadd.f32 %v613_v2, %v265_v50  ;;  %v268_v62 = vmul.f32 %v595_v0, %v229_v46  ;;  %v341_v14 = vld [vmem:[%s607_s25 + $0x68] sm:$0xff]  ;;  %v234_v19 = vld [vmem:[%s601_s22 + $0x80] sm:$0xff] }
  0x19   : > { %428 = vst [vmem:[%s643_s30 + $0x20] sm:$0xff] %v396_v49  ;;  %v305_v60 = vadd.f32 %v613_v2, %v266_v51  ;;  %v269_v63 = vmul.f32 %v595_v0, %v230_v47  ;;  %v398_v4 = vmax.f32 %v366_v54, 0.0  ;;  %v306_v6 = vadd.f32 %v613_v2, %v267_v58  ;;  %v235_v20 = vld [vmem:[%s601_s22 + $0x88] sm:$0xff]  ;;  %v342_v25 = vld [vmem:[%s607_s25 + $0x70] sm:$0xff]  ;;  %v343_v26 = vld [vmem:[%s607_s25 + $0x78] sm:$0xff] }
  0x1a   : > { %429 = vst [vmem:[%s643_s30 + $0x28] sm:$0xff] %v397_v53  ;;  %v399_v5 = vmax.f32 %v367_v55, 0.0  ;;  %v270_v9 = vmul.f32 %v595_v0, %v231_v52  ;;  %v368_v10 = vadd.f32 %v336_v56, %v304_v59  ;;  %v307_v12 = vadd.f32 %v613_v2, %v268_v62  ;;  %v236_v27 = vld [vmem:[%s601_s22 + $0x90] sm:$0xff]  ;;  %v237_v32 = vld [vmem:[%s601_s22 + $0x98] sm:$0xff]  ;;  %v238_v33 = vld [vmem:[%s601_s22 + $0xa0] sm:$0xff] }
  0x1b   : > { %v369_v11 = vadd.f32 %v337_v57, %v305_v60  ;;  %v308_v13 = vadd.f32 %v613_v2, %v269_v63  ;;  %430 = vst [vmem:[%s643_s30 + $0x30] sm:$0xff] %v398_v4  ;;  %v370_v15 = vadd.f32 %v338_v61, %v306_v6  ;;  %v271_v17 = vmul.f32 %v595_v0, %v232_v1  ;;  %v239_v38 = vld [vmem:[%s601_s22 + $0xa8] sm:$0xff]  ;;  %v344_v42 = vld [vmem:[%s607_s25 + $0x80] sm:$0xff]  ;;  %v346_v47 = vld [vmem:[%s607_s25 + $0x90] sm:$0xff] }
  0x1c   : > { %431 = vst [vmem:[%s643_s30 + $0x38] sm:$0xff] %v399_v5  ;;  %v309_v16 = vadd.f32 %v613_v2, %v270_v9  ;;  %v272_v18 = vmul.f32 %v595_v0, %v233_v3  ;;  %v400_v21 = vmax.f32 %v368_v10, 0.0  ;;  %v371_v23 = vadd.f32 %v339_v7, %v307_v12  ;;  %v345_v43 = vld [vmem:[%s607_s25 + $0x88] sm:$0xff]  ;;  %v240_v50 = vld [vmem:[%s601_s22 + $0xb0] sm:$0xff]  ;;  %v241_v51 = vld [vmem:[%s601_s22 + $0xb8] sm:$0xff] }
  0x1d   : > { %v401_v22 = vmax.f32 %v369_v11, 0.0  ;;  %v372_v24 = vadd.f32 %v340_v8, %v308_v13  ;;  %v402_v28 = vmax.f32 %v370_v15, 0.0  ;;  %v310_v30 = vadd.f32 %v613_v2, %v271_v17  ;;  %v347_v55 = vld [vmem:[%s607_s25 + $0x98] sm:$0xff]  ;;  %v348_v56 = vld [vmem:[%s607_s25 + $0xa0] sm:$0xff]  ;;  %v349_v62 = vld [vmem:[%s607_s25 + $0xa8] sm:$0xff] }
  0x1e   : > { %v373_v29 = vadd.f32 %v341_v14, %v309_v16  ;;  %v311_v31 = vadd.f32 %v613_v2, %v272_v18  ;;  %432 = vst [vmem:[%s643_s30 + $0x40] sm:$0xff] %v400_v21  ;;  %v403_v34 = vmax.f32 %v371_v23, 0.0  ;;  %v273_v36 = vmul.f32 %v595_v0, %v234_v19  ;;  %v242_v5 = vld [vmem:[%s601_s22 + $0xc0] sm:$0xff]  ;;  %v243_v6 = vld [vmem:[%s601_s22 + $0xc8] sm:$0xff]  ;;  %v350_v11 = vld [vmem:[%s607_s25 + $0xb0] sm:$0xff] }
  0x1f   : > { %433 = vst [vmem:[%s643_s30 + $0x48] sm:$0xff] %v401_v22  ;;  %v404_v35 = vmax.f32 %v372_v24, 0.0  ;;  %v274_v37 = vmul.f32 %v595_v0, %v235_v20  ;;  %434 = vst [vmem:[%s643_s30 + $0x50] sm:$0xff] %v402_v28  ;;  %v374_v40 = vadd.f32 %v342_v25, %v310_v30  ;;  %v275_v44 = vmul.f32 %v595_v0, %v236_v27  ;;  %v351_v12 = vld [vmem:[%s607_s25 + $0xb8] sm:$0xff]  ;;  %v244_v13 = vld [vmem:[%s601_s22 + $0xd0] sm:$0xff] }
  0x20   : > { %v405_v39 = vmax.f32 %v373_v29, 0.0  ;;  %v375_v41 = vadd.f32 %v343_v26, %v311_v31  ;;  %435 = vst [vmem:[%s643_s30 + $0x58] sm:$0xff] %v403_v34  ;;  %v312_v45 = vadd.f32 %v613_v2, %v273_v36  ;;  %v276_v48 = vmul.f32 %v595_v0, %v237_v32  ;;  %v245_v18 = vld [vmem:[%s601_s22 + $0xd8] sm:$0xff]  ;;  %v246_v19 = vld [vmem:[%s601_s22 + $0xe0] sm:$0xff]  ;;  %v247_v24 = vld [vmem:[%s601_s22 + $0xe8] sm:$0xff] }
  0x21   : > { %436 = vst [vmem:[%s643_s30 + $0x60] sm:$0xff] %v404_v35  ;;  %v313_v46 = vadd.f32 %v613_v2, %v274_v37  ;;  %v277_v49 = vmul.f32 %v595_v0, %v238_v33  ;;  %v406_v52 = vmax.f32 %v374_v40, 0.0  ;;  %v314_v54 = vadd.f32 %v613_v2, %v275_v44  ;;  %v352_v28 = vld [vmem:[%s607_s25 + $0xc0] sm:$0xff]  ;;  %v353_v29 = vld [vmem:[%s607_s25 + $0xc8] sm:$0xff]  ;;  %v354_v33 = vld [vmem:[%s607_s25 + $0xd0] sm:$0xff] }
  0x22   : > { %437 = vst [vmem:[%s643_s30 + $0x68] sm:$0xff] %v405_v39  ;;  %v407_v53 = vmax.f32 %v375_v41, 0.0  ;;  %v278_v57 = vmul.f32 %v595_v0, %v239_v38  ;;  %v376_v58 = vadd.f32 %v344_v42, %v312_v45  ;;  %v315_v60 = vadd.f32 %v613_v2, %v276_v48  ;;  %v248_v36 = vld [vmem:[%s601_s22 + $0xf0] sm:$0xff]  ;;  %v249_v37 = vld [vmem:[%s601_s22 + $0xf8] sm:$0xff]  ;;  %v356_v42 = vld [vmem:[%s607_s25 + $0xe0] sm:$0xff] }
  0x23   : > { %v377_v59 = vadd.f32 %v345_v43, %v313_v46  ;;  %v316_v61 = vadd.f32 %v613_v2, %v277_v49  ;;  %438 = vst [vmem:[%s643_s30 + $0x70] sm:$0xff] %v406_v52  ;;  %v378_v63 = vadd.f32 %v346_v47, %v314_v54  ;;  %v279_v3 = vmul.f32 %v595_v0, %v240_v50  ;;  %v355_v41 = vld [vmem:[%s607_s25 + $0xd8] sm:$0xff]  ;;  %v357_v48 = vld [vmem:[%s607_s25 + $0xe8] sm:$0xff] }
  0x24   : > { %439 = vst [vmem:[%s643_s30 + $0x78] sm:$0xff] %v407_v53  ;;  %v317_v1 = vadd.f32 %v613_v2, %v278_v57  ;;  %v280_v4 = vmul.f32 %v595_v0, %v241_v51  ;;  %v408_v7 = vmax.f32 %v376_v58, 0.0  ;;  %v379_v9 = vadd.f32 %v347_v55, %v315_v60  ;;  %v358_v57 = vld [vmem:[%s607_s25 + $0xf0] sm:$0xff]  ;;  %v359_v58 = vld [vmem:[%s607_s25 + $0xf8] sm:$0xff] }
  0x25   : > { %v409_v8 = vmax.f32 %v377_v59, 0.0  ;;  %v380_v10 = vadd.f32 %v348_v56, %v316_v61  ;;  %v410_v14 = vmax.f32 %v378_v63, 0.0  ;;  %v318_v16 = vadd.f32 %v613_v2, %v279_v3 }
  0x26   : > { %v381_v15 = vadd.f32 %v349_v62, %v317_v1  ;;  %v319_v17 = vadd.f32 %v613_v2, %v280_v4  ;;  %440 = vst [vmem:[%s643_s30 + $0x80] sm:$0xff] %v408_v7  ;;  %v411_v20 = vmax.f32 %v379_v9, 0.0  ;;  %v281_v22 = vmul.f32 %v595_v0, %v242_v5 }
  0x27   : > { %441 = vst [vmem:[%s643_s30 + $0x88] sm:$0xff] %v409_v8  ;;  %v412_v21 = vmax.f32 %v380_v10, 0.0  ;;  %v282_v23 = vmul.f32 %v595_v0, %v243_v6  ;;  %442 = vst [vmem:[%s643_s30 + $0x90] sm:$0xff] %v410_v14  ;;  %v382_v26 = vadd.f32 %v350_v11, %v318_v16  ;;  %v283_v30 = vmul.f32 %v595_v0, %v244_v13 }
  0x28   : > { %v413_v25 = vmax.f32 %v381_v15, 0.0  ;;  %v383_v27 = vadd.f32 %v351_v12, %v319_v17  ;;  %443 = vst [vmem:[%s643_s30 + $0x98] sm:$0xff] %v411_v20  ;;  %v320_v31 = vadd.f32 %v613_v2, %v281_v22  ;;  %v284_v34 = vmul.f32 %v595_v0, %v245_v18 }
  0x29   : > { %444 = vst [vmem:[%s643_s30 + $0xa0] sm:$0xff] %v412_v21  ;;  %v321_v32 = vadd.f32 %v613_v2, %v282_v23  ;;  %v285_v35 = vmul.f32 %v595_v0, %v246_v19  ;;  %v414_v38 = vmax.f32 %v382_v26, 0.0  ;;  %v322_v40 = vadd.f32 %v613_v2, %v283_v30 }
  0x2a   : > { %445 = vst [vmem:[%s643_s30 + $0xa8] sm:$0xff] %v413_v25  ;;  %v415_v39 = vmax.f32 %v383_v27, 0.0  ;;  %v286_v43 = vmul.f32 %v595_v0, %v247_v24  ;;  %v384_v44 = vadd.f32 %v352_v28, %v320_v31  ;;  %v323_v46 = vadd.f32 %v613_v2, %v284_v34 }
  0x2b   : > { %v385_v45 = vadd.f32 %v353_v29, %v321_v32  ;;  %v324_v47 = vadd.f32 %v613_v2, %v285_v35  ;;  %446 = vst [vmem:[%s643_s30 + $0xb0] sm:$0xff] %v414_v38  ;;  %v386_v49 = vadd.f32 %v354_v33, %v322_v40  ;;  %v287_v51 = vmul.f32 %v595_v0, %v248_v36 }
  0x2c   : > { %447 = vst [vmem:[%s643_s30 + $0xb8] sm:$0xff] %v415_v39  ;;  %v325_v50 = vadd.f32 %v613_v2, %v286_v43  ;;  %v288_v52 = vmul.f32 %v595_v0, %v249_v37  ;;  %v416_v53 = vmax.f32 %v384_v44, 0.0  ;;  %v387_v55 = vadd.f32 %v355_v41, %v323_v46 }
  0x2d   : > { %v417_v54 = vmax.f32 %v385_v45, 0.0  ;;  %v388_v56 = vadd.f32 %v356_v42, %v324_v47  ;;  %v418_v59 = vmax.f32 %v386_v49, 0.0  ;;  %v326_v61 = vadd.f32 %v613_v2, %v287_v51 }
  0x2e   : > { %v389_v60 = vadd.f32 %v357_v48, %v325_v50  ;;  %v327_v62 = vadd.f32 %v613_v2, %v288_v52  ;;  %448 = vst [vmem:[%s643_s30 + $0xc0] sm:$0xff] %v416_v53  ;;  %v419_v0 = vmax.f32 %v387_v55, 0.0 }
  0x2f   : > { %449 = vst [vmem:[%s643_s30 + $0xc8] sm:$0xff] %v417_v54  ;;  %v420_v63 = vmax.f32 %v388_v56, 0.0  ;;  %450 = vst [vmem:[%s643_s30 + $0xd0] sm:$0xff] %v418_v59  ;;  %v390_v3 = vadd.f32 %v358_v57, %v326_v61 }
  0x30   : > { %v421_v1 = vmax.f32 %v389_v60, 0.0  ;;  %v391_v4 = vadd.f32 %v359_v58, %v327_v62  ;;  %451 = vst [vmem:[%s643_s30 + $0xd8] sm:$0xff] %v419_v0 }
  0x31   : > { %452 = vst [vmem:[%s643_s30 + $0xe0] sm:$0xff] %v420_v63  ;;  %v422_v5 = vmax.f32 %v390_v3, 0.0 }
  0x32   : > { %453 = vst [vmem:[%s643_s30 + $0xe8] sm:$0xff] %v421_v1  ;;  %v423_v6 = vmax.f32 %v391_v4, 0.0 }
  0x33   : > { %454 = vst [vmem:[%s643_s30 + $0xf0] sm:$0xff] %v422_v5 }
  0x34   : > { %455 = vst [vmem:[%s643_s30 + $0xf8] sm:$0xff] %v423_v6 }
  0x35 PF: > { %s14_s15 = sadd.s32 1, %s555_s15  }
  0x36   : > { %p11_p4 = scmp.ge.s32.totalorder %s14_s15, 4  }
  0x38   :  { %13 = sbr.rel (!%p11_p4) target bundleno = 1 (0x1), region = 69 }

// kernel: _lambda_.4
= control target key start
LH: loop header
LB: loop body
LE: loop exit
PB: predicated region body
PF: predicated region fallthrough
CT: control target
= control target key end

     0   :  { %s7458_s21 = smov 0   ;;  %s10173_s0 = inlined_call_operand.vmem [shape: f32[1,128], index: 0, kind: input, shape index: {}]   ;;  %s10174_s1 = inlined_call_operand.vmem [shape: f32[1,128], index: 1, kind: input, shape index: {}]   ;;  %s10175_s2 = inlined_call_operand.vmem [shape: f32[2,16,16,128], index: 2, kind: input, shape index: {}]   ;;  %s10176_s3 = inlined_call_operand.vmem [shape: bf16[9,128,128], index: 3, kind: input, shape index: {}]   ;;  %s10177_s4 = inlined_call_operand.vmem [shape: f32[2,16,16,128], index: 4, kind: output, shape index: {0}]   ;;  %s10178_s5 = inlined_call_operand.vmem [shape: f32[2,1,128], index: 5, kind: output, shape index: {1}]   ;;  %s10179_s6 = inlined_call_operand.vmem [shape: f32[2,1,128], index: 6, kind: output, shape index: {2}]  }
   0x1 LB: > { %s6117_s22 = sadd.s32 4294967295, %s7420_s21   ;;  %p6121_p0 = scmp.ge.s32.totalorder %s7420_s21, 1  ;;  %s7420_s21 = sphi %s7458_s21, %s17_s21  }
   0x2   : > { %p217_p1 = scmp.lt.s32.totalorder %s7420_s21, 3 }
   0x4   : > { %p218_p2 = pnand %p6121_p0, %p217_p1 }
   0x6   : > { %221 = sbr.rel (%p218_p2) target bundleno = 673 (0x2a1), region = 36 }
   0xb   : > { %v7261_v0 = vld [vmem:[%s10176_s3 + $0x78] sm:$0xff]   ;;  %v7262_v1 = vld [vmem:[%s10176_s3 + $0x70] sm:$0xff]   ;;  %v7422_v2 = vmov 0   ;;  %p253_p3 = scmp.lt.s32.totalorder %s6117_s22, 1  ;;  %v7263_v3 = vld [vmem:[%s10176_s3 + $0x68] sm:$0xff]   ;;  %vm419_vm0 = vcmask 1040384  }
   0xc   : > { %412 = vst [vmem:[#allocation2] sm:$0xf] %v7422_v2  ;;  %413 = vst [vmem:[#allocation2 + $0x4] sm:$0xf] %v7422_v2  ;;  %6804 = vmatprep.subr.bf16.mxu0 %v7261_v0  ;;  %7236 = vmatprep.subr.bf16.mxu1 %v7261_v0  ;;  %vm476_vm1 = vcmask 1043456   ;;  %v7264_v4 = vld [vmem:[%s10176_s3 + $0x60] sm:$0xff]  }
   0xd   : > { %414 = vst [vmem:[#allocation2 + $0x8] sm:$0xf] %v7422_v2  ;;  %416 = vst [vmem:[#allocation2 + $0xcc] sm:$0xf] %v7422_v2  ;;  %6805 = vmatpush3.bf16.msra.mxu0 %v7261_v0  ;;  %7244 = vmatpush3.bf16.msra.mxu1 %v7261_v0  ;;  %s10430_s22 = smov (!%p253_p3, %s6117_s22), 1  ;;  %v7265_v9 = vld [vmem:[%s10176_s3 + $0x58] sm:$0xff]  }
   0xe   : > { %417 = vst [vmem:[#allocation2 + $0xd0] sm:$0xf] %v7422_v2  ;;  %418 = vst [vmem:[#allocation2 + $0xd4] sm:$0xf] %v7422_v2  ;;  %6806 = vmatprep.subr.bf16.mxu0 %v7262_v1  ;;  %7237 = vmatprep.subr.bf16.mxu1 %v7262_v1  ;;  %s6554_s7 = sshll.u32 %s10430_s22, 8  ;;  %v7266_v28 = vld [vmem:[%s10176_s3 + $0x50] sm:$0xff]   ;;  %s265_s26 = scalar_lea.vmem %s10178_s5, %s10430_s22 }
   0xf   : > { %vm420_vm2 = vsmask.f32 256  ;;  %vm477_vm3 = vsmask.f32 7938  ;;  %s7486_s10 = scalar_lea.vmem %s10175_s2, %s6554_s7  ;;  %vm1128_vm6 = vsmask.f32 3328  ;;  %s9989_s24 = scalar_lea.vmem %s10177_s4, %s6554_s7 }
  0x10   : > { %vm7489_vm4 = vmand %vm419_vm0, %vm420_vm2  ;;  %v270_v14 = vld [vmem:[%s7486_s10] sm:$0xff]  ;;  %v271_v16 = vld [vmem:[%s7486_s10 + $0x8] sm:$0xff]  ;;  %vm1129_vm7 = vsmask.f32 7440  ;;  %vm629_vm8 = vsmask.f32 4368  ;;  %s268_s29 = scalar_lea.vmem %s10179_s6, %s10430_s22 }
  0x11   : > { %6807 = vmatpush3.bf16.msra.mxu0 %v7262_v1  ;;  %7245 = vmatpush3.bf16.msra.mxu1 %v7262_v1  ;;  %vm7499_vm5 = vmand %vm476_vm1, %vm477_vm3  ;;  %v7510_v17 = vld [vmem:[%s10173_s0] ss:$0 sm:$0xff]  ;;  %v425_v23 = vld [vmem:[#allocation2 + $0xc] sm:$0x1]  ;;  %vm2158_vm11 = vcmask 1042432   ;;  %vm2159_vm12 = vcmask 1046532  }
  0x12   : > { %6808 = vmatprep.subr.bf16.mxu0 %v7263_v3  ;;  %7238 = vmatprep.subr.bf16.mxu1 %v7263_v3  ;;  %v309_v20 = vmul.f32 %v7510_v17, %v270_v14  ;;  %v310_v21 = vmul.f32 %v7510_v17, %v271_v16  ;;  %v7519_v22 = vld [vmem:[%s10174_s1] ss:$0 sm:$0xff]  ;;  %v426_v24 = vsel %vm7489_vm4, 0, %v425_v23  ;;  %v482_v25 = vld [vmem:[#allocation2 + $0x14] sm:$0xf]  ;;  %v285_v27 = vld [vmem:[%s7486_s10 + $0x78] sm:$0xff] }
  0x13   : > { %v422_v5 = vld [vmem:[#allocation2] sm:$0x1]  ;;  %v1065_v8 = vld [vmem:[#allocation2 + $0x4] sm:$0xf]  ;;  %v284_v26 = vld [vmem:[%s7486_s10 + $0x70] sm:$0xff]  ;;  %v483_v31 = vsel %vm7499_vm5, 0, %v482_v25  ;;  %v324_v35 = vmul.f32 %v7510_v17, %v285_v27 }
  0x14   : > { %v479_v7 = vld [vmem:[#allocation2 + $0x8] sm:$0xf]  ;;  %v423_v10 = vsel %vm7489_vm4, 0, %v422_v5  ;;  %v1141_v12 = vshll.u32 %v1065_v8, 16  ;;  %v1145_v13 = vshrl.u32 %v1065_v8, 16  ;;  %v348_v29 = vadd.f32 %v7519_v22, %v309_v20  ;;  %v286_v43 = vld [vmem:[%s7486_s10 + $0x80] sm:$0xff]  ;;  %vm7553_vm9 = vmor %vm1128_vm6, %vm1129_vm7 }
  0x15   : > { %6809 = vmatpush3.bf16.msra.mxu0 %v7263_v3  ;;  %7246 = vmatpush3.bf16.msra.mxu1 %v7263_v3  ;;  %424 = vst [vmem:[#allocation2] sm:$0x1] %v423_v10  ;;  %v480_v15 = vsel %vm7499_vm5, 0, %v479_v7  ;;  %v349_v30 = vadd.f32 %v7519_v22, %v310_v21  ;;  %427 = vst [vmem:[#allocation2 + $0xc] sm:$0x1] %v426_v24  ;;  %v323_v34 = vmul.f32 %v7510_v17, %v284_v26  ;;  %v287_v44 = vld [vmem:[%s7486_s10 + $0x88] sm:$0xff] }
  0x16   : > { %6810 = vmatprep.subr.bf16.mxu0 %v7264_v4  ;;  %7239 = vmatprep.subr.bf16.mxu1 %v7264_v4  ;;  %481 = vst [vmem:[#allocation2 + $0x8] sm:$0xf] %v480_v15  ;;  %v7512_v18 = vrot.slane %v1141_v12, 5  ;;  %v1147_v19 = vrot.slane %v1145_v13, 4  ;;  %v446_v32 = vld [vmem:[#allocation2 + $0x60] sm:$0x1]  ;;  %v363_v42 = vadd.f32 %v7519_v22, %v324_v35  ;;  %v325_v49 = vmul.f32 %v7510_v17, %v286_v43  ;;  %vm7566_vm10 = vmor %vm420_vm2, %vm629_vm8 }
  0x17   : > { %v503_v33 = vld [vmem:[#allocation2 + $0x68] sm:$0xf]  ;;  %484 = vst [vmem:[#allocation2 + $0x14] sm:$0xf] %v483_v31  ;;  %v447_v36 = vsel %vm7489_vm4, 0, %v446_v32  ;;  %v380_v39 = vmax.f32 %v348_v29, 0.0  ;;  %v362_v41 = vadd.f32 %v7519_v22, %v323_v34  ;;  %v326_v50 = vmul.f32 %v7510_v17, %v287_v44  ;;  %vm7976_vm13 = vmor %vm2158_vm11, %vm2159_vm12 }
  0x18   : > { %v504_v37 = vsel %vm7499_vm5, 0, %v503_v33  ;;  %v1148_v38 = vor.u32 %v1147_v19, %v7512_v18  ;;  %v381_v40 = vmax.f32 %v349_v30, 0.0  ;;  %448 = vst [vmem:[#allocation2 + $0x60] sm:$0x1] %v447_v36  ;;  %v7267_v45 = vld [vmem:[%s10176_s3 + $0x48] sm:$0xff]   ;;  %v395_v55 = vmax.f32 %v363_v42, 0.0 }
  0x19   : > { %6811 = vmatpush3.bf16.msra.mxu0 %v7264_v4  ;;  %7247 = vmatpush3.bf16.msra.mxu1 %v7264_v4  ;;  %505 = vst [vmem:[#allocation2 + $0x68] sm:$0xf] %v504_v37  ;;  %v6556_v47 = vpack.c.bf16 %v380_v39, %v380_v39  ;;  %v394_v54 = vmax.f32 %v362_v41, 0.0  ;;  %v7268_v5 = vld [vmem:[%s10176_s3 + $0x40] sm:$0xff]   ;;  %v364_v12 = vadd.f32 %v7519_v22, %v325_v49  ;;  %v10194_v15 = vmov 0  ;;  %v7582_v36 = vld [vmem:[%s10176_s3 + $0x38] sm:$0xff]  }
  0x1a   : > { %6812 = vmatprep.subr.bf16.mxu0 %v7265_v9  ;;  %7240 = vmatprep.subr.bf16.mxu1 %v7265_v9  ;;  %v6557_v48 = vpack.c.bf16 %v381_v40, %v381_v40  ;;  %v1149_v56 = vrot.slane %v1148_v38, 4  ;;  %v6571_v4 = vpack.c.bf16 %v395_v55, %v395_v55  ;;  %v365_v13 = vadd.f32 %v7519_v22, %v326_v50  ;;  %v449_v26 = vld [vmem:[#allocation2 + $0x6c] sm:$0x1]  ;;  %v506_v31 = vld [vmem:[#allocation2 + $0x74] sm:$0xf]  ;;  %v7588_v43 = vld [vmem:[%s10176_s3 + $0xb8] sm:$0xff]  }
  0x1b   : > { %v632_v58 = vshrl.u32 %v6556_v47, 16  ;;  %v635_v59 = vshll.u32 %v6556_v47, 16  ;;  %v6570_v3 = vpack.c.bf16 %v394_v54, %v394_v54  ;;  %v10195_v15 = vsel %vm7566_vm10, 4294967295, %v10194_v15  ;;  %v272_v38 = vld [vmem:[%s7486_s10 + $0x10] sm:$0xff]  ;;  %v273_v44 = vld [vmem:[%s7486_s10 + $0x18] sm:$0xff] }
  0x1c   : > { %v1064_v46 = vld [vmem:[#allocation2] sm:$0xf]  ;;  %v640_v63 = vshrl.u32 %v6557_v48, 16  ;;  %v643_v0 = vshll.u32 %v6557_v48, 16  ;;  %10196 = vst [vmem:[#allocation3_spill] sm:$0xff] %v10195_v15  ;;  %v759_v29 = vshrl.u32 %v6571_v4, 16  ;;  %v311_v54 = vmul.f32 %v7510_v17, %v272_v38 }
  0x1d   : > { %6813 = vmatpush3.bf16.msra.mxu0 %v7265_v9  ;;  %7248 = vmatpush3.bf16.msra.mxu1 %v7265_v9  ;;  %v7548_v51 = vld [vmem:[#allocation2 + $0x8] sm:$0x1]  ;;  %v1132_v52 = vshrl.u32 %v1064_v46, 16  ;;  %v1135_v53 = vshll.u32 %v1064_v46, 16  ;;  %v634_v2 = vrot.slane %v632_v58, 7  ;;  %v751_v20 = vshrl.u32 %v6570_v3, 16 }
  0x1e   : > { %6814 = vmatprep.subr.bf16.mxu0 %v7266_v28  ;;  %7241 = vmatprep.subr.bf16.mxu1 %v7266_v28  ;;  %v1151_v57 = vshll.u32 %v7548_v51, 16  ;;  %v642_v8 = vrot.slane %v640_v63, 7  ;;  %v952_v9 = vld [vmem:[#allocation2 + $0xc] sm:$0xf]  ;;  %v956_v10 = vld [vmem:[#allocation2 + $0x14] sm:$0x1]  ;;  %v350_v63 = vadd.f32 %v7519_v22, %v311_v54 }
  0x1f   : > { %v1134_v61 = vrot.slane %v1132_v52, 4  ;;  %v1137_v62 = vrot.slane %v1135_v53, 5  ;;  %v637_v16 = vor.u32 %v635_v59, %v634_v2  ;;  %v638_v19 = vrot.slane %v634_v2, 4  ;;  %v1001_v35 = vld [vmem:[#allocation2 + $0x60] sm:$0xf] }
  0x20   : > { %v1153_v1 = vrot.slane %v1151_v57, 5  ;;  %v645_v23 = vor.u32 %v643_v0, %v642_v8  ;;  %v647_v24 = vrot.slane %v642_v8, 4  ;;  %v754_v25 = vshll.u32 %v6570_v3, 16  ;;  %v1005_v42 = vld [vmem:[#allocation2 + $0x68] sm:$0x1] }
  0x21   : > { %6815 = vmatpush3.bf16.msra.mxu0 %v7266_v28  ;;  %7249 = vmatpush3.bf16.msra.mxu1 %v7266_v28  ;;  %v1138_v7 = vor.u32 %v1137_v62, %v1134_v61  ;;  %v953_v27 = vsel %vm7499_vm5, %v637_v16, %v952_v9  ;;  %v753_v28 = vrot.slane %v751_v20, 7  ;;  %v762_v30 = vshll.u32 %v6571_v4, 16  ;;  %v428_v49 = vld [vmem:[#allocation2 + $0x18] sm:$0x1]  ;;  %v485_v55 = vld [vmem:[#allocation2 + $0x20] sm:$0xf] }
  0x22   : > { %6816 = vmatprep.subr.bf16.mxu0 %v7267_v45  ;;  %7242 = vmatprep.subr.bf16.mxu1 %v7267_v45  ;;  %v1154_v14 = vsel %vm7553_vm9, %v1149_v56, %v1153_v1  ;;  %v646_v33 = vsel %vm7566_vm10, %v638_v19, %v645_v23  ;;  %954 = vst [vmem:[#allocation2 + $0xc] sm:$0xf] %v953_v27  ;;  %v396_v37 = vmax.f32 %v364_v12, 0.0  ;;  %v761_v41 = vrot.slane %v759_v29, 7  ;;  %v274_v1 = vld [vmem:[%s7486_s10 + $0x20] sm:$0xff] }
  0x23   : > { %v1139_v21 = vrot.slane %v1138_v7, 4  ;;  %v957_v34 = vsel %vm7489_vm4, %v647_v24, %v956_v10  ;;  %955 = vst [vmem:[#allocation2 + $0x10] sm:$0xf] %v646_v33  ;;  %v757_v40 = vrot.slane %v753_v28, 4  ;;  %v450_v46 = vsel %vm7489_vm4, 0, %v449_v26 }
  0x24   : > { %958 = vst [vmem:[#allocation2 + $0x14] sm:$0x1] %v957_v34  ;;  %v507_v47 = vsel %vm7499_vm5, 0, %v506_v31  ;;  %v6572_v48 = vpack.c.bf16 %v396_v37, %v396_v37  ;;  %v764_v50 = vor.u32 %v762_v30, %v761_v41  ;;  %v766_v52 = vrot.slane %v761_v41, 4  ;;  %451 = vst [vmem:[#allocation2 + $0x6c] sm:$0x1] %v450_v46 }
  0x25   : > { %6817 = vmatpush3.bf16.msra.mxu0 %v7267_v45  ;;  %7250 = vmatpush3.bf16.msra.mxu1 %v7267_v45  ;;  %v1144_v32 = vsel %vm7553_vm9, %v1139_v21, %v7512_v18  ;;  %v756_v18 = vor.u32 %v754_v25, %v753_v28  ;;  %v397_v45 = vmax.f32 %v365_v13, 0.0  ;;  %508 = vst [vmem:[#allocation2 + $0x74] sm:$0xf] %v507_v47  ;;  %v429_v0 = vsel %vm7489_vm4, 0, %v428_v49  ;;  %v288_v41 = vld [vmem:[%s7486_s10 + $0x90] sm:$0xff] }
  0x26   : > { %6818 = vmatprep.subr.bf16.mxu0 %v7268_v5  ;;  %7243 = vmatprep.subr.bf16.mxu1 %v7268_v5  ;;  %v6176_v39 = vcombine.low %v1144_v32, %v1154_v14  ;;  %v768_v57 = vshrl.u32 %v6572_v48, 16  ;;  %v771_v58 = vshll.u32 %v6572_v48, 16  ;;  %v312_v59 = vmul.f32 %v7510_v17, %v273_v44  ;;  %430 = vst [vmem:[#allocation2 + $0x18] sm:$0x1] %v429_v0 }
  0x27   : > { %v1002_v53 = vsel %vm7499_vm5, %v756_v18, %v1001_v35  ;;  %v6573_v56 = vpack.c.bf16 %v397_v45, %v397_v45  ;;  %v765_v61 = vsel %vm7566_vm10, %v757_v40, %v764_v50  ;;  %v1006_v62 = vsel %vm7489_vm4, %v766_v52, %v1005_v42 }
  0x28   : > { %6820 = vmatprep.mubr.bf16.mxu0 %v6176_v39  ;;  %1003 = vst [vmem:[#allocation2 + $0x60] sm:$0xf] %v1002_v53  ;;  %v2166_v2 = vrot.slane %v7548_v51, 5  ;;  %1004 = vst [vmem:[#allocation2 + $0x64] sm:$0xf] %v765_v61  ;;  %v770_v3 = vrot.slane %v768_v57, 7  ;;  %v351_v9 = vadd.f32 %v7519_v22, %v312_v59  ;;  %v313_v21 = vmul.f32 %v7510_v17, %v274_v1 }
  0x29   : > { %6819 = vmatpush3.bf16.msra.mxu0 %v7268_v5  ;;  %7251 = vmatpush3.bf16.msra.mxu1 %v7268_v5  ;;  %1007 = vst [vmem:[#allocation2 + $0x68] sm:$0x1] %v1006_v62  ;;  %v776_v4 = vshrl.u32 %v6573_v56, 16  ;;  %v275_v5 = vld [vmem:[%s7486_s10 + $0x28] sm:$0xff]  ;;  %v779_v8 = vshll.u32 %v6573_v56, 16  ;;  %v382_v10 = vmax.f32 %v350_v63, 0.0 }
  0x2a   : > { %6852 = vmatprep.subr.bf16.mxu1 %v7582_v36  ;;  %6900 = vmatprep.subr.bf16.mxu0 %v7588_v43  ;;  %v1066_v7 = vld [vmem:[#allocation2 + $0xc] sm:$0xf]  ;;  %v486_v12 = vsel %vm7499_vm5, 0, %v485_v55  ;;  %v1067_v13 = vld [vmem:[#allocation2 + $0x10] sm:$0xf]  ;;  %v773_v20 = vor.u32 %v771_v58, %v770_v3  ;;  %v314_v26 = vmul.f32 %v7510_v17, %v275_v5  ;;  %v774_v29 = vrot.slane %v770_v3, 4 }
  0x2b   : > { %v1113_v14 = vld [vmem:[#allocation2 + $0x14] sm:$0x1]  ;;  %v1156_v16 = vshrl.u32 %v1066_v7, 16  ;;  %v1159_v19 = vshll.u32 %v1066_v7, 16  ;;  %487 = vst [vmem:[#allocation2 + $0x20] sm:$0xf] %v486_v12  ;;  %v6558_v48 = vpack.c.bf16 %v382_v10, %v382_v10  ;;  %v7620_v58 = vmul.f32 %v7510_v17, %v288_v41 }
  0x2c   : > { %v1165_v23 = vshll.u32 %v1067_v13, 16  ;;  %v1169_v24 = vshrl.u32 %v1067_v13, 16  ;;  %v1175_v25 = vshll.u32 %v1113_v14, 16  ;;  %v778_v30 = vrot.slane %v776_v4, 7  ;;  %v1008_v31 = vld [vmem:[#allocation2 + $0x6c] sm:$0xf] }
  0x2d   : > { %v1158_v27 = vrot.slane %v1156_v16, 4  ;;  %v1161_v28 = vrot.slane %v1159_v19, 5  ;;  %v1009_v37 = vsel %vm7499_vm5, %v773_v20, %v1008_v31  ;;  %v383_v47 = vmax.f32 %v351_v9, 0.0  ;;  %v1012_v54 = vld [vmem:[#allocation2 + $0x74] sm:$0x1] }
  0x2e   : > { %v1167_v32 = vrot.slane %v1165_v23, 5  ;;  %v1171_v33 = vrot.slane %v1169_v24, 4  ;;  %v1177_v34 = vrot.slane %v1175_v25, 5  ;;  %v781_v40 = vor.u32 %v779_v8, %v778_v30  ;;  %1010 = vst [vmem:[#allocation2 + $0x6c] sm:$0xf] %v1009_v37  ;;  %v7272_v8 = vld [vmem:[%s10176_s3 + $0xb0] sm:$0xff]  }
  0x2f   : > { %v1080_v35 = vld [vmem:[#allocation2 + $0x60] sm:$0xf]  ;;  %v1162_v38 = vor.u32 %v1161_v28, %v1158_v27  ;;  %v1081_v44 = vld [vmem:[#allocation2 + $0x64] sm:$0xf]  ;;  %v783_v46 = vrot.slane %v778_v30, 4  ;;  %v6559_v9 = vpack.c.bf16 %v383_v47, %v383_v47  ;;  %v649_v10 = vshrl.u32 %v6558_v48, 16 }
  0x30   : > { %v1324_v39 = vshrl.u32 %v1080_v35, 16  ;;  %v1327_v18 = vshll.u32 %v1080_v35, 16  ;;  %v1172_v42 = vor.u32 %v1171_v33, %v1167_v32  ;;  %v1120_v45 = vld [vmem:[#allocation2 + $0x68] sm:$0x1]  ;;  %v1333_v53 = vshll.u32 %v1081_v44, 16  ;;  %v289_v47 = vld [vmem:[%s7486_s10 + $0x98] sm:$0xff] }
  0x31   : > { %v1163_v49 = vrot.slane %v1162_v38, 4  ;;  %v1337_v56 = vshrl.u32 %v1081_v44, 16  ;;  %v1343_v57 = vshll.u32 %v1120_v45, 16  ;;  %v782_v63 = vsel %vm7566_vm10, %v774_v29, %v781_v40  ;;  %v431_v20 = vld [vmem:[#allocation2 + $0x24] sm:$0x1]  ;;  %v7274_v38 = vld [vmem:[%s10176_s3 + $0xa8] sm:$0xff]  }
  0x32   : > { %v1326_v50 = vrot.slane %v1324_v39, 4  ;;  %v1329_v52 = vrot.slane %v1327_v18, 5  ;;  %v1173_v55 = vrot.slane %v1172_v42, 4  ;;  %v1335_v62 = vrot.slane %v1333_v53, 5  ;;  %1011 = vst [vmem:[#allocation2 + $0x70] sm:$0xf] %v782_v63 }
  0x33   : > { %v1168_v59 = vsel %vm7553_vm9, %v1163_v49, %v1167_v32  ;;  %v1339_v1 = vrot.slane %v1337_v56, 4  ;;  %v1345_v3 = vrot.slane %v1343_v57, 5  ;;  %v1013_v4 = vsel %vm7489_vm4, %v783_v46, %v1012_v54  ;;  %v488_v28 = vld [vmem:[#allocation2 + $0x2c] sm:$0xf]  ;;  %v959_v32 = vld [vmem:[#allocation2 + $0x18] sm:$0xf] }
  0x34   : > { %v1330_v61 = vor.u32 %v1329_v52, %v1326_v50  ;;  %v1178_v0 = vsel %vm7553_vm9, %v1173_v55, %v1177_v34  ;;  %1014 = vst [vmem:[#allocation2 + $0x74] sm:$0x1] %v1013_v4  ;;  %v652_v14 = vshll.u32 %v6558_v48, 16  ;;  %v352_v16 = vadd.f32 %v7519_v22, %v313_v21  ;;  %v963_v37 = vld [vmem:[#allocation2 + $0x20] sm:$0x1] }
  0x35   : > { %v6177_v5 = vcombine.low %v1168_v59, %v1178_v0  ;;  %v1340_v12 = vor.u32 %v1339_v1, %v1335_v62  ;;  %v1082_v13 = vld [vmem:[#allocation2 + $0x6c] sm:$0xf]  ;;  %v353_v19 = vadd.f32 %v7519_v22, %v314_v26  ;;  %v651_v27 = vrot.slane %v649_v10, 7  ;;  %v452_v54 = vld [vmem:[#allocation2 + $0x78] sm:$0x1]  ;;  %v7276_v55 = vld [vmem:[%s10176_s3 + $0xa0] sm:$0xff]  }
  0x36   : > { %v1331_v7 = vrot.slane %v1330_v61, 4  ;;  %v1348_v24 = vshrl.u32 %v1082_v13, 16  ;;  %v1351_v25 = vshll.u32 %v1082_v13, 16  ;;  %v657_v30 = vshrl.u32 %v6559_v9, 16  ;;  %v290_v4 = vld [vmem:[%s7486_s10 + $0xa0] sm:$0xff] }
  0x37   : > { %6821 = vmatmul.mubr.bf16.vlgmr.msra.gmra.mxu0 %v6177_v5  ;;  %v1341_v29 = vrot.slane %v1340_v12, 4  ;;  %v660_v31 = vshll.u32 %v6559_v9, 16  ;;  %v384_v33 = vmax.f32 %v352_v16, 0.0  ;;  %v654_v26 = vor.u32 %v652_v14, %v651_v27 }
  0x38   : > { %v1336_v23 = vsel %vm7553_vm9, %v1331_v7, %v1335_v62  ;;  %6901 = vmatpush3.bf16.msra.mxu0 %v7588_v43  ;;  %v1350_v34 = vrot.slane %v1348_v24, 4  ;;  %v1353_v21 = vrot.slane %v1351_v25, 5  ;;  %v655_v35 = vrot.slane %v651_v27, 4  ;;  %v7278_v24 = vld [vmem:[%s10176_s3 + $0x98] sm:$0xff]  }
  0x39   : > { %6902 = vmatprep.subr.bf16.mxu0 %v7272_v8  ;;  %v1346_v39 = vsel %vm7553_vm9, %v1341_v29, %v1345_v3  ;;  %v659_v18 = vrot.slane %v657_v30, 7  ;;  %v385_v43 = vmax.f32 %v353_v19, 0.0  ;;  %v432_v40 = vsel %vm7489_vm4, 0, %v431_v20  ;;  %v1083_v42 = vld [vmem:[#allocation2 + $0x70] sm:$0xf]  ;;  %v291_v30 = vld [vmem:[%s7486_s10 + $0xa8] sm:$0xff] }
  0x3a   : > { %v6184_v41 = vcombine.low %v1336_v23, %v1346_v39  ;;  %v1354_v44 = vor.u32 %v1353_v21, %v1350_v34  ;;  %v960_v45 = vsel %vm7499_vm5, %v654_v26, %v959_v32  ;;  %433 = vst [vmem:[#allocation2 + $0x24] sm:$0x1] %v432_v40  ;;  %v489_v46 = vsel %vm7499_vm5, 0, %v488_v28  ;;  %v509_v3 = vld [vmem:[#allocation2 + $0x80] sm:$0xf] }
  0x3b   : > { %v1121_v48 = vld [vmem:[#allocation2 + $0x74] sm:$0x1]  ;;  %v1357_v49 = vshll.u32 %v1083_v42, 16  ;;  %v1361_v50 = vshrl.u32 %v1083_v42, 16  ;;  %v662_v52 = vor.u32 %v660_v31, %v659_v18  ;;  %v664_v53 = vrot.slane %v659_v18, 4 }
  0x3c   : > { %6903 = vmatpush3.bf16.msra.mxu0 %v7272_v8  ;;  %961 = vst [vmem:[#allocation2 + $0x18] sm:$0xf] %v960_v45  ;;  %490 = vst [vmem:[#allocation2 + $0x2c] sm:$0xf] %v489_v46  ;;  %6836 = vmatprep.mubr.bf16.mxu1 %v6184_v41  ;;  %v1355_v56 = vrot.slane %v1354_v44, 4  ;;  %v1367_v57 = vshll.u32 %v1121_v48, 16  ;;  %v6560_v59 = vpack.c.bf16 %v384_v33, %v384_v33 }
  0x3d   : > { %v6561_v61 = vpack.c.bf16 %v385_v43, %v385_v43  ;;  %6904 = vmatprep.subr.bf16.mxu0 %v7274_v38  ;;  %v1359_v62 = vrot.slane %v1357_v49, 5  ;;  %v1363_v63 = vrot.slane %v1361_v50, 4  ;;  %v663_v0 = vsel %vm7566_vm10, %v655_v35, %v662_v52  ;;  %v7271_v43 = vld [vmem:[%s10176_s3 + $0x30] sm:$0xff]  }
  0x3e   : > { %v964_v1 = vsel %vm7489_vm4, %v664_v53, %v963_v37  ;;  %v1369_v5 = vrot.slane %v1367_v57, 5  ;;  %962 = vst [vmem:[#allocation2 + $0x1c] sm:$0xf] %v663_v0  ;;  %v666_v7 = vshrl.u32 %v6560_v59, 16  ;;  %v669_v8 = vshll.u32 %v6560_v59, 16  ;;  %v7280_v44 = vld [vmem:[%s10176_s3 + $0x90] sm:$0xff]  }
  0x3f   : > { %965 = vst [vmem:[#allocation2 + $0x20] sm:$0x1] %v964_v1  ;;  %v674_v9 = vshrl.u32 %v6561_v61, 16  ;;  %v1360_v10 = vsel %vm7553_vm9, %v1355_v56, %v1359_v62  ;;  %v1364_v12 = vor.u32 %v1363_v63, %v1359_v62  ;;  %v677_v13 = vshll.u32 %v6561_v61, 16  ;;  %v455_v62 = vld [vmem:[#allocation2 + $0x84] sm:$0x1] }
  0x40   : > { %v328_v14 = vmul.f32 %v7510_v17, %v289_v47  ;;  %6905 = vmatpush3.bf16.msra.mxu0 %v7274_v38  ;;  %v668_v16 = vrot.slane %v666_v7, 7  ;;  %v366_v20 = vadd.f32 %v7519_v22, %v7620_v58  ;;  %v453_v23 = vsel %vm7489_vm4, 0, %v452_v54 }
  0x41   : > { %v676_v19 = vrot.slane %v674_v9, 7  ;;  %6906 = vmatprep.subr.bf16.mxu0 %v7276_v55  ;;  %v1365_v25 = vrot.slane %v1364_v12, 4  ;;  %v966_v27 = vld [vmem:[#allocation2 + $0x24] sm:$0xf]  ;;  %454 = vst [vmem:[#allocation2 + $0x78] sm:$0x1] %v453_v23  ;;  %v329_v31 = vmul.f32 %v7510_v17, %v290_v4  ;;  %v330_v50 = vmul.f32 %v7510_v17, %v291_v30 }
  0x42   : > { %v367_v28 = vadd.f32 %v7519_v22, %v328_v14  ;;  %v510_v29 = vsel %vm7499_vm5, 0, %v509_v3  ;;  %v671_v32 = vor.u32 %v669_v8, %v668_v16  ;;  %v672_v33 = vrot.slane %v668_v16, 4  ;;  %v7273_v4 = vld [vmem:[%s10176_s3 + $0x28] sm:$0xff]   ;;  %v276_v9 = vld [vmem:[%s7486_s10 + $0x30] sm:$0xff] }
  0x43   : > { %v1068_v58 = vld [vmem:[#allocation2 + $0x18] sm:$0xf]  ;;  %v679_v34 = vor.u32 %v677_v13, %v676_v19  ;;  %v681_v21 = vrot.slane %v676_v19, 4  ;;  %v970_v26 = vld [vmem:[#allocation2 + $0x2c] sm:$0x1]  ;;  %v1370_v35 = vsel %vm7553_vm9, %v1365_v25, %v1369_v5  ;;  %v398_v39 = vmax.f32 %v366_v20, 0.0 }
  0x44   : > { %511 = vst [vmem:[#allocation2 + $0x80] sm:$0xf] %v510_v29  ;;  %v1180_v37 = vshrl.u32 %v1068_v58, 16  ;;  %v1183_v38 = vshll.u32 %v1068_v58, 16  ;;  %6907 = vmatpush3.bf16.msra.mxu0 %v7276_v55  ;;  %v6185_v18 = vcombine.low %v1360_v10, %v1370_v35  ;;  %v967_v41 = vsel %vm7499_vm5, %v671_v32, %v966_v27  ;;  %v7282_v10 = vld [vmem:[%s10176_s3 + $0x88] sm:$0xff]   ;;  %v7275_v19 = vld [vmem:[%s10176_s3 + $0x20] sm:$0xff]  }
  0x45   : > { %v680_v40 = vsel %vm7566_vm10, %v672_v33, %v679_v34  ;;  %v971_v42 = vsel %vm7489_vm4, %v681_v21, %v970_v26  ;;  %6908 = vmatprep.subr.bf16.mxu0 %v7278_v24  ;;  %v1069_v45 = vld [vmem:[#allocation2 + $0x1c] sm:$0xf]  ;;  %968 = vst [vmem:[#allocation2 + $0x24] sm:$0xf] %v967_v41  ;;  %v6574_v49 = vpack.c.bf16 %v398_v39, %v398_v39  ;;  %v399_v55 = vmax.f32 %v367_v28, 0.0 }
  0x46   : > { %v1114_v46 = vld [vmem:[#allocation2 + $0x20] sm:$0x1]  ;;  %v1182_v47 = vrot.slane %v1180_v37, 4  ;;  %v1185_v48 = vrot.slane %v1183_v38, 5  ;;  %969 = vst [vmem:[#allocation2 + $0x28] sm:$0xf] %v680_v40  ;;  %6837 = vmatmul.mubr.bf16.vlgmr.msra.gmra.mxu1 %v6185_v18  ;;  %v368_v61 = vadd.f32 %v7519_v22, %v329_v31  ;;  %v369_v7 = vadd.f32 %v7519_v22, %v330_v50 }
  0x47   : > { %972 = vst [vmem:[#allocation2 + $0x2c] sm:$0x1] %v971_v42  ;;  %v1189_v52 = vshll.u32 %v1069_v45, 16  ;;  %v1193_v53 = vshrl.u32 %v1069_v45, 16  ;;  %v1199_v54 = vshll.u32 %v1114_v46, 16  ;;  %6853 = vmatpush3.bf16.msra.mxu1 %v7582_v36  ;;  %v785_v57 = vshrl.u32 %v6574_v49, 16 }
  0x48   : > { %v1186_v56 = vor.u32 %v1185_v48, %v1182_v47  ;;  %v788_v59 = vshll.u32 %v6574_v49, 16  ;;  %6909 = vmatpush3.bf16.msra.mxu0 %v7278_v24  ;;  %6854 = vmatprep.subr.bf16.mxu1 %v7271_v43  ;;  %v6575_v3 = vpack.c.bf16 %v399_v55, %v399_v55  ;;  %v400_v8 = vmax.f32 %v368_v61, 0.0  ;;  %v1015_v25 = vld [vmem:[#allocation2 + $0x78] sm:$0xf]  ;;  %v512_v58 = vld [vmem:[#allocation2 + $0x8c] sm:$0xf] }
  0x49   : > { %v1191_v63 = vrot.slane %v1189_v52, 5  ;;  %v1195_v0 = vrot.slane %v1193_v53, 4  ;;  %v1201_v1 = vrot.slane %v1199_v54, 5  ;;  %6910 = vmatprep.subr.bf16.mxu0 %v7280_v44  ;;  %v787_v36 = vrot.slane %v785_v57, 7  ;;  %v277_v38 = vld [vmem:[%s7486_s10 + $0x38] sm:$0xff]  ;;  %v7284_v48 = vld [vmem:[%s10176_s3 + $0x80] sm:$0xff]  }
  0x4a   : > { %v1187_v5 = vrot.slane %v1186_v56, 4  ;;  %v793_v13 = vshrl.u32 %v6575_v3, 16  ;;  %v796_v14 = vshll.u32 %v6575_v3, 16  ;;  %v456_v16 = vsel %vm7489_vm4, 0, %v455_v62  ;;  %v434_v47 = vld [vmem:[#allocation2 + $0x30] sm:$0x1] }
  0x4b   : > { %v1196_v12 = vor.u32 %v1195_v0, %v1191_v63  ;;  %6855 = vmatpush3.bf16.msra.mxu1 %v7271_v43  ;;  %v790_v23 = vor.u32 %v788_v59, %v787_v36  ;;  %v791_v24 = vrot.slane %v787_v36, 4  ;;  %v401_v27 = vmax.f32 %v369_v7, 0.0  ;;  %457 = vst [vmem:[#allocation2 + $0x84] sm:$0x1] %v456_v16  ;;  %v1019_v41 = vld [vmem:[#allocation2 + $0x80] sm:$0x1] }
  0x4c   : > { %v1192_v20 = vsel %vm7553_vm9, %v1187_v5, %v1191_v63  ;;  %6911 = vmatpush3.bf16.msra.mxu0 %v7280_v44  ;;  %v1070_v29 = vld [vmem:[#allocation2 + $0x24] sm:$0xf]  ;;  %v795_v31 = vrot.slane %v793_v13, 7  ;;  %6856 = vmatprep.subr.bf16.mxu1 %v7273_v4  ;;  %v7705_v32 = vpack.c.bf16 %v400_v8, %v400_v8  ;;  %v315_v33 = vmul.f32 %v7510_v17, %v276_v9  ;;  %v7277_v54 = vld [vmem:[%s10176_s3 + $0x18] sm:$0xff]   ;;  %v7279_v16 = vld [vmem:[%s10176_s3 + $0x10] sm:$0xff]  }
  0x4d   : > { %v1197_v28 = vrot.slane %v1196_v12, 4  ;;  %v1071_v30 = vld [vmem:[#allocation2 + $0x28] sm:$0xf]  ;;  %6912 = vmatprep.subr.bf16.mxu0 %v7282_v10  ;;  %v1204_v21 = vshrl.u32 %v1070_v29, 16  ;;  %v1207_v26 = vshll.u32 %v1070_v29, 16  ;;  %v1016_v53 = vsel %vm7499_vm5, %v790_v23, %v1015_v25  ;;  %v278_v7 = vld [vmem:[%s7486_s10 + $0x40] sm:$0xff] }
  0x4e   : > { %v1115_v34 = vld [vmem:[#allocation2 + $0x2c] sm:$0x1]  ;;  %v1213_v35 = vshll.u32 %v1071_v30, 16  ;;  %v1217_v37 = vshrl.u32 %v1071_v30, 16  ;;  %v798_v43 = vor.u32 %v796_v14, %v795_v31  ;;  %v800_v40 = vrot.slane %v795_v31, 4  ;;  %v7288_v8 = vld [vmem:[%s10176_s3 + $0x138] sm:$0xff]  }
  0x4f   : > { %v1202_v39 = vsel %vm7553_vm9, %v1197_v28, %v1201_v1  ;;  %v1223_v18 = vshll.u32 %v1115_v34, 16  ;;  %v1206_v44 = vrot.slane %v1204_v21, 4  ;;  %v1209_v45 = vrot.slane %v1207_v26, 5  ;;  %6857 = vmatpush3.bf16.msra.mxu1 %v7273_v4  ;;  %1017 = vst [vmem:[#allocation2 + $0x78] sm:$0xf] %v1016_v53  ;;  %v279_v25 = vld [vmem:[%s7486_s10 + $0x48] sm:$0xff] }
  0x50   : > { %v6178_v42 = vcombine.low %v1192_v20, %v1202_v39  ;;  %v1215_v46 = vrot.slane %v1213_v35, 5  ;;  %6913 = vmatpush3.bf16.msra.mxu0 %v7282_v10  ;;  %v1219_v49 = vrot.slane %v1217_v37, 4  ;;  %v799_v52 = vsel %vm7566_vm10, %v791_v24, %v798_v43  ;;  %6858 = vmatprep.subr.bf16.mxu1 %v7275_v19  ;;  %v491_v1 = vld [vmem:[#allocation2 + $0x38] sm:$0xf]  ;;  %v7281_v39 = vld [vmem:[%s10176_s3 + $0x8] sm:$0xff]  }
  0x51   : > { %v1225_v50 = vrot.slane %v1223_v18, 5  ;;  %v1210_v55 = vor.u32 %v1209_v45, %v1206_v44  ;;  %1018 = vst [vmem:[#allocation2 + $0x7c] sm:$0xf] %v799_v52  ;;  %v1020_v56 = vsel %vm7489_vm4, %v800_v40, %v1019_v41  ;;  %v513_v57 = vsel %vm7499_vm5, 0, %v512_v58  ;;  %6914 = vmatprep.subr.bf16.mxu0 %v7284_v48 }
  0x52   : > { %6824 = vmatprep.mubr.bf16.mxu0 %v6178_v42  ;;  %v6577_v59 = vpack.c.bf16 %v401_v27, %v401_v27  ;;  %v1220_v61 = vor.u32 %v1219_v49, %v1215_v46  ;;  %1021 = vst [vmem:[#allocation2 + $0x80] sm:$0x1] %v1020_v56  ;;  %514 = vst [vmem:[#allocation2 + $0x8c] sm:$0xf] %v513_v57  ;;  %v802_v62 = vshrl.u32 %v7705_v32, 16  ;;  %v805_v63 = vshll.u32 %v7705_v32, 16 }
  0x53   : > { %v316_v0 = vmul.f32 %v7510_v17, %v277_v38  ;;  %v1211_v3 = vrot.slane %v1210_v55, 4  ;;  %6859 = vmatpush3.bf16.msra.mxu1 %v7275_v19  ;;  %v354_v36 = vadd.f32 %v7519_v22, %v315_v33  ;;  %v1022_v12 = vld [vmem:[#allocation2 + $0x84] sm:$0xf]  ;;  %v435_v14 = vsel %vm7489_vm4, 0, %v434_v47 }
  0x54   : > { %v810_v4 = vshrl.u32 %v6577_v59, 16  ;;  %v813_v5 = vshll.u32 %v6577_v59, 16  ;;  %6915 = vmatpush3.bf16.msra.mxu0 %v7284_v48  ;;  %v1221_v9 = vrot.slane %v1220_v61, 4  ;;  %v804_v10 = vrot.slane %v802_v62, 7  ;;  %6860 = vmatprep.subr.bf16.mxu1 %v7277_v54  ;;  %436 = vst [vmem:[#allocation2 + $0x30] sm:$0x1] %v435_v14 }
  0x55   : > { %v355_v13 = vadd.f32 %v7519_v22, %v316_v0  ;;  %v1216_v19 = vsel %vm7553_vm9, %v1211_v3, %v1215_v46  ;;  %v386_v23 = vmax.f32 %v354_v36, 0.0  ;;  %v492_v24 = vsel %vm7499_vm5, 0, %v491_v1  ;;  %6996 = vmatprep.subr.bf16.mxu0 %v7288_v8  ;;  %v7283_v61 = vld [vmem:[%s10176_s3] sm:$0xff]  }
  0x56   : > { %v812_v20 = vrot.slane %v810_v4, 7  ;;  %v1226_v27 = vsel %vm7553_vm9, %v1221_v9, %v1225_v50  ;;  %v807_v28 = vor.u32 %v805_v63, %v804_v10  ;;  %v808_v29 = vrot.slane %v804_v10, 4  ;;  %493 = vst [vmem:[#allocation2 + $0x38] sm:$0xf] %v492_v24  ;;  %v1084_v34 = vld [vmem:[#allocation2 + $0x78] sm:$0xf] }
  0x57   : > { %v387_v30 = vmax.f32 %v355_v13, 0.0  ;;  %v6179_v31 = vcombine.low %v1216_v19, %v1226_v27  ;;  %v6562_v33 = vpack.c.bf16 %v386_v23, %v386_v23  ;;  %6861 = vmatpush3.bf16.msra.mxu1 %v7277_v54  ;;  %v317_v37 = vmul.f32 %v7510_v17, %v278_v7  ;;  %v494_v4 = vld [vmem:[#allocation2 + $0x44] sm:$0xf]  ;;  %v7764_v8 = vld [vmem:[%s10174_s1] ss:$0 sm:$0xff]  ;;  %v293_v19 = vld [vmem:[%s7486_s10 + $0xb8] sm:$0xff] }
  0x58   : > { %v815_v58 = vor.u32 %v813_v5, %v812_v20  ;;  %v817_v32 = vrot.slane %v812_v20, 4  ;;  %v1085_v21 = vld [vmem:[#allocation2 + $0x7c] sm:$0xf]  ;;  %v1023_v26 = vsel %vm7499_vm5, %v807_v28, %v1022_v12  ;;  %v318_v38 = vmul.f32 %v7510_v17, %v279_v25  ;;  %6862 = vmatprep.subr.bf16.mxu1 %v7279_v16 }
  0x59   : > { %v6563_v35 = vpack.c.bf16 %v387_v30, %v387_v30  ;;  %6825 = vmatmul.mubr.bf16.gmra.mxu0 %v6179_v31  ;;  %v1122_v18 = vld [vmem:[#allocation2 + $0x80] sm:$0x1]  ;;  %v1372_v43 = vshrl.u32 %v1084_v34, 16  ;;  %v1375_v40 = vshll.u32 %v1084_v34, 16  ;;  %v1381_v41 = vshll.u32 %v1085_v21, 16 }
  0x5a   : > { %v1385_v42 = vshrl.u32 %v1085_v21, 16  ;;  %1024 = vst [vmem:[#allocation2 + $0x84] sm:$0xf] %v1023_v26  ;;  %v1391_v44 = vshll.u32 %v1122_v18, 16  ;;  %v816_v45 = vsel %vm7566_vm10, %v808_v29, %v815_v58  ;;  %v1026_v46 = vld [vmem:[#allocation2 + $0x8c] sm:$0x1]  ;;  %v356_v3 = vadd.f32 %v7519_v22, %v317_v37 }
  0x5b   : > { %v683_v47 = vshrl.u32 %v6562_v33, 16  ;;  %v686_v48 = vshll.u32 %v6562_v33, 16  ;;  %v437_v17 = vld [vmem:[#allocation2 + $0x3c] sm:$0x1]  ;;  %v1374_v49 = vrot.slane %v1372_v43, 4  ;;  %v1377_v50 = vrot.slane %v1375_v40, 5  ;;  %6863 = vmatpush3.bf16.msra.mxu1 %v7279_v16 }
  0x5c   : > { %v1383_v52 = vrot.slane %v1381_v41, 5  ;;  %v1387_v53 = vrot.slane %v1385_v42, 4  ;;  %1025 = vst [vmem:[#allocation2 + $0x88] sm:$0xf] %v816_v45  ;;  %v1393_v54 = vrot.slane %v1391_v44, 5  ;;  %v1027_v55 = vsel %vm7489_vm4, %v817_v32, %v1026_v46  ;;  %6864 = vmatprep.subr.bf16.mxu1 %v7281_v39  ;;  %v292_v16 = vld [vmem:[%s7486_s10 + $0xb0] sm:$0xff] }
  0x5d   : > { %v685_v56 = vrot.slane %v683_v47, 7  ;;  %v691_v57 = vshrl.u32 %v6563_v35, 16  ;;  %v973_v59 = vld [vmem:[#allocation2 + $0x30] sm:$0xf]  ;;  %v1378_v62 = vor.u32 %v1377_v50, %v1374_v49  ;;  %1028 = vst [vmem:[#allocation2 + $0x8c] sm:$0x1] %v1027_v55  ;;  %v357_v9 = vadd.f32 %v7764_v8, %v318_v38 }
  0x5e   : > { %v1388_v63 = vor.u32 %v1387_v53, %v1383_v52  ;;  %v694_v0 = vshll.u32 %v6563_v35, 16  ;;  %v977_v1 = vld [vmem:[#allocation2 + $0x38] sm:$0x1]  ;;  %v388_v13 = vmax.f32 %v356_v3, 0.0  ;;  %v438_v14 = vsel %vm7489_vm4, 0, %v437_v17 }
  0x5f   : > { %v688_v5 = vor.u32 %v686_v48, %v685_v56  ;;  %v689_v36 = vrot.slane %v685_v56, 4  ;;  %v693_v7 = vrot.slane %v691_v57, 7  ;;  %v1379_v10 = vrot.slane %v1378_v62, 4  ;;  %6865 = vmatpush3.bf16.msra.mxu1 %v7281_v39  ;;  %v7286_v22 = vld [vmem:[%s10176_s3 + $0xf8] sm:$0xff]   ;;  %439 = vst [vmem:[#allocation2 + $0x3c] sm:$0x1] %v438_v14 }
  0x60   : > { %v1389_v12 = vrot.slane %v1388_v63, 4  ;;  %v389_v27 = vmax.f32 %v357_v9, 0.0  ;;  %6866 = vmatprep.subr.bf16.mxu1 %v7283_v61  ;;  %v495_v21 = vsel %vm7499_vm5, 0, %v494_v4  ;;  %v6564_v18 = vpack.c.bf16 %v388_v13, %v388_v13  ;;  %v7789_v40 = vld [vmem:[%s10173_s0] ss:$0 sm:$0xff] }
  0x61   : > { %v1086_v20 = vld [vmem:[#allocation2 + $0x84] sm:$0xf]  ;;  %v696_v23 = vor.u32 %v694_v0, %v693_v7  ;;  %v698_v24 = vrot.slane %v693_v7, 4  ;;  %v974_v25 = vsel %vm7499_vm5, %v688_v5, %v973_v59  ;;  %v1384_v28 = vsel %vm7553_vm9, %v1379_v10, %v1383_v52  ;;  %496 = vst [vmem:[#allocation2 + $0x44] sm:$0xf] %v495_v21 }
  0x62   : > { %v1394_v29 = vsel %vm7553_vm9, %v1389_v12, %v1393_v54  ;;  %v1396_v30 = vshrl.u32 %v1086_v20, 16  ;;  %v1399_v31 = vshll.u32 %v1086_v20, 16  ;;  %975 = vst [vmem:[#allocation2 + $0x30] sm:$0xf] %v974_v25  ;;  %v6565_v43 = vpack.c.bf16 %v389_v27, %v389_v27  ;;  %v458_v48 = vld [vmem:[#allocation2 + $0x90] sm:$0x1] }
  0x63   : > { %v6186_v58 = vcombine.low %v1384_v28, %v1394_v29  ;;  %v1087_v32 = vld [vmem:[#allocation2 + $0x88] sm:$0xf]  ;;  %v697_v33 = vsel %vm7566_vm10, %v689_v36, %v696_v23  ;;  %v978_v34 = vsel %vm7489_vm4, %v698_v24, %v977_v1  ;;  %6867 = vmatpush3.bf16.msra.mxu1 %v7283_v61  ;;  %v331_v41 = vmul.f32 %v7789_v40, %v292_v16  ;;  %v515_v14 = vld [vmem:[#allocation2 + $0x98] sm:$0xf]  ;;  %v294_v16 = vld [vmem:[%s7486_s10 + $0xc0] sm:$0xff] }
  0x64   : > { %v1398_v26 = vrot.slane %v1396_v30, 4  ;;  %v1401_v35 = vrot.slane %v1399_v31, 5  ;;  %v1405_v37 = vshll.u32 %v1087_v32, 16  ;;  %v1409_v38 = vshrl.u32 %v1087_v32, 16  ;;  %976 = vst [vmem:[#allocation2 + $0x34] sm:$0xf] %v697_v33  ;;  %6948 = vmatprep.subr.bf16.mxu1 %v7286_v22 }
  0x65   : > { %979 = vst [vmem:[#allocation2 + $0x38] sm:$0x1] %v978_v34  ;;  %6840 = vmatprep.mubr.bf16.mxu1 %v6186_v58  ;;  %v1123_v39 = vld [vmem:[#allocation2 + $0x8c] sm:$0x1]  ;;  %v332_v42 = vmul.f32 %v7789_v40, %v293_v19  ;;  %v700_v17 = vshrl.u32 %v6564_v18, 16  ;;  %v703_v49 = vshll.u32 %v6564_v18, 16  ;;  %v370_v56 = vadd.f32 %v7764_v8, %v331_v41 }
  0x66   : > { %v1402_v44 = vor.u32 %v1401_v35, %v1398_v26  ;;  %v1407_v45 = vrot.slane %v1405_v37, 5  ;;  %v1411_v46 = vrot.slane %v1409_v38, 4  ;;  %v1415_v47 = vshll.u32 %v1123_v39, 16  ;;  %v980_v5 = vld [vmem:[#allocation2 + $0x3c] sm:$0xf]  ;;  %v295_v25 = vld [vmem:[%s7486_s10 + $0xc8] sm:$0xff] }
  0x67   : > { %v708_v50 = vshrl.u32 %v6565_v43, 16  ;;  %v711_v52 = vshll.u32 %v6565_v43, 16  ;;  %v702_v59 = vrot.slane %v700_v17, 7  ;;  %v371_v62 = vadd.f32 %v7764_v8, %v332_v42  ;;  %v461_v34 = vld [vmem:[#allocation2 + $0x9c] sm:$0x1] }
  0x68   : > { %v1403_v53 = vrot.slane %v1402_v44, 4  ;;  %v1412_v54 = vor.u32 %v1411_v46, %v1407_v45  ;;  %v1417_v55 = vrot.slane %v1415_v47, 5  ;;  %v459_v63 = vsel %vm7489_vm4, 0, %v458_v48  ;;  %v984_v24 = vld [vmem:[#allocation2 + $0x44] sm:$0x1]  ;;  %v280_v47 = vld [vmem:[%s7486_s10 + $0x50] sm:$0xff] }
  0x69   : > { %v1072_v57 = vld [vmem:[#allocation2 + $0x30] sm:$0xf]  ;;  %v710_v61 = vrot.slane %v708_v50, 7  ;;  %460 = vst [vmem:[#allocation2 + $0x90] sm:$0x1] %v459_v63  ;;  %v705_v9 = vor.u32 %v703_v49, %v702_v59  ;;  %v706_v10 = vrot.slane %v702_v59, 4  ;;  %v333_v43 = vmul.f32 %v7789_v40, %v294_v16 }
  0x6a   : > { %v1408_v0 = vsel %vm7553_vm9, %v1403_v53, %v1407_v45  ;;  %v1413_v1 = vrot.slane %v1412_v54, 4  ;;  %v1228_v3 = vshrl.u32 %v1072_v57, 16  ;;  %v1231_v4 = vshll.u32 %v1072_v57, 16  ;;  %v518_v38 = vld [vmem:[#allocation2 + $0xa4] sm:$0xf] }
  0x6b   : > { %v7799_v36 = vld [vmem:[#allocation2 + $0x34] sm:$0xf]  ;;  %v713_v12 = vor.u32 %v711_v52, %v710_v61  ;;  %v715_v13 = vrot.slane %v710_v61, 4  ;;  %v981_v32 = vsel %vm7499_vm5, %v705_v9, %v980_v5  ;;  %v402_v35 = vmax.f32 %v370_v56, 0.0  ;;  %v281_v52 = vld [vmem:[%s7486_s10 + $0x58] sm:$0xff] }
  0x6c   : > { %v7801_v7 = vld [vmem:[#allocation2 + $0x38] sm:$0x1]  ;;  %v1418_v19 = vsel %vm7553_vm9, %v1413_v1, %v1417_v55  ;;  %v1230_v22 = vrot.slane %v1228_v3, 4  ;;  %v1233_v20 = vrot.slane %v1231_v4, 5  ;;  %v1237_v23 = vshll.u32 %v7799_v36, 16 }
  0x6d   : > { %v6187_v27 = vcombine.low %v1408_v0, %v1418_v19  ;;  %v1241_v28 = vshrl.u32 %v7799_v36, 16  ;;  %v1247_v29 = vshll.u32 %v7801_v7, 16  ;;  %v714_v30 = vsel %vm7566_vm10, %v706_v10, %v713_v12  ;;  %982 = vst [vmem:[#allocation2 + $0x3c] sm:$0xf] %v981_v32 }
  0x6e   : > { %v1234_v31 = vor.u32 %v1233_v20, %v1230_v22  ;;  %v1239_v58 = vrot.slane %v1237_v23, 5  ;;  %983 = vst [vmem:[#allocation2 + $0x40] sm:$0xf] %v714_v30  ;;  %v985_v33 = vsel %vm7489_vm4, %v715_v13, %v984_v24  ;;  %v403_v37 = vmax.f32 %v371_v62, 0.0 }
  0x6f   : > { %6841 = vmatmul.mubr.bf16.gmra.mxu1 %v6187_v27  ;;  %v1243_v21 = vrot.slane %v1241_v28, 4  ;;  %v1249_v26 = vrot.slane %v1247_v29, 5  ;;  %986 = vst [vmem:[#allocation2 + $0x44] sm:$0x1] %v985_v33  ;;  %v516_v18 = vsel %vm7499_vm5, 0, %v515_v14  ;;  %v334_v41 = vmul.f32 %v7789_v40, %v295_v25 }
  0x70   : > { %v1235_v39 = vrot.slane %v1234_v31, 4  ;;  %517 = vst [vmem:[#allocation2 + $0x98] sm:$0xf] %v516_v18  ;;  %v6578_v44 = vpack.c.bf16 %v402_v35, %v402_v35  ;;  %v6579_v45 = vpack.c.bf16 %v403_v37, %v403_v37  ;;  %v462_v46 = vsel %vm7489_vm4, 0, %v461_v34  ;;  %v1029_v23 = vld [vmem:[#allocation2 + $0x90] sm:$0xf] }
  0x71   : > { %v1244_v42 = vor.u32 %v1243_v21, %v1239_v58  ;;  %v372_v17 = vadd.f32 %v7764_v8, %v333_v43  ;;  %v373_v49 = vadd.f32 %v7764_v8, %v334_v41  ;;  %463 = vst [vmem:[#allocation2 + $0x9c] sm:$0x1] %v462_v46  ;;  %v519_v50 = vsel %vm7499_vm5, 0, %v518_v38  ;;  %v440_v33 = vld [vmem:[#allocation2 + $0x48] sm:$0x1] }
  0x72   : > { %v1240_v48 = vsel %vm7553_vm9, %v1235_v39, %v1239_v58  ;;  %v819_v54 = vshrl.u32 %v6578_v44, 16  ;;  %v822_v55 = vshll.u32 %v6578_v44, 16  ;;  %v827_v56 = vshrl.u32 %v6579_v45, 16  ;;  %520 = vst [vmem:[#allocation2 + $0xa4] sm:$0xf] %v519_v50  ;;  %v282_v50 = vld [vmem:[%s7486_s10 + $0x60] sm:$0xff] }
  0x73   : > { %v1245_v53 = vrot.slane %v1244_v42, 4  ;;  %v830_v57 = vshll.u32 %v6579_v45, 16  ;;  %v404_v59 = vmax.f32 %v372_v17, 0.0  ;;  %v405_v61 = vmax.f32 %v373_v49, 0.0  ;;  %v497_v37 = vld [vmem:[#allocation2 + $0x50] sm:$0xf] }
  0x74   : > { %v319_v62 = vmul.f32 %v7789_v40, %v280_v47  ;;  %v821_v1 = vrot.slane %v819_v54, 7  ;;  %v829_v3 = vrot.slane %v827_v56, 7  ;;  %v320_v4 = vmul.f32 %v7789_v40, %v281_v52  ;;  %v7836_v9 = vld [vmem:[#allocation2 + $0x3c] sm:$0xf] }
  0x75   : > { %v1250_v63 = vsel %vm7553_vm9, %v1245_v53, %v1249_v26  ;;  %v7833_v0 = vld [vmem:[#allocation2 + $0x40] sm:$0xf]  ;;  %v6580_v14 = vpack.c.bf16 %v404_v59, %v404_v59  ;;  %v1252_v16 = vshrl.u32 %v7836_v9, 16  ;;  %v1255_v19 = vshll.u32 %v7836_v9, 16 }
  0x76   : > { %v6180_v5 = vcombine.low %v1240_v48, %v1250_v63  ;;  %v7838_v10 = vld [vmem:[#allocation2 + $0x44] sm:$0x1]  ;;  %v1261_v12 = vshll.u32 %v7833_v0, 16  ;;  %v1265_v13 = vshrl.u32 %v7833_v0, 16  ;;  %v824_v20 = vor.u32 %v822_v55, %v821_v1 }
  0x77   : > { %v1271_v22 = vshll.u32 %v7838_v10, 16  ;;  %v825_v27 = vrot.slane %v821_v1, 4  ;;  %v832_v28 = vor.u32 %v830_v57, %v829_v3  ;;  %v1033_v29 = vld [vmem:[#allocation2 + $0x98] sm:$0x1]  ;;  %v1254_v30 = vrot.slane %v1252_v16, 4  ;;  %v283_v57 = vld [vmem:[%s7486_s10 + $0x68] sm:$0xff] }
  0x78   : > { %6828 = vmatprep.mubr.bf16.mxu0 %v6180_v5  ;;  %v1263_v24 = vrot.slane %v1261_v12, 5  ;;  %v1267_v25 = vrot.slane %v1265_v13, 4  ;;  %v1257_v31 = vrot.slane %v1255_v19, 5  ;;  %v834_v32 = vrot.slane %v829_v3, 4  ;;  %v1036_v48 = vld [vmem:[#allocation2 + $0x9c] sm:$0xf] }
  0x79   : > { %v1273_v58 = vrot.slane %v1271_v22, 5  ;;  %v833_v21 = vsel %vm7566_vm10, %v825_v27, %v832_v28  ;;  %v1030_v26 = vsel %vm7499_vm5, %v824_v20, %v1029_v23  ;;  %v6581_v35 = vpack.c.bf16 %v405_v61, %v405_v61  ;;  %v1040_v54 = vld [vmem:[#allocation2 + $0xa4] sm:$0x1] }
  0x7a   : > { %v1268_v34 = vor.u32 %v1267_v25, %v1263_v24  ;;  %v1258_v38 = vor.u32 %v1257_v31, %v1254_v30  ;;  %1031 = vst [vmem:[#allocation2 + $0x90] sm:$0xf] %v1030_v26  ;;  %1032 = vst [vmem:[#allocation2 + $0x94] sm:$0xf] %v833_v21  ;;  %v1034_v39 = vsel %vm7489_vm4, %v834_v32, %v1033_v29  ;;  %v836_v18 = vshrl.u32 %v6580_v14, 16 }
  0x7b   : > { %v839_v43 = vshll.u32 %v6580_v14, 16  ;;  %1035 = vst [vmem:[#allocation2 + $0x98] sm:$0x1] %v1034_v39  ;;  %v844_v42 = vshrl.u32 %v6581_v35, 16  ;;  %v847_v44 = vshll.u32 %v6581_v35, 16  ;;  %v358_v45 = vadd.f32 %v7764_v8, %v319_v62 }
  0x7c   : > { %v1269_v41 = vrot.slane %v1268_v34, 4  ;;  %v1259_v46 = vrot.slane %v1258_v38, 4  ;;  %v838_v47 = vrot.slane %v836_v18, 7  ;;  %v359_v17 = vadd.f32 %v7764_v8, %v320_v4  ;;  %v443_v21 = vld [vmem:[#allocation2 + $0x54] sm:$0x1] }
  0x7d   : > { %v441_v49 = vsel %vm7489_vm4, 0, %v440_v33  ;;  %v846_v53 = vrot.slane %v844_v42, 7  ;;  %v390_v55 = vmax.f32 %v358_v45, 0.0  ;;  %v498_v56 = vsel %vm7499_vm5, 0, %v497_v37 }
  0x7e   : > { %v1274_v52 = vsel %vm7553_vm9, %v1269_v41, %v1273_v58  ;;  %442 = vst [vmem:[#allocation2 + $0x48] sm:$0x1] %v441_v49  ;;  %v1264_v59 = vsel %vm7553_vm9, %v1259_v46, %v1263_v24  ;;  %v841_v61 = vor.u32 %v839_v43, %v838_v47  ;;  %v842_v62 = vrot.slane %v838_v47, 4  ;;  %499 = vst [vmem:[#allocation2 + $0x50] sm:$0xf] %v498_v56 }
  0x7f   : > { %v391_v63 = vmax.f32 %v359_v17, 0.0  ;;  %v6181_v1 = vcombine.low %v1264_v59, %v1274_v52  ;;  %v849_v3 = vor.u32 %v847_v44, %v846_v53  ;;  %v851_v4 = vrot.slane %v846_v53, 4  ;;  %v500_v53 = vld [vmem:[#allocation2 + $0x5c] sm:$0xf] }
  0x80   : > { %v6566_v5 = vpack.c.bf16 %v390_v55, %v390_v55  ;;  %v1037_v12 = vsel %vm7499_vm5, %v841_v61, %v1036_v48  ;;  %v321_v14 = vmul.f32 %v7789_v40, %v282_v50  ;;  %v322_v16 = vmul.f32 %v7789_v40, %v283_v57 }
  0x81   : > { %v6567_v13 = vpack.c.bf16 %v391_v63, %v391_v63  ;;  %6829 = vmatmul.mubr.bf16.gmra.mxu0 %v6181_v1  ;;  %v7867_v19 = vld [vmem:[#allocation2 + $0x90] sm:$0xf]  ;;  %v7869_v22 = vld [vmem:[#allocation2 + $0x94] sm:$0xf]  ;;  %v850_v20 = vsel %vm7566_vm10, %v842_v62, %v849_v3  ;;  %1038 = vst [vmem:[#allocation2 + $0x9c] sm:$0xf] %v1037_v12  ;;  %v1041_v23 = vsel %vm7489_vm4, %v851_v4, %v1040_v54 }
  0x82   : > { %v717_v24 = vshrl.u32 %v6566_v5, 16  ;;  %v720_v25 = vshll.u32 %v6566_v5, 16  ;;  %v7875_v27 = vld [vmem:[#allocation2 + $0x98] sm:$0x1]  ;;  %v1420_v28 = vshrl.u32 %v7867_v19, 16  ;;  %v1423_v29 = vshll.u32 %v7867_v19, 16 }
  0x83   : > { %v1429_v30 = vshll.u32 %v7869_v22, 16  ;;  %v1433_v31 = vshrl.u32 %v7869_v22, 16  ;;  %1039 = vst [vmem:[#allocation2 + $0xa0] sm:$0xf] %v850_v20  ;;  %1042 = vst [vmem:[#allocation2 + $0xa4] sm:$0x1] %v1041_v23  ;;  %v360_v47 = vadd.f32 %v7764_v8, %v321_v14  ;;  %v361_v48 = vadd.f32 %v7764_v8, %v322_v16 }
  0x84   : > { %v1439_v58 = vshll.u32 %v7875_v27, 16  ;;  %v719_v32 = vrot.slane %v717_v24, 7  ;;  %v725_v33 = vshrl.u32 %v6567_v13, 16  ;;  %v728_v34 = vshll.u32 %v6567_v13, 16  ;;  %v296_v16 = vld [vmem:[%s7486_s10 + $0xd0] sm:$0xff] }
  0x85   : > { %v1422_v26 = vrot.slane %v1420_v28, 4  ;;  %v1425_v35 = vrot.slane %v1423_v29, 5  ;;  %v1431_v37 = vrot.slane %v1429_v30, 5  ;;  %v1435_v38 = vrot.slane %v1433_v31, 4  ;;  %v987_v39 = vld [vmem:[#allocation2 + $0x48] sm:$0xf] }
  0x86   : > { %v1441_v18 = vrot.slane %v1439_v58, 5  ;;  %v722_v43 = vor.u32 %v720_v25, %v719_v32  ;;  %v723_v41 = vrot.slane %v719_v32, 4  ;;  %v727_v42 = vrot.slane %v725_v33, 7  ;;  %v991_v46 = vld [vmem:[#allocation2 + $0x50] sm:$0x1]  ;;  %v297_v28 = vld [vmem:[%s7486_s10 + $0xd8] sm:$0xff] }
  0x87   : > { %v1426_v44 = vor.u32 %v1425_v35, %v1422_v26  ;;  %v1436_v45 = vor.u32 %v1435_v38, %v1431_v37  ;;  %v444_v52 = vsel %vm7489_vm4, 0, %v443_v21  ;;  %v392_v57 = vmax.f32 %v360_v47, 0.0 }
  0x88   : > { %v730_v17 = vor.u32 %v728_v34, %v727_v42  ;;  %v732_v49 = vrot.slane %v727_v42, 4  ;;  %v988_v50 = vsel %vm7499_vm5, %v722_v43, %v987_v39  ;;  %v7888_v56 = vld [vmem:[#allocation2 + $0x9c] sm:$0xf]  ;;  %v393_v59 = vmax.f32 %v361_v48, 0.0  ;;  %445 = vst [vmem:[#allocation2 + $0x54] sm:$0x1] %v444_v52 }
  0x89   : > { %v1427_v54 = vrot.slane %v1426_v44, 4  ;;  %v1437_v55 = vrot.slane %v1436_v45, 4  ;;  %989 = vst [vmem:[#allocation2 + $0x48] sm:$0xf] %v988_v50  ;;  %v1444_v63 = vshrl.u32 %v7888_v56, 16  ;;  %v1447_v1 = vshll.u32 %v7888_v56, 16 }
  0x8a   : > { %v7890_v61 = vld [vmem:[#allocation2 + $0xa0] sm:$0xf]  ;;  %v7892_v62 = vld [vmem:[#allocation2 + $0xa4] sm:$0x1]  ;;  %v731_v3 = vsel %vm7566_vm10, %v723_v41, %v730_v17  ;;  %v992_v4 = vsel %vm7489_vm4, %v732_v49, %v991_v46  ;;  %v501_v31 = vsel %vm7499_vm5, 0, %v500_v53  ;;  %v6568_v58 = vpack.c.bf16 %v392_v57, %v392_v57 }
  0x8b   : > { %v1432_v5 = vsel %vm7553_vm9, %v1427_v54, %v1431_v37  ;;  %v1442_v12 = vsel %vm7553_vm9, %v1437_v55, %v1441_v18  ;;  %v1453_v13 = vshll.u32 %v7890_v61, 16  ;;  %v1457_v14 = vshrl.u32 %v7890_v61, 16  ;;  %990 = vst [vmem:[#allocation2 + $0x4c] sm:$0xf] %v731_v3  ;;  %993 = vst [vmem:[#allocation2 + $0x50] sm:$0x1] %v992_v4 }
  0x8c   : > { %v6188_v20 = vcombine.low %v1432_v5, %v1442_v12  ;;  %v1446_v23 = vrot.slane %v1444_v63, 4  ;;  %v1449_v24 = vrot.slane %v1447_v1, 5  ;;  %v1463_v25 = vshll.u32 %v7892_v62, 16  ;;  %502 = vst [vmem:[#allocation2 + $0x5c] sm:$0xf] %v501_v31 }
  0x8d   : > { %v1455_v29 = vrot.slane %v1453_v13, 5  ;;  %v1459_v30 = vrot.slane %v1457_v14, 4  ;;  %v6569_v34 = vpack.c.bf16 %v393_v59, %v393_v59  ;;  %v335_v21 = vmul.f32 %v7789_v40, %v296_v16  ;;  %v464_v54 = vld [vmem:[#allocation2 + $0xa8] sm:$0x1]  ;;  %v521_v13 = vld [vmem:[#allocation2 + $0xb0] sm:$0xf] }
  0x8e   : > { %6844 = vmatprep.mubr.bf16.mxu1 %v6188_v20  ;;  %v1450_v32 = vor.u32 %v1449_v24, %v1446_v23  ;;  %v1465_v33 = vrot.slane %v1463_v25, 5  ;;  %v734_v35 = vshrl.u32 %v6568_v58, 16  ;;  %v737_v37 = vshll.u32 %v6568_v58, 16  ;;  %v298_v14 = vld [vmem:[%s7486_s10 + $0xe0] sm:$0xff] }
  0x8f   : > { %v1460_v26 = vor.u32 %v1459_v30, %v1455_v29  ;;  %v336_v38 = vmul.f32 %v7789_v40, %v297_v28  ;;  %v742_v43 = vshrl.u32 %v6569_v34, 16  ;;  %v745_v41 = vshll.u32 %v6569_v34, 16  ;;  %v994_v1 = vld [vmem:[#allocation2 + $0x54] sm:$0xf] }
  0x90   : > { %v1451_v39 = vrot.slane %v1450_v32, 4  ;;  %v7913_v18 = vld [vmem:[#allocation2 + $0x48] sm:$0xf]  ;;  %v374_v42 = vadd.f32 %v7764_v8, %v335_v21  ;;  %v736_v47 = vrot.slane %v734_v35, 7  ;;  %v467_v28 = vld [vmem:[#allocation2 + $0xb4] sm:$0x1] }
  0x91   : > { %v1461_v44 = vrot.slane %v1460_v26, 4  ;;  %v1276_v45 = vshrl.u32 %v7913_v18, 16  ;;  %v1279_v46 = vshll.u32 %v7913_v18, 16  ;;  %v744_v50 = vrot.slane %v742_v43, 7  ;;  %v299_v32 = vld [vmem:[%s7486_s10 + $0xe8] sm:$0xff] }
  0x92   : > { %v1456_v48 = vsel %vm7553_vm9, %v1451_v39, %v1455_v29  ;;  %v7920_v17 = vld [vmem:[#allocation2 + $0x4c] sm:$0xf]  ;;  %v7922_v49 = vld [vmem:[#allocation2 + $0x50] sm:$0x1]  ;;  %v375_v52 = vadd.f32 %v7764_v8, %v336_v38  ;;  %v406_v53 = vmax.f32 %v374_v42, 0.0  ;;  %v739_v12 = vor.u32 %v737_v37, %v736_v47 }
  0x93   : > { %v1466_v55 = vsel %vm7553_vm9, %v1461_v44, %v1465_v33  ;;  %v1278_v57 = vrot.slane %v1276_v45, 4  ;;  %v1281_v59 = vrot.slane %v1279_v46, 5  ;;  %v1285_v63 = vshll.u32 %v7920_v17, 16  ;;  %v998_v25 = vld [vmem:[#allocation2 + $0x5c] sm:$0x1] }
  0x94   : > { %v6189_v3 = vcombine.low %v1456_v48, %v1466_v55  ;;  %v1289_v4 = vshrl.u32 %v7920_v17, 16  ;;  %v1295_v5 = vshll.u32 %v7922_v49, 16  ;;  %v740_v23 = vrot.slane %v736_v47, 4  ;;  %v524_v45 = vld [vmem:[#allocation2 + $0xbc] sm:$0xf] }
  0x95   : > { %v1282_v16 = vor.u32 %v1281_v59, %v1278_v57  ;;  %v1287_v20 = vrot.slane %v1285_v63, 5  ;;  %v747_v24 = vor.u32 %v745_v41, %v744_v50  ;;  %v749_v31 = vrot.slane %v744_v50, 4 }
  0x96   : > { %6845 = vmatmul.mubr.bf16.gmra.mxu1 %v6189_v3  ;;  %v1291_v29 = vrot.slane %v1289_v4, 4  ;;  %v1297_v30 = vrot.slane %v1295_v5, 5  ;;  %v995_v58 = vsel %vm7499_vm5, %v739_v12, %v994_v1  ;;  %v407_v21 = vmax.f32 %v375_v52, 0.0  ;;  %v7948_v52 = vld [vmem:[#allocation2] sm:$0xe] }
  0x97   : > { %v1283_v33 = vrot.slane %v1282_v16, 4  ;;  %v748_v34 = vsel %vm7566_vm10, %v740_v23, %v747_v24  ;;  %996 = vst [vmem:[#allocation2 + $0x54] sm:$0xf] %v995_v58  ;;  %v465_v26 = vsel %vm7489_vm4, 0, %v464_v54  ;;  %v999_v37 = vsel %vm7489_vm4, %v749_v31, %v998_v25 }
  0x98   : > { %v1292_v35 = vor.u32 %v1291_v29, %v1287_v20  ;;  %997 = vst [vmem:[#allocation2 + $0x58] sm:$0xf] %v748_v34  ;;  %466 = vst [vmem:[#allocation2 + $0xa8] sm:$0x1] %v465_v26  ;;  %v522_v38 = vsel %vm7499_vm5, 0, %v521_v13  ;;  %v6582_v39 = vpack.c.bf16 %v406_v53, %v406_v53  ;;  %v6583_v41 = vpack.c.bf16 %v407_v21, %v407_v21 }
  0x99   : > { %v1288_v43 = vsel %vm7553_vm9, %v1283_v33, %v1287_v20  ;;  %1000 = vst [vmem:[#allocation2 + $0x5c] sm:$0x1] %v999_v37  ;;  %523 = vst [vmem:[#allocation2 + $0xb0] sm:$0xf] %v522_v38  ;;  %v337_v42 = vmul.f32 %v7789_v40, %v298_v14  ;;  %v338_v44 = vmul.f32 %v7789_v40, %v299_v32  ;;  %v468_v50 = vsel %vm7489_vm4, 0, %v467_v28 }
  0x9a   : > { %v1293_v46 = vrot.slane %v1292_v35, 4  ;;  %v853_v47 = vshrl.u32 %v6582_v39, 16  ;;  %v856_v48 = vshll.u32 %v6582_v39, 16  ;;  %v861_v53 = vshrl.u32 %v6583_v41, 16  ;;  %469 = vst [vmem:[#allocation2 + $0xb4] sm:$0x1] %v468_v50 }
  0x9b   : > { %v864_v54 = vshll.u32 %v6583_v41, 16  ;;  %v376_v55 = vadd.f32 %v7764_v8, %v337_v42  ;;  %v377_v57 = vadd.f32 %v7764_v8, %v338_v44  ;;  %v525_v63 = vsel %vm7499_vm5, 0, %v524_v45  ;;  %v2111_v41 = vld [vmem:[#allocation2 + $0xc] sm:$0xe] }
  0x9c   : > { %v1298_v59 = vsel %vm7553_vm9, %v1293_v46, %v1297_v30  ;;  %v855_v40 = vrot.slane %v853_v47, 7  ;;  %v863_v3 = vrot.slane %v861_v53, 7  ;;  %526 = vst [vmem:[#allocation2 + $0xbc] sm:$0xf] %v525_v63  ;;  %v6224_v8 = vrot.slane %v7948_v52, 9 }
  0x9d   : > { %v6182_v1 = vcombine.low %v1288_v43, %v1298_v59  ;;  %v408_v4 = vmax.f32 %v376_v55, 0.0  ;;  %v409_v5 = vmax.f32 %v377_v57, 0.0  ;;  %v6225_v63 = vrot.slane %v2111_v41, 9 }
  0x9e   : > { %v7956_v12 = vld [vmem:[#allocation2 + $0x54] sm:$0xf]  ;;  %v858_v13 = vor.u32 %v856_v48, %v855_v40  ;;  %v859_v14 = vrot.slane %v855_v40, 4  ;;  %v866_v24 = vor.u32 %v864_v54, %v863_v3  ;;  %v868_v25 = vrot.slane %v863_v3, 4  ;;  %v7980_v54 = vld [vmem:[#allocation2 + $0x4] sm:$0xf] }
  0x9f   : > { %6832 = vmatprep.mubr.bf16.mxu0 %v6182_v1  ;;  %v7959_v16 = vld [vmem:[#allocation2 + $0x58] sm:$0xf]  ;;  %v1300_v20 = vshrl.u32 %v7956_v12, 16  ;;  %v1303_v23 = vshll.u32 %v7956_v12, 16  ;;  %v1043_v31 = vld [vmem:[#allocation2 + $0xa8] sm:$0xf]  ;;  %v6584_v58 = vpack.c.bf16 %v408_v4, %v408_v4  ;;  %v6585_v32 = vpack.c.bf16 %v409_v5, %v409_v5 }
  0xa0   : > { %v7963_v28 = vld [vmem:[#allocation2 + $0x5c] sm:$0x1]  ;;  %v1309_v29 = vshll.u32 %v7959_v16, 16  ;;  %v1313_v30 = vshrl.u32 %v7959_v16, 16  ;;  %v867_v26 = vsel %vm7566_vm10, %v859_v14, %v866_v24  ;;  %v1047_v35 = vld [vmem:[#allocation2 + $0xb0] sm:$0x1]  ;;  %v1044_v39 = vsel %vm7499_vm5, %v858_v13, %v1043_v31 }
  0xa1   : > { %v1302_v33 = vrot.slane %v1300_v20, 4  ;;  %v1305_v34 = vrot.slane %v1303_v23, 5  ;;  %v1319_v21 = vshll.u32 %v7963_v28, 16  ;;  %1046 = vst [vmem:[#allocation2 + $0xac] sm:$0xf] %v867_v26  ;;  %v1048_v43 = vsel %vm7489_vm4, %v868_v25, %v1047_v35 }
  0xa2   : > { %v1311_v37 = vrot.slane %v1309_v29, 5  ;;  %v1315_v38 = vrot.slane %v1313_v30, 4  ;;  %1045 = vst [vmem:[#allocation2 + $0xa8] sm:$0xf] %v1044_v39  ;;  %1049 = vst [vmem:[#allocation2 + $0xb0] sm:$0x1] %v1048_v43 }
  0xa3   : > { %v1306_v42 = vor.u32 %v1305_v34, %v1302_v33  ;;  %v1321_v44 = vrot.slane %v1319_v21, 5  ;;  %v870_v45 = vshrl.u32 %v6584_v58, 16  ;;  %v873_v46 = vshll.u32 %v6584_v58, 16  ;;  %v1050_v53 = vld [vmem:[#allocation2 + $0xb4] sm:$0xf] }
  0xa4   : > { %v1316_v48 = vor.u32 %v1315_v38, %v1311_v37  ;;  %v878_v50 = vshrl.u32 %v6585_v32, 16  ;;  %v881_v52 = vshll.u32 %v6585_v32, 16  ;;  %v2163_v55 = vrot.slane %v7980_v54, 5  ;;  %v1054_v40 = vld [vmem:[#allocation2 + $0xbc] sm:$0x1] }
  0xa5   : > { %v1307_v57 = vrot.slane %v1306_v42, 4  ;;  %v872_v59 = vrot.slane %v870_v45, 7  ;;  %v7987_v23 = vld [vmem:[#allocation2 + $0x10] sm:$0xf]  ;;  %v7385_v31 = vld [vmem:[#allocation2 + $0x14] sm:$0x1] }
  0xa6   : > { %v1317_v1 = vrot.slane %v1316_v48, 4  ;;  %v880_v3 = vrot.slane %v878_v50, 7  ;;  %v2164_v4 = vsel %vm7976_vm13, %v6224_v8, %v2163_v55  ;;  %v2165_v5 = vrot.slane %v2163_v55, 4  ;;  %v2112_v26 = vld [vmem:[#allocation2 + $0x18] sm:$0xe] }
  0xa7   : > { %v1312_v13 = vsel %vm7553_vm9, %v1307_v57, %v1311_v37  ;;  %v875_v14 = vor.u32 %v873_v46, %v872_v59  ;;  %v876_v20 = vrot.slane %v872_v59, 4  ;;  %v2170_v24 = vrot.slane %v7987_v23, 5 }
  0xa8   : > { %v1322_v25 = vsel %vm7553_vm9, %v1317_v1, %v1321_v44  ;;  %v883_v29 = vor.u32 %v881_v52, %v880_v3  ;;  %v885_v30 = vrot.slane %v880_v3, 4  ;;  %v2167_v8 = vsel %vm7976_vm13, %v2165_v5, %v2166_v2  ;;  %v7996_v33 = vld [vmem:[#allocation2 + $0xac] sm:$0xf]  ;;  %v2113_v52 = vld [vmem:[#allocation2 + $0x24] sm:$0xe] }
  0xa9   : > { %v2173_v58 = vrot.slane %v7385_v31, 5  ;;  %v6183_v32 = vcombine.low %v1312_v13, %v1322_v25  ;;  %v1051_v34 = vsel %vm7499_vm5, %v875_v14, %v1050_v53  ;;  %v6256_v21 = vcombine.low %v2164_v4, %v2167_v8  ;;  %v8000_v35 = vld [vmem:[#allocation2 + $0xa8] sm:$0xf]  ;;  %v8002_v37 = vld [vmem:[#allocation2 + $0xb0] sm:$0x1] }
  0xaa   : > { %v1477_v38 = vshll.u32 %v7996_v33, 16  ;;  %v1481_v51 = vshrl.u32 %v7996_v33, 16  ;;  %v884_v2 = vsel %vm7566_vm10, %v876_v20, %v883_v29  ;;  %1052 = vst [vmem:[#allocation2 + $0xb4] sm:$0xf] %v1051_v34  ;;  %v1055_v39 = vsel %vm7489_vm4, %v885_v30, %v1054_v40  ;;  %v8017_v1 = vld [vmem:[#allocation2 + $0x1c] sm:$0xf] }
  0xab   : > { %6833 = vmatmul.mubr.bf16.gmra.mxu0 %v6183_v32  ;;  %v1468_v43 = vshrl.u32 %v8000_v35, 16  ;;  %v1471_v41 = vshll.u32 %v8000_v35, 16  ;;  %v1487_v42 = vshll.u32 %v8002_v37, 16  ;;  %1053 = vst [vmem:[#allocation2 + $0xb8] sm:$0xf] %v884_v2  ;;  %v2172_v44 = vrot.slane %v2170_v24, 4 }
  0xac   : > { %1056 = vst [vmem:[#allocation2 + $0xbc] sm:$0x1] %v1055_v39  ;;  %v1479_v45 = vrot.slane %v1477_v38, 5  ;;  %v1483_v46 = vrot.slane %v1481_v51, 4  ;;  %6916 = vmatprep.mubr.bf16.mxu0 %v6256_v21  ;;  %v2171_v48 = vsel %vm7976_vm13, %v6225_v63, %v2170_v24  ;;  %v6226_v50 = vrot.slane %v2112_v26, 9  ;;  %v7292_v51 = vld [vmem:[%s10176_s3 + $0x130] sm:$0xff]  }
  0xad   : > { %v1470_v53 = vrot.slane %v1468_v43, 4  ;;  %v1473_v55 = vrot.slane %v1471_v41, 5  ;;  %v2174_v57 = vsel %vm7976_vm13, %v2172_v44, %v2173_v58  ;;  %v1489_v40 = vrot.slane %v1487_v42, 5  ;;  %v7387_v4 = vld [vmem:[#allocation2 + $0x20] sm:$0x1] }
  0xae   : > { %v1484_v59 = vor.u32 %v1483_v46, %v1479_v45  ;;  %v2177_v3 = vrot.slane %v8017_v1, 5  ;;  %v2180_v5 = vrot.slane %v7387_v4, 5  ;;  %v6257_v14 = vcombine.low %v2171_v48, %v2174_v57  ;;  %v8020_v25 = vld [vmem:[#allocation2 + $0x28] sm:$0xf]  ;;  %v7390_v26 = vld [vmem:[#allocation2 + $0x2c] sm:$0x1] }
  0xaf   : > { %v1474_v13 = vor.u32 %v1473_v55, %v1470_v53  ;;  %v6227_v20 = vrot.slane %v2113_v52, 9  ;;  %v2184_v63 = vrot.slane %v8020_v25, 5  ;;  %v8023_v24 = vld [vmem:[#allocation2 + $0x68] sm:$0x1]  ;;  %v2187_v38 = vrot.slane %v7390_v26, 5  ;;  %v7391_v4 = vld [vmem:[%s10176_s3 + $0x138] sm:$0xff]  }
  0xb0   : > { %v2222_v29 = vrot.slane %v8023_v24, 5  ;;  %v1485_v30 = vrot.slane %v1484_v59, 4  ;;  %v2178_v8 = vsel %vm7976_vm13, %v6226_v50, %v2177_v3  ;;  %v2179_v31 = vrot.slane %v2177_v3, 4  ;;  %v2114_v2 = vld [vmem:[#allocation2 + $0x30] sm:$0xe]  ;;  %v7296_v57 = vld [vmem:[%s10176_s3 + $0x128] sm:$0xff]  }
  0xb1   : > { %v1475_v58 = vrot.slane %v1474_v13, 4  ;;  %v8028_v32 = vld [vmem:[#allocation2 + $0xb4] sm:$0xf]  ;;  %v2185_v34 = vsel %vm7976_vm13, %v6227_v20, %v2184_v63  ;;  %v2186_v21 = vrot.slane %v2184_v63, 4  ;;  %v2115_v48 = vld [vmem:[#allocation2 + $0x3c] sm:$0xe] }
  0xb2   : > { %v1490_v39 = vsel %vm7553_vm9, %v1485_v30, %v1489_v40  ;;  %v8037_v43 = vld [vmem:[#allocation2 + $0xb8] sm:$0xf]  ;;  %v1492_v42 = vshrl.u32 %v8028_v32, 16  ;;  %v1495_v44 = vshll.u32 %v8028_v32, 16  ;;  %v2181_v46 = vsel %vm7976_vm13, %v2179_v31, %v2180_v5  ;;  %v7392_v20 = vld [vmem:[#allocation2] sm:$0xf] }
  0xb3   : > { %v8039_v41 = vld [vmem:[#allocation2 + $0xbc] sm:$0x1]  ;;  %v1480_v50 = vsel %vm7553_vm9, %v1475_v58, %v1479_v45  ;;  %v1501_v52 = vshll.u32 %v8037_v43, 16  ;;  %v1505_v53 = vshrl.u32 %v8037_v43, 16  ;;  %6917 = vmatmul.mubr.bf16.vlgmr.msra.gmra.mxu0 %v6257_v14  ;;  %v6258_v45 = vcombine.low %v2178_v8, %v2181_v46  ;;  %v2116_v30 = vld [vmem:[#allocation2 + $0x48] sm:$0xe] }
  0xb4   : > { %v1511_v55 = vshll.u32 %v8039_v41, 16  ;;  %v6190_v59 = vcombine.low %v1480_v50, %v1490_v39  ;;  %v1494_v40 = vrot.slane %v1492_v42, 4  ;;  %v1497_v3 = vrot.slane %v1495_v44, 5  ;;  %6997 = vmatpush3.bf16.msra.mxu0 %v7391_v4  ;;  %v2117_v50 = vld [vmem:[#allocation2 + $0x54] sm:$0xe] }
  0xb5   : > { %v1503_v5 = vrot.slane %v1501_v52, 5  ;;  %v1507_v13 = vrot.slane %v1505_v53, 4  ;;  %v6200_v63 = vcombine.low %v7392_v20, %v7980_v54  ;;  %v2188_v14 = vsel %vm7976_vm13, %v2186_v21, %v2187_v38  ;;  %6998 = vmatprep.subr.bf16.mxu0 %v7292_v51  ;;  %6920 = vmatprep.mubr.bf16.mxu0 %v6258_v45 }
  0xb6   : > { %6848 = vmatprep.mubr.bf16.mxu1 %v6190_v59  ;;  %v1498_v31 = vor.u32 %v1497_v3, %v1494_v40  ;;  %v1513_v58 = vrot.slane %v1511_v55, 5  ;;  %v6228_v26 = vrot.slane %v2114_v2, 9  ;;  %v2191_v39 = vrot.slane %v7799_v36, 5  ;;  %v8064_v55 = vld [vmem:[#allocation2 + $0xc] sm:$0xf] }
  0xb7   : > { %v1508_v42 = vor.u32 %v1507_v13, %v1503_v5  ;;  %v6259_v44 = vcombine.low %v2185_v34, %v2188_v14  ;;  %v2194_v8 = vrot.slane %v7801_v7, 5  ;;  %v6229_v46 = vrot.slane %v2115_v48, 9  ;;  %v2118_v13 = vld [vmem:[#allocation2 + $0x60] sm:$0xe]  ;;  %v2123_v14 = vld [vmem:[#allocation2 + $0x9c] sm:$0xe] }
  0xb8   : > { %v1499_v52 = vrot.slane %v1498_v31, 4  ;;  %6999 = vmatpush3.bf16.msra.mxu0 %v7292_v51  ;;  %v2192_v54 = vsel %vm7976_vm13, %v6228_v26, %v2191_v39  ;;  %v2193_v21 = vrot.slane %v2191_v39, 4  ;;  %v2198_v38 = vrot.slane %v7833_v0, 5  ;;  %v7300_v51 = vld [vmem:[%s10176_s3 + $0x120] sm:$0xff]   ;;  %v8086_v31 = vld [vmem:[#allocation2 + $0x6c] sm:$0xe] }
  0xb9   : > { %v1509_v53 = vrot.slane %v1508_v42, 4  ;;  %v6201_v36 = vcombine.low %v8064_v55, %v7987_v23  ;;  %v2201_v34 = vrot.slane %v7838_v10, 5  ;;  %7000 = vmatprep.subr.bf16.mxu0 %v7296_v57  ;;  %v6230_v7 = vrot.slane %v2116_v30, 9  ;;  %v8091_v26 = vld [vmem:[#allocation2 + $0x18] sm:$0xf] }
  0xba   : > { %v1504_v2 = vsel %vm7553_vm9, %v1499_v52, %v1503_v5  ;;  %v2195_v48 = vsel %vm7976_vm13, %v2193_v21, %v2194_v8  ;;  %v2199_v59 = vsel %vm7976_vm13, %v6229_v46, %v2198_v38  ;;  %v2200_v40 = vrot.slane %v2198_v38, 4  ;;  %v8103_v52 = vld [vmem:[#allocation2 + $0x64] sm:$0xf]  ;;  %v8106_v21 = vld [vmem:[#allocation2 + $0x30] sm:$0xf] }
  0xbb   : > { %v1514_v3 = vsel %vm7553_vm9, %v1509_v53, %v1513_v58  ;;  %6921 = vmatmul.mubr.bf16.gmra.mxu0 %v6259_v44  ;;  %v6260_v10 = vcombine.low %v2192_v54, %v2195_v48  ;;  %v2205_v4 = vrot.slane %v7920_v17, 5  ;;  %v2208_v45 = vrot.slane %v7922_v49, 5  ;;  %v7304_v58 = vld [vmem:[%s10176_s3 + $0x118] sm:$0xff]   ;;  %v8098_v44 = vld [vmem:[#allocation2 + $0x24] sm:$0xf] }
  0xbc   : > { %v6191_v20 = vcombine.low %v1504_v2, %v1514_v3  ;;  %v2202_v5 = vsel %vm7976_vm13, %v2200_v40, %v2201_v34  ;;  %7001 = vmatpush3.bf16.msra.mxu0 %v7296_v57  ;;  %v6231_v30 = vrot.slane %v2117_v50, 9  ;;  %v6202_v49 = vcombine.low %v8091_v26, %v8017_v1  ;;  %v8108_v38 = vld [vmem:[#allocation2 + $0x34] sm:$0xf]  ;;  %v2120_v48 = vld [vmem:[#allocation2 + $0x78] sm:$0xe]  ;;  %v7294_v1 = vld [vmem:[%s10176_s3 + $0xe8] sm:$0xff]  }
  0xbd   : > { %6924 = vmatprep.mubr.bf16.mxu0 %v6260_v10  ;;  %v2206_v39 = vsel %vm7976_vm13, %v6230_v7, %v2205_v4  ;;  %v2207_v57 = vrot.slane %v2205_v4, 4  ;;  %v2212_v42 = vrot.slane %v7959_v16, 5  ;;  %7002 = vmatprep.subr.bf16.mxu0 %v7300_v51  ;;  %v2215_v46 = vrot.slane %v7963_v28, 5  ;;  %v7308_v10 = vld [vmem:[%s10176_s3 + $0x110] sm:$0xff]   ;;  %v8172_v8 = vld [vmem:[#allocation2 + $0x88] sm:$0xf] }
  0xbe   : > { %6849 = vmatmul.mubr.bf16.gmra.mxu1 %v6191_v20  ;;  %v6232_v50 = vrot.slane %v2118_v13, 9  ;;  %v2219_v54 = vrot.slane %v8103_v52, 5  ;;  %v6261_v34 = vcombine.low %v2199_v59, %v2202_v5  ;;  %v8132_v13 = vld [vmem:[#allocation2 + $0x70] sm:$0xf] }
  0xbf   : > { %6868 = vmatprep.mubr.bf16.mxu1 %v6200_v63  ;;  %v2209_v7 = vsel %vm7976_vm13, %v2207_v57, %v2208_v45  ;;  %v2214_v2 = vrot.slane %v2212_v42, 4  ;;  %v8118_v63 = vsel %vm7976_vm13, %v6231_v30, %v2212_v42  ;;  %v6233_v45 = vrot.slane %v8086_v31, 9  ;;  %v8138_v5 = vld [vmem:[%s10176_s3 + $0xf0] sm:$0xff]   ;;  %v8146_v42 = vld [vmem:[#allocation2 + $0x7c] sm:$0xf] }
  0xc0   : > { %v6262_v40 = vcombine.low %v2206_v39, %v2209_v7  ;;  %7003 = vmatpush3.bf16.msra.mxu0 %v7300_v51  ;;  %v2221_v3 = vrot.slane %v2219_v54, 4  ;;  %v8129_v4 = vsel %vm7976_vm13, %v6232_v50, %v2219_v54  ;;  %v2226_v20 = vrot.slane %v8132_v13, 5  ;;  %v2121_v51 = vld [vmem:[#allocation2 + $0x84] sm:$0xe]  ;;  %v7400_v39 = vld [vmem:[#allocation2 + $0x74] sm:$0x1] }
  0xc1   : > { %v8125_v59 = vsel %vm7976_vm13, %v2214_v2, %v2215_v46  ;;  %7004 = vmatprep.subr.bf16.mxu0 %v7304_v58  ;;  %v2229_v57 = vrot.slane %v7400_v39, 5  ;;  %v6234_v31 = vrot.slane %v2120_v48, 9  ;;  %v2233_v46 = vrot.slane %v8146_v42, 5  ;;  %v2122_v50 = vld [vmem:[#allocation2 + $0x90] sm:$0xe]  ;;  %v8158_v48 = vld [vmem:[%s10176_s3 + $0x108] sm:$0xff]  }
  0xc2   : > { %v8144_v30 = vsel %vm7976_vm13, %v2221_v3, %v2222_v29  ;;  %v8151_v7 = vld [vmem:[#allocation2 + $0x60] sm:$0xf]  ;;  %v2228_v2 = vrot.slane %v2226_v20, 4  ;;  %v8162_v39 = vld [vmem:[#allocation2 + $0x6c] sm:$0xf]  ;;  %v6235_v28 = vrot.slane %v2121_v51, 9  ;;  %v8170_v53 = vsel %vm7976_vm13, %v6233_v45, %v2226_v20 }
  0xc3   : > { %6925 = vmatmul.mubr.bf16.gmra.mxu0 %v6261_v34  ;;  %v7403_v29 = vld [vmem:[#allocation2 + $0x80] sm:$0x1]  ;;  %v6263_v34 = vcombine.low %v8118_v63, %v8125_v59  ;;  %v2235_v24 = vrot.slane %v2233_v46, 4  ;;  %v7406_v63 = vld [vmem:[#allocation2 + $0x8c] sm:$0x1]  ;;  %v6236_v20 = vrot.slane %v2122_v50, 9 }
  0xc4   : > { %v2236_v3 = vrot.slane %v7403_v29, 5  ;;  %6928 = vmatprep.mubr.bf16.mxu0 %v6262_v40  ;;  %7005 = vmatpush3.bf16.msra.mxu0 %v7304_v58  ;;  %v6264_v29 = vcombine.low %v8129_v4, %v8144_v30  ;;  %v2240_v40 = vrot.slane %v8172_v8, 5  ;;  %v2243_v59 = vrot.slane %v7406_v63, 5  ;;  %v8182_v4 = vld [vmem:[#allocation2 + $0x78] sm:$0xf] }
  0xc5   : > { %7006 = vmatprep.subr.bf16.mxu0 %v7308_v10  ;;  %v8180_v58 = vsel %vm7976_vm13, %v6234_v31, %v2233_v46  ;;  %v2247_v51 = vrot.slane %v7869_v22, 5  ;;  %v7408_v30 = vld [vmem:[%s10176_s3 + $0xf8] sm:$0xff]   ;;  %v8195_v23 = vsel %vm7976_vm13, %v2228_v2, %v2229_v57  ;;  %v8201_v31 = vld [vmem:[#allocation2 + $0x84] sm:$0xf]  ;;  %v2124_v50 = vld [vmem:[#allocation2 + $0xa8] sm:$0xe] }
  0xc6   : > { %6869 = vmatmul.mubr.bf16.vlgmr.msra.gmra.mxu1 %v6201_v36  ;;  %v8199_v55 = vsel %vm7976_vm13, %v2235_v24, %v2236_v3  ;;  %v2242_v36 = vrot.slane %v2240_v40, 4  ;;  %v8211_v26 = vsel %vm7976_vm13, %v6235_v28, %v2240_v40  ;;  %v2250_v57 = vrot.slane %v7875_v27, 5  ;;  %v2125_v28 = vld [vmem:[#allocation2 + $0xb4] sm:$0xe]  ;;  %v2981_v40 = vld [vmem:[#allocation2 + $0xc] sm:$0xf] }
  0xc7   : > { %6949 = vmatpush3.bf16.msra.mxu1 %v7408_v30  ;;  %6872 = vmatprep.mubr.bf16.mxu1 %v6202_v49  ;;  %v2249_v49 = vrot.slane %v2247_v51, 4  ;;  %v6237_v24 = vrot.slane %v2123_v14, 9  ;;  %v2254_v3 = vrot.slane %v7890_v61, 5  ;;  %v2257_v63 = vrot.slane %v7892_v62, 5  ;;  %v7316_v62 = vld [vmem:[%s10176_s3 + $0x100] sm:$0xff]  }
  0xc8   : > { %6950 = vmatprep.subr.bf16.mxu1 %v8138_v5  ;;  %7007 = vmatpush3.bf16.msra.mxu0 %v7308_v10  ;;  %v8216_v2 = vsel %vm7976_vm13, %v2242_v36, %v2243_v59  ;;  %v6265_v10 = vcombine.low %v8170_v53, %v8195_v23  ;;  %v8229_v14 = vsel %vm7976_vm13, %v6236_v20, %v2247_v51  ;;  %v2261_v59 = vrot.slane %v7996_v33, 5  ;;  %v2982_v36 = vld [vmem:[#allocation2 + $0x10] sm:$0xf]  ;;  %v7298_v51 = vld [vmem:[%s10176_s3 + $0xe0] sm:$0xff]   ;;  %v2983_v45 = vld [vmem:[#allocation2 + $0x14] sm:$0x1] }
  0xc9   : > { %7008 = vmatprep.subr.bf16.mxu0 %v8158_v48  ;;  %v8240_v23 = vsel %vm7976_vm13, %v6237_v24, %v2254_v3  ;;  %v2256_v30 = vrot.slane %v2254_v3, 4  ;;  %v6238_v20 = vrot.slane %v2124_v50, 9  ;;  %v2984_v54 = vld [vmem:[#allocation2 + $0x18] sm:$0xf]  ;;  %v2271_v53 = vrot.slane %v8039_v41, 5 }
  0xca   : > { %v2263_v3 = vrot.slane %v2261_v59, 4  ;;  %v8285_v24 = vld [vmem:[#allocation2 + $0x1c] sm:$0xf]  ;;  %v3043_v27 = vshrl.u32 %v2982_v36, 16  ;;  %v3049_v15 = vshll.u32 %v2983_v45, 16 }
  0xcb   : > { %6951 = vmatpush3.bf16.msra.mxu1 %v8138_v5  ;;  %6929 = vmatmul.mubr.bf16.gmra.mxu0 %v6263_v34  ;;  %v8249_v5 = vsel %vm7976_vm13, %v2249_v49, %v2250_v57  ;;  %v2264_v34 = vrot.slane %v8002_v37, 5  ;;  %v8256_v50 = vsel %vm7976_vm13, %v2256_v30, %v2257_v63  ;;  %v10199_v49 = vcombine.low %v8098_v44, %v8020_v25  ;;  %v7302_v37 = vld [vmem:[%s10176_s3 + $0xd8] sm:$0xff]   ;;  %v8298_v45 = vld [vmem:[#allocation2 + $0x28] sm:$0xf] }
  0xcc   : > { %6952 = vmatprep.subr.bf16.mxu1 %v7294_v1  ;;  %6932 = vmatprep.mubr.bf16.mxu0 %v6264_v29  ;;  %v6239_v29 = vrot.slane %v2125_v28, 9  ;;  %v3030_v63 = vshrl.u32 %v2981_v40, 16  ;;  %v3033_v30 = vshll.u32 %v2981_v40, 16  ;;  %v8273_v28 = vld [vmem:[%s10176_s3 + $0x1b8] sm:$0xff]   ;;  %v10200_v25 = vcombine.low %v8106_v21, %v8108_v38  ;;  %10201 = vst [vmem:[#allocation4_spill] sm:$0xff] %v8285_v24 }
  0xcd   : > { %7009 = vmatpush3.bf16.msra.mxu0 %v8158_v48  ;;  %v2268_v48 = vrot.slane %v8037_v43, 5  ;;  %v3039_v40 = vshll.u32 %v2982_v36, 16  ;;  %v2987_v21 = vld [vmem:[#allocation2 + $0x24] sm:$0xf]  ;;  %v8289_v38 = vsel %vm7976_vm13, %v2263_v3, %v2264_v34  ;;  %v3063_v34 = vshll.u32 %v8285_v24, 16 }
  0xce   : > { %6873 = vmatmul.mubr.bf16.gmra.mxu1 %v10199_v49  ;;  %7010 = vmatprep.subr.bf16.mxu0 %v7316_v62  ;;  %v8282_v49 = vsel %vm7976_vm13, %v6238_v20, %v2261_v59  ;;  %v3032_v57 = vrot.slane %v3030_v63, 4  ;;  %v3035_v46 = vrot.slane %v3033_v30, 5  ;;  %v3054_v59 = vshrl.u32 %v2984_v54, 16 }
  0xcf   : > { %6876 = vmatprep.mubr.bf16.mxu1 %v10200_v25  ;;  %6953 = vmatpush3.bf16.msra.mxu1 %v7294_v1  ;;  %v3041_v1 = vrot.slane %v3039_v40, 5  ;;  %v8291_v25 = vld [vmem:[#allocation2 + $0x20] sm:$0x1]  ;;  %v3057_v20 = vshll.u32 %v2984_v54, 16  ;;  %v8295_v41 = vsel %vm7976_vm13, %v6239_v29, %v2268_v48  ;;  %v2270_v44 = vrot.slane %v2268_v48, 4 }
  0xd0   : > { %6954 = vmatprep.subr.bf16.mxu1 %v7298_v51  ;;  %v3036_v63 = vor.u32 %v3035_v46, %v3032_v57  ;;  %v3045_v30 = vrot.slane %v3043_v27, 4  ;;  %v3056_v36 = vrot.slane %v3054_v59, 4  ;;  %v3067_v3 = vshrl.u32 %v8285_v24, 16  ;;  %v2990_v54 = vld [vmem:[#allocation2 + $0x30] sm:$0xf] }
  0xd1   : > { %7011 = vmatpush3.bf16.msra.mxu0 %v7316_v62  ;;  %v3059_v62 = vrot.slane %v3057_v20, 5  ;;  %v10202_v29 = vcombine.low %v8180_v58, %v8199_v55  ;;  %v7306_v46 = vld [vmem:[%s10176_s3 + $0xd0] sm:$0xff]   ;;  %v8308_v40 = vrot.slane %v3063_v34, 5  ;;  %v3081_v20 = vshll.u32 %v2987_v21, 16 }
  0xd2   : > { %7092 = vmatprep.subr.bf16.mxu0 %v8273_v28  ;;  %v3037_v27 = vrot.slane %v3036_v63, 4  ;;  %v3046_v57 = vor.u32 %v3045_v30, %v3041_v1  ;;  %v3069_v59 = vrot.slane %v3067_v3, 4  ;;  %v10203_v24 = vcombine.low %v7836_v9, %v7833_v0  ;;  %v8318_v63 = vld [vmem:[#allocation2 + $0x2c] sm:$0x1] }
  0xd3   : > { %6955 = vmatpush3.bf16.msra.mxu1 %v7298_v51  ;;  %6933 = vmatmul.mubr.bf16.gmra.mxu0 %v6265_v10  ;;  %v3051_v51 = vrot.slane %v3049_v15, 5  ;;  %v3078_v10 = vshrl.u32 %v2987_v21, 16  ;;  %v3060_v48 = vor.u32 %v3059_v62, %v3056_v36  ;;  %v8315_v58 = vsel %vm7976_vm13, %v2270_v44, %v2271_v53  ;;  %10204 = vst [vmem:[#allocation5_spill] sm:$0xff] %v8318_v63  ;;  %v7310_v44 = vld [vmem:[%s10176_s3 + $0xc8] sm:$0xff]   ;;  %v2993_v36 = vld [vmem:[#allocation2 + $0x3c] sm:$0xf] }
  0xd4   : > { %6956 = vmatprep.subr.bf16.mxu1 %v7302_v37  ;;  %6936 = vmatprep.mubr.bf16.mxu0 %v10202_v29  ;;  %v3047_v55 = vrot.slane %v3046_v57, 4  ;;  %v3073_v29 = vshll.u32 %v8291_v25, 16  ;;  %v10205_v30 = vcombine.low %v7913_v18, %v7920_v17  ;;  %v3042_v21 = vsel %vm7553_vm9, %v3037_v27, %v3041_v1  ;;  %v8342_v57 = vld [vmem:[#allocation2 + $0x38] sm:$0x1] }
  0xd5   : > { %v3080_v15 = vrot.slane %v3078_v10, 4  ;;  %v3070_v0 = vor.u32 %v3069_v59, %v8308_v40  ;;  %v3083_v9 = vrot.slane %v3081_v20, 5  ;;  %v3087_v53 = vshll.u32 %v8298_v45, 16 }
  0xd6   : > { %6877 = vmatmul.mubr.bf16.gmra.mxu1 %v10203_v24  ;;  %v8327_v24 = vld [vmem:[#allocation2 + $0x34] sm:$0xf]  ;;  %v3052_v18 = vsel %vm7553_vm9, %v3047_v55, %v3051_v51  ;;  %v8334_v17 = vrot.slane %v3060_v48, 4  ;;  %v3102_v1 = vshrl.u32 %v2990_v54, 16  ;;  %v3097_v27 = vshll.u32 %v8318_v63, 16  ;;  %v7314_v51 = vld [vmem:[%s10176_s3 + $0xc0] sm:$0xff]  }
  0xd7   : > { %6880 = vmatprep.mubr.bf16.mxu1 %v10205_v30  ;;  %6957 = vmatpush3.bf16.msra.mxu1 %v7302_v37  ;;  %v3091_v37 = vshrl.u32 %v8298_v45, 16  ;;  %v3084_v3 = vor.u32 %v3083_v9, %v3080_v15  ;;  %v8347_v10 = vcombine.low %v3042_v21, %v3052_v18  ;;  %v3075_v48 = vrot.slane %v3073_v29, 5  ;;  %v8349_v55 = vld [vmem:[#allocation2 + $0x40] sm:$0xf] }
  0xd8   : > { %6958 = vmatprep.subr.bf16.mxu1 %v7306_v46  ;;  %v3089_v59 = vrot.slane %v3087_v53, 5  ;;  %v10206_v30 = vcombine.low %v8211_v26, %v8216_v2  ;;  %v3071_v15 = vrot.slane %v3070_v0, 4  ;;  %v3104_v9 = vrot.slane %v3102_v1, 4  ;;  %v8363_v2 = vld [vmem:[#allocation2 + $0x44] sm:$0x1] }
  0xd9   : > { %v3093_v20 = vrot.slane %v3091_v37, 4  ;;  %v3105_v34 = vshll.u32 %v2990_v54, 16  ;;  %v3111_v62 = vshll.u32 %v8327_v24, 16  ;;  %v10207_v63 = vcombine.low %v8229_v14, %v8249_v5  ;;  %v2996_v37 = vld [vmem:[#allocation2 + $0x48] sm:$0xf] }
  0xda   : > { %v3066_v29 = vsel %vm7553_vm9, %v8334_v17, %v8308_v40  ;;  %v3085_v21 = vrot.slane %v3084_v3, 4  ;;  %v3115_v26 = vshrl.u32 %v8327_v24, 16  ;;  %v3126_v18 = vshrl.u32 %v2993_v36, 16  ;;  %v8371_v1 = vld [vmem:[#allocation2 + $0x4c] sm:$0xf] }
  0xdb   : > { %6937 = vmatmul.mubr.bf16.gmra.mxu0 %v10206_v30  ;;  %6959 = vmatpush3.bf16.msra.mxu1 %v7306_v46  ;;  %v3094_v53 = vor.u32 %v3093_v20, %v3089_v59  ;;  %v3099_v46 = vrot.slane %v3097_v27, 5  ;;  %v3107_v54 = vrot.slane %v3105_v34, 5  ;;  %v8365_v0 = vrot.slane %v3111_v62, 5 }
  0xdc   : > { %6940 = vmatprep.mubr.bf16.mxu0 %v10207_v63  ;;  %6960 = vmatprep.subr.bf16.mxu1 %v7310_v44  ;;  %v10208_v14 = vcombine.low %v7956_v12, %v7959_v16  ;;  %v3117_v63 = vrot.slane %v3115_v26, 4  ;;  %v3121_v40 = vshll.u32 %v8342_v57, 16  ;;  %v3129_v17 = vshll.u32 %v2993_v36, 16  ;;  %v8383_v16 = vld [vmem:[%s10176_s3 + $0x178] sm:$0xff]  }
  0xdd   : > { %v3095_v5 = vrot.slane %v3094_v53, 4  ;;  %v10209_v3 = vcombine.low %v8151_v7, %v8103_v52  ;;  %v3108_v62 = vor.u32 %v3107_v54, %v3104_v9  ;;  %v3128_v34 = vrot.slane %v3126_v18, 4 }
  0xde   : > { %6881 = vmatmul.mubr.bf16.gmra.mxu1 %v10208_v14  ;;  %v3135_v27 = vshll.u32 %v8349_v55, 16  ;;  %v3139_v20 = vshrl.u32 %v8349_v55, 16  ;;  %v3076_v12 = vsel %vm7553_vm9, %v3071_v15, %v3075_v48  ;;  %v3090_v52 = vsel %vm7553_vm9, %v3085_v21, %v3089_v59  ;;  %v8393_v48 = vld [vmem:[#allocation2 + $0x50] sm:$0x1]  ;;  %v2999_v15 = vld [vmem:[#allocation2 + $0x54] sm:$0xf] }
  0xdf   : > { %6884 = vmatprep.mubr.bf16.mxu1 %v10209_v3  ;;  %6961 = vmatpush3.bf16.msra.mxu1 %v7310_v44  ;;  %v3118_v7 = vor.u32 %v3117_v63, %v8365_v0  ;;  %v3131_v44 = vrot.slane %v3129_v17, 5  ;;  %v3100_v36 = vsel %vm7553_vm9, %v3095_v5, %v3099_v46  ;;  %v3145_v53 = vshll.u32 %v8363_v2, 16  ;;  %v8395_v3 = vld [vmem:[#allocation2 + $0x58] sm:$0xf] }
  0xe0   : > { %6962 = vmatprep.subr.bf16.mxu1 %v7314_v51  ;;  %v8390_v30 = vrot.slane %v3135_v27, 5  ;;  %v3141_v9 = vrot.slane %v3139_v20, 4  ;;  %v3109_v26 = vrot.slane %v3108_v62, 4  ;;  %v3123_v54 = vrot.slane %v3121_v40, 5  ;;  %v8411_v20 = vld [vmem:[#allocation2 + $0x5c] sm:$0x1] }
  0xe1   : > { %v3132_v18 = vor.u32 %v3131_v44, %v3128_v34  ;;  %v3150_v14 = vshrl.u32 %v2996_v37, 16  ;;  %v10210_v59 = vcombine.low %v8240_v23, %v8256_v50  ;;  %v8400_v21 = vcombine.low %v3066_v29, %v3076_v12 }
  0xe2   : > { %v3142_v46 = vor.u32 %v3141_v9, %v8390_v30  ;;  %v3153_v5 = vshll.u32 %v2996_v37, 16  ;;  %v3159_v63 = vshll.u32 %v8371_v1, 16  ;;  %v10211_v17 = vcombine.low %v8282_v49, %v8289_v38  ;;  %v3002_v37 = vld [vmem:[#allocation2 + $0x60] sm:$0xf] }
  0xe3   : > { %6941 = vmatmul.mubr.bf16.gmra.mxu0 %v10210_v59  ;;  %6963 = vmatpush3.bf16.msra.mxu1 %v7314_v51  ;;  %v8408_v40 = vcombine.low %v3090_v52, %v3100_v36  ;;  %v3119_v62 = vrot.slane %v3118_v7, 4  ;;  %v3152_v34 = vrot.slane %v3150_v14, 4  ;;  %v3163_v23 = vshrl.u32 %v8371_v1, 16  ;;  %v8417_v7 = vld [vmem:[#allocation2 + $0x64] sm:$0xf] }
  0xe4   : > { %6944 = vmatprep.mubr.bf16.mxu0 %v10211_v17  ;;  %7044 = vmatprep.subr.bf16.mxu1 %v8383_v16  ;;  %v3133_v50 = vrot.slane %v3132_v18, 4  ;;  %v3147_v51 = vrot.slane %v3145_v53, 5  ;;  %v3155_v29 = vrot.slane %v3153_v5, 5  ;;  %v3161_v27 = vrot.slane %v3159_v63, 5 }
  0xe5   : > { %v10212_v12 = vcombine.low %v8162_v39, %v8132_v13  ;;  %v3143_v49 = vrot.slane %v3142_v46, 4  ;;  %v3165_v38 = vrot.slane %v3163_v23, 4  ;;  %v3169_v52 = vshll.u32 %v8393_v48, 16 }
  0xe6   : > { %v3174_v44 = vshrl.u32 %v2999_v15, 16  ;;  %v10213_v36 = vcombine.low %v8182_v4, %v8146_v42  ;;  %v3114_v9 = vsel %vm7553_vm9, %v3109_v26, %v8365_v0  ;;  %v3156_v53 = vor.u32 %v3155_v29, %v3152_v34  ;;  %v3005_v4 = vld [vmem:[#allocation2 + $0x6c] sm:$0xf] }
  0xe7   : > { %6885 = vmatmul.mubr.bf16.gmra.mxu1 %v10212_v12  ;;  %v3177_v18 = vshll.u32 %v2999_v15, 16  ;;  %v3183_v13 = vshll.u32 %v8395_v3, 16  ;;  %v3124_v39 = vsel %vm7553_vm9, %v3119_v62, %v3123_v54  ;;  %v3166_v14 = vor.u32 %v3165_v38, %v3161_v27  ;;  %v8437_v12 = vld [vmem:[#allocation2 + $0x68] sm:$0x1] }
  0xe8   : > { %6888 = vmatprep.mubr.bf16.mxu1 %v10213_v36  ;;  %v3171_v59 = vrot.slane %v3169_v52, 5  ;;  %v3176_v46 = vrot.slane %v3174_v44, 4  ;;  %v3157_v5 = vrot.slane %v3156_v53, 4  ;;  %v3187_v42 = vshrl.u32 %v8395_v3, 16 }
  0xe9   : > { %v3179_v63 = vrot.slane %v3177_v18, 5  ;;  %v8428_v17 = vrot.slane %v3183_v13, 5  ;;  %v3167_v23 = vrot.slane %v3166_v14, 4  ;;  %v3193_v0 = vshll.u32 %v8411_v20, 16  ;;  %v8453_v18 = vld [vmem:[#allocation2 + $0x74] sm:$0x1] }
  0xea   : > { %v3198_v26 = vshrl.u32 %v3002_v37, 16  ;;  %v3201_v15 = vshll.u32 %v3002_v37, 16  ;;  %v10214_v34 = vcombine.low %v8295_v41, %v8315_v58  ;;  %v8435_v54 = vcombine.low %v3114_v9, %v3124_v39  ;;  %v8446_v58 = vld [vmem:[#allocation2 + $0x70] sm:$0xf]  ;;  %v3008_v39 = vld [vmem:[#allocation2 + $0x78] sm:$0xf] }
  0xeb   : > { %v3180_v62 = vor.u32 %v3179_v63, %v3176_v46  ;;  %v3189_v29 = vrot.slane %v3187_v42, 4  ;;  %v3207_v38 = vshll.u32 %v8417_v7, 16  ;;  %v3138_v52 = vsel %vm7553_vm9, %v3133_v50, %v8390_v30  ;;  %v8467_v63 = vld [vmem:[#allocation2 + $0x7c] sm:$0xf] }
  0xec   : > { %6945 = vmatmul.mubr.bf16.gmra.mxu0 %v10214_v34  ;;  %v3148_v37 = vsel %vm7553_vm9, %v3143_v49, %v3147_v51  ;;  %v3200_v44 = vrot.slane %v3198_v26, 4  ;;  %v3203_v41 = vrot.slane %v3201_v15, 5  ;;  %v3162_v36 = vsel %vm7553_vm9, %v3157_v5, %v3161_v27  ;;  %v7324_v26 = vld [vmem:[%s10176_s3 + $0x1b0] sm:$0xff]  }
  0xed   : > { %7012 = vmatprep.mubr.bf16.mxu0 %v8347_v10  ;;  %v3172_v9 = vsel %vm7553_vm9, %v3167_v23, %v3171_v59  ;;  %v3181_v53 = vrot.slane %v3180_v62, 4  ;;  %v3190_v10 = vor.u32 %v3189_v29, %v8428_v17  ;;  %v10215_v30 = vcombine.low %v8201_v31, %v8172_v8 }
  0xee   : > { %v3204_v50 = vor.u32 %v3203_v41, %v3200_v44  ;;  %v8458_v51 = vrot.slane %v3207_v38, 5  ;;  %v3211_v49 = vshrl.u32 %v8417_v7, 16  ;;  %v3222_v13 = vshrl.u32 %v3005_v4, 16 }
  0xef   : > { %6889 = vmatmul.mubr.bf16.gmra.mxu1 %v10215_v30  ;;  %v10216_v27 = vcombine.low %v7867_v19, %v7869_v22  ;;  %v8464_v14 = vcombine.low %v3138_v52, %v3148_v37  ;;  %v3195_v59 = vrot.slane %v3193_v0, 5  ;;  %v3225_v46 = vshll.u32 %v3005_v4, 16  ;;  %v8478_v0 = vld [vmem:[#allocation2 + $0x80] sm:$0x1] }
  0xf0   : > { %v3231_v5 = vshll.u32 %v8446_v58, 16  ;;  %v3191_v8 = vrot.slane %v3190_v10, 4  ;;  %v3213_v31 = vrot.slane %v3211_v49, 4  ;;  %v3217_v42 = vshll.u32 %v8437_v12, 16 }
  0xf1   : > { %6892 = vmatprep.mubr.bf16.mxu1 %v10216_v27  ;;  %v3224_v23 = vrot.slane %v3222_v13, 4  ;;  %v8473_v15 = vcombine.low %v3162_v36, %v3172_v9  ;;  %v3227_v19 = vrot.slane %v3225_v46, 5  ;;  %v3235_v4 = vshrl.u32 %v8446_v58, 16  ;;  %v3011_v36 = vld [vmem:[#allocation2 + $0x84] sm:$0xf] }
  0xf2   : > { %v8475_v22 = vrot.slane %v3231_v5, 5  ;;  %v3186_v34 = vsel %vm7553_vm9, %v3181_v53, %v8428_v17  ;;  %v8483_v62 = vrot.slane %v3204_v50, 4  ;;  %v3214_v29 = vor.u32 %v3213_v31, %v8458_v51  ;;  %v7332_v31 = vld [vmem:[%s10176_s3 + $0x1a0] sm:$0xff]  }
  0xf3   : > { %v3241_v38 = vshll.u32 %v8453_v18, 16  ;;  %v3228_v52 = vor.u32 %v3227_v19, %v3224_v23  ;;  %v3237_v37 = vrot.slane %v3235_v4, 4  ;;  %v3246_v44 = vshrl.u32 %v3008_v39, 16  ;;  %v8521_v4 = vld [vmem:[#allocation2 + $0x8c] sm:$0x1] }
  0xf4   : > { %7013 = vmatmul.mubr.bf16.vlgmr.msra.gmra.mxu0 %v8400_v21  ;;  %v3249_v41 = vshll.u32 %v3008_v39, 16  ;;  %v3196_v17 = vsel %vm7553_vm9, %v3191_v8, %v3195_v59  ;;  %v8492_v9 = vrot.slane %v3217_v42, 5  ;;  %v3255_v53 = vshll.u32 %v8467_v63, 16  ;;  %v7328_v21 = vld [vmem:[%s10176_s3 + $0x1a8] sm:$0xff]  }
  0xf5   : > { %7093 = vmatpush3.bf16.msra.mxu0 %v8273_v28  ;;  %7016 = vmatprep.mubr.bf16.mxu0 %v8408_v40  ;;  %v3259_v10 = vshrl.u32 %v8467_v63, 16  ;;  %v3215_v30 = vrot.slane %v3214_v29, 4  ;;  %v3238_v50 = vor.u32 %v3237_v37, %v8475_v22  ;;  %v3248_v28 = vrot.slane %v3246_v44, 4  ;;  %v8500_v40 = vld [vmem:[#allocation2 + $0x88] sm:$0xf]  ;;  %v7317_v44 = vld [vmem:[#allocation2 + $0xc] sm:$0xff]  }
  0xf6   : > { %7094 = vmatprep.subr.bf16.mxu0 %v7324_v26  ;;  %v3251_v49 = vrot.slane %v3249_v41, 5  ;;  %v10217_v13 = vcombine.low %v7888_v56, %v7890_v61  ;;  %v3243_v39 = vrot.slane %v3241_v38, 5  ;;  %v8505_v27 = vrot.slane %v3255_v53, 5 }
  0xf7   : > { %v3261_v59 = vrot.slane %v3259_v10, 4  ;;  %v3265_v46 = vshll.u32 %v8478_v0, 16  ;;  %v10218_v5 = vcombine.low %v8000_v35, %v7996_v33  ;;  %v8511_v8 = vcombine.low %v3186_v34, %v3196_v17  ;;  %v3014_v34 = vld [vmem:[#allocation2 + $0x90] sm:$0xf]  ;;  %v7336_v10 = vld [vmem:[%s10176_s3 + $0x198] sm:$0xff]  }
  0xf8   : > { %6893 = vmatmul.mubr.bf16.gmra.mxu1 %v10217_v13  ;;  %v3229_v42 = vrot.slane %v3228_v52, 4  ;;  %v3239_v23 = vrot.slane %v3238_v50, 4  ;;  %v3252_v56 = vor.u32 %v3251_v49, %v3248_v28  ;;  %v3210_v61 = vsel %vm7553_vm9, %v8483_v62, %v8458_v51 }
  0xf9   : > { %6896 = vmatprep.mubr.bf16.mxu1 %v10218_v5  ;;  %7095 = vmatpush3.bf16.msra.mxu0 %v7324_v26  ;;  %v3262_v19 = vor.u32 %v3261_v59, %v8505_v27  ;;  %v3270_v33 = vshrl.u32 %v3011_v36, 16  ;;  %v3273_v35 = vshll.u32 %v3011_v36, 16  ;;  %v3267_v38 = vrot.slane %v3265_v46, 5  ;;  %v8525_v26 = vld [vmem:[#allocation2 + $0x94] sm:$0xf] }
  0xfa   : > { %7096 = vmatprep.subr.bf16.mxu0 %v7328_v21  ;;  %v3253_v29 = vrot.slane %v3252_v56, 4  ;;  %v3279_v52 = vshll.u32 %v8500_v40, 16  ;;  %v3283_v37 = vshrl.u32 %v8500_v40, 16  ;;  %v3220_v51 = vsel %vm7553_vm9, %v3215_v30, %v8492_v9  ;;  %v8541_v9 = vld [vmem:[#allocation2 + $0x98] sm:$0x1] }
  0xfb   : > { %v3263_v62 = vrot.slane %v3262_v19, 4  ;;  %v3272_v41 = vrot.slane %v3270_v33, 4  ;;  %v3275_v17 = vrot.slane %v3273_v35, 5  ;;  %v3234_v36 = vsel %vm7553_vm9, %v3229_v42, %v8475_v22  ;;  %10219 = vst [vmem:[#allocation6_spill] sm:$0xff] %v8541_v9  ;;  %v3017_v30 = vld [vmem:[#allocation2 + $0x9c] sm:$0xf] }
  0xfc   : > { %7017 = vmatmul.mubr.bf16.gmra.mxu0 %v8435_v54  ;;  %v3244_v53 = vsel %vm7553_vm9, %v3239_v23, %v3243_v39  ;;  %v8539_v50 = vrot.slane %v3279_v52, 5  ;;  %v3285_v28 = vrot.slane %v3283_v37, 4  ;;  %v3258_v54 = vsel %vm7553_vm9, %v3253_v29, %v8505_v27  ;;  %v8552_v42 = vld [vmem:[#allocation2 + $0xa0] sm:$0xf]  ;;  %v8560_v19 = vld [vmem:[#allocation2 + $0xa4] sm:$0x1] }
  0xfd   : > { %7020 = vmatprep.mubr.bf16.mxu0 %v8464_v14  ;;  %7097 = vmatpush3.bf16.msra.mxu0 %v7328_v21  ;;  %v3276_v22 = vor.u32 %v3275_v17, %v3272_v41  ;;  %v3294_v49 = vshrl.u32 %v3014_v34, 16  ;;  %v3297_v13 = vshll.u32 %v3014_v34, 16  ;;  %v3268_v39 = vsel %vm7553_vm9, %v3263_v62, %v3267_v38  ;;  %10220 = vst [vmem:[#allocation7_spill] sm:$0xff] %v8552_v42  ;;  %v3020_v38 = vld [vmem:[#allocation2 + $0xa8] sm:$0xf]  ;;  %v7319_v52 = vld [vmem:[#allocation2 + $0x18] sm:$0xff]  }
  0xfe   : > { %7098 = vmatprep.subr.bf16.mxu0 %v7332_v31  ;;  %v3286_v59 = vor.u32 %v3285_v28, %v8539_v50  ;;  %v3289_v46 = vshll.u32 %v8521_v4, 16  ;;  %v3303_v5 = vshll.u32 %v8525_v26, 16  ;;  %v10221_v14 = vcombine.low %v8028_v32, %v8037_v43  ;;  %10222 = vst [vmem:[#allocation8_spill] sm:$0xff] %v8560_v19  ;;  %v8569_v41 = vld [vmem:[#allocation2 + $0xac] sm:$0xf]  ;;  %v7321_v17 = vld [vmem:[#allocation2 + $0x24] sm:$0xff]  }
  0xff   : > { %v8557_v21 = vrot.slane %v3276_v22, 4  ;;  %v3296_v27 = vrot.slane %v3294_v49, 4  ;;  %v3299_v23 = vrot.slane %v3297_v13, 5  ;;  %v3307_v56 = vshrl.u32 %v8525_v26, 16  ;;  %10223 = vst [vmem:[#allocation9_spill] sm:$0xff] %v8569_v41 }
 0x100   : > { %6897 = vmatmul.mubr.bf16.gmra.mxu1 %v10221_v14  ;;  %v8562_v33 = vcombine.low %v3210_v61, %v3220_v51  ;;  %v8564_v35 = vcombine.low %v3234_v36, %v3244_v53  ;;  %v8566_v34 = vrot.slane %v3303_v5, 5  ;;  %v3318_v29 = vshrl.u32 %v3017_v30, 16  ;;  %v7322_v36 = vld [vmem:[%s10176_s3 + $0x170] sm:$0xff]  }
 0x101   : > { %6964 = vmatprep.mubr.bf16.mxu1 %v7317_v44  ;;  %7099 = vmatpush3.bf16.msra.mxu0 %v7332_v31  ;;  %v3300_v32 = vor.u32 %v3299_v23, %v3296_v27  ;;  %v3309_v43 = vrot.slane %v3307_v56, 4  ;;  %v3313_v37 = vshll.u32 %v8541_v9, 16  ;;  %v3321_v62 = vshll.u32 %v3017_v30, 16  ;;  %v7340_v44 = vld [vmem:[%s10176_s3 + $0x190] sm:$0xff]  }
 0x102   : > { %v8571_v28 = vcombine.low %v3258_v54, %v3268_v39  ;;  %7100 = vmatprep.subr.bf16.mxu0 %v7336_v10  ;;  %v8573_v61 = vrot.slane %v3289_v46, 5  ;;  %v3320_v51 = vrot.slane %v3318_v29, 4  ;;  %v3327_v31 = vshll.u32 %v8552_v42, 16  ;;  %v8589_v49 = vld [vmem:[#allocation2 + $0xb0] sm:$0x1] }
 0x103   : > { %v8586_v30 = vrot.slane %v3286_v59, 4  ;;  %v3310_v54 = vor.u32 %v3309_v43, %v8566_v34  ;;  %v3323_v22 = vrot.slane %v3321_v62, 5  ;;  %10224 = vst [vmem:[#allocation10_spill] sm:$0xff] %v8589_v49  ;;  %v3331_v39 = vshrl.u32 %v8552_v42, 16  ;;  %v3023_v14 = vld [vmem:[#allocation2 + $0xb4] sm:$0xf] }
 0x104   : > { %7021 = vmatmul.mubr.bf16.gmra.mxu0 %v8473_v15  ;;  %v8592_v13 = vrot.slane %v3327_v31, 5  ;;  %v3337_v46 = vshll.u32 %v8560_v19, 16  ;;  %v3342_v5 = vshrl.u32 %v3020_v38, 16  ;;  %v8597_v59 = vrot.slane %v3300_v32, 4  ;;  %v7344_v15 = vld [vmem:[%s10176_s3 + $0x188] sm:$0xff]   ;;  %v301_v19 = vld [vmem:[%s7486_s10 + $0xf8] sm:$0xff] }
 0x105   : > { %7024 = vmatprep.mubr.bf16.mxu0 %v8511_v8  ;;  %7101 = vmatpush3.bf16.msra.mxu0 %v7336_v10  ;;  %v8599_v27 = vrot.slane %v3313_v37, 5  ;;  %v3324_v23 = vor.u32 %v3323_v22, %v3320_v51  ;;  %v3345_v56 = vshll.u32 %v3020_v38, 16  ;;  %v8604_v29 = vld [vmem:[#allocation2 + $0xb8] sm:$0xf]  ;;  %v8606_v43 = vrot.slane %v3310_v54, 4  ;;  %v7325_v10 = vld [vmem:[#allocation2 + $0x3c] sm:$0xff]  }
 0x106   : > { %7102 = vmatprep.subr.bf16.mxu0 %v7340_v44  ;;  %v3333_v62 = vrot.slane %v3331_v39, 4  ;;  %v3344_v31 = vrot.slane %v3342_v5, 4  ;;  %v3351_v8 = vshll.u32 %v8569_v41, 16  ;;  %v8613_v38 = vrot.slane %v3337_v46, 5  ;;  %v8616_v51 = vld [vmem:[#allocation2 + $0xbc] sm:$0x1] }
 0x107   : > { %v3347_v32 = vrot.slane %v3345_v56, 5  ;;  %v3355_v37 = vshrl.u32 %v8569_v41, 16  ;;  %v8622_v54 = vrot.slane %v3324_v23, 4  ;;  %v3361_v46 = vshll.u32 %v8589_v49, 16  ;;  %v7323_v5 = vld [vmem:[#allocation2 + $0x30] sm:$0xff]  }
 0x108   : > { %6965 = vmatmul.mubr.bf16.vlgmr.msra.gmra.mxu1 %v7319_v52  ;;  %v7326_v52 = vld [vmem:[%s10176_s3 + $0x168] sm:$0xff]   ;;  %v3334_v22 = vor.u32 %v3333_v62, %v8592_v13  ;;  %v8625_v39 = vrot.slane %v3351_v8, 5  ;;  %v3366_v53 = vshrl.u32 %v3023_v14, 16  ;;  %v300_v23 = vld [vmem:[%s7486_s10 + $0xf0] sm:$0xff]  ;;  %v3316_v62 = vsel %vm7553_vm9, %v8606_v43, %v8599_v27  ;;  %v470_v42 = vld [vmem:[#allocation2 + $0xc0] sm:$0x1] }
 0x109   : > { %7045 = vmatpush3.bf16.msra.mxu1 %v8383_v16  ;;  %6968 = vmatprep.mubr.bf16.mxu1 %v7321_v17  ;;  %v3306_v16 = vsel %vm7553_vm9, %v8597_v59, %v8566_v34  ;;  %v3348_v17 = vor.u32 %v3347_v32, %v3344_v31  ;;  %v3357_v56 = vrot.slane %v3355_v37, 4  ;;  %v3369_v49 = vshll.u32 %v3023_v14, 16  ;;  %v7330_v34 = vld [vmem:[%s10176_s3 + $0x160] sm:$0xff]   ;;  %v527_v37 = vld [vmem:[#allocation2 + $0xc8] sm:$0xf] }
 0x10a   : > { %7046 = vmatprep.subr.bf16.mxu1 %v7322_v36  ;;  %7103 = vmatpush3.bf16.msra.mxu0 %v7340_v44  ;;  %v3335_v8 = vrot.slane %v3334_v22, 4  ;;  %v3375_v41 = vshll.u32 %v8604_v29, 16  ;;  %v3368_v31 = vrot.slane %v3366_v53, 4  ;;  %v3379_v32 = vshrl.u32 %v8604_v29, 16  ;;  %v7348_v27 = vld [vmem:[%s10176_s3 + $0x180] sm:$0xff]  }
 0x10b   : > { %7104 = vmatprep.subr.bf16.mxu0 %v7344_v15  ;;  %v3349_v44 = vrot.slane %v3348_v17, 4  ;;  %v3358_v59 = vor.u32 %v3357_v56, %v8625_v39  ;;  %v3363_v14 = vrot.slane %v3361_v46, 5  ;;  %v3371_v43 = vrot.slane %v3369_v49, 5 }
 0x10c   : > { %7025 = vmatmul.mubr.bf16.gmra.mxu0 %v8562_v33  ;;  %v8648_v22 = vrot.slane %v3375_v41, 5  ;;  %v3385_v9 = vshll.u32 %v8616_v51, 16  ;;  %v3330_v53 = vsel %vm7553_vm9, %v8622_v54, %v8592_v13  ;;  %v3381_v33 = vrot.slane %v3379_v32, 4 }
 0x10d   : > { %7047 = vmatpush3.bf16.msra.mxu1 %v7322_v36  ;;  %7028 = vmatprep.mubr.bf16.mxu0 %v8564_v35  ;;  %v3340_v36 = vsel %vm7553_vm9, %v3335_v8, %v8613_v38  ;;  %v3359_v17 = vrot.slane %v3358_v59, 4  ;;  %v3354_v41 = vsel %vm7553_vm9, %v3349_v44, %v8625_v39  ;;  %v3372_v49 = vor.u32 %v3371_v43, %v3368_v31  ;;  %v7410_v35 = vld [vmem:[%s10173_s0] ss:$0 sm:$0xff]  ;;  %v3736_v39 = vld [vmem:[#allocation2 + $0x18] sm:$0xe] }
 0x10e   : > { %7048 = vmatprep.subr.bf16.mxu1 %v7326_v52  ;;  %7105 = vmatpush3.bf16.msra.mxu0 %v7344_v15  ;;  %v339_v46 = vmul.f32 %v7410_v35, %v300_v23  ;;  %v340_v56 = vmul.f32 %v7410_v35, %v301_v19  ;;  %v3382_v13 = vor.u32 %v3381_v33, %v8648_v22  ;;  %v3387_v54 = vrot.slane %v3385_v9, 5  ;;  %v8673_v15 = vld [vmem:[%s10176_s3 + $0x238] sm:$0xff]   ;;  %v7411_v9 = vld [vmem:[%s10174_s1] ss:$0 sm:$0xff]  ;;  %v8680_v44 = vld [vmem:[#allocation2 + $0xc] sm:$0xe] }
 0x10f   : > { %v471_v38 = vsel %vm7489_vm4, 0, %v470_v42  ;;  %v528_v8 = vsel %vm7499_vm5, 0, %v527_v37  ;;  %7106 = vmatprep.subr.bf16.mxu0 %v7348_v27  ;;  %v3364_v19 = vsel %vm7553_vm9, %v3359_v17, %v3363_v14  ;;  %v10226_v59 = vsel %vm7553_vm9, %v8557_v21, %v8539_v50  ;;  %v7327_v35 = vld [vmem:[#allocation2 + $0x48] sm:$0xff]   ;;  %v10227_v21 = vld [vmem:[#allocation4_spill] sm:$0xff] }
 0x110   : > { %6969 = vmatmul.mubr.bf16.gmra.mxu1 %v7323_v5  ;;  %v3373_v5 = vrot.slane %v3372_v49, 4  ;;  %v378_v42 = vadd.f32 %v7411_v9, %v339_v46  ;;  %v379_v23 = vadd.f32 %v7411_v9, %v340_v56  ;;  %472 = vst [vmem:[#allocation2 + $0xc0] sm:$0x1] %v471_v38  ;;  %529 = vst [vmem:[#allocation2 + $0xc8] sm:$0xf] %v528_v8  ;;  %v3383_v37 = vrot.slane %v3382_v13, 4 }
 0x111   : > { %6972 = vmatprep.mubr.bf16.mxu1 %v7325_v10  ;;  %7049 = vmatpush3.bf16.msra.mxu1 %v7326_v52  ;;  %v7334_v10 = vld [vmem:[%s10176_s3 + $0x158] sm:$0xff]   ;;  %v10225_v52 = vsel %vm7553_vm9, %v8586_v30, %v8573_v61  ;;  %v8695_v32 = vcombine.low %v3306_v16, %v3316_v62  ;;  %v8697_v14 = vcombine.low %v3330_v53, %v3340_v36  ;;  %v6361_v33 = vrot.slane %v3736_v39, 9  ;;  %v3737_v49 = vld [vmem:[#allocation2 + $0x24] sm:$0xe] }
 0x112   : > { %7050 = vmatprep.subr.bf16.mxu1 %v7330_v34  ;;  %v6346_v31 = vcombine.low %v10226_v59, %v10225_v52  ;;  %v410_v43 = vmax.f32 %v378_v42, 0.0  ;;  %v411_v17 = vmax.f32 %v379_v23, 0.0  ;;  %7107 = vmatpush3.bf16.msra.mxu0 %v7348_v27  ;;  %v8699_v46 = vcombine.low %v3354_v41, %v3364_v19  ;;  %v7329_v16 = vld [vmem:[#allocation2 + $0x54] sm:$0xff]   ;;  %v8714_v41 = vld [vmem:[#allocation2 + $0x10] sm:$0xf]  ;;  %v10228_v42 = vld [vmem:[#allocation5_spill] sm:$0xff] }
 0x113   : > { %v3378_v61 = vsel %vm7553_vm9, %v3373_v5, %v8648_v22  ;;  %v6360_v50 = vrot.slane %v8680_v44, 9  ;;  %v3808_v30 = vrot.slane %v10227_v21, 5  ;;  %7188 = vmatprep.subr.bf16.mxu0 %v8673_v15  ;;  %v3388_v62 = vsel %vm7553_vm9, %v3383_v37, %v3387_v54  ;;  %v7338_v22 = vld [vmem:[%s10176_s3 + $0x150] sm:$0xff]   ;;  %v3739_v52 = vld [vmem:[#allocation2 + $0x3c] sm:$0xe]  ;;  %v7360_v44 = vld [vmem:[%s10176_s3 + $0x228] sm:$0xff]  }
 0x114   : > { %7029 = vmatmul.mubr.bf16.gmra.mxu0 %v8571_v28  ;;  %v6586_v27 = vpack.c.bf16 %v410_v43, %v410_v43  ;;  %v6587_v53 = vpack.c.bf16 %v411_v17, %v411_v17  ;;  %v3811_v36 = vrot.slane %v8291_v25, 5  ;;  %v3801_v56 = vrot.slane %v8714_v41, 5  ;;  %v3738_v54 = vld [vmem:[#allocation2 + $0x30] sm:$0xe] }
 0x115   : > { %7051 = vmatpush3.bf16.msra.mxu1 %v7330_v34  ;;  %7032 = vmatprep.mubr.bf16.mxu0 %v6346_v31  ;;  %v8719_v28 = vsel %vm7976_vm13, %v6361_v33, %v3808_v30  ;;  %v3810_v34 = vrot.slane %v3808_v30, 4  ;;  %v6362_v13 = vrot.slane %v3737_v49, 9  ;;  %v8721_v19 = vcombine.low %v3378_v61, %v3388_v62  ;;  %v7342_v33 = vld [vmem:[%s10176_s3 + $0x148] sm:$0xff]  }
 0x116   : > { %7052 = vmatprep.subr.bf16.mxu1 %v7334_v10  ;;  %v887_v38 = vshrl.u32 %v6586_v27, 16  ;;  %v890_v8 = vshll.u32 %v6586_v27, 16  ;;  %v895_v25 = vshrl.u32 %v6587_v53, 16  ;;  %v898_v39 = vshll.u32 %v6587_v53, 16  ;;  %v3740_v27 = vld [vmem:[#allocation2 + $0x48] sm:$0xe] }
 0x117   : > { %v8725_v5 = vsel %vm7976_vm13, %v3810_v34, %v3811_v36  ;;  %v3815_v9 = vrot.slane %v8298_v45, 5  ;;  %v3818_v23 = vrot.slane %v10228_v42, 5  ;;  %v1057_v37 = vld [vmem:[#allocation2 + $0xc0] sm:$0xf]  ;;  %v6363_v17 = vrot.slane %v3738_v54, 9 }
 0x118   : > { %6973 = vmatmul.mubr.bf16.gmra.mxu1 %v7327_v35  ;;  %v889_v59 = vrot.slane %v887_v38, 7  ;;  %v897_v31 = vrot.slane %v895_v25, 7  ;;  %v6393_v43 = vcombine.low %v8719_v28, %v8725_v5  ;;  %v1061_v49 = vld [vmem:[#allocation2 + $0xc8] sm:$0x1]  ;;  %v3825_v61 = vrot.slane %v8342_v57, 5  ;;  %v7331_v53 = vld [vmem:[#allocation2 + $0x60] sm:$0xff]  }
 0x119   : > { %6976 = vmatprep.mubr.bf16.mxu1 %v7329_v16  ;;  %7053 = vmatpush3.bf16.msra.mxu1 %v7334_v10  ;;  %v8736_v45 = vsel %vm7976_vm13, %v6362_v13, %v3815_v9  ;;  %v3817_v35 = vrot.slane %v3815_v9, 4  ;;  %v3822_v10 = vrot.slane %v8327_v24, 5  ;;  %v6364_v54 = vrot.slane %v3739_v52, 9  ;;  %v7333_v38 = vld [vmem:[#allocation2 + $0x6c] sm:$0xff]   ;;  %v3741_v9 = vld [vmem:[#allocation2 + $0x54] sm:$0xe] }
 0x11a   : > { %7054 = vmatprep.subr.bf16.mxu1 %v7338_v22  ;;  %v892_v21 = vor.u32 %v890_v8, %v889_v59  ;;  %v893_v30 = vrot.slane %v889_v59, 4  ;;  %v900_v16 = vor.u32 %v898_v39, %v897_v31  ;;  %v902_v62 = vrot.slane %v897_v31, 4  ;;  %v3742_v52 = vld [vmem:[#allocation2 + $0x60] sm:$0xe]  ;;  %v8803_v24 = vld [vmem:[#allocation2 + $0x14] sm:$0x1] }
 0x11b   : > { %v8742_v36 = vsel %vm7976_vm13, %v3817_v35, %v3818_v23  ;;  %v8746_v34 = vsel %vm7976_vm13, %v6363_v17, %v3822_v10  ;;  %v3824_v13 = vrot.slane %v3822_v10, 4  ;;  %v3829_v39 = vrot.slane %v8349_v55, 5  ;;  %v3743_v10 = vld [vmem:[#allocation2 + $0x6c] sm:$0xe] }
 0x11c   : > { %7033 = vmatmul.mubr.bf16.gmra.mxu0 %v8695_v32  ;;  %v901_v57 = vsel %vm7566_vm10, %v893_v30, %v900_v16  ;;  %v1058_v8 = vsel %vm7499_vm5, %v892_v21, %v1057_v37  ;;  %v1062_v25 = vsel %vm7489_vm4, %v902_v62, %v1061_v49  ;;  %v7346_v32 = vld [vmem:[%s10176_s3 + $0x140] sm:$0xff]   ;;  %v3832_v55 = vrot.slane %v8363_v2, 5  ;;  %v7359_v28 = vld [vmem:[%s10176_s3 + $0x1e8] sm:$0xff]  }
 0x11d   : > { %7055 = vmatpush3.bf16.msra.mxu1 %v7338_v22  ;;  %7036 = vmatprep.mubr.bf16.mxu0 %v8697_v14  ;;  %1059 = vst [vmem:[#allocation2 + $0xc0] sm:$0xf] %v1058_v8  ;;  %1060 = vst [vmem:[#allocation2 + $0xc4] sm:$0xf] %v901_v57  ;;  %v6394_v22 = vcombine.low %v8736_v45, %v8742_v36  ;;  %v8764_v42 = vsel %vm7976_vm13, %v3824_v13, %v3825_v61  ;;  %v6365_v23 = vrot.slane %v3740_v27, 9 }
 0x11e   : > { %7056 = vmatprep.subr.bf16.mxu1 %v7342_v33  ;;  %1063 = vst [vmem:[#allocation2 + $0xc8] sm:$0x1] %v1062_v25  ;;  %v8771_v59 = vsel %vm7976_vm13, %v6364_v54, %v3829_v39  ;;  %v3831_v31 = vrot.slane %v3829_v39, 4  ;;  %v3836_v37 = vrot.slane %v8371_v1, 5  ;;  %v3839_v17 = vrot.slane %v8393_v48, 5  ;;  %v8788_v48 = vld [vmem:[%s10176_s3 + $0x1f8] sm:$0xff]  }
 0x11f   : > { %v6366_v49 = vrot.slane %v3741_v9, 9  ;;  %v3843_v35 = vrot.slane %v8395_v3, 5  ;;  %v3846_v2 = vrot.slane %v8411_v20, 5  ;;  %v6367_v30 = vrot.slane %v3742_v52, 9  ;;  %v7335_v54 = vld [vmem:[#allocation2 + $0x78] sm:$0xff]  }
 0x120   : > { %6977 = vmatmul.mubr.bf16.gmra.mxu1 %v7331_v53  ;;  %v8779_v61 = vsel %vm7976_vm13, %v3831_v31, %v3832_v55  ;;  %v8783_v21 = vsel %vm7976_vm13, %v6365_v23, %v3836_v37  ;;  %v3838_v1 = vrot.slane %v3836_v37, 4  ;;  %v3850_v16 = vrot.slane %v8417_v7, 5  ;;  %v3744_v39 = vld [vmem:[#allocation2 + $0x78] sm:$0xe]  ;;  %v5376_v14 = vld [vmem:[#allocation2 + $0x30] sm:$0xe] }
 0x121   : > { %6980 = vmatprep.mubr.bf16.mxu1 %v7333_v38  ;;  %7057 = vmatpush3.bf16.msra.mxu1 %v7342_v33  ;;  %v8794_v20 = vsel %vm7976_vm13, %v6366_v49, %v3843_v35  ;;  %v3845_v33 = vrot.slane %v3843_v35, 4  ;;  %v3853_v27 = vrot.slane %v8437_v12, 5  ;;  %v6368_v53 = vrot.slane %v3743_v10, 9  ;;  %v7337_v38 = vld [vmem:[#allocation2 + $0x84] sm:$0xff]   ;;  %v7365_v3 = vld [vmem:[#allocation2 + $0x78] sm:$0xff]  }
 0x122   : > { %7058 = vmatprep.subr.bf16.mxu1 %v7346_v32  ;;  %v8799_v62 = vsel %vm7976_vm13, %v3838_v1, %v3839_v17  ;;  %v3857_v13 = vrot.slane %v8446_v58, 5  ;;  %v3804_v57 = vrot.slane %v8803_v24, 5  ;;  %v3852_v25 = vrot.slane %v3850_v16, 4  ;;  %v7354_v24 = vld [vmem:[#allocation2 + $0x3c] sm:$0xff]  }
 0x123   : > { %v8810_v7 = vsel %vm7976_vm13, %v3845_v33, %v3846_v2  ;;  %v8821_v23 = vsel %vm7976_vm13, %v6367_v30, %v3850_v16  ;;  %v3860_v10 = vrot.slane %v8453_v18, 5  ;;  %v6369_v55 = vrot.slane %v3744_v39, 9 }
 0x124   : > { %7037 = vmatmul.mubr.bf16.gmra.mxu0 %v8699_v46  ;;  %v3026_v12 = vld [vmem:[#allocation2 + $0xc0] sm:$0xf]  ;;  %v8813_v9 = vld [vmem:[#allocation2 + $0xc4] sm:$0xf]  ;;  %v8825_v52 = vsel %vm7976_vm13, %v6368_v53, %v3857_v13  ;;  %v8834_v35 = vsel %vm7976_vm13, %v3852_v25, %v3853_v27  ;;  %v3859_v2 = vrot.slane %v3857_v13, 4  ;;  %v3864_v13 = vrot.slane %v8467_v63, 5 }
 0x125   : > { %v8815_v58 = vld [vmem:[#allocation2 + $0xc8] sm:$0x1]  ;;  %7059 = vmatpush3.bf16.msra.mxu1 %v7346_v32  ;;  %7040 = vmatprep.mubr.bf16.mxu0 %v8721_v19  ;;  %v3390_v46 = vshrl.u32 %v3026_v12, 16  ;;  %v3393_v31 = vshll.u32 %v3026_v12, 16  ;;  %v3399_v37 = vshll.u32 %v8813_v9, 16  ;;  %v3403_v17 = vshrl.u32 %v8813_v9, 16 }
 0x126   : > { %7140 = vmatprep.subr.bf16.mxu1 %v8788_v48  ;;  %v3745_v32 = vld [vmem:[#allocation2 + $0x84] sm:$0xe]  ;;  %v3409_v49 = vshll.u32 %v8815_v58, 16  ;;  %v8841_v12 = vsel %vm7976_vm13, %v3859_v2, %v3860_v10  ;;  %v8851_v39 = vsel %vm7976_vm13, %v6369_v55, %v3864_v13  ;;  %v3866_v10 = vrot.slane %v3864_v13, 4  ;;  %v10234_v53 = vld [vmem:[#allocation10_spill] sm:$0xff] }
 0x127   : > { %v3392_v19 = vrot.slane %v3390_v46, 4  ;;  %v3395_v1 = vrot.slane %v3393_v31, 5  ;;  %v3401_v30 = vrot.slane %v3399_v37, 5  ;;  %v3405_v33 = vrot.slane %v3403_v17, 4  ;;  %v7339_v17 = vld [vmem:[#allocation2 + $0x90] sm:$0xff]   ;;  %v7347_v41 = vld [vmem:[#allocation2 + $0xc0] sm:$0xff]  }
 0x128   : > { %6981 = vmatmul.mubr.bf16.gmra.mxu1 %v7335_v54  ;;  %v3411_v16 = vrot.slane %v3409_v49, 5  ;;  %v3746_v54 = vld [vmem:[#allocation2 + $0x90] sm:$0xe]  ;;  %v3867_v46 = vrot.slane %v8478_v0, 5  ;;  %v3871_v31 = vrot.slane %v8500_v40, 5  ;;  %v3874_v37 = vrot.slane %v8521_v4, 5 }
 0x129   : > { %6984 = vmatprep.mubr.bf16.mxu1 %v7337_v38  ;;  %v3396_v27 = vor.u32 %v3395_v1, %v3392_v19  ;;  %v3406_v25 = vor.u32 %v3405_v33, %v3401_v30  ;;  %v6370_v38 = vrot.slane %v3745_v32, 9  ;;  %v7341_v19 = vld [vmem:[#allocation2 + $0x9c] sm:$0xff]   ;;  %v6371_v0 = vrot.slane %v3746_v54, 9 }
 0x12a   : > { %v3873_v1 = vrot.slane %v3871_v31, 4  ;;  %v3878_v32 = vrot.slane %v8525_v26, 5  ;;  %v3747_v40 = vld [vmem:[#allocation2 + $0x9c] sm:$0xe]  ;;  %v8864_v55 = vsel %vm7976_vm13, %v3866_v10, %v3867_v46  ;;  %v3750_v8 = vld [vmem:[#allocation2 + $0xc0] sm:$0xe] }
 0x12b   : > { %v3397_v49 = vrot.slane %v3396_v27, 4  ;;  %v3407_v2 = vrot.slane %v3406_v25, 4  ;;  %v8855_v63 = vsel %vm7976_vm13, %v6370_v38, %v3871_v31  ;;  %v7349_v27 = vld [vmem:[#allocation2 + $0x18] sm:$0xff]   ;;  %v10230_v25 = vld [vmem:[#allocation6_spill] sm:$0xff]  ;;  %v3748_v38 = vld [vmem:[#allocation2 + $0xa8] sm:$0xe] }
 0x12c   : > { %v3881_v13 = vrot.slane %v10230_v25, 5  ;;  %v8871_v26 = vsel %vm7976_vm13, %v3873_v1, %v3874_v37  ;;  %v3880_v31 = vrot.slane %v3878_v32, 4  ;;  %v6373_v37 = vrot.slane %v3748_v38, 9  ;;  %v10233_v1 = vld [vmem:[#allocation9_spill] sm:$0xff]  ;;  %v5375_v46 = vld [vmem:[#allocation2 + $0x24] sm:$0xe] }
 0x12d   : > { %v3402_v4 = vsel %vm7553_vm9, %v3397_v49, %v3401_v30  ;;  %v3412_v33 = vsel %vm7553_vm9, %v3407_v2, %v3411_v16  ;;  %v8875_v30 = vsel %vm7976_vm13, %v6371_v0, %v3878_v32  ;;  %v3749_v16 = vld [vmem:[#allocation2 + $0xb4] sm:$0xe]  ;;  %v6372_v49 = vrot.slane %v3747_v40, 9  ;;  %v10231_v2 = vld [vmem:[#allocation7_spill] sm:$0xff] }
 0x12e   : > { %v6351_v18 = vcombine.low %v3402_v4, %v3412_v33  ;;  %v3885_v10 = vrot.slane %v10231_v2, 5  ;;  %v473_v4 = vld [vmem:[#allocation2 + $0xcc] sm:$0x1]  ;;  %v10232_v33 = vld [vmem:[#allocation8_spill] sm:$0xff]  ;;  %v3892_v54 = vrot.slane %v10233_v1, 5  ;;  %v3895_v0 = vrot.slane %v10234_v53, 5 }
 0x12f   : > { %v3888_v25 = vrot.slane %v10232_v33, 5  ;;  %v7343_v2 = vld [vmem:[#allocation2 + $0xa8] sm:$0xff]   ;;  %v3803_v6 = vrot.slane %v3801_v56, 4  ;;  %v3909_v1 = vrot.slane %v8815_v58, 5 }
 0x130   : > { %6985 = vmatmul.mubr.bf16.gmra.mxu1 %v7339_v17  ;;  %7041 = vmatmul.mubr.bf16.gmra.mxu0 %v6351_v18  ;;  %v8885_v17 = vsel %vm7976_vm13, %v3880_v31, %v3881_v13  ;;  %v8889_v32 = vsel %vm7976_vm13, %v6372_v49, %v3885_v10  ;;  %v3887_v40 = vrot.slane %v3885_v10, 4  ;;  %v8895_v38 = vsel %vm7976_vm13, %v6373_v37, %v3892_v54  ;;  %v7345_v10 = vld [vmem:[#allocation2 + $0xb4] sm:$0xff]   ;;  %v7350_v33 = vld [vmem:[#allocation2 + $0x24] sm:$0xff]  }
 0x131   : > { %6988 = vmatprep.mubr.bf16.mxu1 %v7341_v19  ;;  %7108 = vmatprep.mubr.bf16.mxu0 %v7349_v27  ;;  %v6374_v19 = vrot.slane %v3749_v16, 9  ;;  %v3894_v53 = vrot.slane %v3892_v54, 4  ;;  %v3899_v27 = vrot.slane %v8604_v29, 5  ;;  %v3902_v31 = vrot.slane %v8616_v51, 5  ;;  %v7353_v51 = vld [vmem:[#allocation2 + $0x30] sm:$0xff]  }
 0x132   : > { %v8900_v13 = vsel %vm7976_vm13, %v3887_v40, %v3888_v25  ;;  %v474_v16 = vsel %vm7489_vm4, 0, %v473_v4  ;;  %v6375_v49 = vrot.slane %v3750_v8, 9  ;;  %v3906_v4 = vrot.slane %v8813_v9, 5  ;;  %v4624_v37 = vld [vmem:[#allocation2 + $0x28] sm:$0xf]  ;;  %v7372_v18 = vld [vmem:[%s10176_s3 + $0x210] sm:$0xff]  }
 0x133   : > { %v8909_v54 = vsel %vm7976_vm13, %v3894_v53, %v3895_v0  ;;  %v8913_v29 = vsel %vm7976_vm13, %v6374_v19, %v3899_v27  ;;  %v3901_v25 = vrot.slane %v3899_v27, 4  ;;  %475 = vst [vmem:[#allocation2 + $0xcc] sm:$0x1] %v474_v16  ;;  %v7356_v0 = vld [vmem:[%s10176_s3 + $0x230] sm:$0xff]   ;;  %v3802_v9 = vsel %vm7976_vm13, %v6360_v50, %v3801_v56  ;;  %v4620_v16 = vld [vmem:[#allocation2 + $0x18] sm:$0xf] }
 0x134   : > { %v8932_v53 = vsel %vm7976_vm13, %v6375_v49, %v3906_v4  ;;  %v3908_v27 = vrot.slane %v3906_v4, 4  ;;  %v3805_v58 = vsel %vm7976_vm13, %v3803_v6, %v3804_v57  ;;  %v7364_v57 = vld [vmem:[%s10176_s3 + $0x220] sm:$0xff]   ;;  %v4621_v49 = vld [vmem:[#allocation2 + $0x1c] sm:$0xf] }
 0x135   : > { %v8926_v40 = vsel %vm7976_vm13, %v3901_v25, %v3902_v31  ;;  %v6392_v56 = vcombine.low %v3802_v9, %v3805_v58  ;;  %v8954_v31 = vpop.f32.mrf.mxu0  ;;  %v4672_v25 = vshll.u32 %v4620_v16, 16  ;;  %v7368_v6 = vld [vmem:[%s10176_s3 + $0x218] sm:$0xff]   ;;  %v5440_v4 = vrot.slane %v4621_v49, 5  ;;  %v4623_v58 = vld [vmem:[#allocation2 + $0x24] sm:$0xf] }
 0x136   : > { %10235 = vst [vmem:[#allocation4_spill] sm:$0xff] %v8954_v31 }
 0x137   : > { %v5442_v50 = vrot.slane %v5440_v4, 4 }
 0x138   : > { %6989 = vmatmul.mubr.bf16.gmra.mxu1 %v7343_v2  ;;  %7109 = vmatmul.mubr.bf16.vlgmr.msra.gmra.mxu0 %v7350_v33  ;;  %v8947_v2 = vsel %vm7976_vm13, %v3908_v27, %v3909_v1  ;;  %v4669_v33 = vshrl.u32 %v4620_v16, 16  ;;  %v4678_v1 = vshll.u32 %v4621_v49, 16  ;;  %v4622_v27 = vld [vmem:[#allocation2 + $0x20] sm:$0x1]  ;;  %v4674_v16 = vrot.slane %v4672_v25, 5 }
 0x139   : > { %6992 = vmatprep.mubr.bf16.mxu1 %v7345_v10  ;;  %7189 = vmatpush3.bf16.msra.mxu0 %v8673_v15  ;;  %v7357_v15 = vld [vmem:[#allocation2 + $0x48] sm:$0xff]   ;;  %v8959_v10 = vpop.f32.mrf.mxu0  ;;  %v5443_v19 = vrot.slane %v4622_v27, 5 }
 0x13a   : > { %7112 = vmatprep.mubr.bf16.mxu0 %v7353_v51  ;;  %7190 = vmatprep.subr.bf16.mxu0 %v7356_v0  ;;  %10236 = vst [vmem:[#allocation5_spill] sm:$0xff] %v8959_v10  ;;  %v5374_v51 = vld [vmem:[#allocation2 + $0x18] sm:$0xe]  ;;  %v8969_v8 = vrot.slane %v4678_v1, 5  ;;  %v8983_v1 = vld [vmem:[#allocation2 + $0x2c] sm:$0x1] }
 0x13b   : > { %v8964_v9 = vpop.f32.mrf.mxu0  ;;  %v8994_v45 = vsel %vm7976_vm13, %v5442_v50, %v5443_v19  ;;  %v9003_v19 = vld [vmem:[#allocation2 + $0x34] sm:$0xf]  ;;  %v4631_v10 = vld [vmem:[#allocation2 + $0x44] sm:$0x1] }
 0x13c   : > { %10237 = vst [vmem:[#allocation3_spill] sm:$0xff] %v8964_v9 }
 0x13d   : > { %7191 = vmatpush3.bf16.msra.mxu0 %v7356_v0  ;;  %v4682_v0 = vshrl.u32 %v4621_v49, 16  ;;  %v8981_v25 = vpop.f32.mrf.mxu0 }
 0x13e   : > { %7192 = vmatprep.subr.bf16.mxu0 %v7360_v44  ;;  %10238 = vst [vmem:[#allocation6_spill] sm:$0xff] %v8981_v25  ;;  %v9015_v25 = vpop.f32.mrf.mxu1 }
 0x13f   : > { %v4684_v49 = vrot.slane %v4682_v0, 4  ;;  %v4706_v0 = vshrl.u32 %v4624_v37, 16  ;;  %10241 = vst [vmem:[#allocation8_spill] sm:$0xff] %v9015_v25  ;;  %v7366_v25 = vld [vmem:[#allocation2 + $0x84] sm:$0xff]  }
 0x140   : > { %6993 = vmatmul.mubr.bf16.gmra.mxu1 %v7347_v41  ;;  %7113 = vmatmul.mubr.bf16.gmra.mxu0 %v7354_v24  ;;  %v7355_v41 = vld [vmem:[%s10176_s3 + $0x1f0] sm:$0xff]   ;;  %v6496_v24 = vrot.slane %v5374_v51, 9  ;;  %v4693_v51 = vshrl.u32 %v4623_v58, 16 }
 0x141   : > { %7060 = vmatprep.mubr.bf16.mxu1 %v6392_v56  ;;  %7116 = vmatprep.mubr.bf16.mxu0 %v7357_v15  ;;  %v7361_v56 = vld [vmem:[#allocation2 + $0x60] sm:$0xff]   ;;  %v4671_v15 = vrot.slane %v4669_v33, 4  ;;  %v4696_v33 = vshll.u32 %v4623_v58, 16  ;;  %v4685_v36 = vor.u32 %v4684_v49, %v8969_v8  ;;  %v6497_v58 = vrot.slane %v5375_v46, 9  ;;  %v4626_v49 = vld [vmem:[#allocation2 + $0x30] sm:$0xf] }
 0x142   : > { %7193 = vmatpush3.bf16.msra.mxu0 %v7360_v44  ;;  %v7358_v44 = vld [vmem:[#allocation2 + $0x54] sm:$0xff]   ;;  %v8990_v5 = vsel %vm7976_vm13, %v6496_v24, %v5440_v4  ;;  %v5450_v24 = vrot.slane %v8983_v1, 5  ;;  %v7363_v46 = vld [vmem:[%s10176_s3 + $0x1e0] sm:$0xff]  }
 0x143   : > { %7194 = vmatprep.subr.bf16.mxu0 %v7364_v57 }
 0x146   : > { %7195 = vmatpush3.bf16.msra.mxu0 %v7364_v57  ;;  %v5447_v57 = vrot.slane %v4624_v37, 5 }
 0x147   : > { %7196 = vmatprep.subr.bf16.mxu0 %v7368_v6 }
 0x148   : > { %7061 = vmatmul.mubr.bf16.vlgmr.msra.gmra.mxu1 %v6393_v43  ;;  %7117 = vmatmul.mubr.bf16.gmra.mxu0 %v7358_v44  ;;  %v4675_v43 = vor.u32 %v4674_v16, %v4671_v15  ;;  %v7376_v44 = vld [vmem:[%s10176_s3 + $0x208] sm:$0xff]   ;;  %v5449_v4 = vrot.slane %v5447_v57, 4  ;;  %v4695_v15 = vrot.slane %v4693_v51, 4  ;;  %v4708_v16 = vrot.slane %v4706_v0, 4 }
 0x149   : > { %7141 = vmatpush3.bf16.msra.mxu1 %v8788_v48  ;;  %7064 = vmatprep.mubr.bf16.mxu1 %v6394_v22  ;;  %v4702_v48 = vshll.u32 %v4624_v37, 16  ;;  %v4688_v22 = vshll.u32 %v4622_v27, 16  ;;  %v4698_v37 = vrot.slane %v4696_v33, 5  ;;  %v4686_v51 = vrot.slane %v4685_v36, 4  ;;  %v4629_v36 = vld [vmem:[#allocation2 + $0x3c] sm:$0xf] }
 0x14a   : > { %7142 = vmatprep.subr.bf16.mxu1 %v7355_v41  ;;  %7120 = vmatprep.mubr.bf16.mxu0 %v7361_v56  ;;  %v9001_v56 = vpop.f32.mrf.mxu0  ;;  %v4676_v50 = vrot.slane %v4675_v43, 4  ;;  %v7380_v43 = vld [vmem:[%s10176_s3 + $0x200] sm:$0xff]  }
 0x14b   : > { %7197 = vmatpush3.bf16.msra.mxu0 %v7368_v6  ;;  %v7362_v6 = vld [vmem:[#allocation2 + $0x6c] sm:$0xff]   ;;  %10239 = vst [vmem:[#allocation7_spill] sm:$0xff] %v9001_v56  ;;  %v9008_v27 = vrot.slane %v4702_v48, 5  ;;  %v4690_v33 = vrot.slane %v4688_v22, 5  ;;  %v10240_v56 = vcombine.low %v8746_v34, %v8764_v42  ;;  %v9026_v48 = vsel %vm7976_vm13, %v5449_v4, %v5450_v24  ;;  %v7367_v4 = vld [vmem:[%s10176_s3 + $0x1d8] sm:$0xff]  }
 0x14c   : > { %7198 = vmatprep.subr.bf16.mxu0 %v7372_v18  ;;  %v4699_v0 = vor.u32 %v4698_v37, %v4695_v15  ;;  %v10242_v34 = vcombine.low %v8771_v59, %v8779_v61  ;;  %v9031_v42 = vpop.f32.mrf.mxu0  ;;  %v4717_v22 = vshrl.u32 %v4626_v49, 16  ;;  %v4681_v59 = vsel %vm7553_vm9, %v4676_v50, %v8969_v8 }
 0x14d   : > { %7143 = vmatpush3.bf16.msra.mxu1 %v7355_v41  ;;  %10243 = vst [vmem:[#allocation9_spill] sm:$0xff] %v9031_v42  ;;  %v4726_v41 = vshll.u32 %v9003_v19, 16  ;;  %v4709_v61 = vor.u32 %v4708_v16, %v9008_v27  ;;  %v6498_v24 = vrot.slane %v5376_v14, 9  ;;  %v4691_v15 = vsel %vm7553_vm9, %v4686_v51, %v4690_v33  ;;  %v9051_v42 = vpop.f32.mrf.mxu1 }
 0x14e   : > { %7144 = vmatprep.subr.bf16.mxu1 %v7359_v28  ;;  %10244 = vst [vmem:[#allocation10_spill] sm:$0xff] %v9051_v42  ;;  %v9053_v8 = vrot.slane %v4699_v0, 4  ;;  %v5454_v14 = vrot.slane %v9003_v19, 5  ;;  %v4719_v50 = vrot.slane %v4717_v22, 4  ;;  %v7371_v0 = vld [vmem:[%s10176_s3 + $0x1d0] sm:$0xff]   ;;  %v9065_v37 = vcombine.low %v4681_v59, %v4691_v15 }
 0x14f   : > { %7199 = vmatpush3.bf16.msra.mxu0 %v7372_v18  ;;  %v9022_v18 = vsel %vm7976_vm13, %v6497_v58, %v5447_v57  ;;  %v4730_v57 = vshrl.u32 %v9003_v19, 16  ;;  %v9035_v58 = vld [vmem:[#allocation2 + $0x40] sm:$0xf]  ;;  %v9060_v51 = vrot.slane %v4726_v41, 5  ;;  %v9067_v19 = vrot.slane %v4709_v61, 4  ;;  %v7369_v22 = vld [vmem:[#allocation2 + $0x90] sm:$0xff]  }
 0x150   : > { %7065 = vmatmul.mubr.bf16.gmra.mxu1 %v10240_v56  ;;  %7200 = vmatprep.subr.bf16.mxu0 %v7376_v44  ;;  %v4720_v56 = vshll.u32 %v4626_v49, 16  ;;  %v4741_v49 = vshrl.u32 %v4629_v36, 16  ;;  %v9076_v41 = vsel %vm7976_vm13, %v6498_v24, %v5454_v14  ;;  %v4632_v59 = vld [vmem:[#allocation2 + $0x48] sm:$0xf]  ;;  %v10246_v61 = vcombine.low %v8783_v21, %v8799_v62 }
 0x151   : > { %7068 = vmatprep.mubr.bf16.mxu1 %v10242_v34  ;;  %7145 = vmatpush3.bf16.msra.mxu1 %v7359_v28  ;;  %v4712_v28 = vshll.u32 %v8983_v1, 16  ;;  %v4744_v34 = vshll.u32 %v4629_v36, 16  ;;  %v4754_v1 = vshrl.u32 %v9035_v58, 16  ;;  %v4732_v33 = vrot.slane %v4730_v57, 4  ;;  %v5377_v36 = vld [vmem:[#allocation2 + $0x3c] sm:$0xe] }
 0x152   : > { %7121 = vmatmul.mubr.bf16.gmra.mxu0 %v7362_v6  ;;  %7146 = vmatprep.subr.bf16.mxu1 %v7363_v46  ;;  %v9049_v6 = vld [vmem:[#allocation2 + $0x38] sm:$0x1]  ;;  %v4722_v16 = vrot.slane %v4720_v56, 5  ;;  %v5461_v56 = vrot.slane %v9035_v58, 5  ;;  %v4743_v57 = vrot.slane %v4741_v49, 4  ;;  %v5456_v15 = vrot.slane %v5454_v14, 4 }
 0x153   : > { %7124 = vmatprep.mubr.bf16.mxu0 %v7365_v3  ;;  %7201 = vmatpush3.bf16.msra.mxu0 %v7376_v44  ;;  %v4750_v3 = vshll.u32 %v9035_v58, 16  ;;  %v9058_v44 = vpop.f32.mrf.mxu0  ;;  %v9069_v42 = vrot.slane %v4712_v28, 5  ;;  %v4746_v9 = vrot.slane %v4744_v34, 5  ;;  %v9082_v28 = vpop.f32.mrf.mxu1  ;;  %v4756_v31 = vrot.slane %v4754_v1, 4 }
 0x154   : > { %7202 = vmatprep.subr.bf16.mxu0 %v7380_v43  ;;  %10245 = vst [vmem:[#allocation11_spill] sm:$0xff] %v9058_v44  ;;  %v9072_v44 = vld [vmem:[#allocation2 + $0x4c] sm:$0xf]  ;;  %10247 = vst [vmem:[#allocation12_spill] sm:$0xff] %v9082_v28  ;;  %v10248_v58 = vcombine.low %v8794_v20, %v8810_v7  ;;  %v4723_v21 = vor.u32 %v4722_v16, %v4719_v50  ;;  %v4733_v62 = vor.u32 %v4732_v33, %v9060_v51 }
 0x155   : > { %7147 = vmatpush3.bf16.msra.mxu1 %v7363_v46  ;;  %v5457_v46 = vrot.slane %v9049_v6, 5  ;;  %v9088_v24 = vrot.slane %v4750_v3, 5  ;;  %v9093_v49 = vpop.f32.mrf.mxu0  ;;  %v4736_v34 = vshll.u32 %v9049_v6, 16  ;;  %v4768_v14 = vshll.u32 %v4632_v59, 16  ;;  %v9102_v16 = vpop.f32.mrf.mxu1 }
 0x156   : > { %7148 = vmatprep.subr.bf16.mxu1 %v7367_v4  ;;  %10249 = vst [vmem:[#allocation13_spill] sm:$0xff] %v9093_v49  ;;  %v4774_v20 = vshll.u32 %v9072_v44, 16  ;;  %v4778_v7 = vshrl.u32 %v9072_v44, 16  ;;  %v5464_v3 = vrot.slane %v4631_v10, 5  ;;  %v4747_v1 = vor.u32 %v4746_v9, %v4743_v57  ;;  %10250 = vst [vmem:[#allocation14_spill] sm:$0xff] %v9102_v16 }
 0x157   : > { %7203 = vmatpush3.bf16.msra.mxu0 %v7380_v43  ;;  %v4705_v43 = vsel %vm7553_vm9, %v9053_v8, %v9008_v27  ;;  %v7375_v27 = vld [vmem:[%s10176_s3 + $0x1c8] sm:$0xff]   ;;  %v4765_v8 = vshrl.u32 %v4632_v59, 16  ;;  %v4760_v50 = vshll.u32 %v4631_v10, 16  ;;  %v9110_v6 = vsel %vm7976_vm13, %v5456_v15, %v5457_v46  ;;  %v9114_v59 = vpop.f32.mrf.mxu0  ;;  %v7370_v46 = vld [vmem:[#allocation2 + $0x9c] sm:$0xff]   ;;  %v9138_v28 = vpop.f32.mrf.mxu1  ;;  %v4635_v49 = vld [vmem:[#allocation2 + $0x54] sm:$0xf] }
 0x158   : > { %7069 = vmatmul.mubr.bf16.gmra.mxu1 %v10246_v61  ;;  %v6499_v61 = vrot.slane %v5377_v36, 9  ;;  %v4757_v33 = vor.u32 %v4756_v31, %v9088_v24  ;;  %v5378_v36 = vld [vmem:[#allocation2 + $0x48] sm:$0xe]  ;;  %10251 = vst [vmem:[#allocation15_spill] sm:$0xff] %v9114_v59  ;;  %v9116_v10 = vrot.slane %v4723_v21, 4  ;;  %v9118_v9 = vrot.slane %v4733_v62, 4 }
 0x159   : > { %7072 = vmatprep.mubr.bf16.mxu1 %v10248_v58  ;;  %7149 = vmatpush3.bf16.msra.mxu1 %v7367_v4  ;;  %v5463_v4 = vrot.slane %v5461_v56, 4  ;;  %v9120_v57 = vrot.slane %v4736_v34, 5  ;;  %v7379_v31 = vld [vmem:[%s10176_s3 + $0x1c0] sm:$0xff]   ;;  %v9129_v15 = vrot.slane %v4774_v20, 5  ;;  %v4780_v58 = vrot.slane %v4778_v7, 4  ;;  %v7373_v21 = vld [vmem:[#allocation2 + $0xa8] sm:$0xff]  }
 0x15a   : > { %7125 = vmatmul.mubr.bf16.gmra.mxu0 %v7366_v25  ;;  %7150 = vmatprep.subr.bf16.mxu1 %v7371_v0  ;;  %v4715_v25 = vsel %vm7553_vm9, %v9067_v19, %v9069_v42  ;;  %v9124_v42 = vsel %vm7976_vm13, %v6499_v61, %v5461_v56  ;;  %v4634_v19 = vld [vmem:[#allocation2 + $0x50] sm:$0x1]  ;;  %v4748_v34 = vrot.slane %v4747_v1, 4  ;;  %v4762_v56 = vrot.slane %v4760_v50, 5  ;;  %10253 = vst [vmem:[#allocation16_spill] sm:$0xff] %v9138_v28 }
 0x15b   : > { %7128 = vmatprep.mubr.bf16.mxu0 %v7369_v22  ;;  %v5468_v22 = vrot.slane %v9072_v44, 5  ;;  %v4767_v44 = vrot.slane %v4765_v8, 4  ;;  %v9133_v62 = vsel %vm7976_vm13, %v5463_v4, %v5464_v3  ;;  %v6500_v61 = vrot.slane %v5378_v36, 9  ;;  %v9143_v4 = vpop.f32.mrf.mxu0  ;;  %v5379_v50 = vld [vmem:[#allocation2 + $0x54] sm:$0xe]  ;;  %v9164_v36 = vpop.f32.mrf.mxu1 }
 0x15c   : > { %v10252_v16 = vcombine.low %v8821_v23, %v8834_v35  ;;  %v4758_v59 = vrot.slane %v4757_v33, 4  ;;  %v4784_v20 = vshll.u32 %v4634_v19, 16  ;;  %v10254_v7 = vcombine.low %v8825_v52, %v8841_v12  ;;  %v4638_v33 = vld [vmem:[#allocation2 + $0x60] sm:$0xf]  ;;  %10255 = vst [vmem:[#allocation17_spill] sm:$0xff] %v9164_v36 }
 0x15d   : > { %7151 = vmatpush3.bf16.msra.mxu1 %v7371_v0  ;;  %v4770_v0 = vrot.slane %v4768_v14, 5  ;;  %v5470_v8 = vrot.slane %v5468_v22, 4  ;;  %v5471_v14 = vrot.slane %v4634_v19, 5  ;;  %v9145_v3 = vcombine.low %v4705_v43, %v4715_v25 }
 0x15e   : > { %7152 = vmatprep.subr.bf16.mxu1 %v7375_v27  ;;  %v4729_v35 = vsel %vm7553_vm9, %v9116_v10, %v9060_v51  ;;  %v4781_v12 = vor.u32 %v4780_v58, %v9129_v15  ;;  %v4739_v43 = vsel %vm7553_vm9, %v9118_v9, %v9120_v57  ;;  %v4789_v51 = vshrl.u32 %v4635_v49, 16  ;;  %v9175_v57 = vld [vmem:[#allocation2 + $0x64] sm:$0xf] }
 0x15f   : > { %v4771_v52 = vor.u32 %v4770_v0, %v4767_v44  ;;  %v4792_v25 = vshll.u32 %v4635_v49, 16  ;;  %v4753_v10 = vsel %vm7553_vm9, %v4748_v34, %v9088_v24  ;;  %v4763_v19 = vsel %vm7553_vm9, %v4758_v59, %v4762_v56  ;;  %v9179_v49 = vld [vmem:[#allocation2 + $0x5c] sm:$0x1]  ;;  %v7374_v24 = vld [vmem:[#allocation2 + $0xb4] sm:$0xff]  }
 0x160   : > { %7073 = vmatmul.mubr.bf16.gmra.mxu1 %v10252_v16  ;;  %v9162_v16 = vsel %vm7976_vm13, %v6500_v61, %v5468_v22  ;;  %v4786_v9 = vrot.slane %v4784_v20, 5  ;;  %v9177_v22 = vpop.f32.mrf.mxu0  ;;  %v6501_v44 = vrot.slane %v5379_v50, 9  ;;  %v4782_v61 = vrot.slane %v4781_v12, 4  ;;  %v9186_v50 = vpop.f32.mrf.mxu1 }
 0x161   : > { %7076 = vmatprep.mubr.bf16.mxu1 %v10254_v7  ;;  %7153 = vmatpush3.bf16.msra.mxu1 %v7375_v27  ;;  %v4636_v27 = vld [vmem:[#allocation2 + $0x58] sm:$0xf]  ;;  %v4772_v34 = vrot.slane %v4771_v52, 4  ;;  %v4813_v59 = vshrl.u32 %v4638_v33, 16  ;;  %v4816_v56 = vshll.u32 %v4638_v33, 16  ;;  %v7377_v7 = vld [vmem:[#allocation2 + $0xc0] sm:$0xff]   ;;  %v9188_v23 = vcombine.low %v4729_v35, %v4739_v43 }
 0x162   : > { %7129 = vmatmul.mubr.bf16.gmra.mxu0 %v7370_v46  ;;  %7154 = vmatprep.subr.bf16.mxu1 %v7379_v31  ;;  %v9173_v46 = vsel %vm7976_vm13, %v5470_v8, %v5471_v14  ;;  %v5475_v0 = vrot.slane %v4636_v27, 5  ;;  %v4798_v58 = vshll.u32 %v4636_v27, 16  ;;  %v4791_v8 = vrot.slane %v4789_v51, 4  ;;  %10257 = vst [vmem:[#allocation18_spill] sm:$0xff] %v9186_v50  ;;  %v9195_v51 = vld [vmem:[#allocation2 + $0x70] sm:$0xf]  ;;  %v9200_v33 = vpop.f32.mrf.mxu0  ;;  %v9216_v50 = vpop.f32.mrf.mxu1 }
 0x163   : > { %7132 = vmatprep.mubr.bf16.mxu0 %v7373_v21  ;;  %v4802_v21 = vshrl.u32 %v4636_v27, 16  ;;  %v4794_v14 = vrot.slane %v4792_v25, 5  ;;  %v4822_v20 = vshll.u32 %v9175_v57, 16  ;;  %v4826_v1 = vshrl.u32 %v9175_v57, 16  ;;  %10259 = vst [vmem:[#allocation19_spill] sm:$0xff] %v9216_v50 }
 0x164   : > { %v9190_v27 = vcombine.low %v4753_v10, %v4763_v19  ;;  %v5478_v12 = vrot.slane %v9179_v49, 5  ;;  %v10258_v25 = vcombine.low %v8855_v63, %v8871_v26  ;;  %v9206_v35 = vrot.slane %v4798_v58, 5  ;;  %v4641_v10 = vld [vmem:[#allocation2 + $0x6c] sm:$0xf] }
 0x165   : > { %7155 = vmatpush3.bf16.msra.mxu1 %v7379_v31  ;;  %v10256_v31 = vcombine.low %v8851_v39, %v8864_v55  ;;  %v9204_v39 = vsel %vm7976_vm13, %v6501_v44, %v5475_v0  ;;  %v5477_v55 = vrot.slane %v5475_v0, 4  ;;  %v4804_v43 = vrot.slane %v4802_v21, 4  ;;  %v4640_v0 = vld [vmem:[#allocation2 + $0x68] sm:$0x1] }
 0x166   : > { %v4777_v19 = vsel %vm7553_vm9, %v4772_v34, %v9129_v15  ;;  %v5482_v63 = vrot.slane %v9175_v57, 5  ;;  %v4815_v26 = vrot.slane %v4813_v59, 4  ;;  %v4787_v44 = vsel %vm7553_vm9, %v4782_v61, %v4786_v9 }
 0x167   : > { %v4795_v52 = vor.u32 %v4794_v14, %v4791_v8  ;;  %v9214_v58 = vrot.slane %v4822_v20, 5  ;;  %v4828_v21 = vrot.slane %v4826_v1, 4  ;;  %v4840_v36 = vshll.u32 %v4641_v10, 16  ;;  %v7378_v1 = vld [vmem:[#allocation2 + $0xcc] sm:$0xff]  }
 0x168   : > { %7077 = vmatmul.mubr.bf16.gmra.mxu1 %v10256_v31  ;;  %v5380_v31 = vld [vmem:[#allocation2 + $0x60] sm:$0xe]  ;;  %v4846_v15 = vshll.u32 %v9195_v51, 16  ;;  %v4850_v34 = vshrl.u32 %v9195_v51, 16  ;;  %v9224_v59 = vsel %vm7976_vm13, %v5477_v55, %v5478_v12  ;;  %v4805_v9 = vor.u32 %v4804_v43, %v9206_v35  ;;  %v5381_v12 = vld [vmem:[#allocation2 + $0x6c] sm:$0xe]  ;;  %v9239_v43 = vpop.f32.mrf.mxu1 }
 0x169   : > { %7080 = vmatprep.mubr.bf16.mxu1 %v10258_v25  ;;  %v4818_v25 = vrot.slane %v4816_v56, 5  ;;  %v4808_v61 = vshll.u32 %v9179_v49, 16  ;;  %v6502_v56 = vrot.slane %v5380_v31, 9  ;;  %v5485_v8 = vrot.slane %v4640_v0, 5  ;;  %10263 = vst [vmem:[#allocation22_spill] sm:$0xff] %v9239_v43 }
 0x16a   : > { %7133 = vmatmul.mubr.bf16.gmra.mxu0 %v7374_v24  ;;  %v4837_v24 = vshrl.u32 %v4641_v10, 16  ;;  %v4832_v20 = vshll.u32 %v4640_v0, 16  ;;  %v9230_v50 = vcombine.low %v4777_v19, %v4787_v44  ;;  %v9232_v28 = vrot.slane %v4795_v52, 4  ;;  %v4643_v31 = vld [vmem:[#allocation2 + $0x74] sm:$0x1] }
 0x16b   : > { %7136 = vmatprep.mubr.bf16.mxu0 %v7377_v7  ;;  %v9220_v57 = vpop.f32.mrf.mxu0  ;;  %v5484_v7 = vrot.slane %v5482_v63, 4  ;;  %v4819_v14 = vor.u32 %v4818_v25, %v4815_v26  ;;  %v5489_v55 = vrot.slane %v9195_v51, 5  ;;  %v10262_v49 = vcombine.low %v8875_v30, %v8885_v17  ;;  %v9293_v43 = vld [vmem:[#allocation2 + $0x88] sm:$0xf] }
 0x16c   : > { %10260 = vst [vmem:[#allocation20_spill] sm:$0xff] %v9220_v57  ;;  %v4829_v57 = vor.u32 %v4828_v21, %v9214_v58  ;;  %v4839_v26 = vrot.slane %v4837_v24, 4  ;;  %v4842_v25 = vrot.slane %v4840_v36, 5  ;;  %v9241_v0 = vrot.slane %v4846_v15, 5 }
 0x16d   : > { %v9228_v10 = vpop.f32.mrf.mxu0  ;;  %v4852_v19 = vrot.slane %v4850_v34, 4  ;;  %v10264_v52 = vcombine.low %v8889_v32, %v8900_v13  ;;  %v4806_v21 = vrot.slane %v4805_v9, 4  ;;  %v4810_v30 = vrot.slane %v4808_v61, 5  ;;  %v4644_v13 = vld [vmem:[#allocation2 + $0x78] sm:$0xf] }
 0x16e   : > { %10261 = vst [vmem:[#allocation21_spill] sm:$0xff] %v9228_v10  ;;  %v9252_v17 = vsel %vm7976_vm13, %v6502_v56, %v5482_v63  ;;  %v9256_v36 = vsel %vm7976_vm13, %v5484_v7, %v5485_v8  ;;  %v4820_v24 = vrot.slane %v4819_v14, 4  ;;  %v4834_v15 = vrot.slane %v4832_v20, 5  ;;  %v4645_v56 = vld [vmem:[#allocation2 + $0x7c] sm:$0xf] }
 0x16f   : > { %v9246_v44 = vpop.f32.mrf.mxu0  ;;  %v6503_v32 = vrot.slane %v5381_v12, 9  ;;  %v4830_v9 = vrot.slane %v4829_v57, 4  ;;  %v5491_v61 = vrot.slane %v5489_v55, 4  ;;  %v4856_v63 = vshll.u32 %v4643_v31, 16  ;;  %v5382_v20 = vld [vmem:[#allocation2 + $0x78] sm:$0xe] }
 0x170   : > { %7081 = vmatmul.mubr.bf16.gmra.mxu1 %v10262_v49  ;;  %10265 = vst [vmem:[#allocation23_spill] sm:$0xff] %v9246_v44  ;;  %v10267_v49 = vcombine.low %v8990_v5, %v8994_v45  ;;  %v4801_v7 = vsel %vm7553_vm9, %v9232_v28, %v9206_v35  ;;  %v4843_v8 = vor.u32 %v4842_v25, %v4839_v26  ;;  %v5496_v12 = vrot.slane %v4645_v56, 5  ;;  %v9276_v57 = vld [vmem:[#allocation2 + $0x80] sm:$0x1] }
 0x171   : > { %7084 = vmatprep.mubr.bf16.mxu1 %v10264_v52  ;;  %v9258_v34 = vpop.f32.mrf.mxu0  ;;  %v5492_v52 = vrot.slane %v4643_v31, 5  ;;  %v4853_v14 = vor.u32 %v4852_v19, %v9241_v0  ;;  %v4811_v5 = vsel %vm7553_vm9, %v4806_v21, %v4810_v30  ;;  %v4861_v31 = vshrl.u32 %v4644_v13, 16  ;;  %v4647_v19 = vld [vmem:[#allocation2 + $0x84] sm:$0xf] }
 0x172   : > { %7137 = vmatmul.mubr.bf16.gmra.mxu0 %v7378_v1  ;;  %10266 = vst [vmem:[#allocation24_spill] sm:$0xff] %v9258_v34  ;;  %v9263_v1 = vpop.f32.mrf.mxu1  ;;  %v4825_v28 = vsel %vm7553_vm9, %v4820_v24, %v9214_v58  ;;  %v9283_v35 = vsel %vm7976_vm13, %v6503_v32, %v5489_v55  ;;  %v4870_v26 = vshll.u32 %v4645_v56, 16  ;;  %v4874_v25 = vshrl.u32 %v4645_v56, 16 }
 0x173   : > { %7204 = vmatprep.mubr.bf16.mxu0 %v10267_v49  ;;  %10268 = vst [vmem:[#allocation25_spill] sm:$0xff] %v9263_v1  ;;  %v9270_v51 = vpop.f32.mrf.mxu0  ;;  %v4864_v49 = vshll.u32 %v4644_v13, 16  ;;  %v4835_v21 = vsel %vm7553_vm9, %v4830_v9, %v4834_v15  ;;  %v9291_v30 = vsel %vm7976_vm13, %v5491_v61, %v5492_v52  ;;  %v4858_v13 = vrot.slane %v4856_v63, 5 }
 0x174   : > { %v6504_v45 = vrot.slane %v5382_v20, 9  ;;  %v10269_v58 = vcombine.low %v8895_v38, %v8909_v54  ;;  %v9298_v55 = vpop.f32.mrf.mxu1  ;;  %v4844_v24 = vrot.slane %v4843_v8, 4  ;;  %v4854_v32 = vrot.slane %v4853_v14, 4 }
 0x175   : > { %v9285_v1 = vpop.f32.mrf.mxu0  ;;  %10270 = vst [vmem:[#allocation26_spill] sm:$0xff] %v9298_v55  ;;  %v5498_v56 = vrot.slane %v5496_v12, 4  ;;  %v5499_v34 = vrot.slane %v9276_v57, 5  ;;  %v10271_v15 = vcombine.low %v8913_v29, %v8926_v40  ;;  %v4863_v61 = vrot.slane %v4861_v31, 4 }
 0x176   : > { %v4866_v52 = vrot.slane %v4864_v49, 5  ;;  %v4885_v63 = vshrl.u32 %v4647_v19, 16  ;;  %v4888_v20 = vshll.u32 %v4647_v19, 16  ;;  %v10272_v38 = vcombine.low %v9022_v18, %v9026_v48  ;;  %v5383_v49 = vld [vmem:[#allocation2 + $0x84] sm:$0xe] }
 0x177   : > { %v9304_v9 = vpop.f32.mrf.mxu0  ;;  %v9309_v54 = vrot.slane %v4870_v26, 5  ;;  %v4876_v8 = vrot.slane %v4874_v25, 4  ;;  %v4894_v14 = vshll.u32 %v9293_v43, 16  ;;  %v10273_v29 = vcombine.low %v9076_v41, %v9110_v6  ;;  %v9328_v26 = vpop.f32.mrf.mxu1 }
 0x178   : > { %7085 = vmatmul.mubr.bf16.gmra.mxu1 %v10269_v58  ;;  %v4898_v58 = vshrl.u32 %v9293_v43, 16  ;;  %v9318_v40 = vcombine.low %v4801_v7, %v4811_v5  ;;  %v9320_v31 = vcombine.low %v4825_v28, %v4835_v21  ;;  %v9326_v48 = vsel %vm7976_vm13, %v6504_v45, %v5496_v12  ;;  %10274 = vst [vmem:[#allocation27_spill] sm:$0xff] %v9328_v26  ;;  %v9340_v5 = vld [vmem:[#allocation2 + $0x94] sm:$0xf]  ;;  %v4650_v12 = vld [vmem:[#allocation2 + $0x90] sm:$0xf] }
 0x179   : > { %7088 = vmatprep.mubr.bf16.mxu1 %v10271_v15  ;;  %v9313_v55 = vpop.f32.mrf.mxu0  ;;  %v4849_v25 = vsel %vm7553_vm9, %v4844_v24, %v9241_v0  ;;  %v4859_v41 = vsel %vm7553_vm9, %v4854_v32, %v4858_v13  ;;  %v9337_v6 = vsel %vm7976_vm13, %v5498_v56, %v5499_v34  ;;  %v5503_v7 = vrot.slane %v9293_v43, 5  ;;  %v4649_v21 = vld [vmem:[#allocation2 + $0x8c] sm:$0x1]  ;;  %v4653_v26 = vld [vmem:[#allocation2 + $0x9c] sm:$0xf] }
 0x17a   : > { %7205 = vmatmul.mubr.bf16.vlgmr.msra.gmra.mxu0 %v10272_v38  ;;  %v4867_v28 = vor.u32 %v4866_v52, %v4863_v61  ;;  %v4880_v19 = vshll.u32 %v9276_v57, 16  ;;  %v4887_v15 = vrot.slane %v4885_v63, 4  ;;  %v4890_v0 = vrot.slane %v4888_v20, 5 }
 0x17b   : > { %7208 = vmatprep.mubr.bf16.mxu0 %v10273_v29  ;;  %v9342_v45 = vpop.f32.mrf.mxu0  ;;  %v4877_v24 = vor.u32 %v4876_v8, %v9309_v54  ;;  %v6505_v13 = vrot.slane %v5383_v49, 9  ;;  %v9346_v32 = vrot.slane %v4894_v14, 5  ;;  %v4900_v34 = vrot.slane %v4898_v58, 4 }
 0x17c   : > { %v4909_v43 = vshrl.u32 %v4650_v12, 16  ;;  %v4912_v38 = vshll.u32 %v4650_v12, 16  ;;  %v4918_v29 = vshll.u32 %v9340_v5, 16  ;;  %v4922_v18 = vshrl.u32 %v9340_v5, 16 }
 0x17d   : > { %v9348_v56 = vpop.f32.mrf.mxu0  ;;  %v10276_v57 = vcombine.low %v8932_v53, %v8947_v2  ;;  %v9357_v52 = vcombine.low %v4849_v25, %v4859_v41  ;;  %v5505_v63 = vrot.slane %v5503_v7, 4  ;;  %v5506_v20 = vrot.slane %v4649_v21, 5 }
 0x17e   : > { %v9352_v61 = vpop.f32.mrf.mxu1  ;;  %v4904_v8 = vshll.u32 %v4649_v21, 16  ;;  %v9364_v49 = vrot.slane %v4867_v28, 4  ;;  %v9366_v12 = vrot.slane %v4880_v19, 5  ;;  %v10279_v2 = vcombine.low %v9124_v42, %v9133_v62  ;;  %v5384_v28 = vld [vmem:[#allocation2 + $0x90] sm:$0xe] }
 0x17f   : > { %10275 = vst [vmem:[#allocation28_spill] sm:$0xff] %v9352_v61  ;;  %10277 = vst [vmem:[#allocation29_spill] sm:$0xff] %v9357_v52  ;;  %v9360_v14 = vpop.f32.mrf.mxu0  ;;  %v4891_v61 = vor.u32 %v4890_v0, %v4887_v15  ;;  %v9373_v25 = vrot.slane %v4877_v24, 4  ;;  %v4901_v41 = vor.u32 %v4900_v34, %v9346_v32  ;;  %v5510_v19 = vrot.slane %v9340_v5, 5  ;;  %v9381_v21 = vld [vmem:[#allocation2 + $0xa0] sm:$0xf] }
 0x180   : > { %7089 = vmatmul.mubr.bf16.gmra.mxu1 %v10276_v57  ;;  %v9368_v53 = vpop.f32.mrf.mxu1  ;;  %v10280_v0 = vcombine.low %v9162_v16, %v9173_v46  ;;  %v4652_v42 = vld [vmem:[#allocation2 + $0x98] sm:$0x1]  ;;  %v4911_v62 = vrot.slane %v4909_v43, 4  ;;  %v4914_v24 = vrot.slane %v4912_v38, 5  ;;  %v9388_v57 = vrot.slane %v4918_v29, 5 }
 0x181   : > { %7156 = vmatprep.mubr.bf16.mxu1 %v9065_v37  ;;  %10278 = vst [vmem:[#allocation30_spill] sm:$0xff] %v9368_v53  ;;  %v9377_v37 = vsel %vm7976_vm13, %v6505_v13, %v5503_v7  ;;  %v9383_v15 = vpop.f32.mrf.mxu0  ;;  %v4924_v7 = vrot.slane %v4922_v18, 4  ;;  %v9394_v34 = vsel %vm7976_vm13, %v5505_v63, %v5506_v20  ;;  %v4906_v5 = vrot.slane %v4904_v8, 5  ;;  %v5385_v20 = vld [vmem:[#allocation2 + $0x9c] sm:$0xe] }
 0x182   : > { %7209 = vmatmul.mubr.bf16.gmra.mxu0 %v10279_v2  ;;  %v9390_v13 = vpop.f32.mrf.mxu1  ;;  %v4933_v2 = vshrl.u32 %v4653_v26, 16  ;;  %v4936_v58 = vshll.u32 %v4653_v26, 16  ;;  %v4892_v44 = vrot.slane %v4891_v61, 4  ;;  %v6506_v16 = vrot.slane %v5384_v28, 9 }
 0x183   : > { %7212 = vmatprep.mubr.bf16.mxu0 %v10280_v0  ;;  %10281 = vst [vmem:[#allocation31_spill] sm:$0xff] %v9390_v13  ;;  %v9396_v53 = vpop.f32.mrf.mxu0  ;;  %v4942_v46 = vshll.u32 %v9381_v21, 16  ;;  %v4946_v43 = vshrl.u32 %v9381_v21, 16  ;;  %v4902_v18 = vrot.slane %v4901_v41, 4  ;;  %v5512_v29 = vrot.slane %v5510_v19, 4 }
 0x184   : > { %v9400_v38 = vpop.f32.mrf.mxu1  ;;  %v5513_v0 = vrot.slane %v4652_v42, 5  ;;  %v4928_v13 = vshll.u32 %v4652_v42, 16  ;;  %v4873_v26 = vsel %vm7553_vm9, %v9364_v49, %v9309_v54  ;;  %v4915_v63 = vor.u32 %v4914_v24, %v4911_v62 }
 0x185   : > { %10282 = vst [vmem:[#allocation32_spill] sm:$0xff] %v9400_v38  ;;  %v9402_v10 = vpop.f32.mrf.mxu0  ;;  %v4925_v61 = vor.u32 %v4924_v7, %v9388_v57  ;;  %v5517_v8 = vrot.slane %v9381_v21, 5  ;;  %v4883_v41 = vsel %vm7553_vm9, %v9373_v25, %v9366_v12  ;;  %v4655_v38 = vld [vmem:[#allocation2 + $0xa4] sm:$0x1]  ;;  %v4935_v52 = vrot.slane %v4933_v2, 4 }
 0x186   : > { %v6870_v28 = vpop.f32.mrf.mxu1  ;;  %v4938_v54 = vrot.slane %v4936_v58, 5  ;;  %v4897_v21 = vsel %vm7553_vm9, %v4892_v44, %v9346_v32  ;;  %v9427_v62 = vrot.slane %v4942_v46, 5  ;;  %v4948_v12 = vrot.slane %v4946_v43, 4  ;;  %v4656_v7 = vld [vmem:[#allocation2 + $0xa8] sm:$0xf] }
 0x187   : > { %v9418_v49 = vpop.f32.mrf.mxu0  ;;  %v10283_v24 = vcombine.low %v9204_v39, %v9224_v59  ;;  %v9436_v58 = vsel %vm7976_vm13, %v5512_v29, %v5513_v0  ;;  %v4930_v44 = vrot.slane %v4928_v13, 5  ;;  %v6507_v32 = vrot.slane %v5385_v20, 9  ;;  %v4657_v43 = vld [vmem:[#allocation2 + $0xac] sm:$0xf]  ;;  %v5386_v0 = vld [vmem:[#allocation2 + $0xa8] sm:$0xe] }
 0x188   : > { %7157 = vmatmul.mubr.bf16.vlgmr.msra.gmra.mxu1 %v9145_v3  ;;  %v9425_v3 = vsel %vm7976_vm13, %v6506_v16, %v5510_v19  ;;  %v1983_v25 = vpop.f32.mrf.mxu1  ;;  %v10285_v2 = vcombine.low %v9252_v17, %v9256_v36  ;;  %v4916_v16 = vrot.slane %v4915_v63, 4  ;;  %v4926_v46 = vrot.slane %v4925_v61, 4  ;;  %v9450_v17 = vld [vmem:[#allocation2 + $0xb0] sm:$0x1] }
 0x189   : > { %7160 = vmatprep.mubr.bf16.mxu1 %v9188_v23  ;;  %v4907_v23 = vsel %vm7553_vm9, %v4902_v18, %v4906_v5  ;;  %v9438_v19 = vpop.f32.mrf.mxu0  ;;  %v5519_v39 = vrot.slane %v5517_v8, 4  ;;  %v5520_v59 = vrot.slane %v4655_v38, 5  ;;  %v9443_v5 = vcombine.low %v4873_v26, %v4883_v41  ;;  %v530_v41 = vld [vmem:[#allocation2 + $0xd4] sm:$0xf] }
 0x18a   : > { %7213 = vmatmul.mubr.bf16.gmra.mxu0 %v10283_v24  ;;  %10284 = vst [vmem:[#allocation33_spill] sm:$0xff] %v9438_v19  ;;  %v6871_v24 = vpop.f32.mrf.mxu1  ;;  %v4939_v18 = vor.u32 %v4938_v54, %v4935_v52  ;;  %v4952_v29 = vshll.u32 %v4655_v38, 16  ;;  %v5524_v13 = vrot.slane %v4657_v43, 5  ;;  %v9447_v42 = vcombine.low %v4897_v21, %v4907_v23 }
 0x18b   : > { %7216 = vmatprep.mubr.bf16.mxu0 %v10285_v2  ;;  %10286 = vst [vmem:[#allocation34_spill] sm:$0xff] %v9443_v5  ;;  %v9445_v20 = vpop.f32.mrf.mxu0  ;;  %v4949_v19 = vor.u32 %v4948_v12, %v9427_v62  ;;  %v4957_v36 = vshrl.u32 %v4656_v7, 16  ;;  %v4960_v63 = vshll.u32 %v4656_v7, 16  ;;  %v9456_v52 = vsel %vm7976_vm13, %v6507_v32, %v5517_v8 }
 0x18c   : > { %10287 = vst [vmem:[#allocation35_spill] sm:$0xff] %v9445_v20  ;;  %10288 = vst [vmem:[#allocation36_spill] sm:$0xff] %v9447_v42  ;;  %v1986_v61 = vpop.f32.mrf.mxu1  ;;  %v4966_v38 = vshll.u32 %v4657_v43, 16  ;;  %v4970_v26 = vshrl.u32 %v4657_v43, 16  ;;  %v4921_v21 = vsel %vm7553_vm9, %v4916_v16, %v9388_v57  ;;  %v4931_v12 = vsel %vm7553_vm9, %v4926_v46, %v4930_v44 }
 0x18d   : > { %v9458_v54 = vpop.f32.mrf.mxu0  ;;  %v9467_v23 = vsel %vm7976_vm13, %v5519_v39, %v5520_v59  ;;  %v6508_v7 = vrot.slane %v5386_v0, 9  ;;  %v9470_v8 = vrot.slane %v4939_v18, 4  ;;  %v9472_v32 = vrot.slane %v4952_v29, 5  ;;  %v10291_v59 = vld [vmem:[#allocation4_spill] sm:$0xff]  ;;  %v10292_v18 = vld [vmem:[#allocation5_spill] sm:$0xff] }
 0x18e   : > { %10289 = vst [vmem:[#allocation37_spill] sm:$0xff] %v9458_v54  ;;  %v6874_v2 = vpop.f32.mrf.mxu1  ;;  %v5526_v43 = vrot.slane %v5524_v13, 4  ;;  %v5527_v42 = vrot.slane %v9450_v17, 5  ;;  %v9478_v44 = vrot.slane %v4949_v19, 4  ;;  %v4959_v16 = vrot.slane %v4957_v36, 4  ;;  %v10294_v19 = vld [vmem:[#allocation3_spill] sm:$0xff] }
 0x18f   : > { %v9476_v57 = vpop.f32.mrf.mxu0  ;;  %v4962_v46 = vrot.slane %v4960_v63, 5  ;;  %v531_v39 = vsel %vm7499_vm5, 0, %v530_v41  ;;  %v1984_v0 = vadd.f32 %v1983_v25, %v10292_v18  ;;  %v10293_v54 = vcombine.low %v9283_v35, %v9291_v30  ;;  %v10295_v36 = vld [vmem:[#allocation6_spill] sm:$0xff]  ;;  %v10297_v30 = vld [vmem:[#allocation7_spill] sm:$0xff]  ;;  %v10300_v18 = vld [vmem:[#allocation13_spill] sm:$0xff] }
 0x190   : > { %7161 = vmatmul.mubr.bf16.gmra.mxu1 %v9190_v27  ;;  %10290 = vst [vmem:[#allocation38_spill] sm:$0xff] %v9476_v57  ;;  %v1992_v27 = vadd.f32 %v6870_v28, %v10291_v59  ;;  %v1999_v29 = vpop.f32.mrf.mxu1  ;;  %v9487_v20 = vrot.slane %v4966_v38, 5  ;;  %532 = vst [vmem:[#allocation2 + $0xd4] sm:$0xf] %v531_v39  ;;  %v1995_v57 = vadd.f32 %v6871_v24, %v10294_v19  ;;  %v10298_v38 = vld [vmem:[#allocation9_spill] sm:$0xff] }
 0x191   : > { %7164 = vmatprep.mubr.bf16.mxu1 %v9230_v50  ;;  %v4972_v50 = vrot.slane %v4970_v26, 4  ;;  %v1987_v63 = vadd.f32 %v1986_v61, %v10295_v36  ;;  %v9491_v5 = vpop.f32.mrf.mxu0  ;;  %v10296_v11 = vcombine.low %v9326_v48, %v9337_v6  ;;  %v9496_v28 = vcombine.low %v4921_v21, %v4931_v12 }
 0x192   : > { %7217 = vmatmul.mubr.bf16.gmra.mxu0 %v10293_v54  ;;  %v9500_v35 = vsel %vm7976_vm13, %v6508_v7, %v5524_v13  ;;  %v2008_v25 = vadd.f32 %v6874_v2, %v10297_v30  ;;  %v2000_v26 = vadd.f32 %v1999_v29, %v10298_v38  ;;  %v6875_v41 = vpop.f32.mrf.mxu1  ;;  %v9506_v24 = vsel %vm7976_vm13, %v5526_v43, %v5527_v42  ;;  %v10299_v54 = vld [vmem:[#allocation11_spill] sm:$0xff]  ;;  %v5387_v2 = vld [vmem:[#allocation2 + $0xb4] sm:$0xe] }
 0x193   : > { %7220 = vmatprep.mubr.bf16.mxu0 %v10296_v11  ;;  %v4976_v61 = vshll.u32 %v9450_v17, 16  ;;  %v2011_v48 = vadd.f32 %v6875_v41, %v10299_v54  ;;  %v9510_v6 = vpop.f32.mrf.mxu0  ;;  %v6539_v21 = vcombine.low %v9456_v52, %v9467_v23  ;;  %v4945_v13 = vsel %vm7553_vm9, %v9470_v8, %v9427_v62  ;;  %v4659_v43 = vld [vmem:[#allocation2 + $0xb4] sm:$0xf]  ;;  %v5389_v23 = vld [vmem:[#allocation2 + $0xcc] sm:$0xe] }
 0x194   : > { %v4955_v42 = vsel %vm7553_vm9, %v9478_v44, %v9472_v32  ;;  %v2002_v12 = vpop.f32.mrf.mxu1  ;;  %v4963_v17 = vor.u32 %v4962_v46, %v4959_v16  ;;  %v4973_v7 = vor.u32 %v4972_v50, %v9487_v20  ;;  %v9524_v39 = vadd.f32 %v9270_v51, %v1992_v27  ;;  %v10301_v50 = vld [vmem:[#allocation15_spill] sm:$0xff] }
 0x195   : > { %v9527_v59 = vadd.f32 %v9285_v1, %v1984_v0  ;;  %v2003_v29 = vadd.f32 %v2002_v12, %v10300_v18  ;;  %v9530_v62 = vpop.f32.mrf.mxu0  ;;  %v6540_v8 = vcombine.low %v9500_v35, %v9506_v24  ;;  %v9535_v32 = vadd.f32 %v9304_v9, %v1995_v57  ;;  %v4660_v1 = vld [vmem:[#allocation2 + $0xb8] sm:$0xf]  ;;  %v9580_v12 = vld [vmem:[#allocation2 + $0xc8] sm:$0x1] }
 0x196   : > { %v9538_v44 = vadd.f32 %v9313_v55, %v1987_v63  ;;  %v6878_v16 = vpop.f32.mrf.mxu1  ;;  %v9541_v51 = vrot.slane %v4976_v61, 5  ;;  %v6509_v46 = vrot.slane %v5387_v2, 9  ;;  %v9544_v27 = vadd.f32 %v9342_v45, %v2008_v25  ;;  %v9553_v55 = vld [vmem:[#allocation2 + $0xbc] sm:$0x1]  ;;  %v4663_v25 = vld [vmem:[#allocation2 + $0xc4] sm:$0xf] }
 0x197   : > { %v9547_v0 = vadd.f32 %v9348_v56, %v2000_v26  ;;  %v2024_v19 = vadd.f32 %v6878_v16, %v10301_v50  ;;  %v9551_v9 = vpop.f32.mrf.mxu0  ;;  %v5531_v57 = vrot.slane %v4660_v1, 5  ;;  %v9556_v36 = vadd.f32 %v9360_v14, %v2011_v48  ;;  %v5388_v61 = vld [vmem:[#allocation2 + $0xc0] sm:$0xe] }
 0x198   : > { %7165 = vmatmul.mubr.bf16.gmra.mxu1 %v9318_v40  ;;  %v4981_v40 = vshrl.u32 %v4659_v43, 16  ;;  %v2015_v63 = vpop.f32.mrf.mxu1  ;;  %v10302_v45 = vcombine.low %v9377_v37, %v9394_v34  ;;  %v4964_v56 = vrot.slane %v4963_v17, 4  ;;  %v4974_v11 = vrot.slane %v4973_v7, 4 }
 0x199   : > { %7168 = vmatprep.mubr.bf16.mxu1 %v9320_v31  ;;  %v4984_v30 = vshll.u32 %v4659_v43, 16  ;;  %v9562_v31 = vadd.f32 %v9383_v15, %v2003_v29  ;;  %v2016_v38 = vadd.f32 %v2015_v63, %v9143_v4  ;;  %v9565_v26 = vpop.f32.mrf.mxu0  ;;  %v10303_v14 = vcombine.low %v9425_v3, %v9436_v58 }
 0x19a   : > { %7221 = vmatmul.mubr.bf16.gmra.mxu0 %v10302_v45  ;;  %v9570_v41 = vcombine.low %v4945_v13, %v4955_v42  ;;  %v5538_v37 = vrot.slane %v4663_v25, 5  ;;  %v9573_v34 = vadd.f32 %v9396_v53, %v2024_v19  ;;  %v6879_v54 = vpop.f32.mrf.mxu1  ;;  %v9577_v15 = vsel %vm7976_vm13, %v6509_v46, %v5531_v57  ;;  %v4662_v53 = vld [vmem:[#allocation2 + $0xc0] sm:$0xf] }
 0x19b   : > { %7224 = vmatprep.mubr.bf16.mxu0 %v10303_v14  ;;  %v5534_v4 = vrot.slane %v9553_v55, 5  ;;  %v4990_v48 = vshll.u32 %v4660_v1, 16  ;;  %v4994_v2 = vshrl.u32 %v4660_v1, 16  ;;  %v2027_v3 = vadd.f32 %v6879_v54, %v9177_v22  ;;  %v9583_v58 = vpop.f32.mrf.mxu0  ;;  %v10305_v45 = vld [vmem:[#allocation20_spill] sm:$0xff]  ;;  %v10307_v14 = vld [vmem:[#allocation33_spill] sm:$0xff] }
 0x19c   : > { %v5533_v13 = vrot.slane %v5531_v57, 4  ;;  %v9585_v42 = vrot.slane %v4981_v40, 4  ;;  %v9588_v17 = vadd.f32 %v9402_v10, %v2016_v38  ;;  %v2018_v7 = vpop.f32.mrf.mxu1  ;;  %v4969_v43 = vsel %vm7553_vm9, %v4964_v56, %v9487_v20  ;;  %v10304_v57 = vld [vmem:[#allocation29_spill] sm:$0xff] }
 0x19d   : > { %v4979_v18 = vsel %vm7553_vm9, %v4974_v11, %v9541_v51  ;;  %v9596_v29 = vrot.slane %v4984_v30, 5  ;;  %v6510_v22 = vrot.slane %v5388_v61, 9  ;;  %v2019_v16 = vadd.f32 %v2018_v7, %v9200_v33  ;;  %v9599_v1 = vpop.f32.mrf.mxu0  ;;  %v10306_v11 = vld [vmem:[#allocation34_spill] sm:$0xff] }
 0x19e   : > { %v5540_v46 = vrot.slane %v5538_v37, 4  ;;  %v5541_v10 = vrot.slane %v9580_v12, 5  ;;  %v9603_v50 = vadd.f32 %v9418_v49, %v2027_v3  ;;  %v6882_v19 = vpop.f32.mrf.mxu1  ;;  %v5005_v20 = vshrl.u32 %v4662_v53, 16 }
 0x19f   : > { %v5008_v40 = vshll.u32 %v4662_v53, 16  ;;  %v5014_v63 = vshll.u32 %v4663_v25, 16  ;;  %v5018_v51 = vshrl.u32 %v4663_v25, 16  ;;  %v2040_v56 = vadd.f32 %v6882_v19, %v10305_v45  ;;  %v9608_v33 = vpop.f32.mrf.mxu0  ;;  %v4666_v53 = vld [vmem:[#allocation2 + $0xd0] sm:$0xf] }
 0x1a0   : > { %7169 = vmatmul.mubr.bf16.gmra.mxu1 %v10304_v57  ;;  %v9610_v30 = vrot.slane %v4990_v48, 5  ;;  %v4996_v38 = vrot.slane %v4994_v2, 4  ;;  %v9613_v61 = vadd.f32 %v10307_v14, %v2019_v16  ;;  %v2031_v49 = vpop.f32.mrf.mxu1  ;;  %v9618_v54 = vcombine.low %v4969_v43, %v4979_v18  ;;  %v10308_v2 = vld [vmem:[#allocation21_spill] sm:$0xff]  ;;  %v9638_v19 = vld [vmem:[#allocation2 + $0xd4] sm:$0x1]  ;;  %v10310_v57 = vld [vmem:[#allocation23_spill] sm:$0xff] }
 0x1a1   : > { %7172 = vmatprep.mubr.bf16.mxu1 %v10306_v11  ;;  %v5535_v25 = vsel %vm7976_vm13, %v5533_v13, %v5534_v4  ;;  %v5000_v3 = vshll.u32 %v9553_v55, 16  ;;  %v5539_v48 = vsel %vm7976_vm13, %v6510_v22, %v5538_v37  ;;  %v2032_v7 = vadd.f32 %v2031_v49, %v10308_v2  ;;  %v9626_v16 = vpop.f32.mrf.mxu0  ;;  %v10309_v4 = vld [vmem:[#allocation35_spill] sm:$0xff]  ;;  %v10312_v14 = vld [vmem:[#allocation24_spill] sm:$0xff] }
 0x1a2   : > { %7225 = vmatmul.mubr.bf16.gmra.mxu0 %v6539_v21  ;;  %v5542_v52 = vsel %vm7976_vm13, %v5540_v46, %v5541_v10  ;;  %v5545_v21 = vrot.slane %v4666_v53, 5  ;;  %v9634_v13 = vadd.f32 %v10309_v4, %v2040_v56  ;;  %v6883_v55 = vpop.f32.mrf.mxu1  ;;  %v5007_v43 = vrot.slane %v5005_v20, 4  ;;  %v4665_v46 = vld [vmem:[#allocation2 + $0xcc] sm:$0xf] }
 0x1a3   : > { %7228 = vmatprep.mubr.bf16.mxu0 %v6540_v8  ;;  %v5010_v37 = vrot.slane %v5008_v40, 5  ;;  %v9636_v18 = vrot.slane %v5014_v63, 5  ;;  %v5020_v22 = vrot.slane %v5018_v51, 4  ;;  %v2043_v45 = vadd.f32 %v6883_v55, %v10310_v57  ;;  %v9641_v35 = vpop.f32.mrf.mxu0  ;;  %v10311_v10 = vld [vmem:[#allocation37_spill] sm:$0xff] }
 0x1a4   : > { %v6541_v24 = vcombine.low %v9577_v15, %v5535_v25  ;;  %v4987_v8 = vor.u32 %v9596_v29, %v9585_v42  ;;  %v9647_v56 = vadd.f32 %v10311_v10, %v2032_v7  ;;  %v2034_v20 = vpop.f32.mrf.mxu1  ;;  %v4997_v40 = vor.u32 %v4996_v38, %v9610_v30  ;;  %v10313_v25 = vld [vmem:[#allocation38_spill] sm:$0xff]  ;;  %v10315_v7 = vld [vmem:[#allocation36_spill] sm:$0xff] }
 0x1a5   : > { %v6542_v63 = vcombine.low %v5539_v48, %v5542_v52  ;;  %v5024_v51 = vshll.u32 %v9580_v12, 16  ;;  %v6511_v11 = vrot.slane %v5389_v23, 9  ;;  %v2035_v49 = vadd.f32 %v2034_v20, %v10312_v14  ;;  %v9652_v2 = vpop.f32.mrf.mxu0  ;;  %v10316_v12 = vld [vmem:[#allocation8_spill] sm:$0xff] }
 0x1a6   : > { %v5547_v4 = vrot.slane %v5545_v21, 4  ;;  %v5548_v15 = vrot.slane %v9638_v19, 5  ;;  %v9656_v42 = vadd.f32 %v10313_v25, %v2043_v45  ;;  %v5011_v55 = vor.u32 %v5010_v37, %v5007_v43 }
 0x1a7   : > { %v6886_v29 = vpop.f32.mrf.mxu1  ;;  %v5021_v38 = vor.u32 %v5020_v22, %v9636_v18  ;;  %v5029_v48 = vshrl.u32 %v4665_v46, 16  ;;  %v5032_v52 = vshll.u32 %v4665_v46, 16  ;;  %v9662_v57 = vpop.f32.mrf.mxu0  ;;  %v5038_v10 = vshll.u32 %v4666_v53, 16  ;;  %v10317_v22 = vld [vmem:[#allocation10_spill] sm:$0xff] }
 0x1a8   : > { %10314 = vst [vmem:[#allocation4_spill] sm:$0xff] %v9656_v42  ;;  %7173 = vmatmul.mubr.bf16.gmra.mxu1 %v10315_v7  ;;  %v2056_v23 = vadd.f32 %v6886_v29, %v10316_v12  ;;  %v5042_v20 = vshrl.u32 %v4666_v53, 16  ;;  %v9665_v14 = vadd.f32 %v9491_v5, %v2035_v49  ;;  %v4988_v25 = vrot.slane %v4987_v8, 4 }
 0x1a9   : > { %7176 = vmatprep.mubr.bf16.mxu1 %v9496_v28  ;;  %v2047_v45 = vpop.f32.mrf.mxu1  ;;  %v4998_v7 = vrot.slane %v4997_v40, 4  ;;  %v5002_v43 = vrot.slane %v5000_v3, 5  ;;  %v5026_v37 = vrot.slane %v5024_v51, 5  ;;  %v9668_v46 = vpop.f32.mrf.mxu0  ;;  %v5546_v28 = vsel %vm7976_vm13, %v6511_v11, %v5545_v21  ;;  %v10318_v51 = vld [vmem:[#allocation12_spill] sm:$0xff]  ;;  %v10319_v11 = vld [vmem:[#allocation14_spill] sm:$0xff] }
 0x1aa   : > { %7229 = vmatmul.mubr.bf16.gmra.mxu0 %v6541_v24  ;;  %v2048_v42 = vadd.f32 %v2047_v45, %v10317_v22  ;;  %v5549_v53 = vsel %vm7976_vm13, %v5547_v4, %v5548_v15  ;;  %v9675_v5 = vadd.f32 %v9510_v6, %v2056_v23  ;;  %v5012_v24 = vrot.slane %v5011_v55, 4 }
 0x1ab   : > { %7232 = vmatprep.mubr.bf16.mxu0 %v6542_v63  ;;  %v6887_v49 = vpop.f32.mrf.mxu1  ;;  %v5022_v8 = vrot.slane %v5021_v38, 4  ;;  %v5031_v40 = vrot.slane %v5029_v48, 4  ;;  %v5034_v3 = vrot.slane %v5032_v52, 5  ;;  %v5040_v45 = vrot.slane %v5038_v10, 5 }
 0x1ac   : > { %v2059_v29 = vadd.f32 %v6887_v49, %v10318_v51  ;;  %v9678_v12 = vpop.f32.mrf.mxu0  ;;  %v5044_v63 = vrot.slane %v5042_v20, 4  ;;  %v9681_v22 = vadd.f32 %v9530_v62, %v2048_v42  ;;  %v6543_v47 = vcombine.low %v5546_v28, %v5549_v53 }
 0x1ad   : > { %v2050_v21 = vpop.f32.mrf.mxu1  ;;  %v4993_v6 = vsel %vm7553_vm9, %v4988_v25, %v9610_v30  ;;  %v5003_v62 = vsel %vm7553_vm9, %v4998_v7, %v5002_v43  ;;  %v5017_v42 = vsel %vm7553_vm9, %v5012_v24, %v9636_v18  ;;  %v5027_v48 = vsel %vm7553_vm9, %v5022_v8, %v5026_v37  ;;  %v10320_v30 = vld [vmem:[#allocation16_spill] sm:$0xff]  ;;  %v10321_v7 = vld [vmem:[#allocation17_spill] sm:$0xff] }
 0x1ae   : > { %v2051_v4 = vadd.f32 %v2050_v21, %v10319_v11  ;;  %v9687_v15 = vpop.f32.mrf.mxu0  ;;  %v9690_v55 = vadd.f32 %v9551_v9, %v2059_v29  ;;  %v5035_v52 = vor.u32 %v5034_v3, %v5031_v40  ;;  %v5045_v9 = vor.u32 %v5044_v63, %v5040_v45  ;;  %v10323_v29 = vld [vmem:[#allocation19_spill] sm:$0xff]  ;;  %v10324_v11 = vld [vmem:[#allocation22_spill] sm:$0xff] }
 0x1af   : > { %v6890_v38 = vpop.f32.mrf.mxu1  ;;  %v5048_v10 = vshll.u32 %v9638_v19, 16  ;;  %v6485_v53 = vcombine.low %v4993_v6, %v5003_v62  ;;  %v6486_v49 = vcombine.low %v5017_v42, %v5027_v48  ;;  %v10325_v48 = vld [vmem:[#allocation25_spill] sm:$0xff] }
 0x1b0   : > { %7177 = vmatmul.mubr.bf16.gmra.mxu1 %v9570_v41  ;;  %v2072_v23 = vadd.f32 %v6890_v38, %v10320_v30  ;;  %v6947_v20 = vpop.f32.mrf.mxu0  ;;  %v9704_v41 = vadd.f32 %v9565_v26, %v2051_v4  ;;  %v5036_v24 = vrot.slane %v5035_v52, 4  ;;  %v5046_v40 = vrot.slane %v5045_v9, 4 }
 0x1b1   : > { %7180 = vmatprep.mubr.bf16.mxu1 %v9618_v54  ;;  %v2063_v25 = vpop.f32.mrf.mxu1  ;;  %v10322_v54 = vld [vmem:[#allocation18_spill] sm:$0xff]  ;;  %v5050_v19 = vrot.slane %v5048_v10, 5 }
 0x1b2   : > { %7233 = vmatmul.mubr.bf16.gmra.mxu0 %v6543_v47  ;;  %v2064_v43 = vadd.f32 %v2063_v25, %v10321_v7  ;;  %v2551_v18 = vpop.f32.mrf.mxu0  ;;  %v9708_v28 = vadd.f32 %v9583_v58, %v2072_v23  ;;  %v5041_v6 = vsel %vm7553_vm9, %v5036_v24, %v5040_v45  ;;  %v10326_v10 = vld [vmem:[#allocation26_spill] sm:$0xff]  ;;  %v10328_v24 = vld [vmem:[#allocation28_spill] sm:$0xff] }
 0x1b3   : > { %v6891_v37 = vpop.f32.mrf.mxu1  ;;  %v5051_v38 = vsel %vm7553_vm9, %v5046_v40, %v5050_v19  ;;  %v10329_v19 = vld [vmem:[#allocation30_spill] sm:$0xff] }
 0x1b4   : > { %v2075_v8 = vadd.f32 %v6891_v37, %v10322_v54  ;;  %v7014_v3 = vpop.f32.mrf.mxu0  ;;  %v9712_v26 = vadd.f32 %v9599_v1, %v2064_v43  ;;  %v6487_v9 = vcombine.low %v5041_v6, %v5051_v38  ;;  %v10327_v43 = vld [vmem:[#allocation27_spill] sm:$0xff]  ;;  %v10331_v38 = vld [vmem:[#allocation32_spill] sm:$0xff] }
 0x1b5   : > { %v2066_v51 = vpop.f32.mrf.mxu1 }
 0x1b6   : > { %v2067_v63 = vadd.f32 %v2066_v51, %v10323_v29  ;;  %v3576_v21 = vpop.f32.mrf.mxu0  ;;  %v9716_v47 = vadd.f32 %v9608_v33, %v2075_v8 }
 0x1b8   : > { %v6894_v58 = vpop.f32.mrf.mxu1  ;;  %7181 = vmatmul.mubr.bf16.gmra.mxu1 %v6485_v53  ;;  %v7015_v1 = vpop.f32.mrf.mxu0  ;;  %v9724_v62 = vadd.f32 %v9626_v16, %v2067_v63 }
 0x1b9   : > { %v2088_v4 = vadd.f32 %v6894_v58, %v10324_v11  ;;  %7184 = vmatprep.mubr.bf16.mxu1 %v6486_v49  ;;  %v10330_v58 = vld [vmem:[#allocation31_spill] sm:$0xff] }
 0x1ba   : > { %v2079_v42 = vpop.f32.mrf.mxu1  ;;  %v3579_v33 = vpop.f32.mrf.mxu0 }
 0x1bb   : > { %v2080_v52 = vadd.f32 %v2079_v42, %v10325_v48  ;;  %v9728_v30 = vadd.f32 %v9641_v35, %v2088_v4 }
 0x1bc   : > { %v6895_v23 = vpop.f32.mrf.mxu1  ;;  %v7018_v7 = vpop.f32.mrf.mxu0 }
 0x1bd   : > { %v2091_v25 = vadd.f32 %v6895_v23, %v10326_v10  ;;  %v9732_v45 = vadd.f32 %v9652_v2, %v2080_v52 }
 0x1be   : > { %v2082_v60 = vpop.f32.mrf.mxu1  ;;  %v3592_v16 = vpop.f32.mrf.mxu0 }
 0x1bf   : > { %v2083_v37 = vadd.f32 %v2082_v60, %v10327_v43  ;;  %v9736_v53 = vadd.f32 %v9662_v57, %v2091_v25 }
 0x1c0   : > { %v6898_v49 = vpop.f32.mrf.mxu1  ;;  %7185 = vmatmul.mubr.bf16.gmra.mxu1 %v6487_v9  ;;  %v7019_v54 = vpop.f32.mrf.mxu0 }
 0x1c1   : > { %v2104_v35 = vadd.f32 %v6898_v49, %v10328_v24  ;;  %v9740_v8 = vadd.f32 %v9668_v46, %v2083_v37 }
 0x1c2   : > { %v2095_v40 = vpop.f32.mrf.mxu1  ;;  %v3595_v2 = vpop.f32.mrf.mxu0 }
 0x1c3   : > { %v2096_v51 = vadd.f32 %v2095_v40, %v10329_v19  ;;  %v9744_v29 = vadd.f32 %v9678_v12, %v2104_v35 }
 0x1c4   : > { %v6899_v63 = vpop.f32.mrf.mxu1  ;;  %v7022_v57 = vpop.f32.mrf.mxu0 }
 0x1c5   : > { %v2107_v11 = vadd.f32 %v6899_v63, %v10330_v58  ;;  %v9748_v4 = vadd.f32 %v9687_v15, %v2096_v51 }
 0x1c6   : > { %v2098_v6 = vpop.f32.mrf.mxu1  ;;  %v3608_v48 = vpop.f32.mrf.mxu0 }
 0x1c7   : > { %v2099_v42 = vadd.f32 %v2098_v6, %v10331_v38  ;;  %v9751_v46 = vadd.f32 %v6947_v20, %v2107_v11 }
 0x1c8   : > { %v6966_v52 = vpop.f32.mrf.mxu1  ;;  %v7023_v9 = vpop.f32.mrf.mxu0 }
 0x1c9   : > { %v2951_v23 = vadd.f32 %v6966_v52, %v9524_v39  ;;  %v9754_v10 = vadd.f32 %v2551_v18, %v2099_v42 }
 0x1ca   : > { %v2822_v12 = vpop.f32.mrf.mxu1  ;;  %v3611_v60 = vpop.f32.mrf.mxu0 }
 0x1cb   : > { %v2949_v25 = vadd.f32 %v2822_v12, %v9527_v59  ;;  %v9757_v43 = vadd.f32 %v7014_v3, %v2951_v23 }
 0x1cc   : > { %v6967_v15 = vpop.f32.mrf.mxu1  ;;  %v7026_v49 = vpop.f32.mrf.mxu0 }
 0x1cd   : > { %v2952_v37 = vadd.f32 %v6967_v15, %v9535_v32  ;;  %v9760_v24 = vadd.f32 %v3576_v21, %v2949_v25 }
 0x1ce   : > { %v2825_v20 = vpop.f32.mrf.mxu1  ;;  %v3624_v40 = vpop.f32.mrf.mxu0 }
 0x1cf   : > { %v2950_v35 = vadd.f32 %v2825_v20, %v9538_v44  ;;  %v9763_v39 = vadd.f32 %v7015_v1, %v2952_v37 }
 0x1d0   : > { %v6970_v18 = vpop.f32.mrf.mxu1  ;;  %v7027_v51 = vpop.f32.mrf.mxu0 }
 0x1d1   : > { %v2955_v19 = vadd.f32 %v6970_v18, %v9544_v27  ;;  %v9766_v59 = vadd.f32 %v3579_v33, %v2950_v35 }
 0x1d2   : > { %v2838_v3 = vpop.f32.mrf.mxu1  ;;  %v3627_v58 = vpop.f32.mrf.mxu0 }
 0x1d3   : > { %v2953_v63 = vadd.f32 %v2838_v3, %v9547_v0  ;;  %v9769_v32 = vadd.f32 %v7018_v7, %v2955_v19 }
 0x1d4   : > { %v6971_v21 = vpop.f32.mrf.mxu1  ;;  %v7030_v6 = vpop.f32.mrf.mxu0 }
 0x1d5   : > { %v2956_v11 = vadd.f32 %v6971_v21, %v9556_v36  ;;  %v9772_v44 = vadd.f32 %v3592_v16, %v2953_v63  ;;  %v10332_v21 = vld [vmem:[#allocation4_spill] sm:$0xff] }
 0x1d6   : > { %v2841_v1 = vpop.f32.mrf.mxu1  ;;  %v3640_v42 = vpop.f32.mrf.mxu0 }
 0x1d7   : > { %v2954_v38 = vadd.f32 %v2841_v1, %v9562_v31  ;;  %v9775_v27 = vadd.f32 %v7019_v54, %v2956_v11 }
 0x1d8   : > { %v6974_v33 = vpop.f32.mrf.mxu1  ;;  %v7031_v23 = vpop.f32.mrf.mxu0 }
 0x1d9   : > { %v2959_v52 = vadd.f32 %v6974_v33, %v9573_v34  ;;  %v9778_v0 = vadd.f32 %v3595_v2, %v2954_v38 }
 0x1da   : > { %v2854_v7 = vpop.f32.mrf.mxu1  ;;  %v3643_v25 = vpop.f32.mrf.mxu0 }
 0x1db   : > { %v2957_v12 = vadd.f32 %v2854_v7, %v9588_v17  ;;  %v9781_v36 = vadd.f32 %v7022_v57, %v2959_v52 }
 0x1dc   : > { %v6975_v16 = vpop.f32.mrf.mxu1  ;;  %v7034_v37 = vpop.f32.mrf.mxu0 }
 0x1dd   : > { %v2960_v15 = vadd.f32 %v6975_v16, %v9603_v50  ;;  %v9784_v31 = vadd.f32 %v3608_v48, %v2957_v12 }
 0x1de   : > { %v2857_v54 = vpop.f32.mrf.mxu1  ;;  %v3656_v35 = vpop.f32.mrf.mxu0 }
 0x1df   : > { %v2958_v20 = vadd.f32 %v2857_v54, %v9613_v61  ;;  %v9787_v34 = vadd.f32 %v7023_v9, %v2960_v15 }
 0x1e0   : > { %v6978_v2 = vpop.f32.mrf.mxu1  ;;  %v7035_v19 = vpop.f32.mrf.mxu0 }
 0x1e1   : > { %v2963_v18 = vadd.f32 %v6978_v2, %v9634_v13  ;;  %v9790_v17 = vadd.f32 %v3611_v60, %v2958_v20 }
 0x1e2   : > { %v2870_v57 = vpop.f32.mrf.mxu1  ;;  %v3659_v63 = vpop.f32.mrf.mxu0 }
 0x1e3   : > { %v2961_v3 = vadd.f32 %v2870_v57, %v9647_v56  ;;  %v9793_v50 = vadd.f32 %v7026_v49, %v2963_v18 }
 0x1e4   : > { %v6979_v48 = vpop.f32.mrf.mxu1  ;;  %v7038_v1 = vpop.f32.mrf.mxu0 }
 0x1e5   : > { %v2964_v11 = vadd.f32 %v6979_v48, %v10332_v21  ;;  %v9796_v61 = vadd.f32 %v3624_v40, %v2961_v3 }
 0x1e6   : > { %v2873_v9 = vpop.f32.mrf.mxu1  ;;  %v3672_v33 = vpop.f32.mrf.mxu0 }
 0x1e7   : > { %v2962_v38 = vadd.f32 %v2873_v9, %v9665_v14  ;;  %v9799_v13 = vadd.f32 %v7027_v51, %v2964_v11 }
 0x1e8   : > { %v6982_v60 = vpop.f32.mrf.mxu1  ;;  %v7039_v7 = vpop.f32.mrf.mxu0 }
 0x1e9   : > { %v2967_v52 = vadd.f32 %v6982_v60, %v9675_v5  ;;  %v9802_v56 = vadd.f32 %v3627_v58, %v2962_v38 }
 0x1ea   : > { %v2886_v49 = vpop.f32.mrf.mxu1  ;;  %v3675_v54 = vpop.f32.mrf.mxu0 }
 0x1eb   : > { %v2965_v12 = vadd.f32 %v2886_v49, %v9681_v22  ;;  %v9805_v16 = vadd.f32 %v7030_v6, %v2967_v52 }
 0x1ec   : > { %v6983_v15 = vpop.f32.mrf.mxu1 }
 0x1ed   : > { %v2968_v40 = vadd.f32 %v6983_v15, %v9690_v55  ;;  %v9808_v20 = vadd.f32 %v3640_v42, %v2965_v12 }
 0x1ee   : > { %v2889_v14 = vpop.f32.mrf.mxu1 }
 0x1ef   : > { %10333 = vst [vmem:[#allocation5_spill] sm:$0xff] %v9808_v20  ;;  %v2966_v51 = vadd.f32 %v2889_v14, %v9704_v41  ;;  %v9811_v2 = vadd.f32 %v7031_v23, %v2968_v40 }
 0x1f0   : > { %v6986_v5 = vpop.f32.mrf.mxu1  ;;  %v7042_v18 = vpop.f32.mrf.mxu0 }
 0x1f1   : > { %10334 = vst [vmem:[#allocation3_spill] sm:$0xff] %v9811_v2  ;;  %v2971_v58 = vadd.f32 %v6986_v5, %v9708_v28  ;;  %v9814_v57 = vadd.f32 %v3643_v25, %v2966_v51 }
 0x1f2   : > { %v2902_v22 = vpop.f32.mrf.mxu1  ;;  %v3688_v3 = vpop.f32.mrf.mxu0 }
 0x1f3   : > { %10335 = vst [vmem:[#allocation6_spill] sm:$0xff] %v9814_v57  ;;  %v2969_v6 = vadd.f32 %v2902_v22, %v9712_v26  ;;  %v9817_v48 = vadd.f32 %v7034_v37, %v2971_v58 }
 0x1f4   : > { %v6987_v55 = vpop.f32.mrf.mxu1  ;;  %v7043_v21 = vpop.f32.mrf.mxu0 }
 0x1f5   : > { %10336 = vst [vmem:[#allocation7_spill] sm:$0xff] %v9817_v48  ;;  %v2972_v42 = vadd.f32 %v6987_v55, %v9716_v47  ;;  %v9820_v11 = vadd.f32 %v3656_v35, %v2969_v6 }
 0x1f6   : > { %v2905_v41 = vpop.f32.mrf.mxu1  ;;  %v3691_v9 = vpop.f32.mrf.mxu0 }
 0x1f7   : > { %10337 = vst [vmem:[#allocation9_spill] sm:$0xff] %v9820_v11  ;;  %v2970_v23 = vadd.f32 %v2905_v41, %v9724_v62  ;;  %v9823_v28 = vadd.f32 %v7035_v19, %v2972_v42 }
 0x1f8   : > { %v6990_v25 = vpop.f32.mrf.mxu1  ;;  %v9826_v60 = vpop.f32.mrf.mxu0 }
 0x1f9   : > { %10338 = vst [vmem:[#allocation11_spill] sm:$0xff] %v9823_v28  ;;  %v2975_v38 = vadd.f32 %v6990_v25, %v9728_v30  ;;  %v9828_v26 = vadd.f32 %v3659_v63, %v2970_v23 }
 0x1fa   : > { %v2918_v37 = vpop.f32.mrf.mxu1  ;;  %v9831_v47 = vpop.f32.mrf.mxu0 }
 0x1fb   : > { %10339 = vst [vmem:[#allocation13_spill] sm:$0xff] %v9828_v26  ;;  %v2973_v52 = vadd.f32 %v2918_v37, %v9732_v45  ;;  %v9833_v35 = vadd.f32 %v7038_v1, %v2975_v38 }
 0x1fc   : > { %v6991_v49 = vpop.f32.mrf.mxu1  ;;  %v9836_v12 = vpop.f32.mrf.mxu0 }
 0x1fd   : > { %10340 = vst [vmem:[#allocation15_spill] sm:$0xff] %v9833_v35  ;;  %v2976_v62 = vadd.f32 %v6991_v49, %v9736_v53  ;;  %v9838_v19 = vadd.f32 %v3672_v33, %v2973_v52 }
 0x1fe   : > { %v2921_v15 = vpop.f32.mrf.mxu1  ;;  %v9841_v40 = vpop.f32.mrf.mxu0 }
 0x1ff   : > { %10341 = vst [vmem:[#allocation29_spill] sm:$0xff] %v9838_v19  ;;  %v2974_v30 = vadd.f32 %v2921_v15, %v9740_v8  ;;  %v9843_v63 = vadd.f32 %v7039_v7, %v2976_v62 }
 0x200   : > { %v6994_v14 = vpop.f32.mrf.mxu1  ;;  %v9846_v51 = vpop.f32.mrf.mxu0 }
 0x201   : > { %10342 = vst [vmem:[#allocation20_spill] sm:$0xff] %v9843_v63  ;;  %v2979_v45 = vadd.f32 %v6994_v14, %v9744_v29  ;;  %v9848_v1 = vadd.f32 %v3675_v54, %v2974_v30 }
 0x202   : > { %v2934_v5 = vpop.f32.mrf.mxu1  ;;  %v9851_v58 = vpop.f32.mrf.mxu0 }
 0x203   : > { %10343 = vst [vmem:[#allocation34_spill] sm:$0xff] %v9848_v1  ;;  %v2977_v53 = vadd.f32 %v2934_v5, %v9748_v4  ;;  %v9853_v33 = vadd.f32 %v7042_v18, %v2979_v45 }
 0x204   : > { %v6995_v22 = vpop.f32.mrf.mxu1  ;;  %v9856_v6 = vpop.f32.mrf.mxu0 }
 0x205   : > { %10344 = vst [vmem:[#allocation33_spill] sm:$0xff] %v9853_v33  ;;  %v2980_v8 = vadd.f32 %v6995_v22, %v9751_v46  ;;  %v9858_v7 = vadd.f32 %v3688_v3, %v2977_v53 }
 0x206   : > { %v2937_v55 = vpop.f32.mrf.mxu1  ;;  %v9861_v42 = vpop.f32.mrf.mxu0 }
 0x207   : > { %10345 = vst [vmem:[#allocation21_spill] sm:$0xff] %v9858_v7  ;;  %v2978_v29 = vadd.f32 %v2937_v55, %v9754_v10  ;;  %v9863_v54 = vadd.f32 %v7043_v21, %v2980_v8 }
 0x208   : > { %v7062_v41 = vpop.f32.mrf.mxu1  ;;  %v9867_v18 = vpop.f32.mrf.mxu0 }
 0x209   : > { %10346 = vst [vmem:[#allocation35_spill] sm:$0xff] %v9863_v54  ;;  %v9865_v4 = vadd.f32 %v3691_v9, %v2978_v29 }
 0x20a   : > { %v4074_v23 = vpop.f32.mrf.mxu1  ;;  %v9869_v38 = vpop.f32.mrf.mxu0 }
 0x20b   : > { %10347 = vst [vmem:[#allocation23_spill] sm:$0xff] %v9865_v4 }
 0x20c   : > { %v7063_v25 = vpop.f32.mrf.mxu1  ;;  %v9873_v3 = vpop.f32.mrf.mxu0 }
 0x20e   : > { %v9871_v46 = vpop.f32.mrf.mxu1  ;;  %v9877_v10 = vpop.f32.mrf.mxu0 }
 0x210   : > { %v9875_v37 = vpop.f32.mrf.mxu1 }
 0x212   : > { %v9879_v52 = vpop.f32.mrf.mxu1  ;;  %v9881_v21 = vpop.f32.mrf.mxu0 }
 0x214   : > { %v9883_v9 = vpop.f32.mrf.mxu1  ;;  %v9885_v49 = vpop.f32.mrf.mxu0 }
 0x216   : > { %v9887_v62 = vpop.f32.mrf.mxu1  ;;  %v9889_v15 = vpop.f32.mrf.mxu0 }
 0x217   : > { %10348 = vst [vmem:[#allocation37_spill] sm:$0xff] %v9889_v15 }
 0x218   : > { %v9891_v30 = vpop.f32.mrf.mxu1  ;;  %v9893_v14 = vpop.f32.mrf.mxu0 }
 0x219   : > { %10349 = vst [vmem:[#allocation24_spill] sm:$0xff] %v9893_v14 }
 0x21a   : > { %v9895_v45 = vpop.f32.mrf.mxu1  ;;  %v9897_v5 = vpop.f32.mrf.mxu0 }
 0x21b   : > { %10350 = vst [vmem:[#allocation38_spill] sm:$0xff] %v9897_v5 }
 0x21c   : > { %v9899_v53 = vpop.f32.mrf.mxu1  ;;  %v9901_v22 = vpop.f32.mrf.mxu0 }
 0x21d   : > { %10351 = vst [vmem:[#allocation36_spill] sm:$0xff] %v9901_v22 }
 0x21e   : > { %v9903_v8 = vpop.f32.mrf.mxu1  ;;  %v9905_v55 = vpop.f32.mrf.mxu0 }
 0x21f   : > { %10352 = vst [vmem:[#allocation8_spill] sm:$0xff] %v9905_v55 }
 0x220   : > { %v9907_v29 = vpop.f32.mrf.mxu1  ;;  %v9909_v4 = vpop.f32.mrf.mxu0 }
 0x221   : > { %10353 = vst [vmem:[#allocation10_spill] sm:$0xff] %v9909_v4 }
 0x222   : > { %v9911_v54 = vpop.f32.mrf.mxu1  ;;  %v9913_v7 = vpop.f32.mrf.mxu0 }
 0x223   : > { %10354 = vst [vmem:[#allocation12_spill] sm:$0xff] %v9913_v7 }
 0x224   : > { %v9915_v33 = vpop.f32.mrf.mxu1  ;;  %v9917_v1 = vpop.f32.mrf.mxu0 }
 0x225   : > { %10355 = vst [vmem:[#allocation14_spill] sm:$0xff] %v9917_v1 }
 0x226   : > { %v9919_v63 = vpop.f32.mrf.mxu1  ;;  %v9921_v19 = vpop.f32.mrf.mxu0 }
 0x227   : > { %10356 = vst [vmem:[#allocation16_spill] sm:$0xff] %v9921_v19 }
 0x228   : > { %v9923_v35 = vpop.f32.mrf.mxu1  ;;  %v9925_v26 = vpop.f32.mrf.mxu0 }
 0x229   : > { %10357 = vst [vmem:[#allocation17_spill] sm:$0xff] %v9925_v26 }
 0x22a   : > { %v9927_v28 = vpop.f32.mrf.mxu1  ;;  %v9929_v11 = vpop.f32.mrf.mxu0 }
 0x22b   : > { %10358 = vst [vmem:[#allocation18_spill] sm:$0xff] %v9927_v28  ;;  %10359 = vst [vmem:[#allocation19_spill] sm:$0xff] %v9929_v11 }
 0x22c   : > { %v9931_v4 = vpop.f32.mrf.mxu1  ;;  %v9933_v48 = vpop.f32.mrf.mxu0 }
 0x22d   : > { %10360 = vst [vmem:[#allocation22_spill] sm:$0xff] %v9931_v4  ;;  %10361 = vst [vmem:[#allocation25_spill] sm:$0xff] %v9933_v48 }
 0x22e   : > { %v9935_v7 = vpop.f32.mrf.mxu1  ;;  %v9937_v55 = vpop.f32.mrf.mxu0 }
 0x22f   : > { %10362 = vst [vmem:[#allocation26_spill] sm:$0xff] %v9935_v7  ;;  %10363 = vst [vmem:[#allocation27_spill] sm:$0xff] %v9937_v55 }
 0x230   : > { %v9939_v1 = vpop.f32.mrf.mxu1  ;;  %v9941_v22 = vpop.f32.mrf.mxu0 }
 0x231   : > { %10364 = vst [vmem:[#allocation28_spill] sm:$0xff] %v9939_v1  ;;  %10365 = vst [vmem:[#allocation30_spill] sm:$0xff] %v9941_v22 }
 0x232   : > { %v9943_v19 = vpop.f32.mrf.mxu1  ;;  %v9945_v57 = vpop.f32.mrf.mxu0 }
 0x233   : > { %10366 = vst [vmem:[#allocation31_spill] sm:$0xff] %v9943_v19  ;;  %10367 = vst [vmem:[#allocation32_spill] sm:$0xff] %v9945_v57 }
 0x234   : > { %v9947_v26 = vpop.f32.mrf.mxu1  ;;  %v9949_v5 = vpop.f32.mrf.mxu0 }
 0x235   : > { %10368 = vst [vmem:[#allocation4_spill] sm:$0xff] %v9947_v26  ;;  %10369 = vst [vmem:[#allocation39_spill] sm:$0xff] %v9949_v5 }
 0x236   : > { %v9951_v11 = vpop.f32.mrf.mxu1  ;;  %v9953_v14 = vpop.f32.mrf.mxu0 }
 0x237   : > { %10370 = vst [vmem:[#allocation40_spill] sm:$0xff] %v9951_v11  ;;  %10371 = vst [vmem:[#allocation41_spill] sm:$0xff] %v9953_v14 }
 0x238   : > { %v9955_v48 = vpop.f32.mrf.mxu1  ;;  %v9957_v7 = vpop.f32.mrf.mxu0 }
 0x239   : > { %10372 = vst [vmem:[#allocation42_spill] sm:$0xff] %v9955_v48  ;;  %10373 = vst [vmem:[#allocation43_spill] sm:$0xff] %v9957_v7  ;;  %v4203_v48 = vadd.f32 %v7062_v41, %v9757_v43 }
 0x23a   : > { %v9959_v55 = vpop.f32.mrf.mxu1  ;;  %v7206_v1 = vpop.f32.mrf.mxu0 }
 0x23b   : > { %10374 = vst [vmem:[#allocation44_spill] sm:$0xff] %v9959_v55  ;;  %v4201_v55 = vadd.f32 %v4074_v23, %v9760_v24 }
 0x23c   : > { %v9961_v22 = vpop.f32.mrf.mxu1  ;;  %v5713_v19 = vpop.f32.mrf.mxu0 }
 0x23d   : > { %10375 = vst [vmem:[#allocation45_spill] sm:$0xff] %v9961_v22  ;;  %v4588_v41 = vadd.f32 %v9831_v47, %v4201_v55  ;;  %v4205_v47 = vadd.f32 %v9879_v52, %v9772_v44  ;;  %v4206_v44 = vadd.f32 %v9887_v62, %v9778_v0 }
 0x23e   : > { %v9963_v4 = vpop.f32.mrf.mxu1  ;;  %v7207_v57 = vpop.f32.mrf.mxu0 }
 0x23f   : > { %10376 = vst [vmem:[#allocation46_spill] sm:$0xff] %v9963_v4  ;;  %v4204_v4 = vadd.f32 %v7063_v25, %v9763_v39  ;;  %v4592_v52 = vadd.f32 %v9851_v58, %v4205_v47 }
 0x240   : > { %v9965_v26 = vpop.f32.mrf.mxu1  ;;  %v5716_v5 = vpop.f32.mrf.mxu0 }
 0x241   : > { %10377 = vst [vmem:[#allocation47_spill] sm:$0xff] %v9965_v26  ;;  %v4590_v26 = vadd.f32 %v9826_v60, %v4203_v48  ;;  %v4207_v48 = vadd.f32 %v9875_v37, %v9769_v32 }
 0x242   : > { %v9967_v11 = vpop.f32.mrf.mxu1  ;;  %v7210_v14 = vpop.f32.mrf.mxu0 }
 0x243   : > { %10378 = vst [vmem:[#allocation48_spill] sm:$0xff] %v9967_v11  ;;  %v4202_v11 = vadd.f32 %v9871_v46, %v9766_v59  ;;  %v4591_v59 = vadd.f32 %v9836_v12, %v4204_v4  ;;  %v4594_v12 = vadd.f32 %v9846_v51, %v4207_v48  ;;  %v4208_v4 = vadd.f32 %v9883_v9, %v9775_v27 }
 0x244   : > { %v9970_v2 = vpop.f32.mrf.mxu1  ;;  %v5729_v7 = vpop.f32.mrf.mxu0 }
 0x245   : > { %10379 = vst [vmem:[#allocation49_spill] sm:$0xff] %v9970_v2  ;;  %v4589_v55 = vadd.f32 %v9841_v40, %v4202_v11 }
 0x246   : > { %v9973_v28 = vpop.f32.mrf.mxu1  ;;  %v9975_v22 = vpop.f32.mrf.mxu0 }
 0x247   : > { %10380 = vst [vmem:[#allocation50_spill] sm:$0xff] %v9973_v28 }
 0x248   : > { %v7158_v20 = vpop.f32.mrf.mxu1  ;;  %v9979_v15 = vpop.f32.mrf.mxu0 }
 0x249   : > { %v5344_v43 = vadd.f32 %v7158_v20, %v4590_v26 }
 0x24a   : > { %v5215_v24 = vpop.f32.mrf.mxu1  ;;  %v9991_v39 = vpop.f32.mrf.mxu0 }
 0x24b   : > { %v5842_v60 = vadd.f32 %v7206_v1, %v5344_v43  ;;  %v5342_v23 = vadd.f32 %v5215_v24, %v4588_v41  ;;  %v4595_v41 = vadd.f32 %v9856_v6, %v4208_v4 }
 0x24c   : > { %v7159_v20 = vpop.f32.mrf.mxu1  ;;  %v9996_v26 = vpop.f32.mrf.mxu0 }
 0x24d   : > { %5874 = vst [vmem:[%s9989_s24 + $0x10] sm:$0xff] %v5842_v60  ;;  %v5840_v25 = vadd.f32 %v5713_v19, %v5342_v23  ;;  %v5345_v46 = vadd.f32 %v7159_v20, %v4591_v59  ;;  %v5944_v48 = vmul.f32 %v5842_v60, %v5842_v60  ;;  %v4209_v59 = vadd.f32 %v9895_v45, %v9784_v31 }
 0x24e   : > { %v5218_v28 = vpop.f32.mrf.mxu1  ;;  %v10002_v2 = vpop.f32.mrf.mxu0 }
 0x24f   : > { %5872 = vst [vmem:[%s9989_s24] sm:$0xff] %v5840_v25  ;;  %v5843_v32 = vadd.f32 %v7207_v57, %v5345_v46  ;;  %v5343_v1 = vadd.f32 %v5218_v28, %v4589_v55  ;;  %v4211_v57 = vadd.f32 %v9891_v30, %v9781_v36  ;;  %v5942_v28 = vmul.f32 %v5840_v25, %v5840_v25 }
 0x250   : > { %v7162_v37 = vpop.f32.mrf.mxu1  ;;  %v10010_v19 = vpop.f32.mrf.mxu0 }
 0x251   : > { %5875 = vst [vmem:[%s9989_s24 + $0x18] sm:$0xff] %v5843_v32  ;;  %v5841_v11 = vadd.f32 %v5716_v5, %v5343_v1  ;;  %v5348_v40 = vadd.f32 %v7162_v37, %v4594_v12  ;;  %v4593_v5 = vadd.f32 %v9861_v42, %v4206_v44  ;;  %v4598_v6 = vadd.f32 %v9867_v18, %v4211_v57 }
 0x252   : > { %v5231_v51 = vpop.f32.mrf.mxu1  ;;  %v10016_v43 = vpop.f32.mrf.mxu0  ;;  %v5945_v42 = vmul.f32 %v5843_v32, %v5843_v32  ;;  %v4596_v44 = vadd.f32 %v9869_v38, %v4209_v59  ;;  %v4214_v59 = vadd.f32 %v9919_v63, %v9802_v56 }
 0x253   : > { %5873 = vst [vmem:[%s9989_s24 + $0x8] sm:$0xff] %v5841_v11  ;;  %v5904_v27 = vadd.f32 %v5841_v11, %v5840_v25  ;;  %v5943_v9 = vmul.f32 %v5841_v11, %v5841_v11  ;;  %v5846_v0 = vadd.f32 %v7210_v14, %v5348_v40  ;;  %v5346_v62 = vadd.f32 %v5231_v51, %v4592_v52 }
 0x254   : > { %v7163_v24 = vpop.f32.mrf.mxu1  ;;  %v10021_v58 = vpop.f32.mrf.mxu0  ;;  %v4212_v14 = vadd.f32 %v9899_v53, %v9787_v34  ;;  %v4215_v52 = vadd.f32 %v9907_v29, %v9793_v50 }
 0x255   : > { %v5905_v36 = vadd.f32 %v5904_v27, %v5842_v60  ;;  %v5974_v30 = vadd.f32 %v5943_v9, %v5942_v28  ;;  %5878 = vst [vmem:[%s9989_s24 + $0x30] sm:$0xff] %v5846_v0  ;;  %v5844_v23 = vadd.f32 %v5729_v7, %v5346_v62  ;;  %v5349_v20 = vadd.f32 %v7163_v24, %v4595_v41 }
 0x256   : > { %v5234_v47 = vpop.f32.mrf.mxu1  ;;  %v10029_v25 = vpop.f32.mrf.mxu0  ;;  %v4210_v7 = vadd.f32 %v9903_v8, %v9790_v17  ;;  %v4599_v37 = vadd.f32 %v9873_v3, %v4212_v14  ;;  %v5948_v51 = vmul.f32 %v5846_v0, %v5846_v0 }
 0x257   : > { %v5975_v46 = vadd.f32 %v5974_v30, %v5944_v48  ;;  %5876 = vst [vmem:[%s9989_s24 + $0x20] sm:$0xff] %v5844_v23  ;;  %v5906_v60 = vadd.f32 %v5905_v36, %v5843_v32  ;;  %v5347_v55 = vadd.f32 %v5234_v47, %v4593_v5  ;;  %v5946_v31 = vmul.f32 %v5844_v23, %v5844_v23 }
 0x258   : > { %v5847_v45 = vadd.f32 %v9975_v22, %v5349_v20  ;;  %v7166_v34 = vpop.f32.mrf.mxu1  ;;  %v10035_v53 = vpop.f32.mrf.mxu0  ;;  %v4597_v28 = vadd.f32 %v9877_v10, %v4210_v7  ;;  %v10381_v20 = vld [vmem:[#allocation37_spill] sm:$0xff] }
 0x259   : > { %v5907_v1 = vadd.f32 %v5906_v60, %v5844_v23  ;;  %v5976_v18 = vadd.f32 %v5975_v46, %v5945_v42  ;;  %v5845_v12 = vadd.f32 %v9979_v15, %v5347_v55  ;;  %v5352_v4 = vadd.f32 %v7166_v34, %v4598_v6  ;;  %v10382_v55 = vld [vmem:[#allocation5_spill] sm:$0xff] }
 0x25a   : > { %5879 = vst [vmem:[%s9989_s24 + $0x38] sm:$0xff] %v5847_v45  ;;  %v5247_v32 = vpop.f32.mrf.mxu1  ;;  %v10041_v11 = vpop.f32.mrf.mxu0  ;;  %v4213_v15 = vadd.f32 %v9911_v54, %v9796_v61  ;;  %v5949_v41 = vmul.f32 %v5847_v45, %v5847_v45 }
 0x25b   : > { %v5977_v17 = vadd.f32 %v5976_v18, %v5946_v31  ;;  %5877 = vst [vmem:[%s9989_s24 + $0x28] sm:$0xff] %v5845_v12  ;;  %v5908_v22 = vadd.f32 %v5907_v1, %v5845_v12  ;;  %v5947_v8 = vmul.f32 %v5845_v12, %v5845_v12  ;;  %v5850_v40 = vadd.f32 %v9991_v39, %v5352_v4  ;;  %v10384_v18 = vld [vmem:[#allocation3_spill] sm:$0xff]  ;;  %v10385_v12 = vld [vmem:[#allocation22_spill] sm:$0xff] }
 0x25c   : > { %v5350_v57 = vadd.f32 %v5247_v32, %v4596_v44  ;;  %v7167_v38 = vpop.f32.mrf.mxu1  ;;  %v10050_v3 = vpop.f32.mrf.mxu0  ;;  %v4216_v39 = vadd.f32 %v9915_v33, %v9799_v13  ;;  %v4600_v36 = vadd.f32 %v9885_v49, %v4213_v15  ;;  %v4220_v4 = vadd.f32 %v10385_v12, %v10384_v18  ;;  %v10386_v44 = vld [vmem:[#allocation24_spill] sm:$0xff] }
 0x25d   : > { %v5909_v27 = vadd.f32 %v5908_v22, %v5846_v0  ;;  %v5978_v9 = vadd.f32 %v5977_v17, %v5947_v8  ;;  %5882 = vst [vmem:[%s9989_s24 + $0x50] sm:$0xff] %v5850_v40  ;;  %v5353_v62 = vadd.f32 %v7167_v38, %v4599_v37  ;;  %v4602_v0 = vadd.f32 %v9881_v21, %v4215_v52  ;;  %v10387_v17 = vld [vmem:[#allocation38_spill] sm:$0xff] }
 0x25e   : > { %v5848_v50 = vadd.f32 %v9996_v26, %v5350_v57  ;;  %v5250_v61 = vpop.f32.mrf.mxu1  ;;  %v10056_v54 = vpop.f32.mrf.mxu0  ;;  %v4603_v47 = vadd.f32 %v10381_v20, %v4216_v39  ;;  %v5952_v31 = vmul.f32 %v5850_v40, %v5850_v40  ;;  %v4601_v32 = vadd.f32 %v10386_v44, %v4214_v59  ;;  %v10389_v57 = vld [vmem:[#allocation26_spill] sm:$0xff]  ;;  %v10400_v44 = vld [vmem:[#allocation13_spill] sm:$0xff] }
 0x25f   : > { %v5979_v29 = vadd.f32 %v5978_v9, %v5948_v51  ;;  %v5910_v10 = vadd.f32 %v5909_v27, %v5847_v45  ;;  %v5851_v24 = vadd.f32 %v10002_v2, %v5353_v62  ;;  %v5351_v5 = vadd.f32 %v5250_v61, %v4597_v28  ;;  %v10390_v27 = vld [vmem:[#allocation36_spill] sm:$0xff] }
 0x260   : > { %5880 = vst [vmem:[%s9989_s24 + $0x40] sm:$0xff] %v5848_v50  ;;  %v7170_v48 = vpop.f32.mrf.mxu1  ;;  %v10062_v13 = vpop.f32.mrf.mxu0  ;;  %v5950_v30 = vmul.f32 %v5848_v50, %v5848_v50  ;;  %v4219_v2 = vadd.f32 %v9923_v35, %v9805_v16 }
 0x261   : > { %v5911_v33 = vadd.f32 %v5910_v10, %v5848_v50  ;;  %v5980_v26 = vadd.f32 %v5979_v29, %v5949_v41  ;;  %5883 = vst [vmem:[%s9989_s24 + $0x58] sm:$0xff] %v5851_v24  ;;  %v5849_v23 = vadd.f32 %v10010_v19, %v5351_v5  ;;  %v5356_v14 = vadd.f32 %v7170_v48, %v4602_v0  ;;  %v10383_v19 = vld [vmem:[#allocation18_spill] sm:$0xff]  ;;  %v10392_v5 = vld [vmem:[#allocation7_spill] sm:$0xff]  ;;  %v10393_v0 = vld [vmem:[#allocation28_spill] sm:$0xff] }
 0x262   : > { %v5263_v21 = vpop.f32.mrf.mxu1  ;;  %v10071_v6 = vpop.f32.mrf.mxu0  ;;  %v4217_v7 = vadd.f32 %v10383_v19, %v10382_v55  ;;  %v4606_v22 = vadd.f32 %v10387_v17, %v4219_v2  ;;  %v4223_v48 = vadd.f32 %v10393_v0, %v10392_v5  ;;  %v10408_v0 = vld [vmem:[#allocation17_spill] sm:$0xff] }
 0x263   : > { %v5981_v49 = vadd.f32 %v5980_v26, %v5950_v30  ;;  %5881 = vst [vmem:[%s9989_s24 + $0x48] sm:$0xff] %v5849_v23  ;;  %v5912_v42 = vadd.f32 %v5911_v33, %v5849_v23  ;;  %v5951_v46 = vmul.f32 %v5849_v23, %v5849_v23  ;;  %v5354_v60 = vadd.f32 %v5263_v21, %v4600_v36  ;;  %v10395_v21 = vld [vmem:[#allocation31_spill] sm:$0xff] }
 0x264   : > { %v5854_v56 = vadd.f32 %v10016_v43, %v5356_v14  ;;  %v7171_v16 = vpop.f32.mrf.mxu1  ;;  %v10077_v35 = vpop.f32.mrf.mxu0  ;;  %v5953_v43 = vmul.f32 %v5851_v24, %v5851_v24  ;;  %v4604_v9 = vadd.f32 %v10390_v27, %v4217_v7  ;;  %v10394_v14 = vld [vmem:[#allocation9_spill] sm:$0xff] }
 0x265   : > { %v5913_v63 = vadd.f32 %v5912_v42, %v5850_v40  ;;  %v5982_v45 = vadd.f32 %v5981_v49, %v5951_v46  ;;  %v5852_v34 = vadd.f32 %v10021_v58, %v5354_v60  ;;  %v5357_v1 = vadd.f32 %v7171_v16, %v4603_v47  ;;  %v10388_v58 = vld [vmem:[#allocation6_spill] sm:$0xff]  ;;  %v10397_v46 = vld [vmem:[#allocation11_spill] sm:$0xff]  ;;  %v10398_v60 = vld [vmem:[#allocation4_spill] sm:$0xff] }
 0x266   : > { %5886 = vst [vmem:[%s9989_s24 + $0x70] sm:$0xff] %v5854_v56  ;;  %v5266_v37 = vpop.f32.mrf.mxu1  ;;  %v10085_v8 = vpop.f32.mrf.mxu0  ;;  %v4218_v38 = vadd.f32 %v10389_v57, %v10388_v58  ;;  %v10396_v49 = vld [vmem:[#allocation10_spill] sm:$0xff]  ;;  %v5956_v55 = vmul.f32 %v5854_v56, %v5854_v56  ;;  %v10403_v57 = vld [vmem:[#allocation16_spill] sm:$0xff] }
 0x267   : > { %v5983_v52 = vadd.f32 %v5982_v45, %v5952_v31  ;;  %5884 = vst [vmem:[%s9989_s24 + $0x60] sm:$0xff] %v5852_v34  ;;  %v5914_v40 = vadd.f32 %v5913_v63, %v5851_v24  ;;  %v5855_v15 = vadd.f32 %v10029_v25, %v5357_v1  ;;  %v5355_v28 = vadd.f32 %v5266_v37, %v4601_v32  ;;  %v10391_v25 = vld [vmem:[#allocation8_spill] sm:$0xff] }
 0x268   : > { %v7174_v51 = vpop.f32.mrf.mxu1  ;;  %v10092_v62 = vpop.f32.mrf.mxu0  ;;  %v5954_v41 = vmul.f32 %v5852_v34, %v5852_v34  ;;  %v4607_v24 = vadd.f32 %v10391_v25, %v4220_v4  ;;  %v4605_v42 = vadd.f32 %v10396_v49, %v4218_v38  ;;  %v10399_v45 = vld [vmem:[#allocation12_spill] sm:$0xff] }
 0x269   : > { %v5915_v39 = vadd.f32 %v5914_v40, %v5852_v34  ;;  %v5984_v50 = vadd.f32 %v5983_v52, %v5953_v43  ;;  %5887 = vst [vmem:[%s9989_s24 + $0x78] sm:$0xff] %v5855_v15  ;;  %v5360_v61 = vadd.f32 %v7174_v51, %v4606_v22  ;;  %v5853_v29 = vadd.f32 %v10035_v53, %v5355_v28  ;;  %v10401_v32 = vld [vmem:[#allocation40_spill] sm:$0xff]  ;;  %v10402_v22 = vld [vmem:[#allocation14_spill] sm:$0xff]  ;;  %v10404_v28 = vld [vmem:[#allocation15_spill] sm:$0xff] }
 0x26a   : > { %v5279_v10 = vpop.f32.mrf.mxu1  ;;  %v10101_v2 = vpop.f32.mrf.mxu0  ;;  %v4221_v53 = vadd.f32 %v10395_v21, %v10394_v14  ;;  %v4610_v34 = vadd.f32 %v10399_v45, %v4223_v48  ;;  %v5957_v1 = vmul.f32 %v5855_v15, %v5855_v15  ;;  %v4222_v37 = vadd.f32 %v10401_v32, %v10400_v44 }
 0x26b   : > { %v5985_v36 = vadd.f32 %v5984_v50, %v5954_v41  ;;  %v5858_v33 = vadd.f32 %v10041_v11, %v5360_v61  ;;  %v5358_v30 = vadd.f32 %v5279_v10, %v4604_v9  ;;  %5885 = vst [vmem:[%s9989_s24 + $0x68] sm:$0xff] %v5853_v29  ;;  %v5916_v26 = vadd.f32 %v5915_v39, %v5853_v29  ;;  %v10407_v10 = vld [vmem:[#allocation44_spill] sm:$0xff] }
 0x26c   : > { %v5955_v23 = vmul.f32 %v5853_v29, %v5853_v29  ;;  %v7175_v59 = vpop.f32.mrf.mxu1  ;;  %v4224_v11 = vadd.f32 %v10398_v60, %v10397_v46  ;;  %v5809_v4 = vpop.f32.mrf.mxu0  ;;  %v4608_v43 = vadd.f32 %v10402_v22, %v4221_v53  ;;  %v10406_v29 = vld [vmem:[#allocation29_spill] sm:$0xff]  ;;  %v4609_v48 = vadd.f32 %v10408_v0, %v4222_v37 }
 0x26d   : > { %5890 = vst [vmem:[%s9989_s24 + $0x90] sm:$0xff] %v5858_v33  ;;  %v5856_v20 = vadd.f32 %v10050_v3, %v5358_v30  ;;  %v5361_v47 = vadd.f32 %v7175_v59, %v4607_v24  ;;  %v5917_v19 = vadd.f32 %v5916_v26, %v5854_v56  ;;  %v4225_v25 = vadd.f32 %v10407_v10, %v10406_v29  ;;  %v10410_v30 = vld [vmem:[#allocation45_spill] sm:$0xff]  ;;  %v10423_v10 = vld [vmem:[#allocation32_spill] sm:$0xff] }
 0x26e   : > { %v5986_v7 = vadd.f32 %v5985_v36, %v5955_v23  ;;  %v5282_v31 = vpop.f32.mrf.mxu1  ;;  %v4611_v38 = vadd.f32 %v10403_v57, %v4224_v11  ;;  %v7231_v61 = vpop.f32.mrf.mxu0  ;;  %v10409_v36 = vld [vmem:[#allocation20_spill] sm:$0xff]  ;;  %v10412_v11 = vld [vmem:[#allocation34_spill] sm:$0xff] }
 0x26f   : > { %5888 = vst [vmem:[%s9989_s24 + $0x80] sm:$0xff] %v5856_v20  ;;  %v5859_v16 = vadd.f32 %v10056_v54, %v5361_v47  ;;  %v5359_v63 = vadd.f32 %v5282_v31, %v4605_v42  ;;  %v5918_v18 = vadd.f32 %v5917_v19, %v5855_v15  ;;  %v5958_v52 = vmul.f32 %v5856_v20, %v5856_v20  ;;  %v10405_v15 = vld [vmem:[#allocation42_spill] sm:$0xff]  ;;  %v10414_v31 = vld [vmem:[#allocation25_spill] sm:$0xff] }
 0x270   : > { %v5987_v3 = vadd.f32 %v5986_v7, %v5956_v55  ;;  %v7178_v12 = vpop.f32.mrf.mxu1  ;;  %v4227_v51 = vadd.f32 %v10405_v15, %v10404_v28  ;;  %v4228_v26 = vadd.f32 %v10410_v30, %v10409_v36  ;;  %v5812_v60 = vpop.f32.mrf.mxu0  ;;  %v10413_v55 = vld [vmem:[#allocation46_spill] sm:$0xff]  ;;  %v10424_v36 = vld [vmem:[#allocation23_spill] sm:$0xff] }
 0x271   : > { %5891 = vst [vmem:[%s9989_s24 + $0x98] sm:$0xff] %v5859_v16  ;;  %v5857_v56 = vadd.f32 %v10062_v13, %v5359_v63  ;;  %v5364_v17 = vadd.f32 %v7178_v12, %v4610_v34  ;;  %v5919_v54 = vadd.f32 %v5918_v18, %v5856_v20  ;;  %v10411_v20 = vld [vmem:[#allocation19_spill] sm:$0xff]  ;;  %v5961_v49 = vmul.f32 %v5859_v16, %v5859_v16  ;;  %v10416_v12 = vld [vmem:[#allocation33_spill] sm:$0xff]  ;;  %v10425_v30 = vld [vmem:[#allocation50_spill] sm:$0xff] }
 0x272   : > { %v5988_v40 = vadd.f32 %v5987_v3, %v5957_v1  ;;  %v5295_v58 = vpop.f32.mrf.mxu1  ;;  %v4614_v47 = vadd.f32 %v10411_v20, %v4227_v51  ;;  %v4226_v19 = vadd.f32 %v10413_v55, %v10412_v11  ;;  %v4612_v63 = vadd.f32 %v10414_v31, %v4225_v25  ;;  %v10415_v3 = vld [vmem:[#allocation27_spill] sm:$0xff] }
 0x273   : > { %5889 = vst [vmem:[%s9989_s24 + $0x88] sm:$0xff] %v5857_v56  ;;  %v5959_v27 = vmul.f32 %v5857_v56, %v5857_v56  ;;  %v5862_v9 = vadd.f32 %v10071_v6, %v5364_v17  ;;  %v5362_v39 = vadd.f32 %v5295_v58, %v4608_v43  ;;  %v5920_v41 = vadd.f32 %v5919_v54, %v5857_v56  ;;  %v7234_v43 = vpop.f32.mrf.mxu0  ;;  %v10418_v54 = vld [vmem:[#allocation21_spill] sm:$0xff] }
 0x274   : > { %v5989_v13 = vadd.f32 %v5988_v40, %v5958_v52  ;;  %v7179_v50 = vpop.f32.mrf.mxu1  ;;  %v5960_v6 = vmul.f32 %v5858_v33, %v5858_v33  ;;  %v4615_v18 = vadd.f32 %v10415_v3, %v4228_v26  ;;  %v10419_v52 = vld [vmem:[#allocation48_spill] sm:$0xff]  ;;  %v4230_v26 = vadd.f32 %v10425_v30, %v10424_v36 }
 0x275   : > { %5894 = vst [vmem:[%s9989_s24 + $0xb0] sm:$0xff] %v5862_v9  ;;  %v5860_v24 = vadd.f32 %v10077_v35, %v5362_v39  ;;  %v5365_v5 = vadd.f32 %v7179_v50, %v4611_v38  ;;  %v5921_v23 = vadd.f32 %v5920_v41, %v5858_v33  ;;  %v4229_v40 = vadd.f32 %v10419_v52, %v10418_v54  ;;  %v10420_v38 = vld [vmem:[#allocation30_spill] sm:$0xff] }
 0x276   : > { %v5990_v59 = vadd.f32 %v5989_v13, %v5959_v27  ;;  %v5298_v14 = vpop.f32.mrf.mxu1  ;;  %v4613_v28 = vadd.f32 %v10420_v38, %v4226_v19  ;;  %v5964_v15 = vmul.f32 %v5862_v9, %v5862_v9  ;;  %v10422_v13 = vld [vmem:[#allocation49_spill] sm:$0xff] }
 0x277   : > { %5892 = vst [vmem:[%s9989_s24 + $0xa0] sm:$0xff] %v5860_v24  ;;  %v5863_v21 = vadd.f32 %v10085_v8, %v5365_v5  ;;  %v5363_v53 = vadd.f32 %v5298_v14, %v4609_v48  ;;  %v5922_v42 = vadd.f32 %v5921_v23, %v5859_v16  ;;  %v5962_v45 = vmul.f32 %v5860_v24, %v5860_v24  ;;  %v10417_v16 = vld [vmem:[#allocation47_spill] sm:$0xff]  ;;  %v5825_v48 = vpop.f32.mrf.mxu0 }
 0x278   : > { %v5991_v35 = vadd.f32 %v5990_v59, %v5960_v6  ;;  %v7182_v46 = vpop.f32.mrf.mxu1  ;;  %v4231_v44 = vadd.f32 %v10417_v16, %v10416_v12  ;;  %v10426_v23 = vld [vmem:[#allocation39_spill] sm:$0xff] }
 0x279   : > { %5895 = vst [vmem:[%s9989_s24 + $0xb8] sm:$0xff] %v5863_v21  ;;  %v5861_v33 = vadd.f32 %v10092_v62, %v5363_v53  ;;  %v5368_v7 = vadd.f32 %v7182_v46, %v4614_v47  ;;  %v5923_v8 = vadd.f32 %v5922_v42, %v5860_v24  ;;  %v5965_v24 = vmul.f32 %v5863_v21, %v5863_v21  ;;  %v7235_v55 = vpop.f32.mrf.mxu0 }
 0x27a   : > { %v5992_v34 = vadd.f32 %v5991_v35, %v5961_v49  ;;  %v5311_v1 = vpop.f32.mrf.mxu1  ;;  %v4618_v25 = vadd.f32 %v10423_v10, %v4231_v44  ;;  %v4616_v59 = vadd.f32 %v10426_v23, %v4229_v40  ;;  %v10427_v35 = vld [vmem:[#allocation41_spill] sm:$0xff] }
 0x27b   : > { %5893 = vst [vmem:[%s9989_s24 + $0xa8] sm:$0xff] %v5861_v33  ;;  %v5963_v32 = vmul.f32 %v5861_v33, %v5861_v33  ;;  %v5866_v37 = vadd.f32 %v10101_v2, %v5368_v7  ;;  %v5366_v56 = vadd.f32 %v5311_v1, %v4612_v63  ;;  %v5924_v17 = vadd.f32 %v5923_v8, %v5861_v33  ;;  %v10421_v2 = vld [vmem:[#allocation35_spill] sm:$0xff]  ;;  %v5828_v44 = vpop.f32.mrf.mxu0 }
 0x27c   : > { %v5993_v62 = vadd.f32 %v5992_v34, %v5962_v45  ;;  %v7183_v22 = vpop.f32.mrf.mxu1  ;;  %v4232_v41 = vadd.f32 %v10422_v13, %v10421_v2  ;;  %v10428_v7 = vld [vmem:[#allocation43_spill] sm:$0xff] }
 0x27d   : > { %5898 = vst [vmem:[%s9989_s24 + $0xd0] sm:$0xff] %v5866_v37  ;;  %v5864_v58 = vadd.f32 %v5809_v4, %v5366_v56  ;;  %v5369_v57 = vadd.f32 %v7183_v22, %v4615_v18  ;;  %v5925_v51 = vadd.f32 %v5924_v17, %v5862_v9  ;;  %v4617_v31 = vadd.f32 %v10428_v7, %v4230_v26 }
 0x27e   : > { %v5994_v27 = vadd.f32 %v5993_v62, %v5963_v32  ;;  %v5314_v39 = vpop.f32.mrf.mxu1  ;;  %v4619_v42 = vadd.f32 %v10427_v35, %v4232_v41  ;;  %v5968_v63 = vmul.f32 %v5866_v37, %v5866_v37 }
 0x27f   : > { %5896 = vst [vmem:[%s9989_s24 + $0xc0] sm:$0xff] %v5864_v58  ;;  %v5867_v50 = vadd.f32 %v7231_v61, %v5369_v57  ;;  %v5367_v29 = vadd.f32 %v5314_v39, %v4613_v28  ;;  %v5926_v4 = vadd.f32 %v5925_v51, %v5863_v21  ;;  %v5966_v61 = vmul.f32 %v5864_v58, %v5864_v58 }
 0x280   : > { %v5995_v5 = vadd.f32 %v5994_v27, %v5964_v15  ;;  %v7186_v0 = vpop.f32.mrf.mxu1 }
 0x281   : > { %5899 = vst [vmem:[%s9989_s24 + $0xd8] sm:$0xff] %v5867_v50  ;;  %v5865_v9 = vadd.f32 %v5812_v60, %v5367_v29  ;;  %v5372_v6 = vadd.f32 %v7186_v0, %v4618_v25  ;;  %v5927_v14 = vadd.f32 %v5926_v4, %v5864_v58  ;;  %v5969_v18 = vmul.f32 %v5867_v50, %v5867_v50 }
 0x282   : > { %v5996_v53 = vadd.f32 %v5995_v5, %v5965_v24  ;;  %v5327_v20 = vpop.f32.mrf.mxu1 }
 0x283   : > { %5897 = vst [vmem:[%s9989_s24 + $0xc8] sm:$0xff] %v5865_v9  ;;  %v5967_v47 = vmul.f32 %v5865_v9, %v5865_v9  ;;  %v5870_v49 = vadd.f32 %v7234_v43, %v5372_v6  ;;  %v5370_v21 = vadd.f32 %v5327_v20, %v4616_v59  ;;  %v5928_v11 = vadd.f32 %v5927_v14, %v5865_v9 }
 0x284   : > { %v5997_v46 = vadd.f32 %v5996_v53, %v5966_v61  ;;  %v7187_v19 = vpop.f32.mrf.mxu1 }
 0x285   : > { %5902 = vst [vmem:[%s9989_s24 + $0xf0] sm:$0xff] %v5870_v49  ;;  %v5868_v60 = vadd.f32 %v5825_v48, %v5370_v21  ;;  %v5373_v33 = vadd.f32 %v7187_v19, %v4619_v42  ;;  %v5929_v8 = vadd.f32 %v5928_v11, %v5866_v37  ;;  %v5972_v52 = vmul.f32 %v5870_v49, %v5870_v49 }
 0x286   : > { %v5998_v45 = vadd.f32 %v5997_v46, %v5967_v47  ;;  %v5330_v34 = vpop.f32.mrf.mxu1 }
 0x287   : > { %5900 = vst [vmem:[%s9989_s24 + $0xe0] sm:$0xff] %v5868_v60  ;;  %v5871_v1 = vadd.f32 %v7235_v55, %v5373_v33  ;;  %v5371_v3 = vadd.f32 %v5330_v34, %v4617_v31  ;;  %v5930_v16 = vadd.f32 %v5929_v8, %v5867_v50  ;;  %v5970_v62 = vmul.f32 %v5868_v60, %v5868_v60 }
 0x288   : > { %v5999_v12 = vadd.f32 %v5998_v45, %v5968_v63 }
 0x289   : > { %5903 = vst [vmem:[%s9989_s24 + $0xf8] sm:$0xff] %v5871_v1  ;;  %v5869_v32 = vadd.f32 %v5828_v44, %v5371_v3  ;;  %v5931_v56 = vadd.f32 %v5930_v16, %v5868_v60  ;;  %v5973_v58 = vmul.f32 %v5871_v1, %v5871_v1 }
 0x28a   : > { %v6000_v17 = vadd.f32 %v5999_v12, %v5969_v18 }
 0x28b   : > { %5901 = vst [vmem:[%s9989_s24 + $0xe8] sm:$0xff] %v5869_v32  ;;  %v5971_v22 = vmul.f32 %v5869_v32, %v5869_v32  ;;  %v5932_v54 = vadd.f32 %v5931_v56, %v5869_v32 }
 0x28c   : > { %v6001_v43 = vadd.f32 %v6000_v17, %v5970_v62 }
 0x28d   : > { %v5933_v37 = vadd.f32 %v5932_v54, %v5870_v49 }
 0x28e   : > { %v6002_v40 = vadd.f32 %v6001_v43, %v5971_v22 }
 0x28f   : > { %v5934_v57 = vadd.f32 %v5933_v37, %v5871_v1 }
 0x290   : > { %v6003_v38 = vadd.f32 %v6002_v40, %v5972_v52 }
 0x291   : > { %v5935_v28 = vrot.slane %v5934_v57, 4 }
 0x292   : > { %v6004_v15 = vadd.f32 %v6003_v38, %v5973_v58 }
 0x293   : > { %v5936_v51 = vadd.f32 %v5935_v28, %v5934_v57 }
 0x294   : > { %v6005_v27 = vrot.slane %v6004_v15, 4 }
 0x295   : > { %v5937_v39 = vrot.slane %v5936_v51, 2 }
 0x296   : > { %v6006_v2 = vadd.f32 %v6005_v27, %v6004_v15 }
 0x297   : > { %v5938_v13 = vadd.f32 %v5937_v39, %v5936_v51 }
 0x298   : > { %v6007_v41 = vrot.slane %v6006_v2, 2 }
 0x299   : > { %v5939_v50 = vrot.slane %v5938_v13, 1 }
 0x29a   : > { %v6008_v29 = vadd.f32 %v6007_v41, %v6006_v2 }
 0x29b   : > { %v5940_v10 = vadd.f32 %v5939_v50, %v5938_v13 }
 0x29c   : > { %v6009_v25 = vrot.slane %v6008_v29, 1 }
 0x29d   : > { %5941 = vst [vmem:[%s265_s26] sm:$0x1] %v5940_v10 }
 0x29e   : > { %v6010_v24 = vadd.f32 %v6009_v25, %v6008_v29 }
 0x2a0   : > { %6011 = vst [vmem:[%s268_s29] sm:$0x1] %v6010_v24 }
 0x2a1 PF: > { %s17_s21 = sadd.s32 1, %s7420_s21  }
 0x2a2   : > { %p14_p4 = scmp.ge.s32.totalorder %s17_s21, 4  }
 0x2a4   :  { %16 = sbr.rel (!%p14_p4) target bundleno = 1 (0x1), region = 101 }

// kernel: _lambda_.3
= control target key start
LH: loop header
LB: loop body
LE: loop exit
PB: predicated region body
PF: predicated region fallthrough
CT: control target
= control target key end

     0   :  { %s7426_s21 = smov 0   ;;  %s10208_s0 = inlined_call_operand.vmem [shape: f32[1,128], index: 0, kind: input, shape index: {}]   ;;  %s10209_s1 = inlined_call_operand.vmem [shape: f32[1,128], index: 1, kind: input, shape index: {}]   ;;  %s10210_s2 = inlined_call_operand.vmem [shape: f32[2,16,16,128], index: 2, kind: input, shape index: {}]   ;;  %s10211_s3 = inlined_call_operand.vmem [shape: bf16[9,128,128], index: 3, kind: input, shape index: {}]   ;;  %s10212_s4 = inlined_call_operand.vmem [shape: f32[2,16,16,128], index: 4, kind: output, shape index: {0}]   ;;  %s10213_s5 = inlined_call_operand.vmem [shape: f32[2,1,128], index: 5, kind: output, shape index: {1}]   ;;  %s10214_s6 = inlined_call_operand.vmem [shape: f32[2,1,128], index: 6, kind: output, shape index: {2}]  }
   0x1 LB: > { %s6085_s22 = sadd.s32 4294967295, %s7388_s21   ;;  %p6089_p0 = scmp.ge.s32.totalorder %s7388_s21, 1  ;;  %s7388_s21 = sphi %s7426_s21, %s17_s21  }
   0x2   : > { %p217_p1 = scmp.lt.s32.totalorder %s7388_s21, 3 }
   0x4   : > { %p218_p2 = pnand %p6089_p0, %p217_p1 }
   0x6   : > { %221 = sbr.rel (%p218_p2) target bundleno = 664 (0x298), region = 36 }
   0xb   : > { %v7229_v0 = vld [vmem:[%s10211_s3 + $0x78] sm:$0xff]   ;;  %v7230_v1 = vld [vmem:[%s10211_s3 + $0x70] sm:$0xff]   ;;  %v7390_v2 = vmov 0   ;;  %p253_p3 = scmp.lt.s32.totalorder %s6085_s22, 1  ;;  %v7231_v3 = vld [vmem:[%s10211_s3 + $0x68] sm:$0xff]   ;;  %vm387_vm0 = vcmask 1040384  }
   0xc   : > { %380 = vst [vmem:[#allocation2] sm:$0xf] %v7390_v2  ;;  %381 = vst [vmem:[#allocation2 + $0x4] sm:$0xf] %v7390_v2  ;;  %6772 = vmatprep.subr.bf16.mxu0 %v7229_v0  ;;  %7204 = vmatprep.subr.bf16.mxu1 %v7229_v0  ;;  %vm444_vm1 = vcmask 1043456   ;;  %v7232_v4 = vld [vmem:[%s10211_s3 + $0x60] sm:$0xff]  }
   0xd   : > { %382 = vst [vmem:[#allocation2 + $0x8] sm:$0xf] %v7390_v2  ;;  %384 = vst [vmem:[#allocation2 + $0xcc] sm:$0xf] %v7390_v2  ;;  %6773 = vmatpush3.bf16.msra.mxu0 %v7229_v0  ;;  %7212 = vmatpush3.bf16.msra.mxu1 %v7229_v0  ;;  %s10474_s22 = smov (!%p253_p3, %s6085_s22), 1  ;;  %v10230_v6 = vmov 0 }
   0xe   : > { %385 = vst [vmem:[#allocation2 + $0xd0] sm:$0xf] %v7390_v2  ;;  %386 = vst [vmem:[#allocation2 + $0xd4] sm:$0xf] %v7390_v2  ;;  %6774 = vmatprep.subr.bf16.mxu0 %v7230_v1  ;;  %7205 = vmatprep.subr.bf16.mxu1 %v7230_v1  ;;  %s6522_s7 = sshll.u32 %s10474_s22, 8  ;;  %v10233_v10 = vmov 0  ;;  %s265_s26 = scalar_lea.vmem %s10213_s5, %s10474_s22 }
   0xf   : > { %vm388_vm2 = vsmask.f32 256  ;;  %vm445_vm3 = vsmask.f32 7938  ;;  %s7454_s10 = scalar_lea.vmem %s10210_s2, %s6522_s7  ;;  %v7233_v14 = vld [vmem:[%s10211_s3 + $0x58] sm:$0xff]   ;;  %v7234_v28 = vld [vmem:[%s10211_s3 + $0x50] sm:$0xff]   ;;  %s10026_s24 = scalar_lea.vmem %s10212_s4, %s6522_s7 }
  0x10   : > { %vm7457_vm4 = vmand %vm387_vm0, %vm388_vm2  ;;  %v270_v13 = vld [vmem:[%s7454_s10] sm:$0xff]  ;;  %v271_v16 = vld [vmem:[%s7454_s10 + $0x8] sm:$0xff]  ;;  %vm1096_vm6 = vsmask.f32 3328  ;;  %vm1097_vm7 = vsmask.f32 7440  ;;  %s268_s29 = scalar_lea.vmem %s10214_s6, %s10474_s22 }
  0x11   : > { %6775 = vmatpush3.bf16.msra.mxu0 %v7230_v1  ;;  %7213 = vmatpush3.bf16.msra.mxu1 %v7230_v1  ;;  %v10231_v6 = vsel %vm7457_vm4, 4294967295, %v10230_v6  ;;  %vm7464_vm5 = vmand %vm444_vm1, %vm445_vm3  ;;  %v7478_v17 = vld [vmem:[%s10208_s0] ss:$0 sm:$0xff]  ;;  %v393_v23 = vld [vmem:[#allocation2 + $0xc] sm:$0x1]  ;;  %v10238_v61 = vmov 0 }
  0x12   : > { %6776 = vmatprep.subr.bf16.mxu0 %v7231_v3  ;;  %7206 = vmatprep.subr.bf16.mxu1 %v7231_v3  ;;  %10232 = vst [vmem:[#allocation3_spill] sm:$0xff] %v10231_v6  ;;  %v10234_v10 = vsel %vm7464_vm5, 4294967295, %v10233_v10  ;;  %v309_v20 = vmul.f32 %v7478_v17, %v270_v13  ;;  %v310_v21 = vmul.f32 %v7478_v17, %v271_v16  ;;  %v7487_v22 = vld [vmem:[%s10209_s1] ss:$0 sm:$0xff]  ;;  %v394_v24 = vsel %vm7457_vm4, 0, %v393_v23  ;;  %v284_v26 = vld [vmem:[%s7454_s10 + $0x70] sm:$0xff]  ;;  %vm7518_vm9 = vmor %vm1096_vm6, %vm1097_vm7 }
  0x13   : > { %v390_v5 = vld [vmem:[#allocation2] sm:$0x1]  ;;  %v1033_v8 = vld [vmem:[#allocation2 + $0x4] sm:$0xf]  ;;  %10235 = vst [vmem:[#allocation4_spill] sm:$0xff] %v10234_v10  ;;  %v285_v27 = vld [vmem:[%s7454_s10 + $0x78] sm:$0xff]  ;;  %v323_v34 = vmul.f32 %v7478_v17, %v284_v26 }
  0x14   : > { %v447_v7 = vld [vmem:[#allocation2 + $0x8] sm:$0xf]  ;;  %v391_v9 = vsel %vm7457_vm4, 0, %v390_v5  ;;  %v1109_v11 = vshll.u32 %v1033_v8, 16  ;;  %v1113_v12 = vshrl.u32 %v1033_v8, 16  ;;  %v348_v29 = vadd.f32 %v7487_v22, %v309_v20  ;;  %v286_v1 = vld [vmem:[%s7454_s10 + $0x80] sm:$0xff] }
  0x15   : > { %6777 = vmatpush3.bf16.msra.mxu0 %v7231_v3  ;;  %7214 = vmatpush3.bf16.msra.mxu1 %v7231_v3  ;;  %392 = vst [vmem:[#allocation2] sm:$0x1] %v391_v9  ;;  %v448_v15 = vsel %vm7464_vm5, 0, %v447_v7  ;;  %v450_v25 = vld [vmem:[#allocation2 + $0x14] sm:$0xf]  ;;  %v349_v30 = vadd.f32 %v7487_v22, %v310_v21  ;;  %v324_v35 = vmul.f32 %v7478_v17, %v285_v27  ;;  %v7235_v48 = vld [vmem:[%s10211_s3 + $0x48] sm:$0xff]  }
  0x16   : > { %6778 = vmatprep.subr.bf16.mxu0 %v7232_v4  ;;  %7207 = vmatprep.subr.bf16.mxu1 %v7232_v4  ;;  %449 = vst [vmem:[#allocation2 + $0x8] sm:$0xf] %v448_v15  ;;  %v7480_v18 = vrot.slane %v1109_v11, 5  ;;  %v1115_v19 = vrot.slane %v1113_v12, 4  ;;  %395 = vst [vmem:[#allocation2 + $0xc] sm:$0x1] %v394_v24  ;;  %v6524_v39 = vpack.c.bf16 %v348_v29, %v348_v29 }
  0x17   : > { %v451_v31 = vsel %vm7464_vm5, 0, %v450_v25  ;;  %v414_v32 = vld [vmem:[#allocation2 + $0x60] sm:$0x1]  ;;  %v471_v33 = vld [vmem:[#allocation2 + $0x68] sm:$0xf]  ;;  %v6525_v40 = vpack.c.bf16 %v349_v30, %v349_v30  ;;  %v362_v41 = vadd.f32 %v7487_v22, %v323_v34  ;;  %v363_v42 = vadd.f32 %v7487_v22, %v324_v35  ;;  %v272_v29 = vld [vmem:[%s7454_s10 + $0x10] sm:$0xff] }
  0x18   : > { %452 = vst [vmem:[#allocation2 + $0x14] sm:$0xf] %v451_v31  ;;  %v415_v36 = vsel %vm7457_vm4, 0, %v414_v32  ;;  %v472_v37 = vsel %vm7464_vm5, 0, %v471_v33  ;;  %v1116_v38 = vor.u32 %v1115_v19, %v7480_v18  ;;  %vm597_vm8 = vsmask.f32 4368 }
  0x19   : > { %6779 = vmatpush3.bf16.msra.mxu0 %v7232_v4  ;;  %7215 = vmatpush3.bf16.msra.mxu1 %v7232_v4  ;;  %416 = vst [vmem:[#allocation2 + $0x60] sm:$0x1] %v415_v36  ;;  %473 = vst [vmem:[#allocation2 + $0x68] sm:$0xf] %v472_v37  ;;  %v600_v44 = vshrl.u32 %v6524_v39, 16  ;;  %v603_v45 = vshll.u32 %v6524_v39, 16  ;;  %v6538_v52 = vpack.c.bf16 %v362_v41, %v362_v41 }
  0x1a   : > { %6780 = vmatprep.subr.bf16.mxu0 %v7233_v14  ;;  %7208 = vmatprep.subr.bf16.mxu1 %v7233_v14  ;;  %v608_v46 = vshrl.u32 %v6525_v40, 16  ;;  %v611_v47 = vshll.u32 %v6525_v40, 16  ;;  %v7514_v53 = vpack.c.bf16 %v363_v42, %v363_v42  ;;  %v1117_v55 = vrot.slane %v1116_v38, 4  ;;  %vm7525_vm10 = vmor %vm388_vm2, %vm597_vm8  ;;  %v417_v2 = vld [vmem:[#allocation2 + $0x6c] sm:$0x1]  ;;  %v7236_v16 = vld [vmem:[%s10211_s3 + $0x40] sm:$0xff]  }
  0x1b   : > { %v602_v57 = vrot.slane %v600_v44, 7  ;;  %v10239_v61 = vsel %vm7525_vm10, 4294967295, %v10238_v61  ;;  %v719_v63 = vshrl.u32 %v6538_v52, 16  ;;  %v722_v0 = vshll.u32 %v6538_v52, 16  ;;  %v474_v15 = vld [vmem:[#allocation2 + $0x74] sm:$0xf] }
  0x1c   : > { %v1032_v43 = vld [vmem:[#allocation2] sm:$0xf]  ;;  %v610_v58 = vrot.slane %v608_v46, 7  ;;  %10240 = vst [vmem:[#allocation5_spill] sm:$0xff] %v10239_v61  ;;  %v727_v13 = vshrl.u32 %v7514_v53, 16  ;;  %v730_v23 = vshll.u32 %v7514_v53, 16  ;;  %v325_v31 = vmul.f32 %v7478_v17, %v286_v1 }
  0x1d   : > { %6781 = vmatpush3.bf16.msra.mxu0 %v7233_v14  ;;  %7216 = vmatpush3.bf16.msra.mxu1 %v7233_v14  ;;  %v7512_v49 = vld [vmem:[#allocation2 + $0x8] sm:$0x1]  ;;  %v1100_v50 = vshrl.u32 %v1032_v43, 16  ;;  %v1103_v51 = vshll.u32 %v1032_v43, 16  ;;  %v920_v62 = vld [vmem:[#allocation2 + $0xc] sm:$0xf]  ;;  %v605_v4 = vor.u32 %v603_v45, %v602_v57  ;;  %v311_v40 = vmul.f32 %v7478_v17, %v272_v29 }
  0x1e   : > { %6782 = vmatprep.subr.bf16.mxu0 %v7234_v28  ;;  %7209 = vmatprep.subr.bf16.mxu1 %v7234_v28  ;;  %v1119_v56 = vshll.u32 %v7512_v49, 16  ;;  %v606_v5 = vrot.slane %v602_v57, 4  ;;  %v613_v7 = vor.u32 %v611_v47, %v610_v58  ;;  %v615_v11 = vrot.slane %v610_v58, 4  ;;  %v287_v14 = vld [vmem:[%s7454_s10 + $0x88] sm:$0xff]  ;;  %v273_v34 = vld [vmem:[%s7454_s10 + $0x18] sm:$0xff]  ;;  %v274_v53 = vld [vmem:[%s7454_s10 + $0x20] sm:$0xff] }
  0x1f   : > { %v1102_v59 = vrot.slane %v1100_v50, 4  ;;  %v1105_v60 = vrot.slane %v1103_v51, 5  ;;  %v924_v8 = vld [vmem:[#allocation2 + $0x14] sm:$0x1]  ;;  %v721_v12 = vrot.slane %v719_v63, 7  ;;  %v921_v21 = vsel %vm7464_vm5, %v605_v4, %v920_v62  ;;  %v7566_v45 = vld [vmem:[%s10211_s3 + $0xb8] sm:$0xff]  }
  0x20   : > { %v1121_v3 = vrot.slane %v1119_v56, 5  ;;  %v614_v20 = vsel %vm7525_vm10, %v606_v5, %v613_v7  ;;  %v969_v24 = vld [vmem:[#allocation2 + $0x60] sm:$0xf]  ;;  %922 = vst [vmem:[#allocation2 + $0xc] sm:$0xf] %v921_v21  ;;  %v925_v26 = vsel %vm7457_vm4, %v615_v11, %v924_v8  ;;  %v729_v30 = vrot.slane %v727_v13, 7 }
  0x21   : > { %6783 = vmatpush3.bf16.msra.mxu0 %v7234_v28  ;;  %7217 = vmatpush3.bf16.msra.mxu1 %v7234_v28  ;;  %v1106_v9 = vor.u32 %v1105_v60, %v1102_v59  ;;  %923 = vst [vmem:[#allocation2 + $0x10] sm:$0xf] %v614_v20  ;;  %v724_v27 = vor.u32 %v722_v0, %v721_v12  ;;  %v725_v28 = vrot.slane %v721_v12, 4  ;;  %926 = vst [vmem:[#allocation2 + $0x14] sm:$0x1] %v925_v26  ;;  %v275_v13 = vld [vmem:[%s7454_s10 + $0x28] sm:$0xff] }
  0x22   : > { %6784 = vmatprep.subr.bf16.mxu0 %v7235_v48  ;;  %7210 = vmatprep.subr.bf16.mxu1 %v7235_v48  ;;  %v1122_v19 = vsel %vm7518_vm9, %v1117_v55, %v1121_v3  ;;  %v326_v32 = vmul.f32 %v7478_v17, %v287_v14  ;;  %v418_v33 = vsel %vm7457_vm4, 0, %v417_v2  ;;  %v396_v35 = vld [vmem:[#allocation2 + $0x18] sm:$0x1]  ;;  %v973_v38 = vld [vmem:[#allocation2 + $0x68] sm:$0x1]  ;;  %v475_v39 = vsel %vm7464_vm5, 0, %v474_v15 }
  0x23   : > { %v1107_v25 = vrot.slane %v1106_v9, 4  ;;  %v970_v37 = vsel %vm7464_vm5, %v724_v27, %v969_v24  ;;  %419 = vst [vmem:[#allocation2 + $0x6c] sm:$0x1] %v418_v33  ;;  %v453_v41 = vld [vmem:[#allocation2 + $0x20] sm:$0xf]  ;;  %v732_v43 = vor.u32 %v730_v23, %v729_v30  ;;  %v734_v44 = vrot.slane %v729_v30, 4 }
  0x24   : > { %971 = vst [vmem:[#allocation2 + $0x60] sm:$0xf] %v970_v37  ;;  %v364_v46 = vadd.f32 %v7487_v22, %v325_v31  ;;  %476 = vst [vmem:[#allocation2 + $0x74] sm:$0xf] %v475_v39  ;;  %v399_v47 = vld [vmem:[#allocation2 + $0x24] sm:$0x1]  ;;  %v312_v50 = vmul.f32 %v7478_v17, %v273_v34  ;;  %v350_v51 = vadd.f32 %v7487_v22, %v311_v40 }
  0x25   : > { %6785 = vmatpush3.bf16.msra.mxu0 %v7235_v48  ;;  %7218 = vmatpush3.bf16.msra.mxu1 %v7235_v48  ;;  %v1112_v36 = vsel %vm7518_vm9, %v1107_v25, %v7480_v18  ;;  %v7561_v18 = vld [vmem:[%s10211_s3 + $0x38] sm:$0xff]   ;;  %v365_v48 = vadd.f32 %v7487_v22, %v326_v32  ;;  %v397_v52 = vsel %vm7457_vm4, 0, %v396_v35  ;;  %v733_v55 = vsel %vm7525_vm10, %v725_v28, %v732_v43 }
  0x26   : > { %6786 = vmatprep.subr.bf16.mxu0 %v7236_v16  ;;  %7211 = vmatprep.subr.bf16.mxu1 %v7236_v16  ;;  %v6144_v42 = vcombine.low %v1112_v36, %v1122_v19  ;;  %v974_v56 = vsel %vm7457_vm4, %v734_v44, %v973_v38  ;;  %v6540_v57 = vpack.c.bf16 %v364_v46, %v364_v46  ;;  %v454_v58 = vsel %vm7464_vm5, 0, %v453_v41 }
  0x27   : > { %398 = vst [vmem:[#allocation2 + $0x18] sm:$0x1] %v397_v52  ;;  %v2134_v59 = vrot.slane %v7512_v49, 5  ;;  %972 = vst [vmem:[#allocation2 + $0x64] sm:$0xf] %v733_v55  ;;  %v7582_v60 = vpack.c.bf16 %v365_v48, %v365_v48  ;;  %v351_v62 = vadd.f32 %v7487_v22, %v312_v50  ;;  %v400_v63 = vsel %vm7457_vm4, 0, %v399_v47 }
  0x28   : > { %6788 = vmatprep.mubr.bf16.mxu0 %v6144_v42  ;;  %975 = vst [vmem:[#allocation2 + $0x68] sm:$0x1] %v974_v56  ;;  %455 = vst [vmem:[#allocation2 + $0x20] sm:$0xf] %v454_v58  ;;  %v1034_v0 = vld [vmem:[#allocation2 + $0xc] sm:$0xf]  ;;  %v7589_v4 = vpack.c.bf16 %v350_v51, %v350_v51  ;;  %v7592_v5 = vmul.f32 %v7478_v17, %v274_v53  ;;  %v314_v40 = vmul.f32 %v7478_v17, %v275_v13 }
  0x29   : > { %6787 = vmatpush3.bf16.msra.mxu0 %v7236_v16  ;;  %7219 = vmatpush3.bf16.msra.mxu1 %v7236_v16  ;;  %v1035_v1 = vld [vmem:[#allocation2 + $0x10] sm:$0xf]  ;;  %v736_v2 = vshrl.u32 %v6540_v57, 16  ;;  %v739_v3 = vshll.u32 %v6540_v57, 16  ;;  %401 = vst [vmem:[#allocation2 + $0x24] sm:$0x1] %v400_v63  ;;  %v6527_v51 = vpack.c.bf16 %v351_v62, %v351_v62 }
  0x2a   : > { %6820 = vmatprep.subr.bf16.mxu1 %v7561_v18  ;;  %6868 = vmatprep.subr.bf16.mxu0 %v7566_v45  ;;  %v7594_v7 = vld [vmem:[#allocation2 + $0x14] sm:$0x1]  ;;  %v1124_v8 = vshrl.u32 %v1034_v0, 16  ;;  %v1127_v9 = vshll.u32 %v1034_v0, 16  ;;  %v1133_v11 = vshll.u32 %v1035_v1, 16  ;;  %v1137_v12 = vshrl.u32 %v1035_v1, 16 }
  0x2b   : > { %v1143_v14 = vshll.u32 %v7594_v7, 16  ;;  %v2141_v15 = vrot.slane %v7594_v7, 5  ;;  %v738_v16 = vrot.slane %v736_v2, 7  ;;  %v744_v19 = vshrl.u32 %v7582_v60, 16  ;;  %v976_v20 = vld [vmem:[#allocation2 + $0x6c] sm:$0xf] }
  0x2c   : > { %v1126_v21 = vrot.slane %v1124_v8, 4  ;;  %v1129_v23 = vrot.slane %v1127_v9, 5  ;;  %v1135_v24 = vrot.slane %v1133_v11, 5  ;;  %v1139_v25 = vrot.slane %v1137_v12, 4  ;;  %v1048_v26 = vld [vmem:[#allocation2 + $0x60] sm:$0xf] }
  0x2d   : > { %v1145_v27 = vrot.slane %v1143_v14, 5  ;;  %v1292_v28 = vshrl.u32 %v1048_v26, 16  ;;  %v1295_v29 = vshll.u32 %v1048_v26, 16  ;;  %v741_v30 = vor.u32 %v739_v3, %v738_v16  ;;  %v7240_v50 = vld [vmem:[%s10211_s3 + $0xb0] sm:$0xff]   ;;  %v456_v58 = vld [vmem:[#allocation2 + $0x2c] sm:$0xf] }
  0x2e   : > { %v1130_v31 = vor.u32 %v1129_v23, %v1126_v21  ;;  %v1140_v32 = vor.u32 %v1139_v25, %v1135_v24  ;;  %v742_v33 = vrot.slane %v738_v16, 4  ;;  %v746_v34 = vrot.slane %v744_v19, 7  ;;  %v1049_v35 = vld [vmem:[#allocation2 + $0x64] sm:$0xf]  ;;  %v980_v57 = vld [vmem:[#allocation2 + $0x74] sm:$0x1] }
  0x2f   : > { %v1088_v36 = vld [vmem:[#allocation2 + $0x68] sm:$0x1]  ;;  %v1294_v37 = vrot.slane %v1292_v28, 4  ;;  %v1297_v38 = vrot.slane %v1295_v29, 5  ;;  %v977_v39 = vsel %vm7464_vm5, %v741_v30, %v976_v20  ;;  %v1301_v43 = vshll.u32 %v1049_v35, 16  ;;  %v288_v9 = vld [vmem:[%s7454_s10 + $0x90] sm:$0xff] }
  0x30   : > { %v1131_v41 = vrot.slane %v1130_v31, 4  ;;  %v1141_v42 = vrot.slane %v1140_v32, 4  ;;  %v1305_v44 = vshrl.u32 %v1049_v35, 16  ;;  %978 = vst [vmem:[#allocation2 + $0x6c] sm:$0xf] %v977_v39  ;;  %v1311_v47 = vshll.u32 %v1088_v36, 16 }
  0x31   : > { %v1298_v46 = vor.u32 %v1297_v38, %v1294_v37  ;;  %v747_v48 = vshll.u32 %v7582_v60, 16  ;;  %v1303_v55 = vrot.slane %v1301_v43, 5  ;;  %v751_v3 = vrot.slane %v746_v34, 4  ;;  %v931_v31 = vld [vmem:[#allocation2 + $0x20] sm:$0x1]  ;;  %v7242_v32 = vld [vmem:[%s10211_s3 + $0xa8] sm:$0xff]  }
  0x32   : > { %v1136_v52 = vsel %vm7518_vm9, %v1131_v41, %v1135_v24  ;;  %v1146_v53 = vsel %vm7518_vm9, %v1141_v42, %v1145_v27  ;;  %v1307_v56 = vrot.slane %v1305_v44, 4  ;;  %v1313_v1 = vrot.slane %v1311_v47, 5  ;;  %v927_v24 = vld [vmem:[#allocation2 + $0x18] sm:$0xf]  ;;  %v7244_v47 = vld [vmem:[%s10211_s3 + $0xa0] sm:$0xff]  }
  0x33   : > { %v6145_v63 = vcombine.low %v1136_v52, %v1146_v53  ;;  %v1299_v0 = vrot.slane %v1298_v46, 4  ;;  %v749_v60 = vor.u32 %v747_v48, %v746_v34  ;;  %v617_v8 = vshrl.u32 %v7589_v4, 16  ;;  %v420_v37 = vld [vmem:[#allocation2 + $0x78] sm:$0x1]  ;;  %v477_v53 = vld [vmem:[#allocation2 + $0x80] sm:$0xf] }
  0x34   : > { %v1308_v2 = vor.u32 %v1307_v56, %v1303_v55  ;;  %v620_v62 = vshll.u32 %v7589_v4, 16  ;;  %v625_v13 = vshrl.u32 %v6527_v51, 16  ;;  %v628_v14 = vshll.u32 %v6527_v51, 16 }
  0x35   : > { %6789 = vmatmul.mubr.bf16.vlgmr.msra.gmra.mxu0 %v6145_v63  ;;  %v1304_v11 = vsel %vm7518_vm9, %v1299_v0, %v1303_v55  ;;  %v750_v12 = vsel %vm7525_vm10, %v742_v33, %v749_v60  ;;  %v981_v19 = vsel %vm7457_vm4, %v751_v3, %v980_v57  ;;  %v619_v20 = vrot.slane %v617_v8, 7 }
  0x36   : > { %v1309_v16 = vrot.slane %v1308_v2, 4  ;;  %979 = vst [vmem:[#allocation2 + $0x70] sm:$0xf] %v750_v12  ;;  %6869 = vmatpush3.bf16.msra.mxu0 %v7566_v45  ;;  %v352_v4 = vadd.f32 %v7487_v22, %v7592_v5  ;;  %982 = vst [vmem:[#allocation2 + $0x74] sm:$0x1] %v981_v19  ;;  %v627_v23 = vrot.slane %v625_v13, 7  ;;  %v353_v25 = vadd.f32 %v7487_v22, %v314_v40 }
  0x37   : > { %v1050_v21 = vld [vmem:[#allocation2 + $0x6c] sm:$0xf]  ;;  %6870 = vmatprep.subr.bf16.mxu0 %v7240_v50  ;;  %v457_v26 = vsel %vm7464_vm5, 0, %v456_v58  ;;  %v327_v27 = vmul.f32 %v7478_v17, %v288_v9  ;;  %v622_v30 = vor.u32 %v620_v62, %v619_v20  ;;  %v289_v5 = vld [vmem:[%s7454_s10 + $0x98] sm:$0xff]  ;;  %v623_v34 = vrot.slane %v619_v20, 4 }
  0x38   : > { %v1314_v45 = vsel %vm7518_vm9, %v1309_v16, %v1313_v1  ;;  %v1316_v28 = vshrl.u32 %v1050_v21, 16  ;;  %v1319_v29 = vshll.u32 %v1050_v21, 16  ;;  %458 = vst [vmem:[#allocation2 + $0x2c] sm:$0xf] %v457_v26  ;;  %v630_v35 = vor.u32 %v628_v14, %v627_v23  ;;  %v934_v9 = vld [vmem:[#allocation2 + $0x24] sm:$0xf] }
  0x39   : > { %v6152_v33 = vcombine.low %v1304_v11, %v1314_v45  ;;  %v632_v36 = vrot.slane %v627_v23, 4  ;;  %v928_v40 = vsel %vm7464_vm5, %v622_v30, %v927_v24  ;;  %v6528_v41 = vpack.c.bf16 %v352_v4, %v352_v4  ;;  %v7246_v13 = vld [vmem:[%s10211_s3 + $0x98] sm:$0xff]   ;;  %v7248_v30 = vld [vmem:[%s10211_s3 + $0x90] sm:$0xff]  }
  0x3a   : > { %v1318_v38 = vrot.slane %v1316_v28, 4  ;;  %v1321_v39 = vrot.slane %v1319_v29, 5  ;;  %6871 = vmatpush3.bf16.msra.mxu0 %v7240_v50  ;;  %v631_v42 = vsel %vm7525_vm10, %v623_v34, %v630_v35  ;;  %929 = vst [vmem:[#allocation2 + $0x18] sm:$0xf] %v928_v40  ;;  %v6529_v44 = vpack.c.bf16 %v353_v25, %v353_v25 }
  0x3b   : > { %6804 = vmatprep.mubr.bf16.mxu1 %v6152_v33  ;;  %v932_v43 = vsel %vm7457_vm4, %v632_v36, %v931_v31  ;;  %v328_v46 = vmul.f32 %v7478_v17, %v289_v5  ;;  %930 = vst [vmem:[#allocation2 + $0x1c] sm:$0xf] %v631_v42  ;;  %v634_v50 = vshrl.u32 %v6528_v41, 16  ;;  %v637_v51 = vshll.u32 %v6528_v41, 16  ;;  %6872 = vmatprep.subr.bf16.mxu0 %v7242_v32  ;;  %v290_v36 = vld [vmem:[%s7454_s10 + $0xa0] sm:$0xff] }
  0x3c   : > { %v1322_v48 = vor.u32 %v1321_v39, %v1318_v38  ;;  %933 = vst [vmem:[#allocation2 + $0x20] sm:$0x1] %v932_v43  ;;  %v366_v52 = vadd.f32 %v7487_v22, %v327_v27  ;;  %v642_v56 = vshrl.u32 %v6529_v44, 16  ;;  %v645_v57 = vshll.u32 %v6529_v44, 16  ;;  %v423_v41 = vld [vmem:[#allocation2 + $0x84] sm:$0x1] }
  0x3d   : > { %v1051_v55 = vld [vmem:[#allocation2 + $0x70] sm:$0xf]  ;;  %v367_v58 = vadd.f32 %v7487_v22, %v328_v46  ;;  %v421_v63 = vsel %vm7457_vm4, 0, %v420_v37  ;;  %v1089_v0 = vld [vmem:[#allocation2 + $0x74] sm:$0x1]  ;;  %v636_v3 = vrot.slane %v634_v50, 7 }
  0x3e   : > { %v1323_v1 = vrot.slane %v1322_v48, 4  ;;  %v1325_v60 = vshll.u32 %v1051_v55, 16  ;;  %v1329_v2 = vshrl.u32 %v1051_v55, 16  ;;  %422 = vst [vmem:[#allocation2 + $0x78] sm:$0x1] %v421_v63  ;;  %6873 = vmatpush3.bf16.msra.mxu0 %v7242_v32  ;;  %v1335_v8 = vshll.u32 %v1089_v0, 16 }
  0x3f   : > { %v644_v62 = vrot.slane %v642_v56, 7  ;;  %v478_v11 = vsel %vm7464_vm5, 0, %v477_v53  ;;  %v6542_v12 = vpack.c.bf16 %v366_v52, %v366_v52  ;;  %6874 = vmatprep.subr.bf16.mxu0 %v7244_v47  ;;  %v639_v19 = vor.u32 %v637_v51, %v636_v3  ;;  %v938_v4 = vld [vmem:[#allocation2 + $0x2c] sm:$0x1]  ;;  %v7239_v56 = vld [vmem:[%s10211_s3 + $0x30] sm:$0xff]  }
  0x40   : > { %v1327_v14 = vrot.slane %v1325_v60, 5  ;;  %v1331_v16 = vrot.slane %v1329_v2, 4  ;;  %v640_v20 = vrot.slane %v636_v3, 4  ;;  %479 = vst [vmem:[#allocation2 + $0x80] sm:$0xf] %v478_v11  ;;  %v1337_v21 = vrot.slane %v1335_v8, 5 }
  0x41   : > { %v647_v23 = vor.u32 %v645_v57, %v644_v62  ;;  %v649_v24 = vrot.slane %v644_v62, 4  ;;  %v7652_v25 = vpack.c.bf16 %v367_v58, %v367_v58  ;;  %v1036_v45 = vld [vmem:[#allocation2 + $0x18] sm:$0xf]  ;;  %v935_v28 = vsel %vm7464_vm5, %v639_v19, %v934_v9  ;;  %v291_v53 = vld [vmem:[%s7454_s10 + $0xa8] sm:$0xff] }
  0x42   : > { %v1328_v26 = vsel %vm7518_vm9, %v1323_v1, %v1327_v14  ;;  %v1332_v27 = vor.u32 %v1331_v16, %v1327_v14  ;;  %v753_v29 = vshrl.u32 %v6542_v12, 16  ;;  %6875 = vmatpush3.bf16.msra.mxu0 %v7244_v47  ;;  %v1037_v31 = vld [vmem:[#allocation2 + $0x1c] sm:$0xf]  ;;  %v1148_v32 = vshrl.u32 %v1036_v45, 16  ;;  %936 = vst [vmem:[#allocation2 + $0x24] sm:$0xf] %v935_v28 }
  0x43   : > { %v1082_v5 = vld [vmem:[#allocation2 + $0x20] sm:$0x1]  ;;  %v1151_v33 = vshll.u32 %v1036_v45, 16  ;;  %v648_v34 = vsel %vm7525_vm10, %v640_v20, %v647_v23  ;;  %v939_v35 = vsel %vm7457_vm4, %v649_v24, %v938_v4  ;;  %6876 = vmatprep.subr.bf16.mxu0 %v7246_v13  ;;  %v1157_v38 = vshll.u32 %v1037_v31, 16  ;;  %v480_v0 = vld [vmem:[#allocation2 + $0x8c] sm:$0xf] }
  0x44   : > { %v1333_v37 = vrot.slane %v1332_v27, 4  ;;  %v1161_v39 = vshrl.u32 %v1037_v31, 16  ;;  %v1167_v40 = vshll.u32 %v1082_v5, 16  ;;  %937 = vst [vmem:[#allocation2 + $0x28] sm:$0xf] %v648_v34  ;;  %v1150_v42 = vrot.slane %v1148_v32, 4 }
  0x45   : > { %940 = vst [vmem:[#allocation2 + $0x2c] sm:$0x1] %v939_v35  ;;  %v1153_v43 = vrot.slane %v1151_v33, 5  ;;  %v7666_v44 = vrot.slane %v753_v29, 7  ;;  %v756_v46 = vshll.u32 %v6542_v12, 16  ;;  %v1159_v50 = vrot.slane %v1157_v38, 5 }
  0x46   : > { %v983_v47 = vld [vmem:[#allocation2 + $0x78] sm:$0xf]  ;;  %v1338_v48 = vsel %vm7518_vm9, %v1333_v37, %v1337_v21  ;;  %v1163_v51 = vrot.slane %v1161_v39, 4  ;;  %v1169_v52 = vrot.slane %v1167_v40, 5  ;;  %6877 = vmatpush3.bf16.msra.mxu0 %v7246_v13  ;;  %v761_v60 = vshrl.u32 %v7652_v25, 16  ;;  %v7241_v16 = vld [vmem:[%s10211_s3 + $0x28] sm:$0xff]  }
  0x47   : > { %v6153_v55 = vcombine.low %v1328_v26, %v1338_v48  ;;  %v1154_v57 = vor.u32 %v1153_v43, %v1150_v42  ;;  %v758_v58 = vor.u32 %v756_v46, %v7666_v44  ;;  %v759_v63 = vrot.slane %v7666_v44, 4  ;;  %6878 = vmatprep.subr.bf16.mxu0 %v7248_v30  ;;  %v276_v26 = vld [vmem:[%s7454_s10 + $0x30] sm:$0xff]  ;;  %v277_v31 = vld [vmem:[%s7454_s10 + $0x38] sm:$0xff]  ;;  %v7250_v5 = vld [vmem:[%s10211_s3 + $0x88] sm:$0xff]  }
  0x48   : > { %v1164_v1 = vor.u32 %v1163_v51, %v1159_v50  ;;  %v764_v2 = vshll.u32 %v7652_v25, 16  ;;  %v329_v3 = vmul.f32 %v7478_v17, %v290_v36  ;;  %v330_v9 = vmul.f32 %v7478_v17, %v291_v53  ;;  %v987_v36 = vld [vmem:[#allocation2 + $0x80] sm:$0x1] }
  0x49   : > { %6805 = vmatmul.mubr.bf16.vlgmr.msra.gmra.mxu1 %v6153_v55  ;;  %v1155_v8 = vrot.slane %v1154_v57, 4  ;;  %v984_v62 = vsel %vm7464_vm5, %v758_v58, %v983_v47  ;;  %v424_v11 = vsel %vm7457_vm4, 0, %v423_v41  ;;  %v1038_v13 = vld [vmem:[#allocation2 + $0x24] sm:$0xf]  ;;  %v763_v14 = vrot.slane %v761_v60, 7 }
  0x4a   : > { %6821 = vmatpush3.bf16.msra.mxu1 %v7561_v18  ;;  %v1165_v12 = vrot.slane %v1164_v1, 4  ;;  %985 = vst [vmem:[#allocation2 + $0x78] sm:$0xf] %v984_v62  ;;  %v368_v19 = vadd.f32 %v7487_v22, %v329_v3  ;;  %425 = vst [vmem:[#allocation2 + $0x84] sm:$0x1] %v424_v11  ;;  %v481_v20 = vsel %vm7464_vm5, 0, %v480_v0  ;;  %6879 = vmatpush3.bf16.msra.mxu0 %v7248_v30 }
  0x4b   : > { %6822 = vmatprep.subr.bf16.mxu1 %v7239_v56  ;;  %v1160_v18 = vsel %vm7518_vm9, %v1155_v8, %v1159_v50  ;;  %v1039_v4 = vld [vmem:[#allocation2 + $0x28] sm:$0xf]  ;;  %v1172_v23 = vshrl.u32 %v1038_v13, 16  ;;  %v1175_v24 = vshll.u32 %v1038_v13, 16  ;;  %v369_v25 = vadd.f32 %v7487_v22, %v330_v9  ;;  %482 = vst [vmem:[#allocation2 + $0x8c] sm:$0xf] %v481_v20  ;;  %6880 = vmatprep.subr.bf16.mxu0 %v7250_v5 }
  0x4c   : > { %v1083_v21 = vld [vmem:[#allocation2 + $0x2c] sm:$0x1]  ;;  %v1170_v27 = vsel %vm7518_vm9, %v1165_v12, %v1169_v52  ;;  %v1181_v45 = vshll.u32 %v1039_v4, 16  ;;  %v1185_v28 = vshrl.u32 %v1039_v4, 16  ;;  %v402_v30 = vld [vmem:[#allocation2 + $0x30] sm:$0x1]  ;;  %v766_v35 = vor.u32 %v764_v2, %v763_v14 }
  0x4d   : > { %v1191_v29 = vshll.u32 %v1083_v21, 16  ;;  %v6146_v32 = vcombine.low %v1160_v18, %v1170_v27  ;;  %v1174_v33 = vrot.slane %v1172_v23, 4  ;;  %v1177_v34 = vrot.slane %v1175_v24, 5  ;;  %v7243_v44 = vld [vmem:[%s10211_s3 + $0x20] sm:$0xff]   ;;  %v459_v58 = vld [vmem:[#allocation2 + $0x38] sm:$0xf] }
  0x4e   : > { %6823 = vmatpush3.bf16.msra.mxu1 %v7239_v56  ;;  %v1183_v37 = vrot.slane %v1181_v45, 5  ;;  %v1187_v38 = vrot.slane %v1185_v28, 4  ;;  %v768_v40 = vrot.slane %v763_v14, 4  ;;  %v767_v42 = vsel %vm7525_vm10, %v759_v63, %v766_v35  ;;  %6881 = vmatpush3.bf16.msra.mxu0 %v7250_v5  ;;  %v278_v2 = vld [vmem:[%s7454_s10 + $0x40] sm:$0xff]  ;;  %v7245_v3 = vld [vmem:[%s10211_s3 + $0x18] sm:$0xff]   ;;  %v279_v28 = vld [vmem:[%s7454_s10 + $0x48] sm:$0xff] }
  0x4f   : > { %v1193_v39 = vrot.slane %v1191_v29, 5  ;;  %6792 = vmatprep.mubr.bf16.mxu0 %v6146_v32  ;;  %v1178_v41 = vor.u32 %v1177_v34, %v1174_v33  ;;  %6824 = vmatprep.subr.bf16.mxu1 %v7241_v16  ;;  %v6544_v43 = vpack.c.bf16 %v368_v19, %v368_v19  ;;  %v403_v46 = vsel %vm7457_vm4, 0, %v402_v30  ;;  %986 = vst [vmem:[#allocation2 + $0x7c] sm:$0xf] %v767_v42  ;;  %v7252_v20 = vld [vmem:[%s10211_s3 + $0x80] sm:$0xff]   ;;  %v7247_v34 = vld [vmem:[%s10211_s3 + $0x10] sm:$0xff]  }
  0x50   : > { %v1188_v47 = vor.u32 %v1187_v38, %v1183_v37  ;;  %v988_v48 = vsel %vm7457_vm4, %v768_v40, %v987_v36  ;;  %v6545_v50 = vpack.c.bf16 %v369_v25, %v369_v25  ;;  %v315_v51 = vmul.f32 %v7478_v17, %v276_v26  ;;  %404 = vst [vmem:[#allocation2 + $0x30] sm:$0x1] %v403_v46  ;;  %v405_v33 = vld [vmem:[#allocation2 + $0x3c] sm:$0x1]  ;;  %v462_v40 = vld [vmem:[#allocation2 + $0x44] sm:$0xf] }
  0x51   : > { %v1179_v52 = vrot.slane %v1178_v41, 4  ;;  %989 = vst [vmem:[#allocation2 + $0x80] sm:$0x1] %v988_v48  ;;  %v1052_v53 = vld [vmem:[#allocation2 + $0x78] sm:$0xf]  ;;  %v770_v55 = vshrl.u32 %v6544_v43, 16  ;;  %v316_v57 = vmul.f32 %v7478_v17, %v277_v31  ;;  %6882 = vmatprep.subr.bf16.mxu0 %v7252_v20  ;;  %v317_v32 = vmul.f32 %v7478_v17, %v278_v2 }
  0x52   : > { %v773_v56 = vshll.u32 %v6544_v43, 16  ;;  %v1189_v63 = vrot.slane %v1188_v47, 4  ;;  %v1340_v0 = vshrl.u32 %v1052_v53, 16  ;;  %v1343_v1 = vshll.u32 %v1052_v53, 16  ;;  %6825 = vmatpush3.bf16.msra.mxu1 %v7241_v16  ;;  %v990_v11 = vld [vmem:[#allocation2 + $0x84] sm:$0xf]  ;;  %6883 = vmatpush3.bf16.msra.mxu0 %v7252_v20 }
  0x53   : > { %v778_v60 = vshrl.u32 %v6545_v50, 16  ;;  %v1184_v8 = vsel %vm7518_vm9, %v1179_v52, %v1183_v37  ;;  %v772_v62 = vrot.slane %v770_v55, 7  ;;  %v781_v9 = vshll.u32 %v6545_v50, 16  ;;  %6826 = vmatprep.subr.bf16.mxu1 %v7243_v44  ;;  %v994_v27 = vld [vmem:[#allocation2 + $0x8c] sm:$0x1]  ;;  %v7256_v41 = vld [vmem:[%s10211_s3 + $0x138] sm:$0xff]  }
  0x54   : > { %v354_v12 = vadd.f32 %v7487_v22, %v315_v51  ;;  %v1194_v13 = vsel %vm7518_vm9, %v1189_v63, %v1193_v39  ;;  %v1342_v14 = vrot.slane %v1340_v0, 4  ;;  %v1345_v16 = vrot.slane %v1343_v1, 5  ;;  %v292_v52 = vld [vmem:[%s7454_s10 + $0xb0] sm:$0xff]  ;;  %6964 = vmatprep.subr.bf16.mxu0 %v7256_v41  ;;  %v7249_v63 = vld [vmem:[%s10211_s3 + $0x8] sm:$0xff]   ;;  %v2955_v10 = vld [vmem:[#allocation2 + $0x24] sm:$0xf] }
  0x55   : > { %v780_v19 = vrot.slane %v778_v60, 7  ;;  %v6147_v18 = vcombine.low %v1184_v8, %v1194_v13  ;;  %v775_v4 = vor.u32 %v773_v56, %v772_v62  ;;  %v776_v21 = vrot.slane %v772_v62, 4 }
  0x56   : > { %v355_v23 = vadd.f32 %v7487_v22, %v316_v57  ;;  %v1346_v24 = vor.u32 %v1345_v16, %v1342_v14  ;;  %6827 = vmatpush3.bf16.msra.mxu1 %v7243_v44  ;;  %v460_v45 = vsel %vm7464_vm5, 0, %v459_v58  ;;  %v1053_v29 = vld [vmem:[#allocation2 + $0x7c] sm:$0xf]  ;;  %v6530_v30 = vpack.c.bf16 %v354_v12, %v354_v12 }
  0x57   : > { %v783_v25 = vor.u32 %v781_v9, %v780_v19  ;;  %v785_v26 = vrot.slane %v780_v19, 4  ;;  %6793 = vmatmul.mubr.bf16.gmra.mxu0 %v6147_v18  ;;  %v991_v31 = vsel %vm7464_vm5, %v775_v4, %v990_v11  ;;  %461 = vst [vmem:[#allocation2 + $0x38] sm:$0xf] %v460_v45  ;;  %v1349_v37 = vshll.u32 %v1053_v29, 16  ;;  %6828 = vmatprep.subr.bf16.mxu1 %v7245_v3  ;;  %v293_v58 = vld [vmem:[%s7454_s10 + $0xb8] sm:$0xff] }
  0x58   : > { %v6531_v5 = vpack.c.bf16 %v355_v23, %v355_v23  ;;  %v1090_v35 = vld [vmem:[#allocation2 + $0x80] sm:$0x1]  ;;  %v1347_v36 = vrot.slane %v1346_v24, 4  ;;  %v1353_v38 = vshrl.u32 %v1053_v29, 16  ;;  %992 = vst [vmem:[#allocation2 + $0x84] sm:$0xf] %v991_v31  ;;  %v318_v56 = vmul.f32 %v7478_v17, %v279_v28 }
  0x59   : > { %v784_v39 = vsel %vm7525_vm10, %v776_v21, %v783_v25  ;;  %v1359_v42 = vshll.u32 %v1090_v35, 16  ;;  %v995_v43 = vsel %vm7457_vm4, %v785_v26, %v994_v27  ;;  %v651_v44 = vshrl.u32 %v6530_v30, 16  ;;  %v941_v2 = vld [vmem:[#allocation2 + $0x30] sm:$0xf]  ;;  %v7251_v23 = vld [vmem:[%s10211_s3] sm:$0xff]  }
  0x5a   : > { %993 = vst [vmem:[#allocation2 + $0x88] sm:$0xf] %v784_v39  ;;  %v654_v46 = vshll.u32 %v6530_v30, 16  ;;  %v1351_v47 = vrot.slane %v1349_v37, 5  ;;  %v1355_v48 = vrot.slane %v1353_v38, 4  ;;  %v659_v50 = vshrl.u32 %v6531_v5, 16  ;;  %6829 = vmatpush3.bf16.msra.mxu1 %v7245_v3 }
  0x5b   : > { %996 = vst [vmem:[#allocation2 + $0x8c] sm:$0x1] %v995_v43  ;;  %v662_v51 = vshll.u32 %v6531_v5, 16  ;;  %v1361_v53 = vrot.slane %v1359_v42, 5  ;;  %v653_v55 = vrot.slane %v651_v44, 7  ;;  %v356_v57 = vadd.f32 %v7487_v22, %v317_v32  ;;  %6830 = vmatprep.subr.bf16.mxu1 %v7247_v34 }
  0x5c   : > { %v1352_v0 = vsel %vm7518_vm9, %v1347_v36, %v1351_v47  ;;  %v1356_v1 = vor.u32 %v1355_v48, %v1351_v47  ;;  %v661_v60 = vrot.slane %v659_v50, 7  ;;  %v406_v3 = vsel %vm7457_vm4, 0, %v405_v33  ;;  %v426_v32 = vld [vmem:[#allocation2 + $0x90] sm:$0x1]  ;;  %v7254_v33 = vld [vmem:[%s10211_s3 + $0xf8] sm:$0xff]  }
  0x5d   : > { %v656_v8 = vor.u32 %v654_v46, %v653_v55  ;;  %v657_v62 = vrot.slane %v653_v55, 4  ;;  %v357_v17 = vadd.f32 %v7487_v22, %v318_v56  ;;  %407 = vst [vmem:[#allocation2 + $0x3c] sm:$0x1] %v406_v3  ;;  %v463_v9 = vsel %vm7464_vm5, 0, %v462_v40  ;;  %v7760_v22 = vld [vmem:[%s10208_s0] ss:$0 sm:$0xff] }
  0x5e   : > { %v1357_v11 = vrot.slane %v1356_v1, 4  ;;  %v664_v12 = vor.u32 %v662_v51, %v661_v60  ;;  %v666_v13 = vrot.slane %v661_v60, 4  ;;  %v945_v14 = vld [vmem:[#allocation2 + $0x38] sm:$0x1]  ;;  %464 = vst [vmem:[#allocation2 + $0x44] sm:$0xf] %v463_v9  ;;  %v6532_v16 = vpack.c.bf16 %v356_v57, %v356_v57  ;;  %6831 = vmatpush3.bf16.msra.mxu1 %v7247_v34 }
  0x5f   : > { %v1054_v19 = vld [vmem:[#allocation2 + $0x84] sm:$0xf]  ;;  %v942_v20 = vsel %vm7464_vm5, %v656_v8, %v941_v2  ;;  %v6533_v18 = vpack.c.bf16 %v357_v17, %v357_v17  ;;  %v331_v4 = vmul.f32 %v7760_v22, %v292_v52  ;;  %v332_v21 = vmul.f32 %v7760_v22, %v293_v58  ;;  %6832 = vmatprep.subr.bf16.mxu1 %v7249_v63  ;;  %v483_v47 = vld [vmem:[#allocation2 + $0x98] sm:$0xf]  ;;  %v7779_v52 = vld [vmem:[%s10209_s1] ss:$0 sm:$0xff] }
  0x60   : > { %v1362_v24 = vsel %vm7518_vm9, %v1357_v11, %v1361_v53  ;;  %v1364_v26 = vshrl.u32 %v1054_v19, 16  ;;  %v1367_v27 = vshll.u32 %v1054_v19, 16  ;;  %v665_v45 = vsel %vm7525_vm10, %v657_v62, %v664_v12  ;;  %943 = vst [vmem:[#allocation2 + $0x30] sm:$0xf] %v942_v20  ;;  %v294_v8 = vld [vmem:[%s7454_s10 + $0xc0] sm:$0xff] }
  0x61   : > { %v1055_v25 = vld [vmem:[#allocation2 + $0x88] sm:$0xf]  ;;  %v6154_v28 = vcombine.low %v1352_v0, %v1362_v24  ;;  %944 = vst [vmem:[#allocation2 + $0x34] sm:$0xf] %v665_v45  ;;  %v946_v5 = vsel %vm7457_vm4, %v666_v13, %v945_v14  ;;  %v668_v37 = vshrl.u32 %v6532_v16, 16  ;;  %v671_v40 = vshll.u32 %v6532_v16, 16 }
  0x62   : > { %v1091_v29 = vld [vmem:[#allocation2 + $0x8c] sm:$0x1]  ;;  %v1373_v31 = vshll.u32 %v1055_v25, 16  ;;  %v1377_v30 = vshrl.u32 %v1055_v25, 16  ;;  %v1366_v34 = vrot.slane %v1364_v26, 4  ;;  %v1369_v35 = vrot.slane %v1367_v27, 5  ;;  %6833 = vmatpush3.bf16.msra.mxu1 %v7249_v63 }
  0x63   : > { %v1383_v36 = vshll.u32 %v1091_v29, 16  ;;  %947 = vst [vmem:[#allocation2 + $0x38] sm:$0x1] %v946_v5  ;;  %6808 = vmatprep.mubr.bf16.mxu1 %v6154_v28  ;;  %v676_v41 = vshrl.u32 %v6533_v18, 16  ;;  %6834 = vmatprep.subr.bf16.mxu1 %v7251_v23  ;;  %v670_v44 = vrot.slane %v668_v37, 7  ;;  %v679_v46 = vshll.u32 %v6533_v18, 16 }
  0x64   : > { %v1375_v38 = vrot.slane %v1373_v31, 5  ;;  %v1379_v39 = vrot.slane %v1377_v30, 4  ;;  %v1370_v42 = vor.u32 %v1369_v35, %v1366_v34  ;;  %v948_v51 = vld [vmem:[#allocation2 + $0x3c] sm:$0xf]  ;;  %v370_v53 = vadd.f32 %v7779_v52, %v331_v4  ;;  %v295_v25 = vld [vmem:[%s7454_s10 + $0xc8] sm:$0xff] }
  0x65   : > { %v1385_v43 = vrot.slane %v1383_v36, 5  ;;  %v678_v50 = vrot.slane %v676_v41, 7  ;;  %v371_v55 = vadd.f32 %v7779_v52, %v332_v21  ;;  %v673_v57 = vor.u32 %v671_v40, %v670_v44  ;;  %v952_v13 = vld [vmem:[#allocation2 + $0x44] sm:$0x1]  ;;  %v429_v29 = vld [vmem:[#allocation2 + $0x9c] sm:$0x1] }
  0x66   : > { %v1380_v48 = vor.u32 %v1379_v39, %v1375_v38  ;;  %v1371_v56 = vrot.slane %v1370_v42, 4  ;;  %v674_v58 = vrot.slane %v670_v44, 4  ;;  %v427_v63 = vsel %vm7457_vm4, 0, %v426_v32  ;;  %6835 = vmatpush3.bf16.msra.mxu1 %v7251_v23  ;;  %v486_v31 = vld [vmem:[#allocation2 + $0xa4] sm:$0xf] }
  0x67   : > { %v1040_v1 = vld [vmem:[#allocation2 + $0x30] sm:$0xf]  ;;  %v681_v60 = vor.u32 %v679_v46, %v678_v50  ;;  %v683_v2 = vrot.slane %v678_v50, 4  ;;  %428 = vst [vmem:[#allocation2 + $0x90] sm:$0x1] %v427_v63  ;;  %v484_v3 = vsel %vm7464_vm5, 0, %v483_v47  ;;  %6916 = vmatprep.subr.bf16.mxu1 %v7254_v33  ;;  %v949_v12 = vsel %vm7464_vm5, %v673_v57, %v948_v51 }
  0x68   : > { %v1381_v0 = vrot.slane %v1380_v48, 4  ;;  %v1376_v62 = vsel %vm7518_vm9, %v1371_v56, %v1375_v38  ;;  %v7790_v17 = vld [vmem:[#allocation2 + $0x34] sm:$0xf]  ;;  %v1196_v9 = vshrl.u32 %v1040_v1, 16  ;;  %v1199_v11 = vshll.u32 %v1040_v1, 16 }
  0x69   : > { %485 = vst [vmem:[#allocation2 + $0x98] sm:$0xf] %v484_v3  ;;  %v1205_v19 = vshll.u32 %v7790_v17, 16  ;;  %v1209_v20 = vshrl.u32 %v7790_v17, 16  ;;  %v682_v18 = vsel %vm7525_vm10, %v674_v58, %v681_v60  ;;  %950 = vst [vmem:[#allocation2 + $0x3c] sm:$0xf] %v949_v12  ;;  %v953_v45 = vsel %vm7457_vm4, %v683_v2, %v952_v13 }
  0x6a   : > { %v1386_v14 = vsel %vm7518_vm9, %v1381_v0, %v1385_v43  ;;  %v7796_v16 = vld [vmem:[#allocation2 + $0x38] sm:$0x1]  ;;  %v1198_v21 = vrot.slane %v1196_v9, 4  ;;  %v1201_v23 = vrot.slane %v1199_v11, 5  ;;  %951 = vst [vmem:[#allocation2 + $0x40] sm:$0xf] %v682_v18  ;;  %v6546_v28 = vpack.c.bf16 %v370_v53, %v370_v53 }
  0x6b   : > { %v6155_v4 = vcombine.low %v1376_v62, %v1386_v14  ;;  %v1215_v24 = vshll.u32 %v7796_v16, 16  ;;  %v1207_v26 = vrot.slane %v1205_v19, 5  ;;  %v1211_v27 = vrot.slane %v1209_v20, 4  ;;  %954 = vst [vmem:[#allocation2 + $0x44] sm:$0x1] %v953_v45  ;;  %v280_v14 = vld [vmem:[%s7454_s10 + $0x50] sm:$0xff] }
  0x6c   : > { %v1202_v30 = vor.u32 %v1201_v23, %v1198_v21  ;;  %v6547_v32 = vpack.c.bf16 %v371_v55, %v371_v55  ;;  %v333_v33 = vmul.f32 %v7760_v22, %v294_v8  ;;  %v787_v35 = vshrl.u32 %v6546_v28, 16  ;;  %v408_v19 = vld [vmem:[#allocation2 + $0x48] sm:$0x1]  ;;  %v281_v23 = vld [vmem:[%s7454_s10 + $0x58] sm:$0xff] }
  0x6d   : > { %6809 = vmatmul.mubr.bf16.gmra.mxu1 %v6155_v4  ;;  %v1217_v5 = vrot.slane %v1215_v24, 5  ;;  %v1212_v34 = vor.u32 %v1211_v27, %v1207_v26  ;;  %v790_v36 = vshll.u32 %v6546_v28, 16  ;;  %v334_v37 = vmul.f32 %v7760_v22, %v295_v25  ;;  %v465_v24 = vld [vmem:[#allocation2 + $0x50] sm:$0xf] }
  0x6e   : > { %v1203_v38 = vrot.slane %v1202_v30, 4  ;;  %v795_v39 = vshrl.u32 %v6547_v32, 16  ;;  %v798_v40 = vshll.u32 %v6547_v32, 16  ;;  %v372_v41 = vadd.f32 %v7779_v52, %v333_v33  ;;  %v997_v0 = vld [vmem:[#allocation2 + $0x90] sm:$0xf] }
  0x6f   : > { %v1213_v42 = vrot.slane %v1212_v34, 4  ;;  %v789_v43 = vrot.slane %v787_v35, 7  ;;  %v373_v44 = vadd.f32 %v7779_v52, %v334_v37  ;;  %v430_v46 = vsel %vm7457_vm4, 0, %v429_v29 }
  0x70   : > { %v1208_v47 = vsel %vm7518_vm9, %v1203_v38, %v1207_v26  ;;  %v7814_v48 = vld [vmem:[#allocation2 + $0x3c] sm:$0xf]  ;;  %v797_v50 = vrot.slane %v795_v39, 7  ;;  %431 = vst [vmem:[#allocation2 + $0x9c] sm:$0x1] %v430_v46  ;;  %v487_v51 = vsel %vm7464_vm5, 0, %v486_v31  ;;  %v6548_v53 = vpack.c.bf16 %v372_v41, %v372_v41 }
  0x71   : > { %v1218_v55 = vsel %vm7518_vm9, %v1213_v42, %v1217_v5  ;;  %v7820_v56 = vld [vmem:[#allocation2 + $0x40] sm:$0xf]  ;;  %v1220_v57 = vshrl.u32 %v7814_v48, 16  ;;  %v1223_v58 = vshll.u32 %v7814_v48, 16  ;;  %v792_v63 = vor.u32 %v790_v36, %v789_v43  ;;  %488 = vst [vmem:[#allocation2 + $0xa4] sm:$0xf] %v487_v51 }
  0x72   : > { %v6148_v1 = vcombine.low %v1208_v47, %v1218_v55  ;;  %v1229_v60 = vshll.u32 %v7820_v56, 16  ;;  %v1233_v2 = vshrl.u32 %v7820_v56, 16  ;;  %v793_v3 = vrot.slane %v789_v43, 4  ;;  %v1001_v8 = vld [vmem:[#allocation2 + $0x98] sm:$0x1]  ;;  %v282_v36 = vld [vmem:[%s7454_s10 + $0x60] sm:$0xff] }
  0x73   : > { %v7826_v62 = vld [vmem:[#allocation2 + $0x44] sm:$0x1]  ;;  %v1222_v9 = vrot.slane %v1220_v57, 4  ;;  %v1225_v11 = vrot.slane %v1223_v58, 5  ;;  %v800_v12 = vor.u32 %v798_v40, %v797_v50  ;;  %v802_v13 = vrot.slane %v797_v50, 4  ;;  %v283_v42 = vld [vmem:[%s7454_s10 + $0x68] sm:$0xff] }
  0x74   : > { %6796 = vmatprep.mubr.bf16.mxu0 %v6148_v1  ;;  %v1231_v20 = vrot.slane %v1229_v60, 5  ;;  %v1235_v18 = vrot.slane %v1233_v2, 4  ;;  %v1239_v4 = vshll.u32 %v7826_v62, 16  ;;  %v998_v21 = vsel %vm7464_vm5, %v792_v63, %v997_v0 }
  0x75   : > { %v1226_v25 = vor.u32 %v1225_v11, %v1222_v9  ;;  %v801_v26 = vsel %vm7525_vm10, %v793_v3, %v800_v12  ;;  %999 = vst [vmem:[#allocation2 + $0x90] sm:$0xf] %v998_v21  ;;  %v1002_v27 = vsel %vm7457_vm4, %v802_v13, %v1001_v8  ;;  %v6549_v45 = vpack.c.bf16 %v373_v44, %v373_v44 }
  0x76   : > { %v1236_v28 = vor.u32 %v1235_v18, %v1231_v20  ;;  %v1241_v29 = vrot.slane %v1239_v4, 5  ;;  %1000 = vst [vmem:[#allocation2 + $0x94] sm:$0xf] %v801_v26  ;;  %1003 = vst [vmem:[#allocation2 + $0x98] sm:$0x1] %v1002_v27  ;;  %v804_v31 = vshrl.u32 %v6548_v53, 16  ;;  %v319_v35 = vmul.f32 %v7760_v22, %v280_v14 }
  0x77   : > { %v807_v30 = vshll.u32 %v6548_v53, 16  ;;  %v1227_v5 = vrot.slane %v1226_v25, 4  ;;  %v812_v32 = vshrl.u32 %v6549_v45, 16  ;;  %v815_v33 = vshll.u32 %v6549_v45, 16  ;;  %v1004_v34 = vld [vmem:[#allocation2 + $0x9c] sm:$0xf] }
  0x78   : > { %v1237_v37 = vrot.slane %v1236_v28, 4  ;;  %v806_v38 = vrot.slane %v804_v31, 7  ;;  %v1008_v39 = vld [vmem:[#allocation2 + $0xa4] sm:$0x1]  ;;  %v320_v40 = vmul.f32 %v7760_v22, %v281_v23  ;;  %v409_v41 = vsel %vm7457_vm4, 0, %v408_v19 }
  0x79   : > { %v1232_v43 = vsel %vm7518_vm9, %v1227_v5, %v1231_v20  ;;  %v814_v44 = vrot.slane %v812_v32, 7  ;;  %v358_v46 = vadd.f32 %v7779_v52, %v319_v35  ;;  %410 = vst [vmem:[#allocation2 + $0x48] sm:$0x1] %v409_v41  ;;  %v466_v47 = vsel %vm7464_vm5, 0, %v465_v24  ;;  %v411_v31 = vld [vmem:[#allocation2 + $0x54] sm:$0x1] }
  0x7a   : > { %v1242_v50 = vsel %vm7518_vm9, %v1237_v37, %v1241_v29  ;;  %v809_v51 = vor.u32 %v807_v30, %v806_v38  ;;  %v810_v53 = vrot.slane %v806_v38, 4  ;;  %v359_v55 = vadd.f32 %v7779_v52, %v320_v40  ;;  %467 = vst [vmem:[#allocation2 + $0x50] sm:$0xf] %v466_v47  ;;  %v468_v35 = vld [vmem:[#allocation2 + $0x5c] sm:$0xf] }
  0x7b   : > { %v6149_v57 = vcombine.low %v1232_v43, %v1242_v50  ;;  %v817_v58 = vor.u32 %v815_v33, %v814_v44  ;;  %v819_v63 = vrot.slane %v814_v44, 4  ;;  %v6534_v0 = vpack.c.bf16 %v358_v46, %v358_v46 }
  0x7c   : > { %v7851_v1 = vld [vmem:[#allocation2 + $0x90] sm:$0xf]  ;;  %v1005_v60 = vsel %vm7464_vm5, %v809_v51, %v1004_v34  ;;  %v6535_v2 = vpack.c.bf16 %v359_v55, %v359_v55  ;;  %v321_v3 = vmul.f32 %v7760_v22, %v282_v36  ;;  %v322_v8 = vmul.f32 %v7760_v22, %v283_v42 }
  0x7d   : > { %6797 = vmatmul.mubr.bf16.gmra.mxu0 %v6149_v57  ;;  %v7857_v9 = vld [vmem:[#allocation2 + $0x94] sm:$0xf]  ;;  %v7859_v11 = vld [vmem:[#allocation2 + $0x98] sm:$0x1]  ;;  %v1388_v12 = vshrl.u32 %v7851_v1, 16  ;;  %v1391_v13 = vshll.u32 %v7851_v1, 16  ;;  %v818_v14 = vsel %vm7525_vm10, %v810_v53, %v817_v58  ;;  %v1009_v19 = vsel %vm7457_vm4, %v819_v63, %v1008_v39 }
  0x7e   : > { %1006 = vst [vmem:[#allocation2 + $0x9c] sm:$0xf] %v1005_v60  ;;  %v1397_v20 = vshll.u32 %v7857_v9, 16  ;;  %v1401_v18 = vshrl.u32 %v7857_v9, 16  ;;  %v1407_v4 = vshll.u32 %v7859_v11, 16  ;;  %v685_v21 = vshrl.u32 %v6534_v0, 16 }
  0x7f   : > { %1007 = vst [vmem:[#allocation2 + $0xa0] sm:$0xf] %v818_v14  ;;  %1010 = vst [vmem:[#allocation2 + $0xa4] sm:$0x1] %v1009_v19  ;;  %v1390_v23 = vrot.slane %v1388_v12, 4  ;;  %v1393_v24 = vrot.slane %v1391_v13, 5  ;;  %v360_v34 = vadd.f32 %v7779_v52, %v321_v3  ;;  %v361_v39 = vadd.f32 %v7779_v52, %v322_v8 }
  0x80   : > { %v688_v25 = vshll.u32 %v6534_v0, 16  ;;  %v693_v26 = vshrl.u32 %v6535_v2, 16  ;;  %v1399_v27 = vrot.slane %v1397_v20, 5  ;;  %v1403_v45 = vrot.slane %v1401_v18, 4  ;;  %v955_v33 = vld [vmem:[#allocation2 + $0x48] sm:$0xf] }
  0x81   : > { %v1409_v28 = vrot.slane %v1407_v4, 5  ;;  %v687_v29 = vrot.slane %v685_v21, 7  ;;  %v1394_v30 = vor.u32 %v1393_v24, %v1390_v23  ;;  %v696_v32 = vshll.u32 %v6535_v2, 16  ;;  %v959_v50 = vld [vmem:[#allocation2 + $0x50] sm:$0x1]  ;;  %v297_v14 = vld [vmem:[%s7454_s10 + $0xd8] sm:$0xff] }
  0x82   : > { %v695_v5 = vrot.slane %v693_v26, 7  ;;  %v1404_v36 = vor.u32 %v1403_v45, %v1399_v27  ;;  %v412_v43 = vsel %vm7457_vm4, 0, %v411_v31  ;;  %v469_v51 = vsel %vm7464_vm5, 0, %v468_v35  ;;  %v296_v13 = vld [vmem:[%s7454_s10 + $0xd0] sm:$0xff]  ;;  %v432_v21 = vld [vmem:[#allocation2 + $0xa8] sm:$0x1] }
  0x83   : > { %v690_v37 = vor.u32 %v688_v25, %v687_v29  ;;  %v691_v38 = vrot.slane %v687_v29, 4  ;;  %v1395_v40 = vrot.slane %v1394_v30, 4  ;;  %413 = vst [vmem:[#allocation2 + $0x54] sm:$0x1] %v412_v43  ;;  %v6536_v53 = vpack.c.bf16 %v360_v34, %v360_v34  ;;  %470 = vst [vmem:[#allocation2 + $0x5c] sm:$0xf] %v469_v51 }
  0x84   : > { %v698_v41 = vor.u32 %v696_v32, %v695_v5  ;;  %v700_v42 = vrot.slane %v695_v5, 4  ;;  %v1405_v44 = vrot.slane %v1404_v36, 4  ;;  %v6537_v26 = vpack.c.bf16 %v361_v39, %v361_v39 }
  0x85   : > { %v7874_v46 = vld [vmem:[#allocation2 + $0x9c] sm:$0xf]  ;;  %v956_v47 = vsel %vm7464_vm5, %v690_v37, %v955_v33  ;;  %v1400_v55 = vsel %vm7518_vm9, %v1395_v40, %v1399_v27  ;;  %v298_v27 = vld [vmem:[%s7454_s10 + $0xe0] sm:$0xff]  ;;  %v705_v29 = vshll.u32 %v6536_v53, 16  ;;  %v335_v31 = vmul.f32 %v7760_v22, %v296_v13 }
  0x86   : > { %v7882_v57 = vld [vmem:[#allocation2 + $0xa0] sm:$0xf]  ;;  %v7884_v58 = vld [vmem:[#allocation2 + $0xa4] sm:$0x1]  ;;  %v1412_v63 = vshrl.u32 %v7874_v46, 16  ;;  %v1415_v0 = vshll.u32 %v7874_v46, 16  ;;  %v699_v60 = vsel %vm7525_vm10, %v691_v38, %v698_v41  ;;  %v1410_v2 = vsel %vm7518_vm9, %v1405_v44, %v1409_v28 }
  0x87   : > { %957 = vst [vmem:[#allocation2 + $0x48] sm:$0xf] %v956_v47  ;;  %v1421_v3 = vshll.u32 %v7882_v57, 16  ;;  %v1425_v8 = vshrl.u32 %v7882_v57, 16  ;;  %v1431_v12 = vshll.u32 %v7884_v58, 16  ;;  %v6156_v19 = vcombine.low %v1400_v55, %v1410_v2 }
  0x88   : > { %958 = vst [vmem:[#allocation2 + $0x4c] sm:$0xf] %v699_v60  ;;  %v1414_v20 = vrot.slane %v1412_v63, 4  ;;  %v1417_v18 = vrot.slane %v1415_v0, 5  ;;  %v960_v4 = vsel %vm7457_vm4, %v700_v42, %v959_v50  ;;  %v702_v28 = vshrl.u32 %v6536_v53, 16 }
  0x89   : > { %v1423_v23 = vrot.slane %v1421_v3, 5  ;;  %v1427_v24 = vrot.slane %v1425_v8, 4  ;;  %v1433_v25 = vrot.slane %v1431_v12, 5  ;;  %961 = vst [vmem:[#allocation2 + $0x50] sm:$0x1] %v960_v4  ;;  %6812 = vmatprep.mubr.bf16.mxu1 %v6156_v19  ;;  %v710_v5 = vshrl.u32 %v6537_v26, 16 }
  0x8a   : > { %v1418_v45 = vor.u32 %v1417_v18, %v1414_v20  ;;  %v713_v32 = vshll.u32 %v6537_v26, 16  ;;  %v336_v33 = vmul.f32 %v7760_v22, %v297_v14  ;;  %v704_v35 = vrot.slane %v702_v28, 7  ;;  %v489_v53 = vld [vmem:[#allocation2 + $0xb0] sm:$0xf]  ;;  %v962_v2 = vld [vmem:[#allocation2 + $0x54] sm:$0xf] }
  0x8b   : > { %v1428_v30 = vor.u32 %v1427_v24, %v1423_v23  ;;  %v374_v36 = vadd.f32 %v7779_v52, %v335_v31  ;;  %v433_v37 = vsel %vm7457_vm4, 0, %v432_v21  ;;  %v712_v40 = vrot.slane %v710_v5, 7  ;;  %v299_v3 = vld [vmem:[%s7454_s10 + $0xe8] sm:$0xff]  ;;  %v966_v20 = vld [vmem:[#allocation2 + $0x5c] sm:$0x1] }
  0x8c   : > { %v1419_v34 = vrot.slane %v1418_v45, 4  ;;  %v375_v41 = vadd.f32 %v7779_v52, %v336_v33  ;;  %434 = vst [vmem:[#allocation2 + $0xa8] sm:$0x1] %v433_v37  ;;  %v337_v42 = vmul.f32 %v7760_v22, %v298_v27  ;;  %v707_v51 = vor.u32 %v705_v29, %v704_v35  ;;  %v435_v24 = vld [vmem:[#allocation2 + $0xb4] sm:$0x1] }
  0x8d   : > { %v1429_v38 = vrot.slane %v1428_v30, 4  ;;  %v708_v60 = vrot.slane %v704_v35, 4  ;;  %v715_v19 = vor.u32 %v713_v32, %v712_v40  ;;  %v490_v45 = vsel %vm7464_vm5, 0, %v489_v53  ;;  %v492_v35 = vld [vmem:[#allocation2 + $0xbc] sm:$0xf] }
  0x8e   : > { %v7905_v39 = vld [vmem:[#allocation2 + $0x48] sm:$0xf]  ;;  %v1424_v43 = vsel %vm7518_vm9, %v1419_v34, %v1423_v23  ;;  %v717_v23 = vrot.slane %v712_v40, 4  ;;  %v963_v27 = vsel %vm7464_vm5, %v707_v51, %v962_v2  ;;  %491 = vst [vmem:[#allocation2 + $0xb0] sm:$0xf] %v490_v45  ;;  %v6550_v30 = vpack.c.bf16 %v374_v36, %v374_v36 }
  0x8f   : > { %v7911_v44 = vld [vmem:[#allocation2 + $0x4c] sm:$0xf]  ;;  %v1244_v47 = vshrl.u32 %v7905_v39, 16  ;;  %v1247_v50 = vshll.u32 %v7905_v39, 16  ;;  %v1434_v55 = vsel %vm7518_vm9, %v1429_v38, %v1433_v25  ;;  %v716_v26 = vsel %vm7525_vm10, %v708_v60, %v715_v19  ;;  %964 = vst [vmem:[#allocation2 + $0x54] sm:$0xf] %v963_v27 }
  0x90   : > { %v1253_v63 = vshll.u32 %v7911_v44, 16  ;;  %v1257_v0 = vshrl.u32 %v7911_v44, 16  ;;  %v6157_v8 = vcombine.low %v1424_v43, %v1434_v55  ;;  %v7920_v12 = vld [vmem:[#allocation2 + $0x50] sm:$0x1]  ;;  %965 = vst [vmem:[#allocation2 + $0x58] sm:$0xf] %v716_v26  ;;  %v967_v31 = vsel %vm7457_vm4, %v717_v23, %v966_v20 }
  0x91   : > { %v1246_v13 = vrot.slane %v1244_v47, 4  ;;  %v1249_v14 = vrot.slane %v1247_v50, 5  ;;  %v1263_v21 = vshll.u32 %v7920_v12, 16  ;;  %968 = vst [vmem:[#allocation2 + $0x5c] sm:$0x1] %v967_v31  ;;  %v6551_v32 = vpack.c.bf16 %v375_v41, %v375_v41 }
  0x92   : > { %v1255_v18 = vrot.slane %v1253_v63, 5  ;;  %v1259_v4 = vrot.slane %v1257_v0, 4  ;;  %6813 = vmatmul.mubr.bf16.gmra.mxu1 %v6157_v8  ;;  %v338_v33 = vmul.f32 %v7760_v22, %v299_v3  ;;  %v376_v34 = vadd.f32 %v7779_v52, %v337_v42  ;;  %v2078_v31 = vld [vmem:[#allocation2] sm:$0xe] }
  0x93   : > { %v1250_v25 = vor.u32 %v1249_v14, %v1246_v13  ;;  %v1265_v29 = vrot.slane %v1263_v21, 5  ;;  %v821_v38 = vshrl.u32 %v6550_v30, 16  ;;  %v824_v40 = vshll.u32 %v6550_v30, 16  ;;  %v1011_v3 = vld [vmem:[#allocation2 + $0xa8] sm:$0xf] }
  0x94   : > { %v1260_v28 = vor.u32 %v1259_v4, %v1255_v18  ;;  %v436_v43 = vsel %vm7457_vm4, 0, %v435_v24  ;;  %v829_v50 = vshrl.u32 %v6551_v32, 16  ;;  %v832_v51 = vshll.u32 %v6551_v32, 16 }
  0x95   : > { %v1251_v5 = vrot.slane %v1250_v25, 4  ;;  %v377_v36 = vadd.f32 %v7779_v52, %v338_v33  ;;  %437 = vst [vmem:[#allocation2 + $0xb4] sm:$0x1] %v436_v43  ;;  %v823_v41 = vrot.slane %v821_v38, 7  ;;  %v493_v42 = vsel %vm7464_vm5, 0, %v492_v35 }
  0x96   : > { %v1261_v37 = vrot.slane %v1260_v28, 4  ;;  %v6552_v53 = vpack.c.bf16 %v376_v34, %v376_v34  ;;  %v831_v63 = vrot.slane %v829_v50, 7  ;;  %494 = vst [vmem:[#allocation2 + $0xbc] sm:$0xf] %v493_v42  ;;  %vm2126_vm11 = vcmask 1042432  }
  0x97   : > { %v1256_v47 = vsel %vm7518_vm9, %v1251_v5, %v1255_v18  ;;  %v6553_v0 = vpack.c.bf16 %v377_v36, %v377_v36  ;;  %v826_v60 = vor.u32 %v824_v40, %v823_v41  ;;  %v827_v2 = vrot.slane %v823_v41, 4  ;;  %v7942_v52 = vld [vmem:[#allocation2 + $0x54] sm:$0xf]  ;;  %v7944_v14 = vld [vmem:[#allocation2 + $0x58] sm:$0xf] }
  0x98   : > { %v1266_v22 = vsel %vm7518_vm9, %v1261_v37, %v1265_v29  ;;  %v838_v8 = vshrl.u32 %v6552_v53, 16  ;;  %v841_v13 = vshll.u32 %v6552_v53, 16  ;;  %v834_v19 = vor.u32 %v832_v51, %v831_v63  ;;  %v7946_v4 = vld [vmem:[#allocation2 + $0x5c] sm:$0x1]  ;;  %v1015_v28 = vld [vmem:[#allocation2 + $0xb0] sm:$0x1] }
  0x99   : > { %v6150_v55 = vcombine.low %v1256_v47, %v1266_v22  ;;  %v836_v20 = vrot.slane %v831_v63, 4  ;;  %v846_v18 = vshrl.u32 %v6553_v0, 16  ;;  %v1268_v21 = vshrl.u32 %v7942_v52, 16  ;;  %v2079_v36 = vld [vmem:[#allocation2 + $0xc] sm:$0xe] }
  0x9a   : > { %v1271_v23 = vshll.u32 %v7942_v52, 16  ;;  %v1277_v24 = vshll.u32 %v7944_v14, 16  ;;  %v1281_v25 = vshrl.u32 %v7944_v14, 16  ;;  %v1287_v26 = vshll.u32 %v7946_v4, 16  ;;  %v7961_v53 = vld [vmem:[#allocation2 + $0x4] sm:$0xf] }
  0x9b   : > { %6800 = vmatprep.mubr.bf16.mxu0 %v6150_v55  ;;  %v835_v27 = vsel %vm7525_vm10, %v827_v2, %v834_v19  ;;  %v1012_v45 = vsel %vm7464_vm5, %v826_v60, %v1011_v3  ;;  %v840_v29 = vrot.slane %v838_v8, 7  ;;  %v1270_v30 = vrot.slane %v1268_v21, 4  ;;  %v2080_v21 = vld [vmem:[#allocation2 + $0x18] sm:$0xe] }
  0x9c   : > { %v1273_v5 = vrot.slane %v1271_v23, 5  ;;  %v1279_v32 = vrot.slane %v1277_v24, 5  ;;  %v1283_v33 = vrot.slane %v1281_v25, 4  ;;  %1013 = vst [vmem:[#allocation2 + $0xa8] sm:$0xf] %v1012_v45  ;;  %v1289_v35 = vrot.slane %v1287_v26, 5 }
  0x9d   : > { %1014 = vst [vmem:[#allocation2 + $0xac] sm:$0xf] %v835_v27  ;;  %v1018_v34 = vld [vmem:[#allocation2 + $0xb4] sm:$0xf]  ;;  %v1016_v37 = vsel %vm7457_vm4, %v836_v20, %v1015_v28  ;;  %v843_v38 = vor.u32 %v841_v13, %v840_v29  ;;  %v844_v40 = vrot.slane %v840_v29, 4  ;;  %v848_v50 = vrot.slane %v846_v18, 7 }
  0x9e   : > { %v1274_v43 = vor.u32 %v1273_v5, %v1270_v30  ;;  %v1284_v47 = vor.u32 %v1283_v33, %v1279_v32  ;;  %1017 = vst [vmem:[#allocation2 + $0xb0] sm:$0x1] %v1016_v37  ;;  %v849_v51 = vshll.u32 %v6553_v0, 16  ;;  %v1022_v41 = vld [vmem:[#allocation2 + $0xbc] sm:$0x1]  ;;  %vm2127_vm12 = vcmask 1046532  }
  0x9f   : > { %v1019_v22 = vsel %vm7464_vm5, %v843_v38, %v1018_v34  ;;  %v6192_v42 = vrot.slane %v2078_v31, 9  ;;  %v2131_v55 = vrot.slane %v7961_v53, 5  ;;  %v853_v3 = vrot.slane %v848_v50, 4  ;;  %vm7965_vm13 = vmor %vm2126_vm11, %vm2127_vm12  ;;  %v7971_v20 = vld [vmem:[#allocation2 + $0x10] sm:$0xf] }
  0xa0   : > { %v1275_v63 = vrot.slane %v1274_v43, 4  ;;  %v1285_v60 = vrot.slane %v1284_v47, 4  ;;  %v851_v2 = vor.u32 %v849_v51, %v848_v50  ;;  %1020 = vst [vmem:[#allocation2 + $0xb4] sm:$0xf] %v1019_v22  ;;  %v6193_v19 = vrot.slane %v2079_v36, 9 }
  0xa1   : > { %v2132_v0 = vsel %vm7965_vm13, %v6192_v42, %v2131_v55  ;;  %v2133_v13 = vrot.slane %v2131_v55, 4  ;;  %v2138_v18 = vrot.slane %v7971_v20, 5  ;;  %v1023_v26 = vsel %vm7457_vm4, %v853_v3, %v1022_v41  ;;  %v8005_v36 = vld [vmem:[#allocation2 + $0x1c] sm:$0xf]  ;;  %v7354_v41 = vld [vmem:[#allocation2 + $0x20] sm:$0x1] }
  0xa2   : > { %v1280_v23 = vsel %vm7518_vm9, %v1275_v63, %v1279_v32  ;;  %v1290_v24 = vsel %vm7518_vm9, %v1285_v60, %v1289_v35  ;;  %v852_v25 = vsel %vm7525_vm10, %v844_v40, %v851_v2  ;;  %1024 = vst [vmem:[#allocation2 + $0xbc] sm:$0x1] %v1023_v26  ;;  %v2145_v22 = vrot.slane %v8005_v36, 5 }
  0xa3   : > { %v6151_v27 = vcombine.low %v1280_v23, %v1290_v24  ;;  %v7982_v45 = vld [vmem:[#allocation2 + $0xa8] sm:$0xf]  ;;  %1021 = vst [vmem:[#allocation2 + $0xb8] sm:$0xf] %v852_v25  ;;  %v2135_v29 = vsel %vm7965_vm13, %v2133_v13, %v2134_v59  ;;  %v2140_v31 = vrot.slane %v2138_v18, 4  ;;  %v2139_v37 = vsel %vm7965_vm13, %v6193_v19, %v2138_v18  ;;  %v7260_v13 = vld [vmem:[%s10211_s3 + $0x130] sm:$0xff]  }
  0xa4   : > { %v7984_v28 = vld [vmem:[#allocation2 + $0xac] sm:$0xf]  ;;  %v1436_v30 = vshrl.u32 %v7982_v45, 16  ;;  %v1439_v5 = vshll.u32 %v7982_v45, 16  ;;  %v6224_v35 = vcombine.low %v2132_v0, %v2135_v29  ;;  %v6194_v59 = vrot.slane %v2080_v21, 9 }
  0xa5   : > { %v1445_v32 = vshll.u32 %v7984_v28, 16  ;;  %v1449_v33 = vshrl.u32 %v7984_v28, 16  ;;  %6801 = vmatmul.mubr.bf16.gmra.mxu0 %v6151_v27  ;;  %v7994_v34 = vld [vmem:[#allocation2 + $0xb0] sm:$0x1]  ;;  %v2142_v49 = vsel %vm7965_vm13, %v2140_v31, %v2141_v15  ;;  %v2148_v42 = vrot.slane %v7354_v41, 5 }
  0xa6   : > { %v1438_v38 = vrot.slane %v1436_v30, 4  ;;  %v1441_v40 = vrot.slane %v1439_v5, 5  ;;  %v1455_v50 = vshll.u32 %v7994_v34, 16  ;;  %6884 = vmatprep.mubr.bf16.mxu0 %v6224_v35  ;;  %v6225_v2 = vcombine.low %v2139_v37, %v2142_v49  ;;  %v2081_v0 = vld [vmem:[#allocation2 + $0x24] sm:$0xe] }
  0xa7   : > { %v1447_v43 = vrot.slane %v1445_v32, 5  ;;  %v1451_v47 = vrot.slane %v1449_v33, 4  ;;  %v8003_v51 = vld [vmem:[#allocation2 + $0xb4] sm:$0xf]  ;;  %v2147_v3 = vrot.slane %v2145_v22, 4  ;;  %v2146_v24 = vsel %vm7965_vm13, %v6194_v59, %v2145_v22 }
  0xa8   : > { %v1442_v7 = vor.u32 %v1441_v40, %v1438_v38  ;;  %v1460_v15 = vshrl.u32 %v8003_v51, 16  ;;  %v1463_v63 = vshll.u32 %v8003_v51, 16  ;;  %v1457_v60 = vrot.slane %v1455_v50, 5  ;;  %v2082_v31 = vld [vmem:[#allocation2 + $0x30] sm:$0xe]  ;;  %v7355_v40 = vld [vmem:[%s10211_s3 + $0x138] sm:$0xff]  }
  0xa9   : > { %v1452_v55 = vor.u32 %v1451_v47, %v1447_v43  ;;  %v8015_v23 = vld [vmem:[#allocation2 + $0xbc] sm:$0x1]  ;;  %v2149_v33 = vsel %vm7965_vm13, %v2147_v3, %v2148_v42  ;;  %v6195_v47 = vrot.slane %v2081_v0, 9  ;;  %v8031_v50 = vld [vmem:[#allocation2 + $0x28] sm:$0xf] }
  0xaa   : > { %v1443_v19 = vrot.slane %v1442_v7, 4  ;;  %v8013_v21 = vld [vmem:[#allocation2 + $0xb8] sm:$0xf]  ;;  %v1462_v25 = vrot.slane %v1460_v15, 4  ;;  %v1465_v26 = vrot.slane %v1463_v63, 5  ;;  %v1479_v32 = vshll.u32 %v8015_v23, 16 }
  0xab   : > { %v1453_v18 = vrot.slane %v1452_v55, 4  ;;  %10243 = vst [vmem:[#allocation6_spill] sm:$0xff] %v8013_v21  ;;  %v1469_v27 = vshll.u32 %v8013_v21, 16  ;;  %v1473_v29 = vshrl.u32 %v8013_v21, 16  ;;  %v2152_v22 = vrot.slane %v8031_v50, 5 }
  0xac   : > { %v1448_v30 = vsel %vm7518_vm9, %v1443_v19, %v1447_v43  ;;  %v1466_v37 = vor.u32 %v1465_v26, %v1462_v25  ;;  %v1481_v38 = vrot.slane %v1479_v32, 5  ;;  %v6226_v43 = vcombine.low %v2146_v24, %v2149_v33  ;;  %v2083_v41 = vld [vmem:[#allocation2 + $0x3c] sm:$0xe]  ;;  %v7357_v55 = vld [vmem:[#allocation2 + $0x2c] sm:$0x1] }
  0xad   : > { %v1458_v5 = vsel %vm7518_vm9, %v1453_v18, %v1457_v60  ;;  %v1471_v49 = vrot.slane %v1469_v27, 5  ;;  %v1475_v59 = vrot.slane %v1473_v29, 4  ;;  %6885 = vmatmul.mubr.bf16.vlgmr.msra.gmra.mxu0 %v6225_v2  ;;  %v2155_v15 = vrot.slane %v7357_v55, 5  ;;  %v7264_v60 = vld [vmem:[%s10211_s3 + $0x128] sm:$0xff]   ;;  %v7358_v32 = vld [vmem:[#allocation2] sm:$0xf] }
  0xae   : > { %v6158_v35 = vcombine.low %v1448_v30, %v1458_v5  ;;  %6965 = vmatpush3.bf16.msra.mxu0 %v7355_v40  ;;  %v1467_v42 = vrot.slane %v1466_v37, 4  ;;  %v6196_v63 = vrot.slane %v2082_v31, 9  ;;  %v2084_v2 = vld [vmem:[#allocation2 + $0x48] sm:$0xe]  ;;  %6888 = vmatprep.mubr.bf16.mxu0 %v6226_v43  ;;  %v2153_v3 = vsel %vm7965_vm13, %v6195_v47, %v2152_v22  ;;  %v7268_v43 = vld [vmem:[%s10211_s3 + $0x120] sm:$0xff]  }
  0xaf   : > { %v1476_v7 = vor.u32 %v1475_v59, %v1471_v49  ;;  %6966 = vmatprep.subr.bf16.mxu0 %v7260_v13  ;;  %v2154_v0 = vrot.slane %v2152_v22, 4  ;;  %v2159_v19 = vrot.slane %v7790_v17, 5  ;;  %v2162_v18 = vrot.slane %v7796_v16, 5  ;;  %v7359_v55 = vld [vmem:[#allocation2 + $0x68] sm:$0x1] }
  0xb0   : > { %6816 = vmatprep.mubr.bf16.mxu1 %v6158_v35  ;;  %v1472_v24 = vsel %vm7518_vm9, %v1467_v42, %v1471_v49  ;;  %v6197_v26 = vrot.slane %v2083_v41, 9  ;;  %v2166_v27 = vrot.slane %v7820_v56, 5  ;;  %v2169_v5 = vrot.slane %v7826_v62, 5  ;;  %v2085_v49 = vld [vmem:[#allocation2 + $0x54] sm:$0xe] }
  0xb1   : > { %v1477_v25 = vrot.slane %v1476_v7, 4  ;;  %v2156_v29 = vsel %vm7965_vm13, %v2154_v0, %v2155_v15  ;;  %v2160_v31 = vsel %vm7965_vm13, %v6196_v63, %v2159_v19  ;;  %v2161_v30 = vrot.slane %v2159_v19, 4  ;;  %v2086_v7 = vld [vmem:[#allocation2 + $0x60] sm:$0xe]  ;;  %v7361_v19 = vld [vmem:[#allocation2 + $0x18] sm:$0xf] }
  0xb2   : > { %6967 = vmatpush3.bf16.msra.mxu0 %v7260_v13  ;;  %v6168_v33 = vcombine.low %v7358_v32, %v7961_v53  ;;  %v6227_v35 = vcombine.low %v2153_v3, %v2156_v29  ;;  %v2168_v37 = vrot.slane %v2166_v27, 4  ;;  %v6198_v40 = vrot.slane %v2084_v2, 9  ;;  %v8070_v3 = vld [vmem:[%s10211_s3 + $0x118] sm:$0xff]  }
  0xb3   : > { %v1482_v16 = vsel %vm7518_vm9, %v1477_v25, %v1481_v38  ;;  %6968 = vmatprep.subr.bf16.mxu0 %v7264_v60  ;;  %v2163_v13 = vsel %vm7965_vm13, %v2161_v30, %v2162_v18  ;;  %v2173_v38 = vrot.slane %v7911_v44, 5  ;;  %v2176_v47 = vrot.slane %v7920_v12, 5  ;;  %v8074_v25 = vld [vmem:[#allocation2 + $0x64] sm:$0xf]  ;;  %v8079_v30 = vld [vmem:[#allocation2 + $0x70] sm:$0xf] }
  0xb4   : > { %v6159_v59 = vcombine.low %v1472_v24, %v1482_v16  ;;  %v6228_v62 = vcombine.low %v2160_v31, %v2163_v13  ;;  %v2167_v53 = vsel %vm7965_vm13, %v6197_v26, %v2166_v27  ;;  %v2170_v22 = vsel %vm7965_vm13, %v2168_v37, %v2169_v5  ;;  %v2087_v27 = vld [vmem:[#allocation2 + $0x6c] sm:$0xe] }
  0xb5   : > { %6889 = vmatmul.mubr.bf16.gmra.mxu0 %v6227_v35  ;;  %v6199_v41 = vrot.slane %v2085_v49, 9  ;;  %v2180_v42 = vrot.slane %v7944_v14, 5  ;;  %v2190_v15 = vrot.slane %v7359_v55, 5  ;;  %v2174_v63 = vsel %vm7965_vm13, %v6198_v40, %v2173_v38  ;;  %v8095_v35 = vld [vmem:[#allocation2 + $0x24] sm:$0xf] }
  0xb6   : > { %6817 = vmatmul.mubr.bf16.gmra.mxu1 %v6159_v59  ;;  %6969 = vmatpush3.bf16.msra.mxu0 %v7264_v60  ;;  %v2175_v12 = vrot.slane %v2173_v38, 4  ;;  %v2183_v2 = vrot.slane %v7946_v4, 5  ;;  %v7360_v60 = vld [vmem:[#allocation2 + $0xc] sm:$0xf]  ;;  %v6170_v18 = vcombine.low %v7361_v19, %v8005_v36  ;;  %v2187_v26 = vrot.slane %v8074_v25, 5  ;;  %v7276_v19 = vld [vmem:[%s10211_s3 + $0x110] sm:$0xff]  }
  0xb7   : > { %6836 = vmatprep.mubr.bf16.mxu1 %v6168_v33  ;;  %6892 = vmatprep.mubr.bf16.mxu0 %v6228_v62  ;;  %v6169_v0 = vcombine.low %v7360_v60, %v7971_v20  ;;  %v2182_v24 = vrot.slane %v2180_v42, 4  ;;  %v6229_v29 = vcombine.low %v2167_v53, %v2170_v22  ;;  %v6200_v31 = vrot.slane %v2086_v7, 9  ;;  %v8085_v20 = vld [vmem:[%s10211_s3 + $0xf0] sm:$0xff]   ;;  %v2089_v62 = vld [vmem:[#allocation2 + $0x84] sm:$0xe] }
  0xb8   : > { %6970 = vmatprep.subr.bf16.mxu0 %v7268_v43  ;;  %v2177_v4 = vsel %vm7965_vm13, %v2175_v12, %v2176_v47  ;;  %v2194_v5 = vrot.slane %v8079_v30, 5  ;;  %v8089_v16 = vsel %vm7965_vm13, %v6199_v41, %v2180_v42  ;;  %v2189_v33 = vrot.slane %v2187_v26, 4  ;;  %v8099_v49 = vld [vmem:[#allocation2 + $0x30] sm:$0xf]  ;;  %v7366_v22 = vld [vmem:[#allocation2 + $0x74] sm:$0x1] }
  0xb9   : > { %v6230_v36 = vcombine.low %v2174_v63, %v2177_v4  ;;  %v8093_v32 = vsel %vm7965_vm13, %v2182_v24, %v2183_v2  ;;  %v6171_v37 = vcombine.low %v8095_v35, %v8031_v50  ;;  %v6172_v59 = vcombine.low %v8099_v49, %v7790_v17  ;;  %v8108_v38 = vld [vmem:[#allocation2 + $0x90] sm:$0xe]  ;;  %v8110_v42 = vld [vmem:[#allocation2 + $0x7c] sm:$0xf]  ;;  %v8121_v2 = vld [vmem:[#allocation2 + $0x60] sm:$0xf] }
  0xba   : > { %6971 = vmatpush3.bf16.msra.mxu0 %v7268_v43  ;;  %v2088_v43 = vld [vmem:[#allocation2 + $0x78] sm:$0xe]  ;;  %v6201_v47 = vrot.slane %v2087_v27, 9  ;;  %v2196_v53 = vrot.slane %v2194_v5, 4  ;;  %v2197_v41 = vrot.slane %v7366_v22, 5  ;;  %v2201_v7 = vrot.slane %v8110_v42, 5 }
  0xbb   : > { %6972 = vmatprep.subr.bf16.mxu0 %v8070_v3  ;;  %v6231_v55 = vcombine.low %v8089_v16, %v8093_v32  ;;  %v8119_v12 = vsel %vm7965_vm13, %v6200_v31, %v2187_v26  ;;  %v8131_v24 = vld [vmem:[%s10211_s3 + $0xe8] sm:$0xff]   ;;  %v2191_v26 = vsel %vm7965_vm13, %v2189_v33, %v2190_v15  ;;  %v6202_v27 = vrot.slane %v2088_v43, 9  ;;  %v7369_v4 = vld [vmem:[#allocation2 + $0x80] sm:$0x1]  ;;  %v2091_v16 = vld [vmem:[#allocation2 + $0x9c] sm:$0xe] }
  0xbc   : > { %v2204_v31 = vrot.slane %v7369_v4, 5  ;;  %v7370_v32 = vld [vmem:[%s10211_s3 + $0xf8] sm:$0xff]   ;;  %v8138_v22 = vld [vmem:[#allocation2 + $0x88] sm:$0xf]  ;;  %v6204_v15 = vrot.slane %v8108_v38, 9  ;;  %v8148_v43 = vsel %vm7965_vm13, %v6201_v47, %v2194_v5  ;;  %v2218_v38 = vrot.slane %v7859_v11, 5 }
  0xbd   : > { %6893 = vmatmul.mubr.bf16.gmra.mxu0 %v6229_v29  ;;  %v2203_v29 = vrot.slane %v2201_v7, 4  ;;  %v2208_v60 = vrot.slane %v8138_v22, 5  ;;  %v7280_v33 = vld [vmem:[%s10211_s3 + $0x108] sm:$0xff]   ;;  %v6232_v4 = vcombine.low %v8119_v12, %v2191_v26  ;;  %v6205_v5 = vrot.slane %v2091_v16, 9  ;;  %v8162_v47 = vld [vmem:[#allocation2 + $0x78] sm:$0xf] }
  0xbe   : > { %6837 = vmatmul.mubr.bf16.vlgmr.msra.gmra.mxu1 %v6169_v0  ;;  %6896 = vmatprep.mubr.bf16.mxu0 %v6230_v36  ;;  %v6203_v0 = vrot.slane %v2089_v62, 9  ;;  %v7372_v36 = vld [vmem:[#allocation2 + $0x8c] sm:$0x1]  ;;  %v2215_v62 = vrot.slane %v7857_v9, 5  ;;  %v2225_v11 = vrot.slane %v7884_v58, 5  ;;  %v8173_v26 = vsel %vm7965_vm13, %v6202_v27, %v2201_v7  ;;  %v7266_v58 = vld [vmem:[%s10211_s3 + $0xe0] sm:$0xff]  }
  0xbf   : > { %6917 = vmatpush3.bf16.msra.mxu1 %v7370_v32  ;;  %6840 = vmatprep.mubr.bf16.mxu1 %v6170_v18  ;;  %v2211_v63 = vrot.slane %v7372_v36, 5  ;;  %v8152_v18 = vsel %vm7965_vm13, %v2196_v53, %v2197_v41  ;;  %v8158_v32 = vld [vmem:[#allocation2 + $0x6c] sm:$0xf]  ;;  %v2210_v40 = vrot.slane %v2208_v60, 4  ;;  %v2222_v41 = vrot.slane %v7882_v57, 5  ;;  %v8245_v17 = vld [vmem:[%s10211_s3 + $0x1b8] sm:$0xff]  }
  0xc0   : > { %6918 = vmatprep.subr.bf16.mxu1 %v8085_v20  ;;  %6973 = vmatpush3.bf16.msra.mxu0 %v8070_v3  ;;  %v2217_v3 = vrot.slane %v2215_v62, 4  ;;  %v8175_v16 = vld [vmem:[#allocation2 + $0x84] sm:$0xf]  ;;  %v8191_v7 = vsel %vm7965_vm13, %v6203_v0, %v2208_v60  ;;  %v8197_v36 = vld [vmem:[#allocation2 + $0xa8] sm:$0xe]  ;;  %v2239_v6 = vrot.slane %v8015_v23, 5 }
  0xc1   : > { %6974 = vmatprep.subr.bf16.mxu0 %v7276_v19  ;;  %v8195_v27 = vsel %vm7965_vm13, %v6205_v5, %v2222_v41  ;;  %v2224_v53 = vrot.slane %v2222_v41, 4  ;;  %v8201_v13 = vsel %vm7965_vm13, %v2210_v40, %v2211_v63  ;;  %v7270_v40 = vld [vmem:[%s10211_s3 + $0xd8] sm:$0xff]   ;;  %v7278_v23 = vld [vmem:[%s10211_s3 + $0xc8] sm:$0xff]  }
  0xc2   : > { %v8209_v60 = vsel %vm7965_vm13, %v2217_v3, %v2218_v38  ;;  %v2951_v38 = vld [vmem:[#allocation2 + $0x14] sm:$0x1]  ;;  %v2952_v5 = vld [vmem:[#allocation2 + $0x18] sm:$0xf]  ;;  %v2953_v3 = vld [vmem:[#allocation2 + $0x1c] sm:$0xf] }
  0xc3   : > { %6919 = vmatpush3.bf16.msra.mxu1 %v8085_v20  ;;  %v8187_v20 = vsel %vm7965_vm13, %v2203_v29, %v2204_v31  ;;  %v8205_v29 = vsel %vm7965_vm13, %v6204_v15, %v2215_v62  ;;  %v7284_v31 = vld [vmem:[%s10211_s3 + $0x100] sm:$0xff]   ;;  %v8225_v0 = vsel %vm7965_vm13, %v2224_v53, %v2225_v11  ;;  %v2950_v62 = vld [vmem:[#allocation2 + $0x10] sm:$0xf]  ;;  %v2232_v15 = vrot.slane %v7994_v34, 5  ;;  %v8262_v34 = vld [vmem:[#allocation2 + $0x28] sm:$0xf] }
  0xc4   : > { %6920 = vmatprep.subr.bf16.mxu1 %v8131_v24  ;;  %6975 = vmatpush3.bf16.msra.mxu0 %v7276_v19  ;;  %v10216_v19 = vrot.slane %v7984_v28, 5  ;;  %v6234_v50 = vcombine.low %v8173_v26, %v8187_v20  ;;  %v3007_v26 = vshll.u32 %v2950_v62, 16  ;;  %v3011_v20 = vshrl.u32 %v2950_v62, 16  ;;  %v7274_v53 = vld [vmem:[%s10211_s3 + $0xd0] sm:$0xff]  }
  0xc5   : > { %6897 = vmatmul.mubr.bf16.gmra.mxu0 %v6231_v55  ;;  %6976 = vmatprep.subr.bf16.mxu0 %v7280_v33  ;;  %v2949_v55 = vld [vmem:[#allocation2 + $0xc] sm:$0xf]  ;;  %v3022_v35 = vshrl.u32 %v2952_v5, 16  ;;  %v3017_v61 = vshll.u32 %v2951_v38, 16  ;;  %v3035_v38 = vshrl.u32 %v2953_v3, 16 }
  0xc6   : > { %6841 = vmatmul.mubr.bf16.gmra.mxu1 %v6171_v37  ;;  %6900 = vmatprep.mubr.bf16.mxu0 %v6232_v4  ;;  %v6206_v37 = vrot.slane %v8197_v36, 9  ;;  %v8238_v4 = vld [vmem:[#allocation2 + $0xb4] sm:$0xe]  ;;  %v2998_v36 = vshrl.u32 %v2949_v55, 16  ;;  %v2231_v41 = vrot.slane %v10216_v19, 4  ;;  %v3001_v11 = vshll.u32 %v2949_v55, 16 }
  0xc7   : > { %6844 = vmatprep.mubr.bf16.mxu1 %v6172_v59  ;;  %6921 = vmatpush3.bf16.msra.mxu1 %v8131_v24  ;;  %v2236_v24 = vrot.slane %v8013_v21, 5  ;;  %v3025_v59 = vshll.u32 %v2952_v5, 16  ;;  %v8258_v49 = vrot.slane %v3007_v26, 5  ;;  %v3013_v12 = vrot.slane %v3011_v20, 4  ;;  %v2954_v19 = vld [vmem:[#allocation2 + $0x20] sm:$0x1] }
  0xc8   : > { %6922 = vmatprep.subr.bf16.mxu1 %v7266_v58  ;;  %6977 = vmatpush3.bf16.msra.mxu0 %v7280_v33  ;;  %v3000_v63 = vrot.slane %v2998_v36, 4  ;;  %v3003_v33 = vrot.slane %v3001_v11, 5  ;;  %v6207_v55 = vrot.slane %v8238_v4, 9  ;;  %v3031_v21 = vshll.u32 %v2953_v3, 16 }
  0xc9   : > { %6978 = vmatprep.subr.bf16.mxu0 %v7284_v31  ;;  %v2238_v62 = vrot.slane %v2236_v24, 4  ;;  %v3024_v36 = vrot.slane %v3022_v35, 4  ;;  %v3027_v11 = vrot.slane %v3025_v59, 5  ;;  %v10245_v4 = vcombine.low %v7814_v48, %v7820_v56  ;;  %v8295_v59 = vld [vmem:[#allocation2 + $0x34] sm:$0xf] }
  0xca   : > { %v3004_v5 = vor.u32 %v3003_v33, %v3000_v63  ;;  %v8275_v26 = vrot.slane %v3031_v21, 5  ;;  %v10246_v63 = vcombine.low %v7905_v39, %v7911_v44  ;;  %v10247_v35 = vrot.slane %v7984_v28, 5 }
  0xcb   : > { %6923 = vmatpush3.bf16.msra.mxu1 %v7266_v58  ;;  %v10244_v58 = vcombine.low %v8148_v43, %v8152_v18  ;;  %v3046_v43 = vshrl.u32 %v2955_v10, 16  ;;  %v3049_v18 = vshll.u32 %v2955_v10, 16  ;;  %v8288_v56 = vsel %vm7965_vm13, %v2231_v41, %v2232_v15  ;;  %v2958_v10 = vld [vmem:[#allocation2 + $0x30] sm:$0xf] }
  0xcc   : > { %6924 = vmatprep.subr.bf16.mxu1 %v7270_v40  ;;  %6979 = vmatpush3.bf16.msra.mxu0 %v7284_v31  ;;  %v3014_v31 = vor.u32 %v3013_v12, %v8258_v49  ;;  %v8284_v48 = vsel %vm7965_vm13, %v6206_v37, %v10247_v35  ;;  %v8290_v12 = vrot.slane %v3017_v61, 5  ;;  %v3037_v21 = vrot.slane %v3035_v38, 4  ;;  %v2961_v38 = vld [vmem:[#allocation2 + $0x3c] sm:$0xf] }
  0xcd   : > { %6901 = vmatmul.mubr.bf16.gmra.mxu0 %v10244_v58  ;;  %7060 = vmatprep.subr.bf16.mxu0 %v8245_v17  ;;  %v3041_v39 = vshll.u32 %v2954_v19, 16  ;;  %v3048_v44 = vrot.slane %v3046_v43, 4  ;;  %v3055_v3 = vshll.u32 %v8262_v34, 16  ;;  %v8297_v37 = vrot.slane %v3004_v5, 4  ;;  %v7282_v5 = vld [vmem:[%s10211_s3 + $0xc0] sm:$0xff]  }
  0xce   : > { %6845 = vmatmul.mubr.bf16.gmra.mxu1 %v10245_v4  ;;  %6904 = vmatprep.mubr.bf16.mxu0 %v6234_v50  ;;  %v8292_v50 = vld [vmem:[#allocation2 + $0x2c] sm:$0x1]  ;;  %v3028_v20 = vor.u32 %v3027_v11, %v3024_v36  ;;  %v3038_v15 = vor.u32 %v3037_v21, %v8275_v26  ;;  %v3059_v61 = vshrl.u32 %v8262_v34, 16  ;;  %v8303_v41 = vsel %vm7965_vm13, %v6207_v55, %v2236_v24  ;;  %v8317_v55 = vld [vmem:[#allocation2 + $0x40] sm:$0xf] }
  0xcf   : > { %6848 = vmatprep.mubr.bf16.mxu1 %v10246_v63  ;;  %6925 = vmatpush3.bf16.msra.mxu1 %v7270_v40  ;;  %v3051_v40 = vrot.slane %v3049_v18, 5  ;;  %v8307_v19 = vsel %vm7965_vm13, %v2238_v62, %v2239_v6  ;;  %v8309_v33 = vrot.slane %v3014_v31, 4  ;;  %v8311_v58 = vrot.slane %v3055_v3, 5  ;;  %v8321_v62 = vld [vmem:[#allocation2 + $0x38] sm:$0x1] }
  0xd0   : > { %6926 = vmatprep.subr.bf16.mxu1 %v7274_v53  ;;  %v3061_v11 = vrot.slane %v3059_v61, 4  ;;  %v3065_v4 = vshll.u32 %v8292_v50, 16  ;;  %v3070_v24 = vshrl.u32 %v2958_v10, 16  ;;  %v8319_v6 = vrot.slane %v3041_v39, 5 }
  0xd1   : > { %v3052_v36 = vor.u32 %v3051_v40, %v3048_v44  ;;  %v3073_v31 = vshll.u32 %v2958_v10, 16  ;;  %v3079_v43 = vshll.u32 %v8295_v59, 16  ;;  %v10248_v18 = vcombine.low %v8191_v7, %v8201_v13  ;;  %v8346_v7 = vld [vmem:[%s10211_s3 + $0x178] sm:$0xff]  }
  0xd2   : > { %v8328_v63 = vrot.slane %v3028_v20, 4  ;;  %v8330_v35 = vrot.slane %v3038_v15, 4  ;;  %v3062_v21 = vor.u32 %v3061_v11, %v8311_v58  ;;  %v3072_v44 = vrot.slane %v3070_v24, 4 }
  0xd3   : > { %6927 = vmatpush3.bf16.msra.mxu1 %v7274_v53  ;;  %v3083_v53 = vshrl.u32 %v8295_v59, 16  ;;  %v10249_v39 = vcombine.low %v7942_v52, %v7944_v14  ;;  %v10250_v10 = vcombine.low %v8205_v29, %v8209_v60  ;;  %v6238_v40 = vcombine.low %v8284_v48, %v8288_v56  ;;  %v8350_v52 = vld [vmem:[#allocation2 + $0x44] sm:$0x1]  ;;  %v2964_v14 = vld [vmem:[#allocation2 + $0x48] sm:$0xf] }
  0xd4   : > { %6928 = vmatprep.subr.bf16.mxu1 %v7278_v23  ;;  %v6239_v13 = vcombine.low %v8303_v41, %v8307_v19  ;;  %v3075_v3 = vrot.slane %v3073_v31, 5  ;;  %v8348_v20 = vrot.slane %v3079_v43, 5  ;;  %v10251_v29 = vcombine.low %v8121_v2, %v8074_v25  ;;  %v8357_v43 = vld [vmem:[#allocation2 + $0x4c] sm:$0xf] }
  0xd5   : > { %6905 = vmatmul.mubr.bf16.gmra.mxu0 %v10248_v18  ;;  %v3053_v60 = vrot.slane %v3052_v36, 4  ;;  %v3067_v48 = vrot.slane %v3065_v4, 5  ;;  %v3085_v56 = vrot.slane %v3083_v53, 4  ;;  %v3094_v15 = vshrl.u32 %v2961_v38, 16 }
  0xd6   : > { %6849 = vmatmul.mubr.bf16.gmra.mxu1 %v10249_v39  ;;  %6908 = vmatprep.mubr.bf16.mxu0 %v10250_v10  ;;  %v3063_v61 = vrot.slane %v3062_v21, 4  ;;  %v3097_v11 = vshll.u32 %v2961_v38, 16  ;;  %v3103_v24 = vshll.u32 %v8317_v55, 16  ;;  %v3107_v31 = vshrl.u32 %v8317_v55, 16  ;;  %v2967_v21 = vld [vmem:[#allocation2 + $0x54] sm:$0xf] }
  0xd7   : > { %6852 = vmatprep.mubr.bf16.mxu1 %v10251_v29  ;;  %6929 = vmatpush3.bf16.msra.mxu1 %v7278_v23  ;;  %v3010_v25 = vsel %vm7518_vm9, %v8297_v37, %v8258_v49  ;;  %v3020_v2 = vsel %vm7518_vm9, %v8309_v33, %v8290_v12  ;;  %v3089_v23 = vshll.u32 %v8321_v62, 16  ;;  %v3096_v36 = vrot.slane %v3094_v15, 4 }
  0xd8   : > { %6930 = vmatprep.subr.bf16.mxu1 %v7282_v5  ;;  %v3076_v38 = vor.u32 %v3075_v3, %v3072_v44  ;;  %v3086_v4 = vor.u32 %v3085_v56, %v8348_v20  ;;  %v3099_v53 = vrot.slane %v3097_v11, 5  ;;  %v8369_v18 = vrot.slane %v3103_v24, 5  ;;  %v8385_v3 = vld [vmem:[#allocation2 + $0x58] sm:$0xf]  ;;  %v8393_v56 = vld [vmem:[#allocation2 + $0x50] sm:$0x1] }
  0xd9   : > { %v3034_v49 = vsel %vm7518_vm9, %v8328_v63, %v8275_v26  ;;  %v3109_v37 = vrot.slane %v3107_v31, 4  ;;  %v3113_v39 = vshll.u32 %v8350_v52, 16  ;;  %v3118_v12 = vshrl.u32 %v2964_v14, 16  ;;  %v2970_v31 = vld [vmem:[#allocation2 + $0x60] sm:$0xf] }
  0xda   : > { %v3044_v33 = vsel %vm7518_vm9, %v8330_v35, %v8319_v6  ;;  %v3121_v44 = vshll.u32 %v2964_v14, 16  ;;  %v3127_v10 = vshll.u32 %v8357_v43, 16  ;;  %v10252_v26 = vcombine.low %v8195_v27, %v8225_v0 }
  0xdb   : > { %6931 = vmatpush3.bf16.msra.mxu1 %v7282_v5  ;;  %v3058_v5 = vsel %vm7518_vm9, %v3053_v60, %v8311_v58  ;;  %v3068_v63 = vsel %vm7518_vm9, %v3063_v61, %v3067_v48  ;;  %v3091_v29 = vrot.slane %v3089_v23, 5  ;;  %v3100_v6 = vor.u32 %v3099_v53, %v3096_v36  ;;  %v8407_v53 = vld [vmem:[#allocation2 + $0x5c] sm:$0x1] }
  0xdc   : > { %7012 = vmatprep.subr.bf16.mxu1 %v8346_v7  ;;  %v3110_v35 = vor.u32 %v3109_v37, %v8369_v18  ;;  %v10253_v58 = vcombine.low %v8158_v32, %v8079_v30  ;;  %v3077_v14 = vrot.slane %v3076_v38, 4  ;;  %v3087_v60 = vrot.slane %v3086_v4, 4 }
  0xdd   : > { %6909 = vmatmul.mubr.bf16.gmra.mxu0 %v10252_v26  ;;  %v3120_v15 = vrot.slane %v3118_v12, 4  ;;  %v3123_v11 = vrot.slane %v3121_v44, 5  ;;  %v10254_v27 = vcombine.low %v8162_v47, %v8110_v42  ;;  %v3115_v0 = vrot.slane %v3113_v39, 5  ;;  %v8412_v44 = vld [vmem:[#allocation2 + $0x64] sm:$0xf] }
  0xde   : > { %6853 = vmatmul.mubr.bf16.gmra.mxu1 %v10253_v58  ;;  %6912 = vmatprep.mubr.bf16.mxu0 %v6238_v40  ;;  %v8401_v48 = vrot.slane %v3127_v10, 5  ;;  %v3131_v61 = vshrl.u32 %v8357_v43, 16  ;;  %v3142_v24 = vshrl.u32 %v2967_v21, 16  ;;  %v6304_v23 = vcombine.low %v3010_v25, %v3020_v2  ;;  %v8431_v58 = vld [vmem:[#allocation2 + $0x68] sm:$0x1] }
  0xdf   : > { %6856 = vmatprep.mubr.bf16.mxu1 %v10254_v27  ;;  %v8404_v36 = vcombine.low %v3034_v49, %v3044_v33  ;;  %v3145_v30 = vshll.u32 %v2967_v21, 16  ;;  %v3151_v32 = vshll.u32 %v8385_v3, 16  ;;  %v3101_v40 = vrot.slane %v3100_v6, 4  ;;  %v2973_v33 = vld [vmem:[#allocation2 + $0x6c] sm:$0xf] }
  0xe0   : > { %v3111_v38 = vrot.slane %v3110_v35, 4  ;;  %v3133_v4 = vrot.slane %v3131_v61, 4  ;;  %v3144_v42 = vrot.slane %v3142_v24, 4  ;;  %v8409_v47 = vcombine.low %v3058_v5, %v3068_v63 }
  0xe1   : > { %v3124_v37 = vor.u32 %v3123_v11, %v3120_v15  ;;  %v3137_v39 = vshll.u32 %v8393_v56, 16  ;;  %v3147_v12 = vrot.slane %v3145_v30, 5  ;;  %v3082_v25 = vsel %vm7518_vm9, %v3077_v14, %v8348_v20  ;;  %v8434_v14 = vld [vmem:[#allocation2 + $0x70] sm:$0xf]  ;;  %v2976_v15 = vld [vmem:[#allocation2 + $0x78] sm:$0xf] }
  0xe2   : > { %v8417_v2 = vrot.slane %v3151_v32, 5  ;;  %v3155_v21 = vshrl.u32 %v8385_v3, 16  ;;  %v3166_v49 = vshrl.u32 %v2970_v31, 16  ;;  %v3092_v5 = vsel %vm7518_vm9, %v3087_v60, %v3091_v29  ;;  %v8457_v30 = vld [vmem:[#allocation2 + $0x74] sm:$0x1] }
  0xe3   : > { %v3134_v10 = vor.u32 %v3133_v4, %v8401_v48  ;;  %v3148_v26 = vor.u32 %v3147_v12, %v3144_v42  ;;  %v3169_v63 = vshll.u32 %v2970_v31, 16  ;;  %v3106_v20 = vsel %vm7518_vm9, %v3101_v40, %v8369_v18 }
  0xe4   : > { %v3116_v6 = vsel %vm7518_vm9, %v3111_v38, %v3115_v0  ;;  %v3157_v35 = vrot.slane %v3155_v21, 4  ;;  %v3175_v29 = vshll.u32 %v8412_v44, 16  ;;  %v10255_v60 = vcombine.low %v8175_v16, %v8138_v22 }
  0xe5   : > { %6913 = vmatmul.mubr.bf16.gmra.mxu0 %v6239_v13  ;;  %v8439_v41 = vrot.slane %v3124_v37, 4  ;;  %v8441_v19 = vrot.slane %v3137_v39, 5  ;;  %v3161_v13 = vshll.u32 %v8407_v53, 16  ;;  %v3179_v18 = vshrl.u32 %v8412_v44, 16  ;;  %v8464_v39 = vld [vmem:[#allocation2 + $0x7c] sm:$0xf] }
  0xe6   : > { %6857 = vmatmul.mubr.bf16.gmra.mxu1 %v10255_v60  ;;  %6980 = vmatprep.mubr.bf16.mxu0 %v6304_v23  ;;  %v10256_v11 = vcombine.low %v7851_v1, %v7857_v9  ;;  %v3158_v27 = vor.u32 %v3157_v35, %v8417_v2  ;;  %v3168_v0 = vrot.slane %v3166_v49, 4  ;;  %v3171_v61 = vrot.slane %v3169_v63, 5 }
  0xe7   : > { %v3190_v22 = vshrl.u32 %v2973_v33, 16  ;;  %v8449_v16 = vcombine.low %v3082_v25, %v3092_v5  ;;  %v8451_v24 = vcombine.low %v3106_v20, %v3116_v6  ;;  %v8453_v31 = vrot.slane %v3134_v10, 4  ;;  %v7292_v5 = vld [vmem:[%s10211_s3 + $0x1b0] sm:$0xff]   ;;  %v8483_v20 = vld [vmem:[#allocation2 + $0x80] sm:$0x1] }
  0xe8   : > { %6860 = vmatprep.mubr.bf16.mxu1 %v10256_v11  ;;  %v8455_v23 = vrot.slane %v3148_v26, 4  ;;  %v8459_v32 = vrot.slane %v3175_v29, 5  ;;  %v3181_v40 = vrot.slane %v3179_v18, 4  ;;  %v3193_v9 = vshll.u32 %v2973_v33, 16  ;;  %v8497_v11 = vld [vmem:[#allocation2 + $0x88] sm:$0xf] }
  0xe9   : > { %v3192_v1 = vrot.slane %v3190_v22, 4  ;;  %v3163_v38 = vrot.slane %v3161_v13, 5  ;;  %v3185_v4 = vshll.u32 %v8431_v58, 16  ;;  %v3199_v42 = vshll.u32 %v8434_v14, 16 }
  0xea   : > { %v3203_v37 = vshrl.u32 %v8434_v14, 16  ;;  %v3159_v12 = vrot.slane %v3158_v27, 4  ;;  %v3172_v25 = vor.u32 %v3171_v61, %v3168_v0  ;;  %v3195_v21 = vrot.slane %v3193_v9, 5  ;;  %v8510_v0 = vld [vmem:[#allocation2 + $0x8c] sm:$0x1] }
  0xeb   : > { %v3214_v49 = vshrl.u32 %v2976_v15, 16  ;;  %v3130_v33 = vsel %vm7518_vm9, %v8439_v41, %v8401_v48  ;;  %v3140_v10 = vsel %vm7518_vm9, %v8453_v31, %v8441_v19  ;;  %v3154_v26 = vsel %vm7518_vm9, %v8455_v23, %v8417_v2  ;;  %v7296_v48 = vld [vmem:[%s10211_s3 + $0x1a8] sm:$0xff]   ;;  %v2979_v41 = vld [vmem:[#allocation2 + $0x84] sm:$0xf] }
  0xec   : > { %v8481_v63 = vrot.slane %v3199_v42, 5  ;;  %v3182_v6 = vor.u32 %v3181_v40, %v8459_v32  ;;  %v3196_v35 = vor.u32 %v3195_v21, %v3192_v1  ;;  %v3205_v29 = vrot.slane %v3203_v37, 4  ;;  %v7285_v23 = vld [vmem:[#allocation2 + $0xc] sm:$0xff]  }
  0xed   : > { %6981 = vmatmul.mubr.bf16.vlgmr.msra.gmra.mxu0 %v8404_v36  ;;  %v3209_v60 = vshll.u32 %v8457_v30, 16  ;;  %v10257_v2 = vcombine.low %v7874_v46, %v7882_v57  ;;  %v3216_v19 = vrot.slane %v3214_v49, 4  ;;  %v3217_v13 = vshll.u32 %v2976_v15, 16 }
  0xee   : > { %7061 = vmatpush3.bf16.msra.mxu0 %v8245_v17  ;;  %v3223_v36 = vshll.u32 %v8464_v39, 16  ;;  %v3227_v18 = vshrl.u32 %v8464_v39, 16  ;;  %v10258_v27 = vcombine.low %v7982_v45, %v7984_v28  ;;  %6984 = vmatprep.mubr.bf16.mxu0 %v8409_v47  ;;  %v3164_v46 = vsel %vm7518_vm9, %v3159_v12, %v3163_v38  ;;  %v2982_v28 = vld [vmem:[#allocation2 + $0x90] sm:$0xf]  ;;  %v7300_v38 = vld [vmem:[%s10211_s3 + $0x1a0] sm:$0xff]  }
  0xef   : > { %6861 = vmatmul.mubr.bf16.gmra.mxu1 %v10257_v2  ;;  %v8505_v57 = vrot.slane %v3172_v25, 4  ;;  %v8507_v17 = vrot.slane %v3185_v4, 5  ;;  %v3206_v15 = vor.u32 %v3205_v29, %v8481_v63  ;;  %7062 = vmatprep.subr.bf16.mxu0 %v7292_v5  ;;  %v3219_v61 = vrot.slane %v3217_v13, 5  ;;  %v8523_v25 = vld [vmem:[#allocation2 + $0x94] sm:$0xf] }
  0xf0   : > { %6864 = vmatprep.mubr.bf16.mxu1 %v10258_v27  ;;  %v8512_v22 = vrot.slane %v3223_v36, 5  ;;  %v3229_v31 = vrot.slane %v3227_v18, 4  ;;  %v3238_v45 = vshrl.u32 %v2979_v41, 16  ;;  %v8514_v47 = vrot.slane %v3182_v6, 4 }
  0xf1   : > { %v8516_v40 = vrot.slane %v3209_v60, 5  ;;  %v3233_v1 = vshll.u32 %v8483_v20, 16  ;;  %v3241_v9 = vshll.u32 %v2979_v41, 16  ;;  %v3197_v4 = vrot.slane %v3196_v35, 4  ;;  %v2985_v35 = vld [vmem:[#allocation2 + $0x9c] sm:$0xf] }
  0xf2   : > { %7063 = vmatpush3.bf16.msra.mxu0 %v7292_v5  ;;  %v3220_v42 = vor.u32 %v3219_v61, %v3216_v19  ;;  %v3230_v37 = vor.u32 %v3229_v31, %v8512_v22  ;;  %v3240_v12 = vrot.slane %v3238_v45, 4  ;;  %v3207_v21 = vrot.slane %v3206_v15, 4  ;;  %v8554_v61 = vld [vmem:[#allocation2 + $0x98] sm:$0x1] }
  0xf3   : > { %7064 = vmatprep.subr.bf16.mxu0 %v7296_v48  ;;  %v3243_v49 = vrot.slane %v3241_v9, 5  ;;  %v3247_v6 = vshll.u32 %v8497_v11, 16  ;;  %v3251_v29 = vshrl.u32 %v8497_v11, 16  ;;  %v6309_v60 = vcombine.low %v3130_v33, %v3140_v10  ;;  %v8539_v10 = vld [vmem:[#allocation2 + $0xa0] sm:$0xf] }
  0xf4   : > { %v6310_v5 = vcombine.low %v3154_v26, %v3164_v46  ;;  %v8527_v41 = vrot.slane %v3220_v42, 4  ;;  %v3257_v2 = vshll.u32 %v8510_v0, 16  ;;  %v3178_v19 = vsel %vm7518_vm9, %v8505_v57, %v8459_v32  ;;  %10259 = vst [vmem:[#allocation7_spill] sm:$0xff] %v8539_v10  ;;  %v10260_v26 = vld [vmem:[#allocation6_spill] sm:$0xff]  ;;  %v8568_v42 = vld [vmem:[#allocation2 + $0xac] sm:$0xf] }
  0xf5   : > { %6985 = vmatmul.mubr.bf16.gmra.mxu0 %v8449_v16  ;;  %v3188_v13 = vsel %vm7518_vm9, %v8514_v47, %v8507_v17  ;;  %v3235_v36 = vrot.slane %v3233_v1, 5  ;;  %v3262_v33 = vshrl.u32 %v2982_v28, 16  ;;  %v10261_v18 = vcombine.low %v8003_v51, %v10260_v26  ;;  %10262 = vst [vmem:[#allocation6_spill] sm:$0xff] %v8554_v61  ;;  %v7289_v47 = vld [vmem:[#allocation2 + $0x24] sm:$0xff]   ;;  %10263 = vst [vmem:[#allocation8_spill] sm:$0xff] %v8568_v42 }
  0xf6   : > { %6988 = vmatprep.mubr.bf16.mxu0 %v8451_v24  ;;  %v3231_v16 = vrot.slane %v3230_v37, 4  ;;  %v3244_v27 = vor.u32 %v3243_v49, %v3240_v12  ;;  %v3265_v46 = vshll.u32 %v2982_v28, 16  ;;  %v3271_v32 = vshll.u32 %v8523_v25, 16  ;;  %7065 = vmatpush3.bf16.msra.mxu0 %v7296_v48  ;;  %v7287_v24 = vld [vmem:[#allocation2 + $0x18] sm:$0xff]   ;;  %v8577_v49 = vld [vmem:[#allocation2 + $0xa4] sm:$0x1] }
  0xf7   : > { %6865 = vmatmul.mubr.bf16.gmra.mxu1 %v10261_v18  ;;  %v3202_v57 = vsel %vm7518_vm9, %v3197_v4, %v8481_v63  ;;  %v3212_v17 = vsel %vm7518_vm9, %v3207_v21, %v8516_v40  ;;  %v8552_v15 = vrot.slane %v3247_v6, 5  ;;  %v3253_v51 = vrot.slane %v3251_v29, 4  ;;  %7066 = vmatprep.subr.bf16.mxu0 %v7300_v38  ;;  %v7304_v63 = vld [vmem:[%s10211_s3 + $0x198] sm:$0xff]   ;;  %10264 = vst [vmem:[#allocation9_spill] sm:$0xff] %v8577_v49 }
  0xf8   : > { %6932 = vmatprep.mubr.bf16.mxu1 %v7285_v23  ;;  %v3226_v48 = vsel %vm7518_vm9, %v8527_v41, %v8512_v22  ;;  %v8563_v31 = vrot.slane %v3257_v2, 5  ;;  %v3264_v45 = vrot.slane %v3262_v33, 4  ;;  %v3275_v28 = vshrl.u32 %v8523_v25, 16  ;;  %v2988_v23 = vld [vmem:[#allocation2 + $0xa8] sm:$0xf]  ;;  %v7290_v22 = vld [vmem:[%s10211_s3 + $0x170] sm:$0xff]  }
  0xf9   : > { %v3267_v40 = vrot.slane %v3265_v46, 5  ;;  %v8566_v1 = vrot.slane %v3271_v32, 5  ;;  %v3286_v9 = vshrl.u32 %v2985_v35, 16  ;;  %v3289_v4 = vshll.u32 %v2985_v35, 16  ;;  %v7308_v41 = vld [vmem:[%s10211_s3 + $0x190] sm:$0xff]  }
  0xfa   : > { %v3236_v37 = vsel %vm7518_vm9, %v3231_v16, %v3235_v36  ;;  %v8575_v12 = vrot.slane %v3244_v27, 4  ;;  %v3277_v21 = vrot.slane %v3275_v28, 4  ;;  %v3295_v6 = vshll.u32 %v8539_v10, 16  ;;  %7067 = vmatpush3.bf16.msra.mxu0 %v7300_v38  ;;  %v8591_v32 = vld [vmem:[#allocation2 + $0xb0] sm:$0x1] }
  0xfb   : > { %v3254_v29 = vor.u32 %v3253_v51, %v8552_v15  ;;  %v3288_v2 = vrot.slane %v3286_v9, 4  ;;  %v3291_v35 = vrot.slane %v3289_v4, 5  ;;  %v3299_v33 = vshrl.u32 %v8539_v10, 16  ;;  %7068 = vmatprep.subr.bf16.mxu0 %v7304_v63  ;;  %10265 = vst [vmem:[#allocation10_spill] sm:$0xff] %v8591_v32  ;;  %v2991_v28 = vld [vmem:[#allocation2 + $0xb4] sm:$0xf] }
  0xfc   : > { %v6311_v26 = vcombine.low %v3178_v19, %v3188_v13  ;;  %v8585_v36 = vcombine.low %v3202_v57, %v3212_v17  ;;  %v3281_v18 = vshll.u32 %v8554_v61, 16  ;;  %v8588_v16 = vrot.slane %v3295_v6, 5  ;;  %v8600_v57 = vld [vmem:[#allocation2 + $0xb8] sm:$0xf]  ;;  %v7294_v17 = vld [vmem:[%s10211_s3 + $0x168] sm:$0xff]  }
  0xfd   : > { %6989 = vmatmul.mubr.bf16.gmra.mxu0 %v6309_v60  ;;  %v3268_v38 = vor.u32 %v3267_v40, %v3264_v45  ;;  %v3278_v27 = vor.u32 %v3277_v21, %v8566_v1  ;;  %v3301_v46 = vrot.slane %v3299_v33, 4  ;;  %v3310_v51 = vshrl.u32 %v2988_v23, 16  ;;  %10266 = vst [vmem:[#allocation11_spill] sm:$0xff] %v8600_v57  ;;  %v495_v10 = vld [vmem:[#allocation2 + $0xc8] sm:$0xf] }
  0xfe   : > { %6992 = vmatprep.mubr.bf16.mxu0 %v6310_v5  ;;  %v8593_v9 = vcombine.low %v3226_v48, %v3236_v37  ;;  %v3250_v19 = vsel %vm7518_vm9, %v8575_v12, %v8552_v15  ;;  %v3313_v13 = vshll.u32 %v2988_v23, 16  ;;  %v3319_v60 = vshll.u32 %v8568_v42, 16  ;;  %v7291_v15 = vld [vmem:[#allocation2 + $0x30] sm:$0xff]   ;;  %7069 = vmatpush3.bf16.msra.mxu0 %v7304_v63  ;;  %v7293_v37 = vld [vmem:[#allocation2 + $0x3c] sm:$0xff]  }
  0xff   : > { %6933 = vmatmul.mubr.bf16.vlgmr.msra.gmra.mxu1 %v7287_v24  ;;  %v3255_v5 = vrot.slane %v3254_v29, 4  ;;  %v3292_v24 = vor.u32 %v3291_v35, %v3288_v2  ;;  %v3305_v48 = vshll.u32 %v8577_v49, 16  ;;  %v3312_v45 = vrot.slane %v3310_v51, 4  ;;  %7070 = vmatprep.subr.bf16.mxu0 %v7308_v41  ;;  %v300_v29 = vld [vmem:[%s7454_s10 + $0xf0] sm:$0xff]  ;;  %v7298_v2 = vld [vmem:[%s10211_s3 + $0x160] sm:$0xff]  }
 0x100   : > { %7013 = vmatpush3.bf16.msra.mxu1 %v8346_v7  ;;  %6936 = vmatprep.mubr.bf16.mxu1 %v7289_v47  ;;  %v3302_v23 = vor.u32 %v3301_v46, %v8588_v16  ;;  %v3315_v40 = vrot.slane %v3313_v13, 5  ;;  %v8608_v4 = vrot.slane %v3319_v60, 5  ;;  %v3323_v7 = vshrl.u32 %v8568_v42, 16  ;;  %v7312_v47 = vld [vmem:[%s10211_s3 + $0x188] sm:$0xff]   ;;  %v301_v13 = vld [vmem:[%s7454_s10 + $0xf8] sm:$0xff] }
 0x101   : > { %7014 = vmatprep.subr.bf16.mxu1 %v7290_v22  ;;  %v8614_v12 = vrot.slane %v3268_v38, 4  ;;  %v8616_v21 = vrot.slane %v3278_v27, 4  ;;  %v8618_v6 = vrot.slane %v3281_v18, 5  ;;  %v3329_v63 = vshll.u32 %v8591_v32, 16  ;;  %v438_v60 = vld [vmem:[#allocation2 + $0xc0] sm:$0x1] }
 0x102   : > { %v3316_v35 = vor.u32 %v3315_v40, %v3312_v45  ;;  %v3325_v33 = vrot.slane %v3323_v7, 4  ;;  %v3334_v46 = vshrl.u32 %v2991_v28, 16  ;;  %v3337_v51 = vshll.u32 %v2991_v28, 16  ;;  %v7316_v32 = vld [vmem:[%s10211_s3 + $0x180] sm:$0xff]   ;;  %7071 = vmatpush3.bf16.msra.mxu0 %v7308_v41 }
 0x103   : > { %v3293_v38 = vrot.slane %v3292_v24, 4  ;;  %v3307_v27 = vrot.slane %v3305_v48, 5  ;;  %v3343_v18 = vshll.u32 %v8600_v57, 16  ;;  %v3347_v42 = vshrl.u32 %v8600_v57, 16  ;;  %v8635_v24 = vld [vmem:[#allocation2 + $0xbc] sm:$0x1]  ;;  %7072 = vmatprep.subr.bf16.mxu0 %v7312_v47 }
 0x104   : > { %7015 = vmatpush3.bf16.msra.mxu1 %v7290_v22  ;;  %v3260_v45 = vsel %vm7518_vm9, %v3255_v5, %v8563_v31  ;;  %v3303_v28 = vrot.slane %v3302_v23, 4  ;;  %v3326_v40 = vor.u32 %v3325_v33, %v8608_v4  ;;  %v3331_v22 = vrot.slane %v3329_v63, 5  ;;  %v7376_v41 = vld [vmem:[%s10208_s0] ss:$0 sm:$0xff] }
 0x105   : > { %7016 = vmatprep.subr.bf16.mxu1 %v7294_v17  ;;  %6993 = vmatmul.mubr.bf16.gmra.mxu0 %v6311_v26  ;;  %v3317_v48 = vrot.slane %v3316_v35, 4  ;;  %v3336_v7 = vrot.slane %v3334_v46, 4  ;;  %v3339_v57 = vrot.slane %v3337_v51, 5  ;;  %v8637_v49 = vrot.slane %v3343_v18, 5  ;;  %v7295_v46 = vld [vmem:[#allocation2 + $0x48] sm:$0xff]  }
 0x106   : > { %6996 = vmatprep.mubr.bf16.mxu0 %v8585_v36  ;;  %v3327_v61 = vrot.slane %v3326_v40, 4  ;;  %v3349_v31 = vrot.slane %v3347_v42, 4  ;;  %v339_v5 = vmul.f32 %v7376_v41, %v300_v29  ;;  %v340_v23 = vmul.f32 %v7376_v41, %v301_v13  ;;  %7073 = vmatpush3.bf16.msra.mxu0 %v7312_v47  ;;  %v8673_v47 = vld [vmem:[%s10211_s3 + $0x238] sm:$0xff]   ;;  %v3705_v40 = vld [vmem:[#allocation2 + $0x24] sm:$0xe] }
 0x107   : > { %6937 = vmatmul.mubr.bf16.gmra.mxu1 %v7291_v15  ;;  %v6314_v26 = vcombine.low %v3250_v19, %v3260_v45  ;;  %v3274_v63 = vsel %vm7518_vm9, %v8614_v12, %v8566_v1  ;;  %v3284_v36 = vsel %vm7518_vm9, %v8616_v21, %v8618_v6  ;;  %v439_v15 = vsel %vm7457_vm4, 0, %v438_v60  ;;  %v7377_v1 = vld [vmem:[%s10209_s1] ss:$0 sm:$0xff]  ;;  %7074 = vmatprep.subr.bf16.mxu0 %v7316_v32 }
 0x108   : > { %6940 = vmatprep.mubr.bf16.mxu1 %v7293_v37  ;;  %7017 = vmatpush3.bf16.msra.mxu1 %v7294_v17  ;;  %v7302_v37 = vld [vmem:[%s10211_s3 + $0x158] sm:$0xff]   ;;  %v3298_v19 = vsel %vm7518_vm9, %v3293_v38, %v8588_v16  ;;  %v378_v17 = vadd.f32 %v7377_v1, %v339_v5  ;;  %v379_v12 = vadd.f32 %v7377_v1, %v340_v23  ;;  %v496_v6 = vsel %vm7464_vm5, 0, %v495_v10 }
 0x109   : > { %7018 = vmatprep.subr.bf16.mxu1 %v7298_v2  ;;  %440 = vst [vmem:[#allocation2 + $0xc0] sm:$0x1] %v439_v15  ;;  %v3308_v29 = vsel %vm7518_vm9, %v3303_v28, %v3307_v27  ;;  %v3322_v35 = vsel %vm7518_vm9, %v3317_v48, %v8608_v4  ;;  %v3340_v33 = vor.u32 %v3339_v57, %v3336_v7  ;;  %v3353_v16 = vshll.u32 %v8635_v24, 16  ;;  %v7297_v38 = vld [vmem:[#allocation2 + $0x54] sm:$0xff]   ;;  %v8680_v4 = vld [vmem:[#allocation2 + $0xc] sm:$0xe] }
 0x10a   : > { %497 = vst [vmem:[#allocation2 + $0xc8] sm:$0xf] %v496_v6  ;;  %v3332_v10 = vsel %vm7518_vm9, %v3327_v61, %v3331_v22  ;;  %v3350_v51 = vor.u32 %v3349_v31, %v8637_v49  ;;  %v6554_v13 = vpack.c.bf16 %v378_v17, %v378_v17  ;;  %v6555_v60 = vpack.c.bf16 %v379_v12, %v379_v12  ;;  %v7306_v27 = vld [vmem:[%s10211_s3 + $0x150] sm:$0xff]   ;;  %v7310_v31 = vld [vmem:[%s10211_s3 + $0x148] sm:$0xff]  }
 0x10b   : > { %v8678_v57 = vcombine.low %v3274_v63, %v3284_v36  ;;  %v8685_v18 = vcombine.low %v3298_v19, %v3308_v29  ;;  %7075 = vmatpush3.bf16.msra.mxu0 %v7316_v32  ;;  %v8688_v22 = vcombine.low %v3322_v35, %v3332_v10  ;;  %v8692_v48 = vrot.slane %v3353_v16, 5  ;;  %v8701_v63 = vld [vmem:[#allocation2 + $0x10] sm:$0xf]  ;;  %v7299_v10 = vld [vmem:[#allocation2 + $0x60] sm:$0xff]  }
 0x10c   : > { %7019 = vmatpush3.bf16.msra.mxu1 %v7298_v2  ;;  %v855_v45 = vshrl.u32 %v6554_v13, 16  ;;  %v858_v28 = vshll.u32 %v6554_v13, 16  ;;  %v863_v61 = vshrl.u32 %v6555_v60, 16  ;;  %v8690_v2 = vrot.slane %v3340_v33, 4  ;;  %7156 = vmatprep.subr.bf16.mxu0 %v8673_v47  ;;  %v3706_v35 = vld [vmem:[#allocation2 + $0x30] sm:$0xe] }
 0x10d   : > { %7020 = vmatprep.subr.bf16.mxu1 %v7302_v37  ;;  %6997 = vmatmul.mubr.bf16.gmra.mxu0 %v8593_v9  ;;  %v866_v7 = vshll.u32 %v6555_v60, 16  ;;  %v8698_v41 = vrot.slane %v3350_v51, 4  ;;  %v6328_v9 = vrot.slane %v8680_v4, 9  ;;  %v3769_v36 = vrot.slane %v8701_v63, 5  ;;  %v8710_v33 = vld [vmem:[#allocation2 + $0x14] sm:$0x1] }
 0x10e   : > { %7000 = vmatprep.mubr.bf16.mxu0 %v6314_v26  ;;  %v857_v32 = vrot.slane %v855_v45, 7  ;;  %v865_v5 = vrot.slane %v863_v61, 7  ;;  %v6330_v15 = vrot.slane %v3705_v40, 9  ;;  %v3783_v26 = vrot.slane %v8262_v34, 5  ;;  %v3708_v45 = vld [vmem:[#allocation2 + $0x48] sm:$0xe] }
 0x10f   : > { %6941 = vmatmul.mubr.bf16.gmra.mxu1 %v7295_v46  ;;  %v3786_v19 = vrot.slane %v8292_v50, 5  ;;  %v3772_v16 = vrot.slane %v8710_v33, 5  ;;  %v3707_v46 = vld [vmem:[#allocation2 + $0x3c] sm:$0xe]  ;;  %v3356_v51 = vsel %vm7518_vm9, %v8698_v41, %v8692_v48  ;;  %v6331_v40 = vrot.slane %v3706_v35, 9  ;;  %v7314_v41 = vld [vmem:[%s10211_s3 + $0x140] sm:$0xff]  }
 0x110   : > { %6944 = vmatprep.mubr.bf16.mxu1 %v7297_v38  ;;  %7021 = vmatpush3.bf16.msra.mxu1 %v7302_v37  ;;  %v1025_v23 = vld [vmem:[#allocation2 + $0xc0] sm:$0xf]  ;;  %v860_v1 = vor.u32 %v858_v28, %v857_v32  ;;  %v861_v17 = vrot.slane %v857_v32, 4  ;;  %v868_v12 = vor.u32 %v866_v7, %v865_v5  ;;  %v870_v6 = vrot.slane %v865_v5, 4  ;;  %v7301_v28 = vld [vmem:[#allocation2 + $0x6c] sm:$0xff]  }
 0x111   : > { %7022 = vmatprep.subr.bf16.mxu1 %v7306_v27  ;;  %v1029_v29 = vld [vmem:[#allocation2 + $0xc8] sm:$0x1]  ;;  %v3346_v37 = vsel %vm7518_vm9, %v8690_v2, %v8637_v49  ;;  %v8715_v34 = vsel %vm7965_vm13, %v6330_v15, %v3783_v26  ;;  %v3785_v50 = vrot.slane %v3783_v26, 4  ;;  %v3790_v2 = vrot.slane %v8295_v59, 5  ;;  %v3709_v7 = vld [vmem:[#allocation2 + $0x54] sm:$0xe] }
 0x112   : > { %v869_v60 = vsel %vm7525_vm10, %v861_v17, %v868_v12  ;;  %v1026_v49 = vsel %vm7464_vm5, %v860_v1, %v1025_v23  ;;  %v1030_v38 = vsel %vm7457_vm4, %v870_v6, %v1029_v29  ;;  %v3793_v48 = vrot.slane %v8321_v62, 5 }
 0x113   : > { %1027 = vst [vmem:[#allocation2 + $0xc0] sm:$0xf] %v1026_v49  ;;  %1028 = vst [vmem:[#allocation2 + $0xc4] sm:$0xf] %v869_v60  ;;  %v8729_v61 = vsel %vm7965_vm13, %v3785_v50, %v3786_v19  ;;  %v6332_v32 = vrot.slane %v3707_v46, 9  ;;  %v3797_v5 = vrot.slane %v8317_v55, 5  ;;  %v8743_v59 = vsel %vm7965_vm13, %v6331_v40, %v3790_v2 }
 0x114   : > { %7023 = vmatpush3.bf16.msra.mxu1 %v7306_v27  ;;  %1031 = vst [vmem:[#allocation2 + $0xc8] sm:$0x1] %v1030_v38  ;;  %v6362_v27 = vcombine.low %v8715_v34, %v8729_v61  ;;  %v3800_v23 = vrot.slane %v8350_v52, 5  ;;  %v3792_v62 = vrot.slane %v3790_v2, 4  ;;  %v6333_v15 = vrot.slane %v3708_v45, 9  ;;  %v7305_v50 = vld [vmem:[#allocation2 + $0x84] sm:$0xff]  }
 0x115   : > { %7024 = vmatprep.subr.bf16.mxu1 %v7310_v31  ;;  %7001 = vmatmul.mubr.bf16.gmra.mxu0 %v8678_v57  ;;  %v3804_v26 = vrot.slane %v8357_v43, 5  ;;  %v8749_v19 = vsel %vm7965_vm13, %v6332_v32, %v3797_v5  ;;  %v3799_v55 = vrot.slane %v3797_v5, 4  ;;  %v3807_v52 = vrot.slane %v8393_v56, 5  ;;  %v3710_v57 = vld [vmem:[#allocation2 + $0x60] sm:$0xe]  ;;  %v8768_v56 = vld [vmem:[%s10211_s3 + $0x1f8] sm:$0xff]  }
 0x116   : > { %7004 = vmatprep.mubr.bf16.mxu0 %v8685_v18  ;;  %v6334_v1 = vrot.slane %v3709_v7, 9  ;;  %v8754_v17 = vsel %vm7965_vm13, %v3792_v62, %v3793_v48  ;;  %v3811_v12 = vrot.slane %v8385_v3, 5  ;;  %v8763_v6 = vrot.slane %v3769_v36, 4  ;;  %v7303_v3 = vld [vmem:[#allocation2 + $0x78] sm:$0xff]   ;;  %v3711_v2 = vld [vmem:[#allocation2 + $0x6c] sm:$0xe] }
 0x117   : > { %6945 = vmatmul.mubr.bf16.gmra.mxu1 %v7299_v10  ;;  %v8758_v43 = vsel %vm7965_vm13, %v6333_v15, %v3804_v26  ;;  %v3806_v18 = vrot.slane %v3804_v26, 4  ;;  %v8774_v29 = vsel %vm7965_vm13, %v3799_v55, %v3800_v23  ;;  %v3814_v35 = vrot.slane %v8407_v53, 5 }
 0x118   : > { %6948 = vmatprep.mubr.bf16.mxu1 %v7301_v28  ;;  %7025 = vmatpush3.bf16.msra.mxu1 %v7310_v31  ;;  %v3813_v13 = vrot.slane %v3811_v12, 4  ;;  %v6335_v60 = vrot.slane %v3710_v57, 9  ;;  %v6318_v49 = vcombine.low %v3346_v37, %v3356_v51  ;;  %v8791_v40 = vsel %vm7965_vm13, %v6334_v1, %v3811_v12  ;;  %v3712_v37 = vld [vmem:[#allocation2 + $0x78] sm:$0xe]  ;;  %v4593_v57 = vld [vmem:[#allocation2 + $0x2c] sm:$0x1] }
 0x119   : > { %7026 = vmatprep.subr.bf16.mxu1 %v7314_v41  ;;  %v8781_v10 = vsel %vm7965_vm13, %v3806_v18, %v3807_v52  ;;  %v3818_v62 = vrot.slane %v8412_v44, 5  ;;  %v3821_v15 = vrot.slane %v8431_v58, 5  ;;  %v10284_v21 = vcombine.low %v8749_v19, %v8774_v29 }
 0x11a   : > { %v2994_v38 = vld [vmem:[#allocation2 + $0xc0] sm:$0xf]  ;;  %v8783_v45 = vld [vmem:[#allocation2 + $0xc4] sm:$0xf]  ;;  %v8799_v23 = vsel %vm7965_vm13, %v3813_v13, %v3814_v35  ;;  %v6336_v35 = vrot.slane %v3711_v2, 9 }
 0x11b   : > { %v8785_v28 = vld [vmem:[#allocation2 + $0xc8] sm:$0x1]  ;;  %v3358_v48 = vshrl.u32 %v2994_v38, 16  ;;  %v3361_v7 = vshll.u32 %v2994_v38, 16  ;;  %v3367_v32 = vshll.u32 %v8783_v45, 16  ;;  %v3371_v5 = vshrl.u32 %v8783_v45, 16 }
 0x11c   : > { %7027 = vmatpush3.bf16.msra.mxu1 %v7314_v41  ;;  %v3377_v51 = vshll.u32 %v8785_v28, 16  ;;  %v8808_v18 = vsel %vm7965_vm13, %v6335_v60, %v3818_v62  ;;  %v3820_v12 = vrot.slane %v3818_v62, 4  ;;  %v3832_v38 = vrot.slane %v8464_v39, 5  ;;  %v7315_v4 = vld [vmem:[#allocation2 + $0xc0] sm:$0xff]  }
 0x11d   : > { %7108 = vmatprep.subr.bf16.mxu1 %v8768_v56  ;;  %7005 = vmatmul.mubr.bf16.gmra.mxu0 %v8688_v22  ;;  %v3360_v26 = vrot.slane %v3358_v48, 4  ;;  %v3363_v55 = vrot.slane %v3361_v7, 5  ;;  %v3369_v52 = vrot.slane %v3367_v32, 5  ;;  %v3373_v1 = vrot.slane %v3371_v5, 4  ;;  %v3713_v48 = vld [vmem:[#allocation2 + $0x84] sm:$0xe] }
 0x11e   : > { %7008 = vmatprep.mubr.bf16.mxu0 %v6318_v49  ;;  %v3379_v41 = vrot.slane %v3377_v51, 5  ;;  %v3825_v22 = vrot.slane %v8434_v14, 5  ;;  %v8813_v13 = vsel %vm7965_vm13, %v3820_v12, %v3821_v15  ;;  %v6337_v49 = vrot.slane %v3712_v37, 9  ;;  %v7307_v14 = vld [vmem:[#allocation2 + $0x90] sm:$0xff]   ;;  %v7309_v32 = vld [vmem:[#allocation2 + $0x9c] sm:$0xff]  }
 0x11f   : > { %6949 = vmatmul.mubr.bf16.gmra.mxu1 %v7303_v3  ;;  %v3364_v44 = vor.u32 %v3363_v55, %v3360_v26  ;;  %v3374_v58 = vor.u32 %v3373_v1, %v3369_v52  ;;  %v3828_v3 = vrot.slane %v8457_v30, 5  ;;  %v7317_v5 = vld [vmem:[#allocation2 + $0x18] sm:$0xff]   ;;  %v3834_v37 = vrot.slane %v3832_v38, 4  ;;  %v3714_v1 = vld [vmem:[#allocation2 + $0x90] sm:$0xe] }
 0x120   : > { %6952 = vmatprep.mubr.bf16.mxu1 %v7305_v50  ;;  %v8821_v2 = vsel %vm7965_vm13, %v6336_v35, %v3825_v22  ;;  %v3827_v51 = vrot.slane %v3825_v22, 4  ;;  %v8825_v30 = vsel %vm7965_vm13, %v6337_v49, %v3832_v38  ;;  %v3835_v39 = vrot.slane %v8483_v20, 5  ;;  %v3715_v12 = vld [vmem:[#allocation2 + $0x9c] sm:$0xe] }
 0x121   : > { %v3365_v7 = vrot.slane %v3364_v44, 4  ;;  %v3375_v60 = vrot.slane %v3374_v58, 4  ;;  %v6338_v26 = vrot.slane %v3713_v48, 9  ;;  %v3839_v55 = vrot.slane %v8497_v11, 5  ;;  %v10270_v48 = vld [vmem:[#allocation6_spill] sm:$0xff] }
 0x122   : > { %v8835_v58 = vsel %vm7965_vm13, %v3827_v51, %v3828_v3  ;;  %v8839_v35 = vsel %vm7965_vm13, %v3834_v37, %v3835_v39  ;;  %v3842_v20 = vrot.slane %v8510_v0, 5  ;;  %v6339_v3 = vrot.slane %v3714_v1, 9  ;;  %v10271_v37 = vld [vmem:[#allocation7_spill] sm:$0xff]  ;;  %v10273_v1 = vld [vmem:[#allocation8_spill] sm:$0xff] }
 0x123   : > { %v3370_v62 = vsel %vm7518_vm9, %v3365_v7, %v3369_v52  ;;  %v3380_v15 = vsel %vm7518_vm9, %v3375_v60, %v3379_v41  ;;  %v3716_v52 = vld [vmem:[#allocation2 + $0xa8] sm:$0xe]  ;;  %v8848_v22 = vsel %vm7965_vm13, %v6338_v26, %v3839_v55  ;;  %v3841_v49 = vrot.slane %v3839_v55, 4  ;;  %v3717_v60 = vld [vmem:[#allocation2 + $0xb4] sm:$0xe]  ;;  %v7330_v41 = vld [vmem:[#allocation2 + $0x6c] sm:$0xff]  }
 0x124   : > { %v6319_v44 = vcombine.low %v3370_v62, %v3380_v15  ;;  %v3846_v38 = vrot.slane %v8523_v25, 5  ;;  %v3849_v7 = vrot.slane %v10270_v48, 5  ;;  %v6340_v0 = vrot.slane %v3715_v12, 9  ;;  %v10272_v62 = vld [vmem:[#allocation9_spill] sm:$0xff]  ;;  %v3718_v11 = vld [vmem:[#allocation2 + $0xc0] sm:$0xe] }
 0x125   : > { %v8854_v51 = vsel %vm7965_vm13, %v3841_v49, %v3842_v20  ;;  %v3853_v39 = vrot.slane %v10271_v37, 5  ;;  %v3856_v15 = vrot.slane %v10272_v62, 5  ;;  %v6341_v26 = vrot.slane %v3716_v52, 9  ;;  %v10274_v20 = vld [vmem:[#allocation10_spill] sm:$0xff]  ;;  %v7311_v52 = vld [vmem:[#allocation2 + $0xa8] sm:$0xff]  }
 0x126   : > { %7009 = vmatmul.mubr.bf16.gmra.mxu0 %v6319_v44  ;;  %v8862_v25 = vsel %vm7965_vm13, %v6339_v3, %v3846_v38  ;;  %v3848_v55 = vrot.slane %v3846_v38, 4  ;;  %v3863_v49 = vrot.slane %v10274_v20, 5  ;;  %v6342_v48 = vrot.slane %v3717_v60, 9  ;;  %v7318_v37 = vld [vmem:[#allocation2 + $0x24] sm:$0xff]  }
 0x127   : > { %6953 = vmatmul.mubr.bf16.gmra.mxu1 %v7307_v14  ;;  %7076 = vmatprep.mubr.bf16.mxu0 %v7317_v5  ;;  %v441_v5 = vld [vmem:[#allocation2 + $0xcc] sm:$0x1]  ;;  %v8867_v12 = vsel %vm7965_vm13, %v6340_v0, %v3853_v39  ;;  %v3855_v44 = vrot.slane %v3853_v39, 4  ;;  %v7313_v0 = vld [vmem:[#allocation2 + $0xb4] sm:$0xff]   ;;  %v3870_v20 = vrot.slane %v8635_v24, 5  ;;  %v3877_v39 = vrot.slane %v8785_v28, 5 }
 0x128   : > { %6956 = vmatprep.mubr.bf16.mxu1 %v7309_v32  ;;  %v3860_v32 = vrot.slane %v10273_v1, 5  ;;  %v8872_v62 = vsel %vm7965_vm13, %v3848_v55, %v3849_v7  ;;  %v10275_v1 = vld [vmem:[#allocation11_spill] sm:$0xff]  ;;  %v442_v7 = vsel %vm7457_vm4, 0, %v441_v5  ;;  %v7321_v55 = vld [vmem:[#allocation2 + $0x30] sm:$0xff]   ;;  %v6343_v5 = vrot.slane %v3718_v11, 9 }
 0x129   : > { %v3867_v14 = vrot.slane %v10275_v1, 5  ;;  %v8883_v60 = vsel %vm7965_vm13, %v3855_v44, %v3856_v15  ;;  %443 = vst [vmem:[#allocation2 + $0xcc] sm:$0x1] %v442_v7  ;;  %v3874_v44 = vrot.slane %v8783_v45, 5  ;;  %v3770_v28 = vsel %vm7965_vm13, %v6328_v9, %v3769_v36  ;;  %v7325_v7 = vld [vmem:[#allocation2 + $0x48] sm:$0xff]  }
 0x12a   : > { %v8876_v3 = vsel %vm7965_vm13, %v6341_v26, %v3860_v32  ;;  %v3862_v38 = vrot.slane %v3860_v32, 4  ;;  %v7324_v26 = vld [vmem:[%s10211_s3 + $0x230] sm:$0xff]  }
 0x12b   : > { %v8899_v15 = vsel %vm7965_vm13, %v6342_v48, %v3867_v14  ;;  %v3869_v24 = vrot.slane %v3867_v14, 4  ;;  %v8914_v11 = vsel %vm7965_vm13, %v6343_v5, %v3874_v44  ;;  %v3876_v45 = vrot.slane %v3874_v44, 4  ;;  %v8941_v5 = vld [vmem:[#allocation2 + $0x1c] sm:$0xf]  ;;  %v5342_v14 = vld [vmem:[#allocation2 + $0x18] sm:$0xe] }
 0x12c   : > { %v8895_v1 = vsel %vm7965_vm13, %v3862_v38, %v3863_v49  ;;  %v7380_v38 = vld [vmem:[#allocation2 + $0x1c] sm:$0xf]  ;;  %v6464_v50 = vrot.slane %v5342_v14, 9 }
 0x12d   : > { %v8907_v49 = vsel %vm7965_vm13, %v3869_v24, %v3870_v20  ;;  %v3776_v48 = vrot.slane %v7380_v38, 5  ;;  %v8932_v63 = vsel %vm7965_vm13, %v3876_v45, %v3877_v39  ;;  %v8939_v24 = vpop.f32.mrf.mxu0  ;;  %v4588_v39 = vld [vmem:[#allocation2 + $0x18] sm:$0xf] }
 0x12e   : > { %7077 = vmatmul.mubr.bf16.vlgmr.msra.gmra.mxu0 %v7318_v37  ;;  %v7328_v37 = vld [vmem:[%s10211_s3 + $0x228] sm:$0xff]   ;;  %10276 = vst [vmem:[#allocation3_spill] sm:$0xff] %v8932_v63  ;;  %10277 = vst [vmem:[#allocation5_spill] sm:$0xff] %v8939_v24  ;;  %v4637_v38 = vshrl.u32 %v4588_v39, 16  ;;  %v4640_v45 = vshll.u32 %v4588_v39, 16 }
 0x12f   : > { %6957 = vmatmul.mubr.bf16.gmra.mxu1 %v7311_v52  ;;  %7157 = vmatpush3.bf16.msra.mxu0 %v8673_v47  ;;  %v3773_v47 = vsel %vm7965_vm13, %v8763_v6, %v3772_v16  ;;  %v3704_v52 = vld [vmem:[#allocation2 + $0x18] sm:$0xe]  ;;  %v3778_v20 = vrot.slane %v3776_v48, 4  ;;  %v7381_v16 = vld [vmem:[#allocation2 + $0x20] sm:$0x1] }
 0x130   : > { %6960 = vmatprep.mubr.bf16.mxu1 %v7313_v0  ;;  %7080 = vmatprep.mubr.bf16.mxu0 %v7321_v55  ;;  %v7322_v0 = vld [vmem:[#allocation2 + $0x3c] sm:$0xff]   ;;  %v6360_v36 = vcombine.low %v3770_v28, %v3773_v47  ;;  %v6329_v33 = vrot.slane %v3704_v52, 9  ;;  %v3779_v6 = vrot.slane %v7381_v16, 5  ;;  %v8947_v28 = vpop.f32.mrf.mxu0  ;;  %v4646_v52 = vshll.u32 %v8941_v5, 16 }
 0x131   : > { %7158 = vmatprep.subr.bf16.mxu0 %v7324_v26  ;;  %v7332_v55 = vld [vmem:[%s10211_s3 + $0x220] sm:$0xff]   ;;  %10278 = vst [vmem:[#allocation6_spill] sm:$0xff] %v8947_v28  ;;  %v7336_v47 = vld [vmem:[%s10211_s3 + $0x218] sm:$0xff]  }
 0x132   : > { %v3777_v44 = vsel %vm7965_vm13, %v6329_v33, %v3776_v48  ;;  %v7326_v48 = vld [vmem:[#allocation2 + $0x54] sm:$0xff]   ;;  %v4591_v33 = vld [vmem:[#allocation2 + $0x24] sm:$0xf]  ;;  %v8959_v16 = vld [vmem:[#allocation2 + $0x20] sm:$0x1]  ;;  %v8961_v39 = vpop.f32.mrf.mxu0 }
 0x133   : > { %7159 = vmatpush3.bf16.msra.mxu0 %v7324_v26  ;;  %v3780_v26 = vsel %vm7965_vm13, %v3778_v20, %v3779_v6  ;;  %v7329_v20 = vld [vmem:[#allocation2 + $0x60] sm:$0xff]   ;;  %v4639_v6 = vrot.slane %v4637_v38, 4  ;;  %10279 = vst [vmem:[#allocation7_spill] sm:$0xff] %v8961_v39  ;;  %v4661_v42 = vshrl.u32 %v4591_v33, 16  ;;  %v4664_v32 = vshll.u32 %v4591_v33, 16 }
 0x134   : > { %7160 = vmatprep.subr.bf16.mxu0 %v7328_v37  ;;  %v4594_v33 = vld [vmem:[#allocation2 + $0x30] sm:$0xf]  ;;  %v5411_v34 = vrot.slane %v8959_v16, 5  ;;  %v4680_v39 = vshll.u32 %v4593_v57, 16 }
 0x135   : > { %v4663_v53 = vrot.slane %v4661_v42, 4  ;;  %v4685_v14 = vshrl.u32 %v4594_v33, 16  ;;  %v4688_v31 = vshll.u32 %v4594_v33, 16  ;;  %v5418_v33 = vrot.slane %v4593_v57, 5  ;;  %v9015_v57 = vld [vmem:[%s10211_s3 + $0x200] sm:$0xff]  }
 0x136   : > { %7081 = vmatmul.mubr.bf16.gmra.mxu0 %v7322_v0  ;;  %v6361_v0 = vcombine.low %v3777_v44, %v3780_v26  ;;  %v7340_v44 = vld [vmem:[%s10211_s3 + $0x210] sm:$0xff]   ;;  %v8966_v26 = vrot.slane %v4646_v52, 5  ;;  %v4656_v52 = vshll.u32 %v8959_v16, 16 }
 0x137   : > { %6961 = vmatmul.mubr.bf16.gmra.mxu1 %v7315_v4  ;;  %7084 = vmatprep.mubr.bf16.mxu0 %v7325_v7  ;;  %v4650_v4 = vshrl.u32 %v8941_v5, 16  ;;  %v4642_v7 = vrot.slane %v4640_v45, 5  ;;  %v5408_v45 = vrot.slane %v8941_v5, 5  ;;  %v8984_v5 = vld [vmem:[#allocation2 + $0x34] sm:$0xf] }
 0x138   : > { %7028 = vmatprep.mubr.bf16.mxu1 %v6360_v36  ;;  %7161 = vmatpush3.bf16.msra.mxu0 %v7328_v37  ;;  %v8954_v36 = vld [vmem:[#allocation2 + $0x28] sm:$0xf]  ;;  %v7323_v37 = vld [vmem:[%s10211_s3 + $0x1f0] sm:$0xff]   ;;  %v8988_v46 = vrot.slane %v4656_v52, 5  ;;  %v4698_v42 = vshrl.u32 %v8984_v5, 16 }
 0x139   : > { %7162 = vmatprep.subr.bf16.mxu0 %v7332_v55  ;;  %v4652_v9 = vrot.slane %v4650_v4, 4  ;;  %v4674_v38 = vshrl.u32 %v8954_v36, 16  ;;  %v7327_v4 = vld [vmem:[%s10211_s3 + $0x1e8] sm:$0xff]  }
 0x13b   : > { %v4653_v61 = vor.u32 %v4652_v9, %v8966_v26  ;;  %v7331_v9 = vld [vmem:[%s10211_s3 + $0x1e0] sm:$0xff]  }
 0x13c   : > { %7163 = vmatpush3.bf16.msra.mxu0 %v7332_v55  ;;  %v4670_v55 = vshll.u32 %v8954_v36, 16 }
 0x13d   : > { %7164 = vmatprep.subr.bf16.mxu0 %v7336_v47 }
 0x13e   : > { %7085 = vmatmul.mubr.bf16.gmra.mxu0 %v7326_v48  ;;  %v5343_v48 = vld [vmem:[#allocation2 + $0x24] sm:$0xe] }
 0x13f   : > { %7029 = vmatmul.mubr.bf16.vlgmr.msra.gmra.mxu1 %v6361_v0  ;;  %7088 = vmatprep.mubr.bf16.mxu0 %v7329_v20  ;;  %v4643_v0 = vor.u32 %v4642_v7, %v4639_v6  ;;  %v4666_v20 = vrot.slane %v4664_v32, 5  ;;  %v8986_v6 = vrot.slane %v4670_v55, 5  ;;  %v4676_v7 = vrot.slane %v4674_v38, 4 }
 0x140   : > { %7109 = vmatpush3.bf16.msra.mxu1 %v8768_v56  ;;  %7032 = vmatprep.mubr.bf16.mxu1 %v6362_v27  ;;  %v8979_v56 = vpop.f32.mrf.mxu0  ;;  %v5415_v27 = vrot.slane %v8954_v36, 5  ;;  %v7333_v36 = vld [vmem:[#allocation2 + $0x78] sm:$0xff]   ;;  %v4694_v32 = vshll.u32 %v8984_v5, 16  ;;  %v4654_v38 = vrot.slane %v4653_v61, 4  ;;  %v4690_v61 = vrot.slane %v4688_v31, 5 }
 0x141   : > { %7110 = vmatprep.subr.bf16.mxu1 %v7323_v37  ;;  %7165 = vmatpush3.bf16.msra.mxu0 %v7336_v47  ;;  %10280 = vst [vmem:[#allocation9_spill] sm:$0xff] %v8979_v56  ;;  %v5410_v47 = vrot.slane %v5408_v45, 4  ;;  %v8993_v16 = vrot.slane %v4643_v0, 4  ;;  %v6465_v56 = vrot.slane %v5343_v48, 9  ;;  %v10282_v0 = vcombine.low %v8743_v59, %v8754_v17  ;;  %v9005_v48 = vpop.f32.mrf.mxu1 }
 0x142   : > { %7166 = vmatprep.subr.bf16.mxu0 %v7340_v44  ;;  %v8997_v55 = vpop.f32.mrf.mxu0  ;;  %v5417_v52 = vrot.slane %v5415_v27, 4  ;;  %10283 = vst [vmem:[#allocation10_spill] sm:$0xff] %v9005_v48  ;;  %v4667_v28 = vor.u32 %v4666_v20, %v4663_v53  ;;  %v4677_v24 = vor.u32 %v4676_v7, %v8986_v6  ;;  %v9019_v59 = vsel %vm7965_vm13, %v6464_v50, %v5408_v45  ;;  %v9025_v53 = vld [vmem:[#allocation2 + $0x38] sm:$0x1]  ;;  %v9049_v7 = vld [vmem:[#allocation2 + $0x40] sm:$0xf] }
 0x143   : > { %10281 = vst [vmem:[#allocation8_spill] sm:$0xff] %v8997_v55  ;;  %v5344_v55 = vld [vmem:[#allocation2 + $0x30] sm:$0xe]  ;;  %v9023_v17 = vsel %vm7965_vm13, %v5410_v47, %v5411_v34  ;;  %v4649_v19 = vsel %vm7518_vm9, %v8993_v16, %v8966_v26  ;;  %v9036_v29 = vsel %vm7965_vm13, %v6465_v56, %v5415_v27  ;;  %v9038_v50 = vrot.slane %v4694_v32, 5  ;;  %v7334_v56 = vld [vmem:[#allocation2 + $0x84] sm:$0xff]   ;;  %v9051_v27 = vpop.f32.mrf.mxu1 }
 0x144   : > { %7111 = vmatpush3.bf16.msra.mxu1 %v7323_v37  ;;  %v7344_v37 = vld [vmem:[%s10211_s3 + $0x208] sm:$0xff]   ;;  %v4700_v45 = vrot.slane %v4698_v42, 4  ;;  %v9040_v31 = vpop.f32.mrf.mxu0  ;;  %v4659_v34 = vsel %vm7518_vm9, %v4654_v38, %v8988_v46  ;;  %v4682_v26 = vrot.slane %v4680_v39, 5  ;;  %v6466_v20 = vrot.slane %v5344_v55, 9  ;;  %10286 = vst [vmem:[#allocation12_spill] sm:$0xff] %v9051_v27  ;;  %v7337_v32 = vld [vmem:[#allocation2 + $0x90] sm:$0xff]  }
 0x145   : > { %7112 = vmatprep.subr.bf16.mxu1 %v7327_v4  ;;  %7167 = vmatpush3.bf16.msra.mxu0 %v7340_v44  ;;  %v5422_v44 = vrot.slane %v8984_v5, 5  ;;  %10285 = vst [vmem:[#allocation11_spill] sm:$0xff] %v9040_v31  ;;  %v9047_v5 = vsel %vm7965_vm13, %v5417_v52, %v5418_v33  ;;  %v4668_v47 = vrot.slane %v4667_v28, 4  ;;  %v5425_v16 = vrot.slane %v9025_v53, 5  ;;  %v7339_v39 = vld [vmem:[%s10211_s3 + $0x1d0] sm:$0xff]  }
 0x146   : > { %7089 = vmatmul.mubr.bf16.gmra.mxu0 %v7330_v41  ;;  %v4687_v41 = vrot.slane %v4685_v14, 4  ;;  %7168 = vmatprep.subr.bf16.mxu0 %v7344_v37  ;;  %v4678_v14 = vrot.slane %v4677_v24, 4  ;;  %v4701_v55 = vor.u32 %v4700_v45, %v9038_v50  ;;  %v4704_v28 = vshll.u32 %v9025_v53, 16  ;;  %v5345_v24 = vld [vmem:[#allocation2 + $0x3c] sm:$0xe]  ;;  %v9062_v52 = vpop.f32.mrf.mxu0  ;;  %v9077_v45 = vpop.f32.mrf.mxu1 }
 0x147   : > { %7033 = vmatmul.mubr.bf16.gmra.mxu1 %v10282_v0  ;;  %7092 = vmatprep.mubr.bf16.mxu0 %v7333_v36  ;;  %v5424_v36 = vrot.slane %v5422_v44, 4  ;;  %10287 = vst [vmem:[#allocation13_spill] sm:$0xff] %v9062_v52  ;;  %v9066_v0 = vcombine.low %v4649_v19, %v4659_v34  ;;  %v10289_v53 = vcombine.low %v8758_v43, %v8781_v10  ;;  %10290 = vst [vmem:[#allocation15_spill] sm:$0xff] %v9077_v45  ;;  %v4600_v43 = vld [vmem:[#allocation2 + $0x48] sm:$0xf] }
 0x148   : > { %7036 = vmatprep.mubr.bf16.mxu1 %v10284_v21  ;;  %7113 = vmatpush3.bf16.msra.mxu1 %v7327_v4  ;;  %v7335_v21 = vld [vmem:[%s10211_s3 + $0x1d8] sm:$0xff]   ;;  %v4691_v46 = vor.u32 %v4690_v61, %v4687_v41  ;;  %v9072_v61 = vsel %vm7965_vm13, %v6466_v20, %v5422_v44  ;;  %v4683_v19 = vsel %vm7518_vm9, %v4678_v14, %v4682_v26  ;;  %v5429_v44 = vrot.slane %v9049_v7, 5  ;;  %v9089_v20 = vld [vmem:[#allocation2 + $0x4c] sm:$0xf]  ;;  %v4602_v45 = vld [vmem:[#allocation2 + $0x50] sm:$0x1] }
 0x149   : > { %7114 = vmatprep.subr.bf16.mxu1 %v7331_v9  ;;  %v4597_v4 = vld [vmem:[#allocation2 + $0x3c] sm:$0xf]  ;;  %7169 = vmatpush3.bf16.msra.mxu0 %v7344_v37  ;;  %v4718_v37 = vshll.u32 %v9049_v7, 16  ;;  %10288 = vst [vmem:[#allocation14_spill] sm:$0xff] %v9066_v0  ;;  %v9086_v34 = vsel %vm7965_vm13, %v5424_v36, %v5425_v16  ;;  %v10291_v10 = vcombine.low %v8791_v40, %v8799_v23  ;;  %v9099_v14 = vrot.slane %v4701_v55, 4  ;;  %v9105_v23 = vpop.f32.mrf.mxu0 }
 0x14a   : > { %7170 = vmatprep.subr.bf16.mxu0 %v9015_v57  ;;  %v4709_v42 = vshrl.u32 %v4597_v4, 16  ;;  %v4712_v38 = vshll.u32 %v4597_v4, 16  ;;  %v4673_v4 = vsel %vm7518_vm9, %v4668_v47, %v8986_v6  ;;  %v4599_v6 = vld [vmem:[#allocation2 + $0x44] sm:$0x1]  ;;  %v6467_v47 = vrot.slane %v5345_v24, 9  ;;  %10292 = vst [vmem:[#allocation16_spill] sm:$0xff] %v9105_v23  ;;  %v9110_v24 = vpop.f32.mrf.mxu1 }
 0x14b   : > { %v9101_v36 = vrot.slane %v4704_v28, 5  ;;  %v9103_v16 = vrot.slane %v4718_v37, 5  ;;  %10293 = vst [vmem:[#allocation17_spill] sm:$0xff] %v9110_v24  ;;  %v7338_v55 = vld [vmem:[#allocation2 + $0x9c] sm:$0xff]   ;;  %v5431_v28 = vrot.slane %v5429_v44, 4  ;;  %v5432_v37 = vrot.slane %v4599_v6, 5 }
 0x14c   : > { %7115 = vmatpush3.bf16.msra.mxu1 %v7331_v9  ;;  %v4722_v9 = vshrl.u32 %v9049_v7, 16  ;;  %v4714_v26 = vrot.slane %v4712_v38, 5  ;;  %v7343_v7 = vld [vmem:[%s10211_s3 + $0x1c8] sm:$0xff]   ;;  %v4746_v38 = vshrl.u32 %v9089_v20, 16  ;;  %v4728_v41 = vshll.u32 %v4599_v6, 16 }
 0x14d   : > { %7116 = vmatprep.subr.bf16.mxu1 %v7335_v21  ;;  %7171 = vmatpush3.bf16.msra.mxu0 %v9015_v57  ;;  %v5436_v27 = vrot.slane %v9089_v20, 5  ;;  %v9137_v23 = vld [vmem:[#allocation2 + $0x5c] sm:$0x1] }
 0x14e   : > { %7093 = vmatmul.mubr.bf16.gmra.mxu0 %v7334_v56  ;;  %v9094_v56 = vrot.slane %v4691_v46, 4  ;;  %v4724_v40 = vrot.slane %v4722_v9, 4  ;;  %v4733_v46 = vshrl.u32 %v4600_v43, 16  ;;  %v7341_v9 = vld [vmem:[#allocation2 + $0xa8] sm:$0xff]   ;;  %v4748_v48 = vrot.slane %v4746_v38, 4 }
 0x14f   : > { %7037 = vmatmul.mubr.bf16.gmra.mxu1 %v10289_v53  ;;  %v4711_v53 = vrot.slane %v4709_v42, 4  ;;  %7096 = vmatprep.mubr.bf16.mxu0 %v7337_v32  ;;  %v4736_v42 = vshll.u32 %v4600_v43, 16  ;;  %v4742_v32 = vshll.u32 %v9089_v20, 16  ;;  %v9118_v43 = vsel %vm7965_vm13, %v6467_v47, %v5429_v44  ;;  %v4604_v47 = vld [vmem:[#allocation2 + $0x58] sm:$0xf] }
 0x150   : > { %7040 = vmatprep.mubr.bf16.mxu1 %v10291_v10  ;;  %7117 = vmatpush3.bf16.msra.mxu1 %v7335_v21  ;;  %v5346_v21 = vld [vmem:[#allocation2 + $0x48] sm:$0xe]  ;;  %v9112_v10 = vcombine.low %v4673_v4, %v4683_v19  ;;  %v7347_v4 = vld [vmem:[%s10211_s3 + $0x1c0] sm:$0xff]   ;;  %v4725_v44 = vor.u32 %v4724_v40, %v9103_v16  ;;  %v4603_v20 = vld [vmem:[#allocation2 + $0x54] sm:$0xf]  ;;  %v9142_v19 = vpop.f32.mrf.mxu1  ;;  %v9146_v40 = vsel %vm7965_vm13, %v5431_v28, %v5432_v37  ;;  %v5438_v52 = vrot.slane %v5436_v27, 4 }
 0x151   : > { %7118 = vmatprep.subr.bf16.mxu1 %v7339_v39  ;;  %v4715_v33 = vor.u32 %v4714_v26, %v4711_v53  ;;  %v6468_v6 = vrot.slane %v5346_v21, 9  ;;  %v9133_v53 = vpop.f32.mrf.mxu0  ;;  %v4735_v26 = vrot.slane %v4733_v46, 4  ;;  %v4738_v57 = vrot.slane %v4736_v42, 5  ;;  %10297 = vst [vmem:[#allocation20_spill] sm:$0xff] %v9142_v19  ;;  %v5347_v46 = vld [vmem:[#allocation2 + $0x54] sm:$0xe] }
 0x152   : > { %10294 = vst [vmem:[#allocation18_spill] sm:$0xff] %v9112_v10  ;;  %10295 = vst [vmem:[#allocation19_spill] sm:$0xff] %v9133_v53  ;;  %v9135_v24 = vrot.slane %v4742_v32, 5  ;;  %v4730_v21 = vrot.slane %v4728_v41, 5  ;;  %v5439_v53 = vrot.slane %v4602_v45, 5  ;;  %v5443_v42 = vrot.slane %v4604_v47, 5 }
 0x153   : > { %v10298_v32 = vcombine.low %v8821_v2, %v8835_v58  ;;  %v4716_v38 = vrot.slane %v4715_v33, 4  ;;  %v4752_v19 = vshll.u32 %v4602_v45, 16  ;;  %v4766_v31 = vshll.u32 %v4604_v47, 16  ;;  %v7342_v37 = vld [vmem:[#allocation2 + $0xb4] sm:$0xff]   ;;  %v9151_v41 = vpop.f32.mrf.mxu0  ;;  %v9161_v45 = vld [vmem:[#allocation2 + $0x64] sm:$0xf] }
 0x154   : > { %7119 = vmatpush3.bf16.msra.mxu1 %v7339_v39  ;;  %v10296_v39 = vcombine.low %v8808_v18, %v8813_v13  ;;  %v4757_v18 = vshrl.u32 %v4603_v20, 16  ;;  %v4760_v13 = vshll.u32 %v4603_v20, 16  ;;  %v4770_v28 = vshrl.u32 %v4604_v47, 16  ;;  %10299 = vst [vmem:[#allocation21_spill] sm:$0xff] %v9151_v41 }
 0x155   : > { %7120 = vmatprep.subr.bf16.mxu1 %v7343_v7  ;;  %v9155_v10 = vsel %vm7965_vm13, %v6468_v6, %v5436_v27  ;;  %v4739_v2 = vor.u32 %v4738_v57, %v4735_v26  ;;  %v4749_v58 = vor.u32 %v4748_v48, %v9135_v24  ;;  %v6469_v33 = vrot.slane %v5347_v46, 9 }
 0x156   : > { %7097 = vmatmul.mubr.bf16.gmra.mxu0 %v7338_v55  ;;  %v4606_v55 = vld [vmem:[#allocation2 + $0x60] sm:$0xf]  ;;  %v5445_v20 = vrot.slane %v5443_v42, 4  ;;  %v4721_v41 = vsel %vm7518_vm9, %v4716_v38, %v9103_v16  ;;  %v9168_v27 = vsel %vm7965_vm13, %v5438_v52, %v5439_v53  ;;  %v4759_v48 = vrot.slane %v4757_v18, 4 }
 0x157   : > { %7041 = vmatmul.mubr.bf16.gmra.mxu1 %v10296_v39  ;;  %7100 = vmatprep.mubr.bf16.mxu0 %v7341_v9  ;;  %v4726_v39 = vrot.slane %v4725_v44, 4  ;;  %v9158_v9 = vpop.f32.mrf.mxu1  ;;  %v4781_v44 = vshrl.u32 %v4606_v55, 16  ;;  %v4784_v47 = vshll.u32 %v4606_v55, 16  ;;  %v4762_v57 = vrot.slane %v4760_v13, 5  ;;  %v9174_v55 = vpop.f32.mrf.mxu0 }
 0x158   : > { %7044 = vmatprep.mubr.bf16.mxu1 %v10298_v32  ;;  %7121 = vmatpush3.bf16.msra.mxu1 %v7343_v7  ;;  %10300 = vst [vmem:[#allocation22_spill] sm:$0xff] %v9158_v9  ;;  %v5446_v7 = vrot.slane %v9137_v23, 5  ;;  %v7345_v32 = vld [vmem:[#allocation2 + $0xc0] sm:$0xff]   ;;  %v4754_v26 = vrot.slane %v4752_v19, 5  ;;  %v9172_v46 = vrot.slane %v4766_v31, 5  ;;  %v4772_v9 = vrot.slane %v4770_v28, 4 }
 0x159   : > { %7122 = vmatprep.subr.bf16.mxu1 %v7347_v4  ;;  %v4731_v6 = vsel %vm7518_vm9, %v4726_v39, %v4730_v21  ;;  %v4740_v0 = vrot.slane %v4739_v2, 4  ;;  %v4750_v63 = vrot.slane %v4749_v58, 4  ;;  %v9178_v16 = vsel %vm7965_vm13, %v6469_v33, %v5443_v42  ;;  %v9184_v53 = vpop.f32.mrf.mxu1  ;;  %v4608_v2 = vld [vmem:[#allocation2 + $0x68] sm:$0x1] }
 0x15a   : > { %v4790_v52 = vshll.u32 %v9161_v45, 16  ;;  %10302 = vst [vmem:[#allocation23_spill] sm:$0xff] %v9184_v53  ;;  %v9188_v31 = vsel %vm7965_vm13, %v5445_v20, %v5446_v7  ;;  %v4783_v19 = vrot.slane %v4781_v44, 4  ;;  %v4786_v21 = vrot.slane %v4784_v47, 5  ;;  %v4610_v7 = vld [vmem:[#allocation2 + $0x70] sm:$0xf] }
 0x15b   : > { %v4794_v38 = vshrl.u32 %v9161_v45, 16  ;;  %v10303_v42 = vcombine.low %v8848_v22, %v8854_v51  ;;  %v4763_v39 = vor.u32 %v4762_v57, %v4759_v48  ;;  %v5450_v22 = vrot.slane %v9161_v45, 5  ;;  %v4609_v51 = vld [vmem:[#allocation2 + $0x6c] sm:$0xf] }
 0x15c   : > { %7123 = vmatpush3.bf16.msra.mxu1 %v7347_v4  ;;  %v10301_v4 = vcombine.low %v8825_v30, %v8839_v35  ;;  %v10304_v30 = vsel %vm7518_vm9, %v9099_v14, %v9101_v36  ;;  %v10305_v35 = vsel %vm7518_vm9, %v9094_v56, %v9038_v50  ;;  %v9209_v28 = vcombine.low %v4721_v41, %v4731_v6  ;;  %v5348_v50 = vld [vmem:[#allocation2 + $0x60] sm:$0xe]  ;;  %v9215_v56 = vpop.f32.mrf.mxu0  ;;  %v5349_v47 = vld [vmem:[#allocation2 + $0x6c] sm:$0xe] }
 0x15d   : > { %v9204_v18 = vcombine.low %v10305_v35, %v10304_v30  ;;  %v4773_v14 = vor.u32 %v4772_v9, %v9172_v46  ;;  %v4776_v36 = vshll.u32 %v9137_v23, 16  ;;  %v4745_v58 = vsel %vm7518_vm9, %v4740_v0, %v9135_v24  ;;  %v9226_v9 = vpop.f32.mrf.mxu1  ;;  %v7346_v23 = vld [vmem:[#allocation2 + $0xcc] sm:$0xff]  }
 0x15e   : > { %7101 = vmatmul.mubr.bf16.gmra.mxu0 %v7342_v37  ;;  %v4755_v33 = vsel %vm7518_vm9, %v4750_v63, %v4754_v26  ;;  %v9224_v20 = vrot.slane %v4790_v52, 5  ;;  %10306 = vst [vmem:[#allocation24_spill] sm:$0xff] %v9226_v9  ;;  %v4787_v45 = vor.u32 %v4786_v21, %v4783_v19  ;;  %v4796_v44 = vrot.slane %v4794_v38, 4 }
 0x15f   : > { %7045 = vmatmul.mubr.bf16.gmra.mxu1 %v10301_v4  ;;  %7104 = vmatprep.mubr.bf16.mxu0 %v7345_v32  ;;  %v4805_v32 = vshrl.u32 %v4609_v51, 16  ;;  %v4808_v48 = vshll.u32 %v4609_v51, 16  ;;  %v9228_v57 = vrot.slane %v4763_v39, 4  ;;  %v6470_v0 = vrot.slane %v5348_v50, 9  ;;  %v9241_v39 = vpop.f32.mrf.mxu1 }
 0x160   : > { %7048 = vmatprep.mubr.bf16.mxu1 %v10303_v42  ;;  %v5452_v24 = vrot.slane %v5450_v22, 4  ;;  %v5453_v6 = vrot.slane %v4608_v2, 5  ;;  %v9230_v63 = vrot.slane %v4773_v14, 4  ;;  %v9232_v26 = vrot.slane %v4776_v36, 5  ;;  %10308 = vst [vmem:[#allocation25_spill] sm:$0xff] %v9241_v39 }
 0x161   : > { %v4814_v52 = vshll.u32 %v4610_v7, 16  ;;  %v4818_v4 = vshrl.u32 %v4610_v7, 16  ;;  %v9236_v30 = vcombine.low %v4745_v58, %v4755_v33  ;;  %v4800_v19 = vshll.u32 %v4608_v2, 16  ;;  %v4611_v36 = vld [vmem:[#allocation2 + $0x74] sm:$0x1] }
 0x162   : > { %v6471_v21 = vrot.slane %v5349_v47, 9  ;;  %v5457_v38 = vrot.slane %v4610_v7, 5  ;;  %v10307_v35 = vcombine.low %v8862_v25, %v8872_v62  ;;  %v9243_v51 = vrot.slane %v4787_v45, 4  ;;  %v4612_v45 = vld [vmem:[#allocation2 + $0x78] sm:$0xf] }
 0x163   : > { %v4797_v14 = vor.u32 %v4796_v44, %v9224_v20  ;;  %v4807_v50 = vrot.slane %v4805_v32, 4  ;;  %v4810_v41 = vrot.slane %v4808_v48, 5  ;;  %v10309_v58 = vcombine.low %v8867_v12, %v8883_v60  ;;  %v4613_v12 = vld [vmem:[#allocation2 + $0x7c] sm:$0xf]  ;;  %v9266_v60 = vld [vmem:[#allocation2 + $0x80] sm:$0x1] }
 0x164   : > { %v10311_v25 = vcombine.low %v9019_v59, %v9023_v17  ;;  %v4769_v62 = vsel %vm7518_vm9, %v9228_v57, %v9172_v46  ;;  %v9260_v33 = vsel %vm7965_vm13, %v6470_v0, %v5450_v22  ;;  %v9264_v7 = vsel %vm7965_vm13, %v5452_v24, %v5453_v6  ;;  %v5350_v57 = vld [vmem:[#allocation2 + $0x78] sm:$0xe]  ;;  %v9280_v0 = vpop.f32.mrf.mxu1 }
 0x165   : > { %v9234_v42 = vpop.f32.mrf.mxu0  ;;  %v4779_v59 = vsel %vm7518_vm9, %v9230_v63, %v9232_v26  ;;  %v9272_v17 = vrot.slane %v4814_v52, 5  ;;  %v5464_v46 = vrot.slane %v4613_v12, 5  ;;  %v4802_v22 = vrot.slane %v4800_v19, 5  ;;  %10313 = vst [vmem:[#allocation28_spill] sm:$0xff] %v9280_v0  ;;  %v9286_v52 = vld [vmem:[#allocation2 + $0x88] sm:$0xf] }
 0x166   : > { %7105 = vmatmul.mubr.bf16.gmra.mxu0 %v7346_v23  ;;  %v4820_v23 = vrot.slane %v4818_v4, 4  ;;  %v9278_v47 = vsel %vm7965_vm13, %v6471_v21, %v5457_v38  ;;  %v5459_v32 = vrot.slane %v5457_v38, 4  ;;  %v5460_v48 = vrot.slane %v4611_v36, 5  ;;  %v4615_v4 = vld [vmem:[#allocation2 + $0x84] sm:$0xf] }
 0x167   : > { %7049 = vmatmul.mubr.bf16.gmra.mxu1 %v10307_v35  ;;  %v9249_v2 = vpop.f32.mrf.mxu0  ;;  %7172 = vmatprep.mubr.bf16.mxu0 %v10311_v25  ;;  %v4793_v24 = vsel %vm7518_vm9, %v9243_v51, %v9224_v20  ;;  %v4798_v6 = vrot.slane %v4797_v14, 4  ;;  %v4811_v63 = vor.u32 %v4810_v41, %v4807_v50  ;;  %v4824_v26 = vshll.u32 %v4611_v36, 16  ;;  %v9299_v50 = vpop.f32.mrf.mxu1 }
 0x168   : > { %7052 = vmatprep.mubr.bf16.mxu1 %v10309_v58  ;;  %10310 = vst [vmem:[#allocation26_spill] sm:$0xff] %v9249_v2  ;;  %v4829_v21 = vshrl.u32 %v4612_v45, 16  ;;  %v4832_v35 = vshll.u32 %v4612_v45, 16  ;;  %v4838_v38 = vshll.u32 %v4613_v12, 16  ;;  %v4842_v58 = vshrl.u32 %v4613_v12, 16  ;;  %10316 = vst [vmem:[#allocation30_spill] sm:$0xff] %v9299_v50 }
 0x169   : > { %v9274_v44 = vpop.f32.mrf.mxu0  ;;  %v4821_v25 = vor.u32 %v4820_v23, %v9272_v17  ;;  %v6472_v37 = vrot.slane %v5350_v57, 9  ;;  %v5466_v13 = vrot.slane %v5464_v46, 4  ;;  %v5467_v0 = vrot.slane %v9266_v60, 5 }
 0x16a   : > { %10312 = vst [vmem:[#allocation27_spill] sm:$0xff] %v9274_v44  ;;  %v4853_v20 = vshrl.u32 %v4615_v4, 16  ;;  %v4856_v41 = vshll.u32 %v4615_v4, 16  ;;  %v4862_v51 = vshll.u32 %v9286_v52, 16  ;;  %v4866_v14 = vshrl.u32 %v9286_v52, 16 }
 0x16b   : > { %v9288_v19 = vpop.f32.mrf.mxu0  ;;  %v10315_v36 = vcombine.low %v8876_v3, %v8895_v1  ;;  %v10317_v12 = vcombine.low %v9036_v29, %v9047_v5  ;;  %v4803_v23 = vsel %vm7518_vm9, %v4798_v6, %v4802_v22  ;;  %v9308_v45 = vsel %vm7965_vm13, %v5459_v32, %v5460_v48 }
 0x16c   : > { %10314 = vst [vmem:[#allocation29_spill] sm:$0xff] %v9288_v19  ;;  %v9310_v57 = vrot.slane %v4811_v63, 4  ;;  %v9312_v4 = vrot.slane %v4824_v26, 5  ;;  %v10318_v3 = vcombine.low %v8899_v15, %v8907_v49  ;;  %v10319_v29 = vcombine.low %v9072_v61, %v9086_v34  ;;  %v5351_v26 = vld [vmem:[#allocation2 + $0x84] sm:$0xe] }
 0x16d   : > { %v9292_v39 = vpop.f32.mrf.mxu0  ;;  %v4831_v5 = vrot.slane %v4829_v21, 4  ;;  %v4834_v22 = vrot.slane %v4832_v35, 5  ;;  %v9322_v6 = vrot.slane %v4838_v38, 5  ;;  %v4844_v32 = vrot.slane %v4842_v58, 4  ;;  %v9339_v58 = vpop.f32.mrf.mxu1 }
 0x16e   : > { %7173 = vmatmul.mubr.bf16.vlgmr.msra.gmra.mxu0 %v10317_v12  ;;  %v9324_v48 = vrot.slane %v4821_v25, 4  ;;  %v9328_v63 = vsel %vm7965_vm13, %v6472_v37, %v5464_v46  ;;  %v9332_v15 = vsel %vm7965_vm13, %v5466_v13, %v5467_v0  ;;  %v4848_v49 = vshll.u32 %v9266_v60, 16  ;;  %10320 = vst [vmem:[#allocation31_spill] sm:$0xff] %v9339_v58  ;;  %v4617_v60 = vld [vmem:[#allocation2 + $0x8c] sm:$0x1] }
 0x16f   : > { %7053 = vmatmul.mubr.bf16.gmra.mxu1 %v10315_v36  ;;  %v9317_v1 = vpop.f32.mrf.mxu0  ;;  %7176 = vmatprep.mubr.bf16.mxu0 %v10319_v29  ;;  %v4855_v34 = vrot.slane %v4853_v20, 4  ;;  %v4858_v21 = vrot.slane %v4856_v41, 5  ;;  %v9337_v35 = vrot.slane %v4862_v51, 5  ;;  %v4868_v38 = vrot.slane %v4866_v14, 4  ;;  %v9356_v51 = vld [vmem:[#allocation2 + $0x94] sm:$0xf] }
 0x170   : > { %7056 = vmatprep.mubr.bf16.mxu1 %v10318_v3  ;;  %v9341_v25 = vcombine.low %v4769_v62, %v4779_v59  ;;  %v9345_v46 = vcombine.low %v4793_v24, %v4803_v23  ;;  %v4835_v41 = vor.u32 %v4834_v22, %v4831_v5  ;;  %v4845_v62 = vor.u32 %v4844_v32, %v9322_v6  ;;  %v4618_v14 = vld [vmem:[#allocation2 + $0x90] sm:$0xf]  ;;  %v4621_v3 = vld [vmem:[#allocation2 + $0x9c] sm:$0xf]  ;;  %v9370_v13 = vld [vmem:[#allocation2 + $0xa0] sm:$0xf] }
 0x171   : > { %v9335_v61 = vpop.f32.mrf.mxu0  ;;  %v6473_v59 = vrot.slane %v5351_v26, 9  ;;  %v9364_v12 = vrot.slane %v4848_v49, 5  ;;  %v5471_v23 = vrot.slane %v9286_v52, 5  ;;  %v5474_v5 = vrot.slane %v4617_v60, 5  ;;  %v10322_v24 = vld [vmem:[#allocation3_spill] sm:$0xff] }
 0x172   : > { %v4859_v22 = vor.u32 %v4858_v21, %v4855_v34  ;;  %v4869_v32 = vor.u32 %v4868_v38, %v9337_v35  ;;  %v4872_v26 = vshll.u32 %v4617_v60, 16  ;;  %v10323_v37 = vcombine.low %v8914_v11, %v10322_v24  ;;  %v10325_v21 = vld [vmem:[#allocation14_spill] sm:$0xff] }
 0x173   : > { %v9349_v0 = vpop.f32.mrf.mxu0  ;;  %v10324_v49 = vcombine.low %v9118_v43, %v9146_v40  ;;  %v4877_v52 = vshrl.u32 %v4618_v14, 16  ;;  %v4880_v36 = vshll.u32 %v4618_v14, 16  ;;  %v4886_v58 = vshll.u32 %v9356_v51, 16 }
 0x174   : > { %v4890_v34 = vshrl.u32 %v9356_v51, 16  ;;  %v10326_v60 = vcombine.low %v9155_v10, %v9168_v27  ;;  %v4836_v11 = vrot.slane %v4835_v41, 4  ;;  %v4901_v24 = vshrl.u32 %v4621_v3, 16  ;;  %v5352_v41 = vld [vmem:[#allocation2 + $0x90] sm:$0xe] }
 0x175   : > { %v9367_v29 = vpop.f32.mrf.mxu0  ;;  %v9392_v40 = vsel %vm7965_vm13, %v6473_v59, %v5471_v23  ;;  %v5473_v14 = vrot.slane %v5471_v23, 4  ;;  %v4860_v9 = vrot.slane %v4859_v22, 4  ;;  %v4870_v10 = vrot.slane %v4869_v32, 4 }
 0x176   : > { %v9372_v20 = vpop.f32.mrf.mxu1  ;;  %7177 = vmatmul.mubr.bf16.gmra.mxu0 %v10324_v49  ;;  %v4910_v49 = vshll.u32 %v9370_v13, 16  ;;  %v4874_v27 = vrot.slane %v4872_v26, 5  ;;  %v4882_v53 = vrot.slane %v4880_v36, 5  ;;  %v9401_v59 = vrot.slane %v4886_v58, 5 }
 0x177   : > { %10321 = vst [vmem:[#allocation32_spill] sm:$0xff] %v9372_v20  ;;  %7057 = vmatmul.mubr.bf16.gmra.mxu1 %v10323_v37  ;;  %v9383_v38 = vpop.f32.mrf.mxu0  ;;  %7180 = vmatprep.mubr.bf16.mxu0 %v10326_v60  ;;  %v4846_v37 = vrot.slane %v4845_v62, 4  ;;  %v4904_v20 = vshll.u32 %v4621_v3, 16  ;;  %v5478_v62 = vrot.slane %v9356_v51, 5  ;;  %v4620_v60 = vld [vmem:[#allocation2 + $0x98] sm:$0x1]  ;;  %v4841_v44 = vsel %vm7518_vm9, %v4836_v11, %v9322_v6 }
 0x178   : > { %7124 = vmatprep.mubr.bf16.mxu1 %v10325_v21  ;;  %v9388_v43 = vpop.f32.mrf.mxu1  ;;  %v4914_v21 = vshrl.u32 %v9370_v13, 16  ;;  %v4892_v23 = vrot.slane %v4890_v34, 4  ;;  %v4903_v32 = vrot.slane %v4901_v24, 4  ;;  %v9415_v36 = vsel %vm7965_vm13, %v5473_v14, %v5474_v5 }
 0x179   : > { %10327 = vst [vmem:[#allocation3_spill] sm:$0xff] %v9388_v43  ;;  %v9396_v50 = vpop.f32.mrf.mxu0  ;;  %v4879_v43 = vrot.slane %v4877_v52, 4  ;;  %v4851_v22 = vsel %vm7518_vm9, %v4846_v37, %v9364_v12  ;;  %v4906_v51 = vrot.slane %v4904_v20, 5  ;;  %v6474_v58 = vrot.slane %v5352_v41, 9  ;;  %v4623_v20 = vld [vmem:[#allocation2 + $0xa4] sm:$0x1] }
 0x17a   : > { %v9399_v3 = vpop.f32.mrf.mxu1  ;;  %v9417_v52 = vrot.slane %v4910_v49, 5  ;;  %v4916_v34 = vrot.slane %v4914_v21, 4  ;;  %v4865_v6 = vsel %vm7518_vm9, %v4860_v9, %v9337_v35  ;;  %v5480_v11 = vrot.slane %v5478_v62, 4  ;;  %v5353_v41 = vld [vmem:[#allocation2 + $0x9c] sm:$0xe] }
 0x17b   : > { %10328 = vst [vmem:[#allocation14_spill] sm:$0xff] %v9399_v3  ;;  %v9403_v19 = vpop.f32.mrf.mxu0  ;;  %v5481_v12 = vrot.slane %v4620_v60, 5  ;;  %v4896_v37 = vshll.u32 %v4620_v60, 16  ;;  %v10331_v5 = vcombine.low %v9178_v16, %v9188_v31  ;;  %v4875_v14 = vsel %vm7518_vm9, %v4870_v10, %v4874_v27  ;;  %v9434_v35 = vld [vmem:[#allocation2 + $0xac] sm:$0xf] }
 0x17c   : > { %v9411_v26 = vpop.f32.mrf.mxu1  ;;  %v4883_v49 = vor.u32 %v4882_v53, %v4879_v43  ;;  %v4893_v21 = vor.u32 %v4892_v23, %v9401_v59  ;;  %v5485_v9 = vrot.slane %v9370_v13, 5  ;;  %v10333_v16 = vsel %vm7518_vm9, %v9324_v48, %v9312_v4  ;;  %v9464_v27 = vld [vmem:[#allocation2 + $0xb0] sm:$0x1] }
 0x17d   : > { %10329 = vst [vmem:[#allocation33_spill] sm:$0xff] %v9411_v26  ;;  %v9419_v3 = vpop.f32.mrf.mxu0  ;;  %v10330_v26 = vld [vmem:[#allocation18_spill] sm:$0xff]  ;;  %v10334_v53 = vsel %vm7518_vm9, %v9310_v57, %v9272_v17  ;;  %v9454_v13 = vcombine.low %v4841_v44, %v4851_v22  ;;  %v5492_v43 = vrot.slane %v9434_v35, 5  ;;  %v4917_v4 = vor.u32 %v4916_v34, %v9417_v52  ;;  %v5354_v17 = vld [vmem:[#allocation2 + $0xa8] sm:$0xe] }
 0x17e   : > { %v9424_v24 = vpop.f32.mrf.mxu1  ;;  %7181 = vmatmul.mubr.bf16.gmra.mxu0 %v10331_v5  ;;  %v9452_v31 = vcombine.low %v10334_v53, %v10333_v16  ;;  %v4920_v48 = vshll.u32 %v4623_v20, 16  ;;  %v9468_v44 = vcombine.low %v4865_v6, %v4875_v14  ;;  %v9472_v23 = vsel %vm7965_vm13, %v5480_v11, %v5481_v12 }
 0x17f   : > { %7125 = vmatmul.mubr.bf16.vlgmr.msra.gmra.mxu1 %v10330_v26  ;;  %v9437_v60 = vpop.f32.mrf.mxu0  ;;  %v10332_v26 = vcombine.low %v9260_v33, %v9264_v7  ;;  %10335 = vst [vmem:[#allocation18_spill] sm:$0xff] %v9454_v13  ;;  %v9461_v7 = vsel %vm7965_vm13, %v6474_v58, %v5478_v62  ;;  %v4898_v22 = vrot.slane %v4896_v37, 5  ;;  %v4884_v62 = vrot.slane %v4883_v49, 4  ;;  %v10346_v49 = vld [vmem:[#allocation13_spill] sm:$0xff] }
 0x180   : > { %7128 = vmatprep.mubr.bf16.mxu1 %v9204_v18  ;;  %v4907_v18 = vor.u32 %v4906_v51, %v4903_v32  ;;  %v1951_v10 = vpop.f32.mrf.mxu1  ;;  %10336 = vst [vmem:[#allocation34_spill] sm:$0xff] %v9468_v44  ;;  %v6475_v32 = vrot.slane %v5353_v41, 9  ;;  %v4624_v51 = vld [vmem:[#allocation2 + $0xa8] sm:$0xf]  ;;  %v4894_v58 = vrot.slane %v4893_v21, 4  ;;  %v5488_v34 = vrot.slane %v4623_v20, 5 }
 0x181   : > { %7184 = vmatprep.mubr.bf16.mxu0 %v10332_v26  ;;  %v9466_v57 = vpop.f32.mrf.mxu0  ;;  %v5487_v26 = vrot.slane %v5485_v9, 4  ;;  %v6476_v33 = vrot.slane %v5354_v17, 9  ;;  %v5494_v2 = vrot.slane %v5492_v43, 4  ;;  %v5495_v6 = vrot.slane %v9464_v27, 5 }
 0x182   : > { %v6839_v5 = vpop.f32.mrf.mxu1  ;;  %v4908_v53 = vrot.slane %v4907_v18, 4  ;;  %v4918_v44 = vrot.slane %v4917_v4, 4  ;;  %v4922_v13 = vrot.slane %v4920_v48, 5  ;;  %v4925_v11 = vshrl.u32 %v4624_v51, 16  ;;  %v498_v18 = vld [vmem:[#allocation2 + $0xd4] sm:$0xf] }
 0x183   : > { %v9474_v16 = vpop.f32.mrf.mxu0  ;;  %v4928_v12 = vshll.u32 %v4624_v51, 16  ;;  %v9483_v20 = vsel %vm7965_vm13, %v6475_v32, %v5485_v9  ;;  %v4934_v21 = vshll.u32 %v9434_v35, 16  ;;  %v4938_v41 = vshrl.u32 %v9434_v35, 16 }
 0x184   : > { %v1954_v14 = vpop.f32.mrf.mxu1  ;;  %v10337_v4 = vcombine.low %v9278_v47, %v9308_v45  ;;  %v4889_v48 = vsel %vm7518_vm9, %v4884_v62, %v9401_v59  ;;  %v4899_v9 = vsel %vm7518_vm9, %v4894_v58, %v4898_v22  ;;  %v9498_v32 = vsel %vm7965_vm13, %v5487_v26, %v5488_v34  ;;  %v5355_v62 = vld [vmem:[#allocation2 + $0xb4] sm:$0xe]  ;;  %v10340_v26 = vld [vmem:[#allocation5_spill] sm:$0xff] }
 0x185   : > { %v9477_v37 = vpop.f32.mrf.mxu0  ;;  %v4913_v47 = vsel %vm7518_vm9, %v4908_v53, %v9417_v52  ;;  %v9511_v45 = vsel %vm7965_vm13, %v6476_v33, %v5492_v43  ;;  %v9515_v59 = vsel %vm7965_vm13, %v5494_v2, %v5495_v6  ;;  %v4923_v51 = vsel %vm7518_vm9, %v4918_v44, %v4922_v13  ;;  %v10341_v13 = vld [vmem:[#allocation6_spill] sm:$0xff]  ;;  %v10342_v53 = vld [vmem:[#allocation7_spill] sm:$0xff] }
 0x186   : > { %v6842_v17 = vpop.f32.mrf.mxu1  ;;  %7185 = vmatmul.mubr.bf16.gmra.mxu0 %v10337_v4  ;;  %v499_v52 = vsel %vm7464_vm5, 0, %v498_v18  ;;  %v1960_v43 = vadd.f32 %v9424_v24, %v10340_v26  ;;  %v9528_v34 = vrot.slane %v4934_v21, 5  ;;  %v1952_v44 = vadd.f32 %v1951_v10, %v10341_v13  ;;  %v9538_v18 = vld [vmem:[#allocation2 + $0xbc] sm:$0x1]  ;;  %v10343_v4 = vld [vmem:[#allocation9_spill] sm:$0xff]  ;;  %v10344_v26 = vld [vmem:[#allocation8_spill] sm:$0xff] }
 0x187   : > { %7129 = vmatmul.mubr.bf16.gmra.mxu1 %v9209_v28  ;;  %v9501_v35 = vpop.f32.mrf.mxu0  ;;  %v10338_v28 = vcombine.low %v9328_v63, %v9332_v15  ;;  %v4927_v63 = vrot.slane %v4925_v11, 4  ;;  %v4930_v15 = vrot.slane %v4928_v12, 5  ;;  %500 = vst [vmem:[#allocation2 + $0xd4] sm:$0xf] %v499_v52  ;;  %v1963_v6 = vadd.f32 %v6839_v5, %v10342_v53  ;;  %v9547_v52 = vld [vmem:[#allocation2 + $0xb8] sm:$0xf] }
 0x188   : > { %7132 = vmatprep.mubr.bf16.mxu1 %v9236_v30  ;;  %v4944_v30 = vshll.u32 %v9464_v27, 16  ;;  %v1967_v22 = vpop.f32.mrf.mxu1  ;;  %v9530_v27 = vrot.slane %v4938_v41, 4  ;;  %v9534_v12 = vcombine.low %v4889_v48, %v4899_v9  ;;  %v9543_v21 = vcombine.low %v4913_v47, %v4923_v51  ;;  %v4627_v5 = vld [vmem:[#allocation2 + $0xb4] sm:$0xf]  ;;  %v10345_v9 = vld [vmem:[#allocation11_spill] sm:$0xff] }
 0x189   : > { %7188 = vmatprep.mubr.bf16.mxu0 %v10338_v28  ;;  %v9524_v33 = vpop.f32.mrf.mxu0  ;;  %v1955_v28 = vadd.f32 %v1954_v14, %v10343_v4  ;;  %v6477_v10 = vrot.slane %v5355_v62, 9  ;;  %v1976_v48 = vadd.f32 %v6842_v17, %v10344_v26  ;;  %v1968_v13 = vadd.f32 %v1967_v22, %v10345_v9  ;;  %v10347_v62 = vld [vmem:[#allocation16_spill] sm:$0xff] }
 0x18a   : > { %v6843_v11 = vpop.f32.mrf.mxu1  ;;  %v9545_v41 = vrot.slane %v4944_v30, 5  ;;  %v4931_v24 = vor.u32 %v4930_v15, %v4927_v63  ;;  %v5499_v2 = vrot.slane %v9547_v52, 5  ;;  %v4941_v47 = vor.u32 %v9530_v27, %v9528_v34  ;;  %v9566_v63 = vld [vmem:[#allocation2 + $0xc4] sm:$0xf] }
 0x18b   : > { %v9541_v58 = vpop.f32.mrf.mxu0  ;;  %v1979_v14 = vadd.f32 %v6843_v11, %v10346_v49  ;;  %v5502_v30 = vrot.slane %v9538_v18, 5  ;;  %v9559_v51 = vadd.f32 %v9292_v39, %v1960_v43  ;;  %v10348_v22 = vcombine.low %v9392_v40, %v9415_v36  ;;  %v10349_v39 = vld [vmem:[#allocation19_spill] sm:$0xff]  ;;  %v5356_v36 = vld [vmem:[#allocation2 + $0xc0] sm:$0xe] }
 0x18c   : > { %v1970_v53 = vpop.f32.mrf.mxu1  ;;  %v4949_v49 = vshrl.u32 %v4627_v5, 16  ;;  %v9569_v15 = vadd.f32 %v9317_v1, %v1952_v44  ;;  %v9572_v27 = vadd.f32 %v9335_v61, %v1963_v6  ;;  %v4952_v40 = vshll.u32 %v4627_v5, 16 }
 0x18d   : > { %v9553_v4 = vpop.f32.mrf.mxu0  ;;  %v1971_v17 = vadd.f32 %v1970_v53, %v10347_v62  ;;  %v5506_v9 = vrot.slane %v9566_v63, 5  ;;  %v9583_v1 = vadd.f32 %v9349_v0, %v1955_v28  ;;  %v4958_v61 = vshll.u32 %v9547_v52, 16  ;;  %v9587_v53 = vld [vmem:[#allocation2 + $0xc8] sm:$0x1] }
 0x18e   : > { %v6846_v26 = vpop.f32.mrf.mxu1  ;;  %7189 = vmatmul.mubr.bf16.gmra.mxu0 %v10348_v22  ;;  %v4962_v6 = vshrl.u32 %v9547_v52, 16  ;;  %v9602_v0 = vsel %vm7965_vm13, %v6477_v10, %v5499_v2  ;;  %v5501_v28 = vrot.slane %v5499_v2, 4  ;;  %v4630_v52 = vld [vmem:[#allocation2 + $0xc0] sm:$0xf]  ;;  %v5509_v2 = vrot.slane %v9587_v53, 5 }
 0x18f   : > { %7133 = vmatmul.mubr.bf16.gmra.mxu1 %v9341_v25  ;;  %v1992_v43 = vadd.f32 %v6846_v26, %v10349_v39  ;;  %v9576_v11 = vpop.f32.mrf.mxu0  ;;  %v10350_v25 = vcombine.low %v9461_v7, %v9472_v23  ;;  %v9593_v7 = vadd.f32 %v9383_v38, %v1968_v13  ;;  %v10351_v23 = vld [vmem:[#allocation21_spill] sm:$0xff]  ;;  %v9598_v26 = vrot.slane %v4931_v24, 4 }
 0x190   : > { %7136 = vmatprep.mubr.bf16.mxu1 %v9345_v46  ;;  %v1983_v44 = vpop.f32.mrf.mxu1  ;;  %v9590_v46 = vadd.f32 %v9367_v29, %v1976_v48  ;;  %v6478_v39 = vrot.slane %v5356_v36, 9  ;;  %v9605_v29 = vadd.f32 %v9396_v50, %v1979_v14  ;;  %v9608_v38 = vadd.f32 %v9403_v19, %v1971_v17 }
 0x191   : > { %7192 = vmatprep.mubr.bf16.mxu0 %v10350_v25  ;;  %v1984_v5 = vadd.f32 %v1983_v44, %v10351_v23  ;;  %v9596_v62 = vpop.f32.mrf.mxu0  ;;  %v9611_v48 = vadd.f32 %v9419_v3, %v1992_v43  ;;  %v9616_v25 = vrot.slane %v4949_v49, 4  ;;  %v5508_v10 = vrot.slane %v5506_v9, 4 }
 0x192   : > { %v6847_v22 = vpop.f32.mrf.mxu1  ;;  %v9619_v36 = vrot.slane %v4941_v47, 4  ;;  %v4973_v50 = vshrl.u32 %v4630_v52, 16  ;;  %v4976_v14 = vshll.u32 %v4630_v52, 16  ;;  %v9629_v43 = vrot.slane %v4958_v61, 5  ;;  %v10353_v52 = vld [vmem:[#allocation18_spill] sm:$0xff] }
 0x193   : > { %v1995_v24 = vadd.f32 %v6847_v22, %v9174_v55  ;;  %v9614_v13 = vpop.f32.mrf.mxu0  ;;  %v9622_v19 = vadd.f32 %v9437_v60, %v1984_v5  ;;  %v9627_v55 = vrot.slane %v4952_v40, 5  ;;  %v10352_v47 = vcombine.low %v9483_v20, %v9498_v32  ;;  %v9644_v5 = vld [vmem:[#allocation2 + $0xd0] sm:$0xf] }
 0x194   : > { %v1986_v44 = vpop.f32.mrf.mxu1  ;;  %v5503_v60 = vsel %vm7965_vm13, %v5501_v28, %v5502_v30  ;;  %v4982_v40 = vshll.u32 %v9566_v63, 16  ;;  %v4986_v61 = vshrl.u32 %v9566_v63, 16  ;;  %v10354_v20 = vcombine.low %v9511_v45, %v9515_v59  ;;  %v5357_v30 = vld [vmem:[#allocation2 + $0xcc] sm:$0xe]  ;;  %v9663_v45 = vld [vmem:[#allocation2 + $0xd4] sm:$0x1] }
 0x195   : > { %v1987_v3 = vadd.f32 %v1986_v44, %v9215_v56  ;;  %v9625_v17 = vpop.f32.mrf.mxu0  ;;  %v9632_v49 = vadd.f32 %v9466_v57, %v1995_v24  ;;  %v5507_v56 = vsel %vm7965_vm13, %v6478_v39, %v5506_v9  ;;  %v5510_v32 = vsel %vm7965_vm13, %v5508_v10, %v5509_v2  ;;  %v10355_v59 = vld [vmem:[#allocation26_spill] sm:$0xff] }
 0x196   : > { %v6850_v23 = vpop.f32.mrf.mxu1  ;;  %7193 = vmatmul.mubr.bf16.gmra.mxu0 %v10352_v47  ;;  %v5513_v9 = vrot.slane %v9644_v5, 5  ;;  %v4964_v22 = vrot.slane %v4962_v6, 4  ;;  %v4975_v39 = vrot.slane %v4973_v50, 4  ;;  %v4978_v24 = vrot.slane %v4976_v14, 5  ;;  %v10356_v50 = vld [vmem:[#allocation27_spill] sm:$0xff] }
 0x197   : > { %7137 = vmatmul.mubr.bf16.gmra.mxu1 %v9452_v31  ;;  %v2008_v57 = vadd.f32 %v6850_v23, %v9234_v42  ;;  %v9648_v31 = vpop.f32.mrf.mxu0  ;;  %7196 = vmatprep.mubr.bf16.mxu0 %v10354_v20  ;;  %v9657_v63 = vadd.f32 %v9474_v16, %v1987_v3  ;;  %v4937_v42 = vsel %vm7518_vm9, %v9598_v26, %v9528_v34  ;;  %v4968_v16 = vshll.u32 %v9538_v18, 16  ;;  %v4633_v26 = vld [vmem:[#allocation2 + $0xcc] sm:$0xf] }
 0x198   : > { %7140 = vmatprep.mubr.bf16.mxu1 %v10353_v52  ;;  %v1999_v28 = vpop.f32.mrf.mxu1  ;;  %v6509_v2 = vcombine.low %v9602_v0, %v5503_v60  ;;  %v6510_v47 = vcombine.low %v5507_v56, %v5510_v32  ;;  %v9673_v52 = vrot.slane %v4982_v40, 5  ;;  %v4988_v34 = vrot.slane %v4986_v61, 4  ;;  %v10357_v61 = vld [vmem:[#allocation29_spill] sm:$0xff] }
 0x199   : > { %v2000_v44 = vadd.f32 %v1999_v28, %v10355_v59  ;;  %v9666_v10 = vpop.f32.mrf.mxu0  ;;  %v9671_v3 = vadd.f32 %v9477_v37, %v2008_v57  ;;  %v6479_v6 = vrot.slane %v5357_v30, 9  ;;  %v5515_v28 = vrot.slane %v5513_v9, 4 }
 0x19a   : > { %v6851_v23 = vpop.f32.mrf.mxu1  ;;  %v5516_v59 = vrot.slane %v9663_v45, 5  ;;  %v4947_v37 = vsel %vm7518_vm9, %v9619_v36, %v9545_v41  ;;  %v4955_v60 = vor.u32 %v9627_v55, %v9616_v25  ;;  %v4965_v56 = vor.u32 %v4964_v22, %v9629_v43  ;;  %v10359_v22 = vld [vmem:[#allocation10_spill] sm:$0xff] }
 0x19b   : > { %v2011_v14 = vadd.f32 %v6851_v23, %v10356_v50  ;;  %v9676_v20 = vpop.f32.mrf.mxu0  ;;  %v9680_v0 = vadd.f32 %v9501_v35, %v2000_v44  ;;  %v4979_v40 = vor.u32 %v4978_v24, %v4975_v39  ;;  %v4992_v30 = vshll.u32 %v9587_v53, 16  ;;  %v10358_v50 = vld [vmem:[#allocation34_spill] sm:$0xff] }
 0x19c   : > { %v2002_v18 = vpop.f32.mrf.mxu1  ;;  %v4997_v35 = vshrl.u32 %v4633_v26, 16  ;;  %v4989_v41 = vor.u32 %v4988_v34, %v9673_v52  ;;  %v5514_v25 = vsel %vm7965_vm13, %v6479_v6, %v5513_v9  ;;  %v5000_v36 = vshll.u32 %v4633_v26, 16 }
 0x19d   : > { %v2003_v57 = vadd.f32 %v2002_v18, %v10357_v61  ;;  %v9690_v32 = vpop.f32.mrf.mxu0  ;;  %v9694_v44 = vadd.f32 %v9524_v33, %v2011_v14  ;;  %v5006_v55 = vshll.u32 %v9644_v5, 16  ;;  %v5517_v33 = vsel %vm7965_vm13, %v5515_v28, %v5516_v59  ;;  %v10360_v18 = vld [vmem:[#allocation12_spill] sm:$0xff] }
 0x19e   : > { %v6854_v23 = vpop.f32.mrf.mxu1  ;;  %7197 = vmatmul.mubr.bf16.gmra.mxu0 %v6509_v2  ;;  %v5010_v24 = vshrl.u32 %v9644_v5, 16  ;;  %v6452_v9 = vcombine.low %v4937_v42, %v4947_v37  ;;  %v4956_v6 = vrot.slane %v4955_v60, 4  ;;  %v4966_v26 = vrot.slane %v4965_v56, 4 }
 0x19f   : > { %7141 = vmatmul.mubr.bf16.gmra.mxu1 %v10358_v50  ;;  %v2024_v39 = vadd.f32 %v6854_v23, %v10359_v22  ;;  %v9703_v53 = vpop.f32.mrf.mxu0  ;;  %7200 = vmatprep.mubr.bf16.mxu0 %v6510_v47  ;;  %v9709_v2 = vadd.f32 %v9541_v58, %v2003_v57  ;;  %v4970_v14 = vrot.slane %v4968_v16, 5  ;;  %v4994_v50 = vrot.slane %v4992_v30, 5  ;;  %v10361_v57 = vld [vmem:[#allocation15_spill] sm:$0xff] }
 0x1a0   : > { %7144 = vmatprep.mubr.bf16.mxu1 %v9534_v12  ;;  %v2015_v34 = vpop.f32.mrf.mxu1  ;;  %v4980_v12 = vrot.slane %v4979_v40, 4  ;;  %v4990_v28 = vrot.slane %v4989_v41, 4  ;;  %v6511_v5 = vcombine.low %v5514_v25, %v5517_v33  ;;  %v4999_v59 = vrot.slane %v4997_v35, 4  ;;  %v10362_v40 = vld [vmem:[#allocation17_spill] sm:$0xff] }
 0x1a1   : > { %v2016_v61 = vadd.f32 %v2015_v34, %v10360_v18  ;;  %v9712_v23 = vpop.f32.mrf.mxu0  ;;  %v9715_v47 = vadd.f32 %v9553_v4, %v2024_v39  ;;  %v5002_v58 = vrot.slane %v5000_v36, 5  ;;  %v5008_v37 = vrot.slane %v5006_v55, 5 }
 0x1a2   : > { %v6855_v8 = vpop.f32.mrf.mxu1  ;;  %v5012_v16 = vrot.slane %v5010_v24, 4  ;;  %v4961_v4 = vsel %vm7518_vm9, %v4956_v6, %v9629_v43  ;;  %v4971_v35 = vsel %vm7518_vm9, %v4966_v26, %v4970_v14  ;;  %v4995_v55 = vsel %vm7518_vm9, %v4990_v28, %v4994_v50  ;;  %v10363_v43 = vld [vmem:[#allocation20_spill] sm:$0xff]  ;;  %v10364_v26 = vld [vmem:[#allocation22_spill] sm:$0xff]  ;;  %v10365_v28 = vld [vmem:[#allocation23_spill] sm:$0xff] }
 0x1a3   : > { %v2027_v22 = vadd.f32 %v6855_v8, %v10361_v57  ;;  %v9718_v42 = vpop.f32.mrf.mxu0  ;;  %v9721_v60 = vadd.f32 %v9576_v11, %v2016_v61  ;;  %v4985_v11 = vsel %vm7518_vm9, %v4980_v12, %v9673_v52  ;;  %v5003_v39 = vor.u32 %v5002_v58, %v4999_v59  ;;  %v10366_v57 = vld [vmem:[#allocation24_spill] sm:$0xff] }
 0x1a4   : > { %v2018_v56 = vpop.f32.mrf.mxu1  ;;  %v5013_v24 = vor.u32 %v5012_v16, %v5008_v37  ;;  %v5016_v34 = vshll.u32 %v9663_v45, 16  ;;  %v6453_v12 = vcombine.low %v4961_v4, %v4971_v35  ;;  %v6454_v50 = vcombine.low %v4985_v11, %v4995_v55  ;;  %v10368_v55 = vld [vmem:[#allocation28_spill] sm:$0xff] }
 0x1a5   : > { %v2019_v30 = vadd.f32 %v2018_v56, %v10362_v40  ;;  %v6914_v41 = vpop.f32.mrf.mxu0  ;;  %v9730_v25 = vadd.f32 %v9596_v62, %v2027_v22  ;;  %v5004_v8 = vrot.slane %v5003_v39, 4  ;;  %v10367_v40 = vld [vmem:[#allocation25_spill] sm:$0xff] }
 0x1a6   : > { %v6858_v36 = vpop.f32.mrf.mxu1  ;;  %7201 = vmatmul.mubr.bf16.gmra.mxu0 %v6511_v5  ;;  %v5014_v5 = vrot.slane %v5013_v24, 4  ;;  %v5018_v59 = vrot.slane %v5016_v34, 5  ;;  %v10369_v34 = vld [vmem:[#allocation30_spill] sm:$0xff] }
 0x1a7   : > { %7145 = vmatmul.mubr.bf16.gmra.mxu1 %v9543_v21  ;;  %v2040_v33 = vadd.f32 %v6858_v36, %v10363_v43  ;;  %v2516_v62 = vpop.f32.mrf.mxu0  ;;  %v9741_v6 = vadd.f32 %v9614_v13, %v2019_v30  ;;  %v5009_v4 = vsel %vm7518_vm9, %v5004_v8, %v5008_v37  ;;  %v10371_v8 = vld [vmem:[#allocation32_spill] sm:$0xff] }
 0x1a8   : > { %7148 = vmatprep.mubr.bf16.mxu1 %v6452_v9  ;;  %v2031_v21 = vpop.f32.mrf.mxu1  ;;  %v5019_v35 = vsel %vm7518_vm9, %v5014_v5, %v5018_v59  ;;  %v10372_v59 = vld [vmem:[#allocation3_spill] sm:$0xff] }
 0x1a9   : > { %v2032_v14 = vadd.f32 %v2031_v21, %v10364_v26  ;;  %v6915_v18 = vpop.f32.mrf.mxu0  ;;  %v9745_v52 = vadd.f32 %v9625_v17, %v2040_v33  ;;  %v6455_v24 = vcombine.low %v5009_v4, %v5019_v35  ;;  %v10374_v35 = vld [vmem:[#allocation33_spill] sm:$0xff] }
 0x1aa   : > { %v6859_v61 = vpop.f32.mrf.mxu1 }
 0x1ab   : > { %v2043_v9 = vadd.f32 %v6859_v61, %v10365_v28  ;;  %v2519_v45 = vpop.f32.mrf.mxu0  ;;  %v9749_v58 = vadd.f32 %v9648_v31, %v2032_v14  ;;  %v10370_v14 = vld [vmem:[#allocation31_spill] sm:$0xff] }
 0x1ac   : > { %v2034_v13 = vpop.f32.mrf.mxu1 }
 0x1ad   : > { %v2035_v22 = vadd.f32 %v2034_v13, %v10366_v57  ;;  %v6982_v16 = vpop.f32.mrf.mxu0  ;;  %v9753_v56 = vadd.f32 %v9666_v10, %v2043_v9 }
 0x1af   : > { %v6862_v17 = vpop.f32.mrf.mxu1  ;;  %7149 = vmatmul.mubr.bf16.gmra.mxu1 %v6453_v12  ;;  %v3544_v31 = vpop.f32.mrf.mxu0  ;;  %v9761_v36 = vadd.f32 %v9676_v20, %v2035_v22 }
 0x1b0   : > { %v2056_v30 = vadd.f32 %v6862_v17, %v10367_v40  ;;  %7152 = vmatprep.mubr.bf16.mxu1 %v6454_v50  ;;  %v10373_v17 = vld [vmem:[#allocation14_spill] sm:$0xff] }
 0x1b1   : > { %v2047_v11 = vpop.f32.mrf.mxu1  ;;  %v6983_v10 = vpop.f32.mrf.mxu0 }
 0x1b2   : > { %v2048_v39 = vadd.f32 %v2047_v11, %v10368_v55  ;;  %v9765_v43 = vadd.f32 %v9690_v32, %v2056_v30 }
 0x1b3   : > { %v6863_v33 = vpop.f32.mrf.mxu1  ;;  %v3547_v26 = vpop.f32.mrf.mxu0 }
 0x1b4   : > { %v2059_v21 = vadd.f32 %v6863_v33, %v10369_v34  ;;  %v9769_v37 = vadd.f32 %v9703_v53, %v2048_v39 }
 0x1b5   : > { %v2050_v54 = vpop.f32.mrf.mxu1  ;;  %v6986_v20 = vpop.f32.mrf.mxu0 }
 0x1b6   : > { %v2051_v61 = vadd.f32 %v2050_v54, %v10370_v14  ;;  %v9773_v12 = vadd.f32 %v9712_v23, %v2059_v21 }
 0x1b7   : > { %v6866_v50 = vpop.f32.mrf.mxu1  ;;  %7153 = vmatmul.mubr.bf16.gmra.mxu1 %v6455_v24  ;;  %v3560_v28 = vpop.f32.mrf.mxu0 }
 0x1b8   : > { %v2072_v32 = vadd.f32 %v6866_v50, %v10371_v8  ;;  %v9777_v9 = vadd.f32 %v9718_v42, %v2051_v61 }
 0x1b9   : > { %v2063_v5 = vpop.f32.mrf.mxu1  ;;  %v6987_v53 = vpop.f32.mrf.mxu0 }
 0x1ba   : > { %v2064_v13 = vadd.f32 %v2063_v5, %v10372_v59  ;;  %v9780_v57 = vadd.f32 %v6914_v41, %v2072_v32 }
 0x1bb   : > { %v6867_v22 = vpop.f32.mrf.mxu1  ;;  %v3563_v30 = vpop.f32.mrf.mxu0 }
 0x1bc   : > { %v2075_v40 = vadd.f32 %v6867_v22, %v10373_v17  ;;  %v9783_v23 = vadd.f32 %v2516_v62, %v2064_v13 }
 0x1bd   : > { %v2066_v4 = vpop.f32.mrf.mxu1  ;;  %v6990_v55 = vpop.f32.mrf.mxu0 }
 0x1be   : > { %v2067_v11 = vadd.f32 %v2066_v4, %v10374_v35  ;;  %v9786_v39 = vadd.f32 %v6915_v18, %v2075_v40 }
 0x1bf   : > { %v6934_v42 = vpop.f32.mrf.mxu1  ;;  %v3576_v24 = vpop.f32.mrf.mxu0 }
 0x1c0   : > { %v2919_v33 = vadd.f32 %v6934_v42, %v9559_v51  ;;  %v9789_v34 = vadd.f32 %v2519_v45, %v2067_v11 }
 0x1c1   : > { %v2790_v41 = vpop.f32.mrf.mxu1  ;;  %v6991_v54 = vpop.f32.mrf.mxu0 }
 0x1c2   : > { %v2917_v21 = vadd.f32 %v2790_v41, %v9569_v15  ;;  %v9792_v14 = vadd.f32 %v6982_v16, %v2919_v33 }
 0x1c3   : > { %v6935_v62 = vpop.f32.mrf.mxu1  ;;  %v3579_v50 = vpop.f32.mrf.mxu0 }
 0x1c4   : > { %v2920_v61 = vadd.f32 %v6935_v62, %v9572_v27  ;;  %v9795_v8 = vadd.f32 %v3544_v31, %v2917_v21 }
 0x1c5   : > { %v2793_v18 = vpop.f32.mrf.mxu1  ;;  %v6994_v5 = vpop.f32.mrf.mxu0 }
 0x1c6   : > { %v2918_v32 = vadd.f32 %v2793_v18, %v9583_v1  ;;  %v9798_v51 = vadd.f32 %v6983_v10, %v2920_v61 }
 0x1c7   : > { %v6938_v45 = vpop.f32.mrf.mxu1  ;;  %v3592_v13 = vpop.f32.mrf.mxu0 }
 0x1c8   : > { %v2923_v59 = vadd.f32 %v6938_v45, %v9590_v46  ;;  %v9801_v15 = vadd.f32 %v3547_v26, %v2918_v32 }
 0x1c9   : > { %v2806_v16 = vpop.f32.mrf.mxu1  ;;  %v6995_v17 = vpop.f32.mrf.mxu0 }
 0x1ca   : > { %v2921_v22 = vadd.f32 %v2806_v16, %v9593_v7  ;;  %v9804_v27 = vadd.f32 %v6986_v20, %v2923_v59 }
 0x1cb   : > { %v6939_v31 = vpop.f32.mrf.mxu1  ;;  %v3595_v4 = vpop.f32.mrf.mxu0 }
 0x1cc   : > { %v2924_v40 = vadd.f32 %v6939_v31, %v9605_v29  ;;  %v9807_v1 = vadd.f32 %v3560_v28, %v2921_v22 }
 0x1cd   : > { %v2809_v10 = vpop.f32.mrf.mxu1  ;;  %v6998_v11 = vpop.f32.mrf.mxu0 }
 0x1ce   : > { %v2922_v35 = vadd.f32 %v2809_v10, %v9608_v38  ;;  %v9810_v46 = vadd.f32 %v6987_v53, %v2924_v40 }
 0x1cf   : > { %v6942_v26 = vpop.f32.mrf.mxu1  ;;  %v3608_v33 = vpop.f32.mrf.mxu0 }
 0x1d0   : > { %v2927_v42 = vadd.f32 %v6942_v26, %v9611_v48  ;;  %v9813_v7 = vadd.f32 %v3563_v30, %v2922_v35 }
 0x1d1   : > { %v2822_v20 = vpop.f32.mrf.mxu1  ;;  %v6999_v21 = vpop.f32.mrf.mxu0 }
 0x1d2   : > { %v2925_v41 = vadd.f32 %v2822_v20, %v9622_v19  ;;  %v9816_v29 = vadd.f32 %v6990_v55, %v2927_v42 }
 0x1d3   : > { %v6943_v28 = vpop.f32.mrf.mxu1  ;;  %v3611_v61 = vpop.f32.mrf.mxu0 }
 0x1d4   : > { %v2928_v62 = vadd.f32 %v6943_v28, %v9632_v49  ;;  %v9819_v38 = vadd.f32 %v3576_v24, %v2925_v41 }
 0x1d5   : > { %v2825_v53 = vpop.f32.mrf.mxu1  ;;  %v7002_v32 = vpop.f32.mrf.mxu0 }
 0x1d6   : > { %v2926_v18 = vadd.f32 %v2825_v53, %v9657_v63  ;;  %v9822_v48 = vadd.f32 %v6991_v54, %v2928_v62 }
 0x1d7   : > { %v6946_v30 = vpop.f32.mrf.mxu1  ;;  %v3624_v59 = vpop.f32.mrf.mxu0 }
 0x1d8   : > { %v2931_v45 = vadd.f32 %v6946_v30, %v9671_v3  ;;  %v9825_v19 = vadd.f32 %v3579_v50, %v2926_v18 }
 0x1d9   : > { %v2838_v55 = vpop.f32.mrf.mxu1  ;;  %v7003_v22 = vpop.f32.mrf.mxu0 }
 0x1da   : > { %v2929_v16 = vadd.f32 %v2838_v55, %v9680_v0  ;;  %v9828_v49 = vadd.f32 %v6994_v5, %v2931_v45 }
 0x1db   : > { %v6947_v24 = vpop.f32.mrf.mxu1  ;;  %v3627_v40 = vpop.f32.mrf.mxu0 }
 0x1dc   : > { %v2932_v31 = vadd.f32 %v6947_v24, %v9694_v44  ;;  %v9831_v63 = vadd.f32 %v3592_v13, %v2929_v16 }
 0x1dd   : > { %v2841_v54 = vpop.f32.mrf.mxu1  ;;  %v7006_v35 = vpop.f32.mrf.mxu0 }
 0x1de   : > { %v2930_v10 = vadd.f32 %v2841_v54, %v9709_v2  ;;  %v9834_v3 = vadd.f32 %v6995_v17, %v2932_v31 }
 0x1df   : > { %v6950_v50 = vpop.f32.mrf.mxu1  ;;  %v3640_v42 = vpop.f32.mrf.mxu0 }
 0x1e0   : > { %v2935_v26 = vadd.f32 %v6950_v50, %v9715_v47  ;;  %v9837_v0 = vadd.f32 %v3595_v4, %v2930_v10 }
 0x1e1   : > { %v2854_v5 = vpop.f32.mrf.mxu1  ;;  %v7007_v41 = vpop.f32.mrf.mxu0 }
 0x1e2   : > { %v2933_v20 = vadd.f32 %v2854_v5, %v9721_v60  ;;  %v9840_v44 = vadd.f32 %v6998_v11, %v2935_v26 }
 0x1e3   : > { %v6951_v13 = vpop.f32.mrf.mxu1  ;;  %v3643_v62 = vpop.f32.mrf.mxu0 }
 0x1e4   : > { %v2936_v28 = vadd.f32 %v6951_v13, %v9730_v25  ;;  %v9843_v2 = vadd.f32 %v3608_v33, %v2933_v20 }
 0x1e5   : > { %v2857_v17 = vpop.f32.mrf.mxu1 }
 0x1e6   : > { %10375 = vst [vmem:[#allocation4_spill] sm:$0xff] %v9843_v2  ;;  %v2934_v53 = vadd.f32 %v2857_v17, %v9741_v6  ;;  %v9846_v18 = vadd.f32 %v6999_v21, %v2936_v28  ;;  %v7010_v4 = vpop.f32.mrf.mxu0 }
 0x1e7   : > { %v6954_v47 = vpop.f32.mrf.mxu1 }
 0x1e8   : > { %10376 = vst [vmem:[#allocation5_spill] sm:$0xff] %v9846_v18  ;;  %v2939_v30 = vadd.f32 %v6954_v47, %v9745_v52  ;;  %v9849_v45 = vadd.f32 %v3611_v61, %v2934_v53  ;;  %v3656_v11 = vpop.f32.mrf.mxu0 }
 0x1e9   : > { %v2870_v60 = vpop.f32.mrf.mxu1 }
 0x1ea   : > { %10377 = vst [vmem:[#allocation6_spill] sm:$0xff] %v9849_v45  ;;  %v2937_v55 = vadd.f32 %v2870_v60, %v9749_v58  ;;  %v9852_v16 = vadd.f32 %v7002_v32, %v2939_v30  ;;  %v7011_v33 = vpop.f32.mrf.mxu0 }
 0x1eb   : > { %v6955_v25 = vpop.f32.mrf.mxu1 }
 0x1ec   : > { %10378 = vst [vmem:[#allocation7_spill] sm:$0xff] %v9852_v16  ;;  %v2940_v24 = vadd.f32 %v6955_v25, %v9753_v56  ;;  %v9855_v31 = vadd.f32 %v3624_v59, %v2937_v55  ;;  %v3659_v21 = vpop.f32.mrf.mxu0 }
 0x1ed   : > { %v2873_v6 = vpop.f32.mrf.mxu1 }
 0x1ee   : > { %10379 = vst [vmem:[#allocation9_spill] sm:$0xff] %v9855_v31  ;;  %v2938_v54 = vadd.f32 %v2873_v6, %v9761_v36  ;;  %v9858_v10 = vadd.f32 %v7003_v22, %v2940_v24  ;;  %v9860_v61 = vpop.f32.mrf.mxu0 }
 0x1ef   : > { %v6958_v52 = vpop.f32.mrf.mxu1 }
 0x1f0   : > { %10380 = vst [vmem:[#allocation8_spill] sm:$0xff] %v9858_v10  ;;  %v2943_v50 = vadd.f32 %v6958_v52, %v9765_v43  ;;  %v9863_v58 = vadd.f32 %v3627_v40, %v2938_v54  ;;  %v9865_v26 = vpop.f32.mrf.mxu0 }
 0x1f1   : > { %v2886_v32 = vpop.f32.mrf.mxu1 }
 0x1f2   : > { %10381 = vst [vmem:[#allocation11_spill] sm:$0xff] %v9863_v58  ;;  %v2941_v56 = vadd.f32 %v2886_v32, %v9769_v37  ;;  %v9868_v59 = vadd.f32 %v7006_v35, %v2943_v50  ;;  %v9870_v20 = vpop.f32.mrf.mxu0 }
 0x1f3   : > { %v6959_v5 = vpop.f32.mrf.mxu1 }
 0x1f4   : > { %10382 = vst [vmem:[#allocation13_spill] sm:$0xff] %v9868_v59  ;;  %v2944_v36 = vadd.f32 %v6959_v5, %v9773_v12  ;;  %v9873_v22 = vadd.f32 %v3640_v42, %v2941_v56  ;;  %v9875_v28 = vpop.f32.mrf.mxu0 }
 0x1f5   : > { %v2889_v13 = vpop.f32.mrf.mxu1 }
 0x1f6   : > { %10383 = vst [vmem:[#allocation16_spill] sm:$0xff] %v9873_v22  ;;  %v2942_v43 = vadd.f32 %v2889_v13, %v9777_v9  ;;  %v9878_v40 = vadd.f32 %v7007_v41, %v2944_v36  ;;  %v9880_v53 = vpop.f32.mrf.mxu0 }
 0x1f7   : > { %v6962_v17 = vpop.f32.mrf.mxu1 }
 0x1f8   : > { %10384 = vst [vmem:[#allocation19_spill] sm:$0xff] %v9878_v40  ;;  %v2947_v37 = vadd.f32 %v6962_v17, %v9780_v57  ;;  %v9883_v35 = vadd.f32 %v3643_v62, %v2942_v43  ;;  %v9885_v30 = vpop.f32.mrf.mxu0 }
 0x1f9   : > { %v2902_v47 = vpop.f32.mrf.mxu1 }
 0x1fa   : > { %10385 = vst [vmem:[#allocation21_spill] sm:$0xff] %v9883_v35  ;;  %v2945_v12 = vadd.f32 %v2902_v47, %v9783_v23  ;;  %v9888_v42 = vadd.f32 %v7010_v4, %v2947_v37  ;;  %v9890_v55 = vpop.f32.mrf.mxu0 }
 0x1fb   : > { %v6963_v60 = vpop.f32.mrf.mxu1 }
 0x1fc   : > { %10386 = vst [vmem:[#allocation18_spill] sm:$0xff] %v9888_v42  ;;  %v2948_v9 = vadd.f32 %v6963_v60, %v9786_v39  ;;  %v9893_v41 = vadd.f32 %v3656_v11, %v2945_v12  ;;  %v9895_v24 = vpop.f32.mrf.mxu0 }
 0x1fd   : > { %v2905_v25 = vpop.f32.mrf.mxu1 }
 0x1fe   : > { %10387 = vst [vmem:[#allocation26_spill] sm:$0xff] %v9893_v41  ;;  %v2946_v57 = vadd.f32 %v2905_v25, %v9789_v34  ;;  %v9898_v62 = vadd.f32 %v7011_v33, %v2948_v9  ;;  %v9900_v54 = vpop.f32.mrf.mxu0 }
 0x1ff   : > { %v7030_v6 = vpop.f32.mrf.mxu1 }
 0x200   : > { %10388 = vst [vmem:[#allocation27_spill] sm:$0xff] %v9898_v62  ;;  %v9902_v23 = vadd.f32 %v3659_v21, %v2946_v57  ;;  %v9904_v52 = vpop.f32.mrf.mxu0 }
 0x201   : > { %v4042_v4 = vpop.f32.mrf.mxu1 }
 0x202   : > { %10389 = vst [vmem:[#allocation29_spill] sm:$0xff] %v9902_v23  ;;  %v9906_v32 = vpop.f32.mrf.mxu0 }
 0x203   : > { %v7031_v50 = vpop.f32.mrf.mxu1 }
 0x204   : > { %v9910_v11 = vpop.f32.mrf.mxu0 }
 0x205   : > { %v9908_v39 = vpop.f32.mrf.mxu1 }
 0x206   : > { %v9914_v34 = vpop.f32.mrf.mxu0 }
 0x207   : > { %v9912_v56 = vpop.f32.mrf.mxu1 }
 0x208   : > { %v9918_v5 = vpop.f32.mrf.mxu0 }
 0x209   : > { %v9916_v33 = vpop.f32.mrf.mxu1 }
 0x20a   : > { %v9922_v36 = vpop.f32.mrf.mxu0 }
 0x20b   : > { %v9920_v21 = vpop.f32.mrf.mxu1  ;;  %10390 = vst [vmem:[#allocation34_spill] sm:$0xff] %v9922_v36 }
 0x20c   : > { %v9926_v43 = vpop.f32.mrf.mxu0 }
 0x20d   : > { %v9924_v13 = vpop.f32.mrf.mxu1  ;;  %10391 = vst [vmem:[#allocation10_spill] sm:$0xff] %v9926_v43 }
 0x20e   : > { %v9930_v37 = vpop.f32.mrf.mxu0 }
 0x20f   : > { %v9928_v17 = vpop.f32.mrf.mxu1  ;;  %10392 = vst [vmem:[#allocation12_spill] sm:$0xff] %v9930_v37 }
 0x210   : > { %v9934_v12 = vpop.f32.mrf.mxu0 }
 0x211   : > { %v9932_v47 = vpop.f32.mrf.mxu1  ;;  %10393 = vst [vmem:[#allocation15_spill] sm:$0xff] %v9934_v12 }
 0x212   : > { %v9938_v9 = vpop.f32.mrf.mxu0 }
 0x213   : > { %v9936_v60 = vpop.f32.mrf.mxu1  ;;  %10394 = vst [vmem:[#allocation17_spill] sm:$0xff] %v9938_v9 }
 0x214   : > { %v9942_v57 = vpop.f32.mrf.mxu0 }
 0x215   : > { %v9940_v25 = vpop.f32.mrf.mxu1  ;;  %10395 = vst [vmem:[#allocation20_spill] sm:$0xff] %v9942_v57 }
 0x216   : > { %v9946_v62 = vpop.f32.mrf.mxu0 }
 0x217   : > { %v9944_v23 = vpop.f32.mrf.mxu1  ;;  %10396 = vst [vmem:[#allocation22_spill] sm:$0xff] %v9946_v62 }
 0x218   : > { %v9950_v42 = vpop.f32.mrf.mxu0 }
 0x219   : > { %v9948_v41 = vpop.f32.mrf.mxu1  ;;  %10397 = vst [vmem:[#allocation23_spill] sm:$0xff] %v9950_v42 }
 0x21a   : > { %v9954_v40 = vpop.f32.mrf.mxu0 }
 0x21b   : > { %v9952_v35 = vpop.f32.mrf.mxu1  ;;  %10398 = vst [vmem:[#allocation24_spill] sm:$0xff] %v9954_v40 }
 0x21c   : > { %v9958_v59 = vpop.f32.mrf.mxu0 }
 0x21d   : > { %v9956_v22 = vpop.f32.mrf.mxu1  ;;  %10399 = vst [vmem:[#allocation25_spill] sm:$0xff] %v9958_v59 }
 0x21e   : > { %v9962_v10 = vpop.f32.mrf.mxu0 }
 0x21f   : > { %v9960_v58 = vpop.f32.mrf.mxu1  ;;  %10401 = vst [vmem:[#allocation30_spill] sm:$0xff] %v9962_v10 }
 0x220   : > { %10400 = vst [vmem:[#allocation28_spill] sm:$0xff] %v9960_v58  ;;  %v9966_v31 = vpop.f32.mrf.mxu0 }
 0x221   : > { %v9964_v57 = vpop.f32.mrf.mxu1  ;;  %10403 = vst [vmem:[#allocation32_spill] sm:$0xff] %v9966_v31 }
 0x222   : > { %10402 = vst [vmem:[#allocation31_spill] sm:$0xff] %v9964_v57  ;;  %v9970_v16 = vpop.f32.mrf.mxu0 }
 0x223   : > { %v9968_v62 = vpop.f32.mrf.mxu1  ;;  %10405 = vst [vmem:[#allocation14_spill] sm:$0xff] %v9970_v16 }
 0x224   : > { %10404 = vst [vmem:[#allocation3_spill] sm:$0xff] %v9968_v62  ;;  %v9974_v9 = vpop.f32.mrf.mxu0 }
 0x225   : > { %v9972_v42 = vpop.f32.mrf.mxu1  ;;  %10407 = vst [vmem:[#allocation35_spill] sm:$0xff] %v9974_v9 }
 0x226   : > { %10406 = vst [vmem:[#allocation33_spill] sm:$0xff] %v9972_v42  ;;  %v9978_v12 = vpop.f32.mrf.mxu0 }
 0x227   : > { %v9976_v40 = vpop.f32.mrf.mxu1  ;;  %10409 = vst [vmem:[#allocation37_spill] sm:$0xff] %v9978_v12 }
 0x228   : > { %10408 = vst [vmem:[#allocation36_spill] sm:$0xff] %v9976_v40  ;;  %v9982_v45 = vpop.f32.mrf.mxu0 }
 0x229   : > { %v9980_v59 = vpop.f32.mrf.mxu1  ;;  %10411 = vst [vmem:[#allocation39_spill] sm:$0xff] %v9982_v45 }
 0x22a   : > { %10410 = vst [vmem:[#allocation38_spill] sm:$0xff] %v9980_v59  ;;  %v9986_v37 = vpop.f32.mrf.mxu0 }
 0x22b   : > { %v9984_v10 = vpop.f32.mrf.mxu1  ;;  %10413 = vst [vmem:[#allocation41_spill] sm:$0xff] %v9986_v37 }
 0x22c   : > { %10412 = vst [vmem:[#allocation40_spill] sm:$0xff] %v9984_v10  ;;  %v9990_v43 = vpop.f32.mrf.mxu0 }
 0x22d   : > { %v9988_v31 = vpop.f32.mrf.mxu1  ;;  %10415 = vst [vmem:[#allocation43_spill] sm:$0xff] %v9990_v43  ;;  %v4171_v43 = vadd.f32 %v7030_v6, %v9792_v14  ;;  %v4170_v14 = vadd.f32 %v9908_v39, %v9801_v15  ;;  %v4173_v39 = vadd.f32 %v9916_v33, %v9807_v1  ;;  %v4174_v1 = vadd.f32 %v9924_v13, %v9813_v7 }
 0x22e   : > { %10414 = vst [vmem:[#allocation42_spill] sm:$0xff] %v9988_v31  ;;  %v7174_v42 = vpop.f32.mrf.mxu0 }
 0x22f   : > { %v9992_v16 = vpop.f32.mrf.mxu1  ;;  %v4560_v33 = vadd.f32 %v9885_v30, %v4173_v39 }
 0x230   : > { %10416 = vst [vmem:[#allocation44_spill] sm:$0xff] %v9992_v16  ;;  %v5681_v40 = vpop.f32.mrf.mxu0 }
 0x231   : > { %v9994_v9 = vpop.f32.mrf.mxu1 }
 0x232   : > { %10417 = vst [vmem:[#allocation45_spill] sm:$0xff] %v9994_v9  ;;  %v7175_v12 = vpop.f32.mrf.mxu0  ;;  %v4169_v9 = vadd.f32 %v4042_v4, %v9795_v8 }
 0x233   : > { %v9996_v62 = vpop.f32.mrf.mxu1 }
 0x234   : > { %10418 = vst [vmem:[#allocation46_spill] sm:$0xff] %v9996_v62  ;;  %v5684_v45 = vpop.f32.mrf.mxu0 }
 0x235   : > { %v9998_v59 = vpop.f32.mrf.mxu1 }
 0x236   : > { %10419 = vst [vmem:[#allocation47_spill] sm:$0xff] %v9998_v59  ;;  %v7178_v10 = vpop.f32.mrf.mxu0  ;;  %v4172_v59 = vadd.f32 %v7031_v50, %v9798_v51 }
 0x237   : > { %v10000_v18 = vpop.f32.mrf.mxu1 }
 0x238   : > { %10420 = vst [vmem:[#allocation48_spill] sm:$0xff] %v10000_v18  ;;  %v5697_v31 = vpop.f32.mrf.mxu0  ;;  %v4558_v18 = vadd.f32 %v9860_v61, %v4171_v43  ;;  %v4175_v61 = vadd.f32 %v9912_v56, %v9804_v27  ;;  %v4559_v15 = vadd.f32 %v9870_v20, %v4172_v59  ;;  %v4176_v20 = vadd.f32 %v9920_v21, %v9810_v46 }
 0x239   : > { %v10002_v37 = vpop.f32.mrf.mxu1 }
 0x23a   : > { %10421 = vst [vmem:[#allocation49_spill] sm:$0xff] %v10002_v37  ;;  %v10007_v57 = vpop.f32.mrf.mxu0  ;;  %v4562_v59 = vadd.f32 %v9880_v53, %v4175_v61 }
 0x23b   : > { %v10005_v16 = vpop.f32.mrf.mxu1 }
 0x23c   : > { %10422 = vst [vmem:[#allocation50_spill] sm:$0xff] %v10005_v16  ;;  %v10012_v2 = vpop.f32.mrf.mxu0  ;;  %v4556_v16 = vadd.f32 %v9865_v26, %v4169_v9  ;;  %v4557_v9 = vadd.f32 %v9875_v28, %v4170_v14 }
 0x23d   : > { %v10010_v62 = vpop.f32.mrf.mxu1 }
 0x23e   : > { %10423 = vst [vmem:[#allocation51_spill] sm:$0xff] %v10010_v62  ;;  %v10016_v58 = vpop.f32.mrf.mxu0 }
 0x23f   : > { %v7126_v36 = vpop.f32.mrf.mxu1 }
 0x240   : > { %v5312_v6 = vadd.f32 %v7126_v36, %v4558_v18  ;;  %v10028_v51 = vpop.f32.mrf.mxu0 }
 0x241   : > { %v5183_v8 = vpop.f32.mrf.mxu1 }
 0x242   : > { %v5810_v4 = vadd.f32 %v7174_v42, %v5312_v6  ;;  %v5310_v50 = vadd.f32 %v5183_v8, %v4556_v16  ;;  %v10033_v26 = vpop.f32.mrf.mxu0  ;;  %v4563_v6 = vadd.f32 %v9890_v55, %v4176_v20 }
 0x243   : > { %v7127_v18 = vpop.f32.mrf.mxu1 }
 0x244   : > { %5842 = vst [vmem:[%s10026_s24 + $0x10] sm:$0xff] %v5810_v4  ;;  %v5808_v36 = vadd.f32 %v5681_v40, %v5310_v50  ;;  %v5313_v43 = vadd.f32 %v7127_v18, %v4559_v15  ;;  %v10039_v37 = vpop.f32.mrf.mxu0  ;;  %v5912_v61 = vmul.f32 %v5810_v4, %v5810_v4  ;;  %v4177_v15 = vadd.f32 %v9932_v47, %v9819_v38 }
 0x245   : > { %v5186_v62 = vpop.f32.mrf.mxu1 }
 0x246   : > { %5840 = vst [vmem:[%s10026_s24] sm:$0xff] %v5808_v36  ;;  %v5811_v27 = vadd.f32 %v7175_v12, %v5313_v43  ;;  %v5311_v16 = vadd.f32 %v5186_v62, %v4557_v9  ;;  %v10047_v40 = vpop.f32.mrf.mxu0  ;;  %v4179_v12 = vadd.f32 %v9928_v17, %v9816_v29  ;;  %v5910_v62 = vmul.f32 %v5808_v36, %v5808_v36 }
 0x247   : > { %v7130_v42 = vpop.f32.mrf.mxu1 }
 0x248   : > { %5843 = vst [vmem:[%s10026_s24 + $0x18] sm:$0xff] %v5811_v27  ;;  %v5809_v28 = vadd.f32 %v5684_v45, %v5311_v16  ;;  %v5316_v56 = vadd.f32 %v7130_v42, %v4562_v59  ;;  %v10053_v14 = vpop.f32.mrf.mxu0  ;;  %v4561_v45 = vadd.f32 %v9895_v24, %v4174_v1  ;;  %v4566_v55 = vadd.f32 %v9900_v54, %v4179_v12 }
 0x249   : > { %v5199_v53 = vpop.f32.mrf.mxu1  ;;  %v5913_v24 = vmul.f32 %v5811_v27, %v5811_v27  ;;  %v4564_v1 = vadd.f32 %v9904_v52, %v4177_v15  ;;  %v4182_v15 = vadd.f32 %v9956_v22, %v9837_v0 }
 0x24a   : > { %5841 = vst [vmem:[%s10026_s24 + $0x8] sm:$0xff] %v5809_v28  ;;  %v5872_v46 = vadd.f32 %v5809_v28, %v5808_v36  ;;  %v5911_v21 = vmul.f32 %v5809_v28, %v5809_v28  ;;  %v5814_v7 = vadd.f32 %v7178_v10, %v5316_v56  ;;  %v5314_v13 = vadd.f32 %v5199_v53, %v4560_v33  ;;  %v10058_v30 = vpop.f32.mrf.mxu0 }
 0x24b   : > { %v7131_v8 = vpop.f32.mrf.mxu1  ;;  %v4180_v10 = vadd.f32 %v9936_v60, %v9822_v48  ;;  %v4183_v33 = vadd.f32 %v9944_v23, %v9828_v49 }
 0x24c   : > { %v5873_v29 = vadd.f32 %v5872_v46, %v5810_v4  ;;  %v5942_v17 = vadd.f32 %v5911_v21, %v5910_v62  ;;  %5846 = vst [vmem:[%s10026_s24 + $0x30] sm:$0xff] %v5814_v7  ;;  %v5812_v50 = vadd.f32 %v5697_v31, %v5314_v13  ;;  %v5317_v18 = vadd.f32 %v7131_v8, %v4563_v6  ;;  %v10066_v36 = vpop.f32.mrf.mxu0 }
 0x24d   : > { %v5202_v39 = vpop.f32.mrf.mxu1  ;;  %v4178_v31 = vadd.f32 %v9940_v25, %v9825_v19  ;;  %v4567_v42 = vadd.f32 %v9906_v32, %v4180_v10  ;;  %v5916_v53 = vmul.f32 %v5814_v7, %v5814_v7 }
 0x24e   : > { %v5943_v43 = vadd.f32 %v5942_v17, %v5912_v61  ;;  %5844 = vst [vmem:[%s10026_s24 + $0x20] sm:$0xff] %v5812_v50  ;;  %v5874_v4 = vadd.f32 %v5873_v29, %v5811_v27  ;;  %v5315_v9 = vadd.f32 %v5202_v39, %v4561_v45  ;;  %v5914_v38 = vmul.f32 %v5812_v50, %v5812_v50  ;;  %v10072_v60 = vpop.f32.mrf.mxu0  ;;  %v10425_v39 = vld [vmem:[#allocation34_spill] sm:$0xff] }
 0x24f   : > { %v5815_v47 = vadd.f32 %v10007_v57, %v5317_v18  ;;  %v7134_v48 = vpop.f32.mrf.mxu1  ;;  %v4565_v62 = vadd.f32 %v9910_v11, %v4178_v31  ;;  %v10426_v31 = vld [vmem:[#allocation4_spill] sm:$0xff] }
 0x250   : > { %v5875_v16 = vadd.f32 %v5874_v4, %v5812_v50  ;;  %v5944_v54 = vadd.f32 %v5943_v43, %v5913_v24  ;;  %v5813_v59 = vadd.f32 %v10012_v2, %v5315_v9  ;;  %v5320_v20 = vadd.f32 %v7134_v48, %v4566_v55  ;;  %v10078_v28 = vpop.f32.mrf.mxu0 }
 0x251   : > { %5847 = vst [vmem:[%s10026_s24 + $0x38] sm:$0xff] %v5815_v47  ;;  %v5215_v27 = vpop.f32.mrf.mxu1  ;;  %v4181_v2 = vadd.f32 %v9948_v41, %v9831_v63  ;;  %v5917_v6 = vmul.f32 %v5815_v47, %v5815_v47 }
 0x252   : > { %v5945_v19 = vadd.f32 %v5944_v54, %v5914_v38  ;;  %5845 = vst [vmem:[%s10026_s24 + $0x28] sm:$0xff] %v5813_v59  ;;  %v5876_v25 = vadd.f32 %v5875_v16, %v5813_v59  ;;  %v5915_v57 = vmul.f32 %v5813_v59, %v5813_v59  ;;  %v5818_v56 = vadd.f32 %v10016_v58, %v5320_v20  ;;  %v10087_v32 = vpop.f32.mrf.mxu0  ;;  %v10428_v20 = vld [vmem:[#allocation5_spill] sm:$0xff] }
 0x253   : > { %v5318_v12 = vadd.f32 %v5215_v27, %v4564_v1  ;;  %v7135_v52 = vpop.f32.mrf.mxu1  ;;  %v4184_v58 = vadd.f32 %v9952_v35, %v9834_v3  ;;  %v4568_v29 = vadd.f32 %v9918_v5, %v4181_v2  ;;  %v10429_v1 = vld [vmem:[#allocation3_spill] sm:$0xff] }
 0x254   : > { %v5877_v46 = vadd.f32 %v5876_v25, %v5814_v7  ;;  %v5946_v21 = vadd.f32 %v5945_v19, %v5915_v57  ;;  %5850 = vst [vmem:[%s10026_s24 + $0x50] sm:$0xff] %v5818_v56  ;;  %v5321_v13 = vadd.f32 %v7135_v52, %v4567_v42  ;;  %v10093_v41 = vpop.f32.mrf.mxu0  ;;  %v4570_v7 = vadd.f32 %v9914_v34, %v4183_v33  ;;  %v10430_v42 = vld [vmem:[#allocation10_spill] sm:$0xff]  ;;  %v10431_v57 = vld [vmem:[#allocation12_spill] sm:$0xff] }
 0x255   : > { %v5816_v49 = vadd.f32 %v10028_v51, %v5318_v12  ;;  %v5218_v63 = vpop.f32.mrf.mxu1  ;;  %v4571_v55 = vadd.f32 %v10425_v39, %v4184_v58  ;;  %v5920_v0 = vmul.f32 %v5818_v56, %v5818_v56  ;;  %v4188_v27 = vadd.f32 %v10429_v1, %v10428_v20  ;;  %v10432_v52 = vld [vmem:[#allocation6_spill] sm:$0xff] }
 0x256   : > { %v5947_v23 = vadd.f32 %v5946_v21, %v5916_v53  ;;  %v5878_v11 = vadd.f32 %v5877_v46, %v5815_v47  ;;  %v5819_v8 = vadd.f32 %v10033_v26, %v5321_v13  ;;  %v5319_v45 = vadd.f32 %v5218_v63, %v4565_v62  ;;  %v10099_v3 = vpop.f32.mrf.mxu0  ;;  %v10424_v26 = vld [vmem:[#allocation28_spill] sm:$0xff]  ;;  %v10433_v62 = vld [vmem:[#allocation33_spill] sm:$0xff]  ;;  %v10434_v21 = vld [vmem:[#allocation15_spill] sm:$0xff] }
 0x257   : > { %5848 = vst [vmem:[%s10026_s24 + $0x40] sm:$0xff] %v5816_v49  ;;  %v7138_v61 = vpop.f32.mrf.mxu1  ;;  %v5918_v17 = vmul.f32 %v5816_v49, %v5816_v49  ;;  %v4187_v10 = vadd.f32 %v10424_v26, %v9840_v44  ;;  %v4569_v19 = vadd.f32 %v10430_v42, %v4182_v15  ;;  %v10444_v42 = vld [vmem:[#allocation11_spill] sm:$0xff] }
 0x258   : > { %v5879_v35 = vadd.f32 %v5878_v11, %v5816_v49  ;;  %v5948_v51 = vadd.f32 %v5947_v23, %v5917_v6  ;;  %5851 = vst [vmem:[%s10026_s24 + $0x58] sm:$0xff] %v5819_v8  ;;  %v5817_v50 = vadd.f32 %v10039_v37, %v5319_v45  ;;  %v5324_v18 = vadd.f32 %v7138_v61, %v4570_v7  ;;  %v10108_v24 = vpop.f32.mrf.mxu0  ;;  %v10427_v37 = vld [vmem:[#allocation31_spill] sm:$0xff]  ;;  %v10437_v61 = vld [vmem:[#allocation36_spill] sm:$0xff] }
 0x259   : > { %v5231_v34 = vpop.f32.mrf.mxu1  ;;  %v4185_v38 = vadd.f32 %v10427_v37, %v10426_v31  ;;  %v4574_v33 = vadd.f32 %v10431_v57, %v4187_v10  ;;  %v5921_v2 = vmul.f32 %v5819_v8, %v5819_v8  ;;  %v10436_v7 = vld [vmem:[#allocation7_spill] sm:$0xff] }
 0x25a   : > { %v5949_v5 = vadd.f32 %v5948_v51, %v5918_v17  ;;  %5849 = vst [vmem:[%s10026_s24 + $0x48] sm:$0xff] %v5817_v50  ;;  %v5880_v43 = vadd.f32 %v5879_v35, %v5817_v50  ;;  %v5919_v4 = vmul.f32 %v5817_v50, %v5817_v50  ;;  %v5322_v9 = vadd.f32 %v5231_v34, %v4568_v29  ;;  %v10114_v47 = vpop.f32.mrf.mxu0  ;;  %v10439_v34 = vld [vmem:[#allocation38_spill] sm:$0xff] }
 0x25b   : > { %v5822_v22 = vadd.f32 %v10047_v40, %v5324_v18  ;;  %v7139_v44 = vpop.f32.mrf.mxu1  ;;  %v4572_v13 = vadd.f32 %v10434_v21, %v4185_v38  ;;  %v4191_v29 = vadd.f32 %v10437_v61, %v10436_v7  ;;  %v10438_v18 = vld [vmem:[#allocation9_spill] sm:$0xff] }
 0x25c   : > { %v5881_v48 = vadd.f32 %v5880_v43, %v5818_v56  ;;  %v5950_v16 = vadd.f32 %v5949_v5, %v5919_v4  ;;  %v5820_v54 = vadd.f32 %v10053_v14, %v5322_v9  ;;  %v5325_v59 = vadd.f32 %v7139_v44, %v4571_v55  ;;  %v10127_v58 = vpop.f32.mrf.mxu0  ;;  %v10440_v5 = vld [vmem:[#allocation20_spill] sm:$0xff]  ;;  %v10452_v61 = vld [vmem:[#allocation25_spill] sm:$0xff] }
 0x25d   : > { %5854 = vst [vmem:[%s10026_s24 + $0x70] sm:$0xff] %v5822_v22  ;;  %v5234_v25 = vpop.f32.mrf.mxu1  ;;  %v4186_v14 = vadd.f32 %v10433_v62, %v10432_v52  ;;  %v10441_v4 = vld [vmem:[#allocation8_spill] sm:$0xff]  ;;  %v5924_v31 = vmul.f32 %v5822_v22, %v5822_v22 }
 0x25e   : > { %v5951_v40 = vadd.f32 %v5950_v16, %v5920_v0  ;;  %5852 = vst [vmem:[%s10026_s24 + $0x60] sm:$0xff] %v5820_v54  ;;  %v5882_v12 = vadd.f32 %v5881_v48, %v5819_v8  ;;  %v5823_v56 = vadd.f32 %v10058_v30, %v5325_v59  ;;  %v5323_v53 = vadd.f32 %v5234_v25, %v4569_v19  ;;  %v10435_v30 = vld [vmem:[#allocation17_spill] sm:$0xff]  ;;  %v10136_v10 = vpop.f32.mrf.mxu0  ;;  %v10442_v9 = vld [vmem:[#allocation40_spill] sm:$0xff]  ;;  %v10443_v16 = vld [vmem:[#allocation22_spill] sm:$0xff] }
 0x25f   : > { %v7142_v46 = vpop.f32.mrf.mxu1  ;;  %v5922_v49 = vmul.f32 %v5820_v54, %v5820_v54  ;;  %v4575_v45 = vadd.f32 %v10435_v30, %v4188_v27  ;;  %v4573_v43 = vadd.f32 %v10440_v5, %v4186_v14  ;;  %v10445_v19 = vld [vmem:[#allocation42_spill] sm:$0xff]  ;;  %v10447_v62 = vld [vmem:[#allocation24_spill] sm:$0xff] }
 0x260   : > { %v5883_v6 = vadd.f32 %v5882_v12, %v5820_v54  ;;  %v5952_v63 = vadd.f32 %v5951_v40, %v5921_v2  ;;  %5855 = vst [vmem:[%s10026_s24 + $0x78] sm:$0xff] %v5823_v56  ;;  %v5328_v23 = vadd.f32 %v7142_v46, %v4574_v33  ;;  %v5821_v11 = vadd.f32 %v10066_v36, %v5323_v53  ;;  %v5777_v27 = vpop.f32.mrf.mxu0  ;;  %v10446_v33 = vld [vmem:[#allocation23_spill] sm:$0xff]  ;;  %v10448_v53 = vld [vmem:[#allocation13_spill] sm:$0xff] }
 0x261   : > { %v5247_v8 = vpop.f32.mrf.mxu1  ;;  %v4189_v36 = vadd.f32 %v10439_v34, %v10438_v18  ;;  %v4578_v54 = vadd.f32 %v10443_v16, %v4191_v29  ;;  %v5925_v59 = vmul.f32 %v5823_v56, %v5823_v56  ;;  %v4190_v25 = vadd.f32 %v10445_v19, %v10444_v42 }
 0x262   : > { %v5953_v35 = vadd.f32 %v5952_v63, %v5922_v49  ;;  %v5826_v17 = vadd.f32 %v10072_v60, %v5328_v23  ;;  %v5326_v51 = vadd.f32 %v5247_v8, %v4572_v13  ;;  %5853 = vst [vmem:[%s10026_s24 + $0x68] sm:$0xff] %v5821_v11  ;;  %v5884_v50 = vadd.f32 %v5883_v6, %v5821_v11  ;;  %v7199_v23 = vpop.f32.mrf.mxu0  ;;  %v10451_v8 = vld [vmem:[#allocation45_spill] sm:$0xff] }
 0x263   : > { %v5923_v15 = vmul.f32 %v5821_v11, %v5821_v11  ;;  %v7143_v26 = vpop.f32.mrf.mxu1  ;;  %v4192_v60 = vadd.f32 %v10442_v9, %v10441_v4  ;;  %v4576_v2 = vadd.f32 %v10446_v33, %v4189_v36  ;;  %v10450_v11 = vld [vmem:[#allocation16_spill] sm:$0xff]  ;;  %v4577_v29 = vadd.f32 %v10452_v61, %v4190_v25 }
 0x264   : > { %5858 = vst [vmem:[%s10026_s24 + $0x90] sm:$0xff] %v5826_v17  ;;  %v5824_v39 = vadd.f32 %v10078_v28, %v5326_v51  ;;  %v5329_v55 = vadd.f32 %v7143_v26, %v4575_v45  ;;  %v5885_v37 = vadd.f32 %v5884_v50, %v5822_v22  ;;  %v4193_v30 = vadd.f32 %v10451_v8, %v10450_v11  ;;  %v10454_v51 = vld [vmem:[#allocation46_spill] sm:$0xff]  ;;  %v5780_v9 = vpop.f32.mrf.mxu0  ;;  %v10467_v8 = vld [vmem:[#allocation37_spill] sm:$0xff] }
 0x265   : > { %v5954_v38 = vadd.f32 %v5953_v35, %v5923_v15  ;;  %v5250_v0 = vpop.f32.mrf.mxu1  ;;  %v4579_v14 = vadd.f32 %v10447_v62, %v4192_v60  ;;  %v10453_v35 = vld [vmem:[#allocation19_spill] sm:$0xff]  ;;  %v10456_v60 = vld [vmem:[#allocation21_spill] sm:$0xff] }
 0x266   : > { %5856 = vst [vmem:[%s10026_s24 + $0x80] sm:$0xff] %v5824_v39  ;;  %v5827_v44 = vadd.f32 %v10087_v32, %v5329_v55  ;;  %v5327_v48 = vadd.f32 %v5250_v0, %v4573_v43  ;;  %v5886_v20 = vadd.f32 %v5885_v37, %v5823_v56  ;;  %v5926_v40 = vmul.f32 %v5824_v39, %v5824_v39  ;;  %v10449_v56 = vld [vmem:[#allocation44_spill] sm:$0xff] }
 0x267   : > { %v5955_v28 = vadd.f32 %v5954_v38, %v5924_v31  ;;  %v7146_v1 = vpop.f32.mrf.mxu1  ;;  %v4195_v46 = vadd.f32 %v10449_v56, %v10448_v53  ;;  %v4196_v50 = vadd.f32 %v10454_v51, %v10453_v35  ;;  %v10457_v31 = vld [vmem:[#allocation47_spill] sm:$0xff]  ;;  %v10458_v0 = vld [vmem:[#allocation32_spill] sm:$0xff]  ;;  %v10468_v35 = vld [vmem:[#allocation29_spill] sm:$0xff] }
 0x268   : > { %5859 = vst [vmem:[%s10026_s24 + $0x98] sm:$0xff] %v5827_v44  ;;  %v5825_v22 = vadd.f32 %v10093_v41, %v5327_v48  ;;  %v5332_v57 = vadd.f32 %v7146_v1, %v4578_v54  ;;  %v5887_v32 = vadd.f32 %v5886_v20, %v5824_v39  ;;  %v10455_v39 = vld [vmem:[#allocation30_spill] sm:$0xff]  ;;  %v5929_v5 = vmul.f32 %v5827_v44, %v5827_v44  ;;  %v10469_v51 = vld [vmem:[#allocation51_spill] sm:$0xff] }
 0x269   : > { %v5956_v12 = vadd.f32 %v5955_v28, %v5925_v59  ;;  %v5263_v52 = vpop.f32.mrf.mxu1  ;;  %v4582_v55 = vadd.f32 %v10455_v39, %v4195_v46  ;;  %v4194_v37 = vadd.f32 %v10457_v31, %v10456_v60  ;;  %v4580_v48 = vadd.f32 %v10458_v0, %v4193_v30  ;;  %v10459_v28 = vld [vmem:[#allocation14_spill] sm:$0xff] }
 0x26a   : > { %5857 = vst [vmem:[%s10026_s24 + $0x88] sm:$0xff] %v5825_v22  ;;  %v5927_v21 = vmul.f32 %v5825_v22, %v5825_v22  ;;  %v5830_v13 = vadd.f32 %v10099_v3, %v5332_v57  ;;  %v5330_v6 = vadd.f32 %v5263_v52, %v4576_v2  ;;  %v5888_v49 = vadd.f32 %v5887_v32, %v5825_v22  ;;  %v10460_v1 = vld [vmem:[#allocation18_spill] sm:$0xff]  ;;  %v7202_v2 = vpop.f32.mrf.mxu0 }
 0x26b   : > { %v5957_v41 = vadd.f32 %v5956_v12, %v5926_v40  ;;  %v7147_v63 = vpop.f32.mrf.mxu1  ;;  %v5928_v3 = vmul.f32 %v5826_v17, %v5826_v17  ;;  %v4583_v20 = vadd.f32 %v10459_v28, %v4196_v50  ;;  %v10462_v32 = vld [vmem:[#allocation26_spill] sm:$0xff]  ;;  %v10463_v40 = vld [vmem:[#allocation49_spill] sm:$0xff]  ;;  %v4198_v50 = vadd.f32 %v10469_v51, %v10468_v35 }
 0x26c   : > { %5862 = vst [vmem:[%s10026_s24 + $0xb0] sm:$0xff] %v5830_v13  ;;  %v5828_v45 = vadd.f32 %v10108_v24, %v5330_v6  ;;  %v5333_v7 = vadd.f32 %v7147_v63, %v4579_v14  ;;  %v5889_v15 = vadd.f32 %v5888_v49, %v5826_v17  ;;  %v4197_v12 = vadd.f32 %v10463_v40, %v10462_v32  ;;  %v10464_v14 = vld [vmem:[#allocation35_spill] sm:$0xff] }
 0x26d   : > { %v5958_v26 = vadd.f32 %v5957_v41, %v5927_v21  ;;  %v5266_v18 = vpop.f32.mrf.mxu1  ;;  %v4581_v53 = vadd.f32 %v10464_v14, %v4194_v37  ;;  %v5932_v56 = vmul.f32 %v5830_v13, %v5830_v13  ;;  %v10466_v41 = vld [vmem:[#allocation50_spill] sm:$0xff] }
 0x26e   : > { %5860 = vst [vmem:[%s10026_s24 + $0xa0] sm:$0xff] %v5828_v45  ;;  %v5831_v34 = vadd.f32 %v10114_v47, %v5333_v7  ;;  %v5331_v36 = vadd.f32 %v5266_v18, %v4577_v29  ;;  %v5890_v43 = vadd.f32 %v5889_v15, %v5827_v44  ;;  %v5930_v16 = vmul.f32 %v5828_v45, %v5828_v45  ;;  %v10461_v44 = vld [vmem:[#allocation48_spill] sm:$0xff]  ;;  %v5793_v29 = vpop.f32.mrf.mxu0  ;;  %v10470_v15 = vld [vmem:[#allocation39_spill] sm:$0xff] }
 0x26f   : > { %v5959_v24 = vadd.f32 %v5958_v26, %v5928_v3  ;;  %v7150_v4 = vpop.f32.mrf.mxu1  ;;  %v4199_v42 = vadd.f32 %v10461_v44, %v10460_v1  ;;  %v4584_v26 = vadd.f32 %v10470_v15, %v4197_v12 }
 0x270   : > { %5863 = vst [vmem:[%s10026_s24 + $0xb8] sm:$0xff] %v5831_v34  ;;  %v5829_v17 = vadd.f32 %v10127_v58, %v5331_v36  ;;  %v5336_v38 = vadd.f32 %v7150_v4, %v4582_v55  ;;  %v5891_v47 = vadd.f32 %v5890_v43, %v5828_v45  ;;  %v5933_v45 = vmul.f32 %v5831_v34, %v5831_v34  ;;  %v7203_v31 = vpop.f32.mrf.mxu0 }
 0x271   : > { %v5960_v54 = vadd.f32 %v5959_v24, %v5929_v5  ;;  %v5279_v59 = vpop.f32.mrf.mxu1  ;;  %v4586_v30 = vadd.f32 %v10467_v8, %v4199_v42  ;;  %v10471_v24 = vld [vmem:[#allocation41_spill] sm:$0xff] }
 0x272   : > { %5861 = vst [vmem:[%s10026_s24 + $0xa8] sm:$0xff] %v5829_v17  ;;  %v5931_v19 = vmul.f32 %v5829_v17, %v5829_v17  ;;  %v5834_v25 = vadd.f32 %v10136_v10, %v5336_v38  ;;  %v5334_v22 = vadd.f32 %v5279_v59, %v4580_v48  ;;  %v5892_v57 = vadd.f32 %v5891_v47, %v5829_v17  ;;  %v10465_v10 = vld [vmem:[#allocation27_spill] sm:$0xff]  ;;  %v5796_v42 = vpop.f32.mrf.mxu0 }
 0x273   : > { %v5961_v58 = vadd.f32 %v5960_v54, %v5930_v16  ;;  %v7151_v33 = vpop.f32.mrf.mxu1  ;;  %v4200_v49 = vadd.f32 %v10466_v41, %v10465_v10  ;;  %v10472_v38 = vld [vmem:[#allocation43_spill] sm:$0xff] }
 0x274   : > { %5866 = vst [vmem:[%s10026_s24 + $0xd0] sm:$0xff] %v5834_v25  ;;  %v5832_v52 = vadd.f32 %v5777_v27, %v5334_v22  ;;  %v5337_v62 = vadd.f32 %v7151_v33, %v4583_v20  ;;  %v5893_v46 = vadd.f32 %v5892_v57, %v5830_v13  ;;  %v4585_v0 = vadd.f32 %v10472_v38, %v4198_v50 }
 0x275   : > { %v5962_v21 = vadd.f32 %v5961_v58, %v5931_v19  ;;  %v5282_v6 = vpop.f32.mrf.mxu1  ;;  %v4587_v43 = vadd.f32 %v10471_v24, %v4200_v49  ;;  %v5936_v48 = vmul.f32 %v5834_v25, %v5834_v25 }
 0x276   : > { %5864 = vst [vmem:[%s10026_s24 + $0xc0] sm:$0xff] %v5832_v52  ;;  %v5835_v63 = vadd.f32 %v7199_v23, %v5337_v62  ;;  %v5335_v11 = vadd.f32 %v5282_v6, %v4581_v53  ;;  %v5894_v27 = vadd.f32 %v5893_v46, %v5831_v34  ;;  %v5934_v23 = vmul.f32 %v5832_v52, %v5832_v52 }
 0x277   : > { %v5963_v7 = vadd.f32 %v5962_v21, %v5932_v56  ;;  %v7154_v61 = vpop.f32.mrf.mxu1 }
 0x278   : > { %5867 = vst [vmem:[%s10026_s24 + $0xd8] sm:$0xff] %v5835_v63  ;;  %v5833_v13 = vadd.f32 %v5780_v9, %v5335_v11  ;;  %v5340_v3 = vadd.f32 %v7154_v61, %v4586_v30  ;;  %v5895_v18 = vadd.f32 %v5894_v27, %v5832_v52  ;;  %v5937_v20 = vmul.f32 %v5835_v63, %v5835_v63 }
 0x279   : > { %v5964_v36 = vadd.f32 %v5963_v7, %v5933_v45  ;;  %v5295_v39 = vpop.f32.mrf.mxu1 }
 0x27a   : > { %5865 = vst [vmem:[%s10026_s24 + $0xc8] sm:$0xff] %v5833_v13  ;;  %v5935_v55 = vmul.f32 %v5833_v13, %v5833_v13  ;;  %v5838_v5 = vadd.f32 %v7202_v2, %v5340_v3  ;;  %v5338_v34 = vadd.f32 %v5295_v39, %v4584_v26  ;;  %v5896_v60 = vadd.f32 %v5895_v18, %v5833_v13 }
 0x27b   : > { %v5965_v4 = vadd.f32 %v5964_v36, %v5934_v23  ;;  %v7155_v37 = vpop.f32.mrf.mxu1 }
 0x27c   : > { %5870 = vst [vmem:[%s10026_s24 + $0xf0] sm:$0xff] %v5838_v5  ;;  %v5836_v9 = vadd.f32 %v5793_v29, %v5338_v34  ;;  %v5341_v17 = vadd.f32 %v7155_v37, %v4587_v43  ;;  %v5897_v47 = vadd.f32 %v5896_v60, %v5834_v25  ;;  %v5940_v40 = vmul.f32 %v5838_v5, %v5838_v5 }
 0x27d   : > { %v5966_v16 = vadd.f32 %v5965_v4, %v5935_v55  ;;  %v5298_v54 = vpop.f32.mrf.mxu1 }
 0x27e   : > { %5868 = vst [vmem:[%s10026_s24 + $0xe0] sm:$0xff] %v5836_v9  ;;  %v5839_v59 = vadd.f32 %v7203_v31, %v5341_v17  ;;  %v5339_v28 = vadd.f32 %v5298_v54, %v4585_v0  ;;  %v5898_v44 = vadd.f32 %v5897_v47, %v5835_v63  ;;  %v5938_v58 = vmul.f32 %v5836_v9, %v5836_v9 }
 0x27f   : > { %v5967_v1 = vadd.f32 %v5966_v16, %v5936_v48 }
 0x280   : > { %5871 = vst [vmem:[%s10026_s24 + $0xf8] sm:$0xff] %v5839_v59  ;;  %v5837_v19 = vadd.f32 %v5796_v42, %v5339_v28  ;;  %v5899_v22 = vadd.f32 %v5898_v44, %v5836_v9  ;;  %v5941_v52 = vmul.f32 %v5839_v59, %v5839_v59 }
 0x281   : > { %v5968_v57 = vadd.f32 %v5967_v1, %v5937_v20 }
 0x282   : > { %5869 = vst [vmem:[%s10026_s24 + $0xe8] sm:$0xff] %v5837_v19  ;;  %v5939_v33 = vmul.f32 %v5837_v19, %v5837_v19  ;;  %v5900_v32 = vadd.f32 %v5899_v22, %v5837_v19 }
 0x283   : > { %v5969_v2 = vadd.f32 %v5968_v57, %v5938_v58 }
 0x284   : > { %v5901_v25 = vadd.f32 %v5900_v32, %v5838_v5 }
 0x285   : > { %v5970_v12 = vadd.f32 %v5969_v2, %v5939_v33 }
 0x286   : > { %v5902_v62 = vadd.f32 %v5901_v25, %v5839_v59 }
 0x287   : > { %v5971_v14 = vadd.f32 %v5970_v12, %v5940_v40 }
 0x288   : > { %v5903_v53 = vrot.slane %v5902_v62, 4 }
 0x289   : > { %v5972_v56 = vadd.f32 %v5971_v14, %v5941_v52 }
 0x28a   : > { %v5904_v46 = vadd.f32 %v5903_v53, %v5902_v62 }
 0x28b   : > { %v5973_v21 = vrot.slane %v5972_v56, 4 }
 0x28c   : > { %v5905_v6 = vrot.slane %v5904_v46, 2 }
 0x28d   : > { %v5974_v10 = vadd.f32 %v5973_v21, %v5972_v56 }
 0x28e   : > { %v5906_v41 = vadd.f32 %v5905_v6, %v5904_v46 }
 0x28f   : > { %v5975_v49 = vrot.slane %v5974_v10, 2 }
 0x290   : > { %v5907_v63 = vrot.slane %v5906_v41, 1 }
 0x291   : > { %v5976_v11 = vadd.f32 %v5975_v49, %v5974_v10 }
 0x292   : > { %v5908_v8 = vadd.f32 %v5907_v63, %v5906_v41 }
 0x293   : > { %v5977_v30 = vrot.slane %v5976_v11, 1 }
 0x294   : > { %5909 = vst [vmem:[%s265_s26] sm:$0x1] %v5908_v8 }
 0x295   : > { %v5978_v45 = vadd.f32 %v5977_v30, %v5976_v11 }
 0x297   : > { %5979 = vst [vmem:[%s268_s29] sm:$0x1] %v5978_v45 }
 0x298 PF: > { %s17_s21 = sadd.s32 1, %s7388_s21  }
 0x299   : > { %p14_p4 = scmp.ge.s32.totalorder %s17_s21, 4  }
 0x29b   :  { %16 = sbr.rel (!%p14_p4) target bundleno = 1 (0x1), region = 101 }

</bundles_post_ra>
